<compile_context>
chip_gen: v7x
topology: tpu7x:2x2x1
jax: 0.10.0
libtpu: 0.0.40
codegen_flags: <defaults>
</compile_context>

<pallas_src>
import functools

import jax
import jax.numpy as jnp
from jax.experimental import pallas as pl
from jax.experimental.pallas import tpu as pltpu

# Keep f32 matmuls genuinely f32 on TPU (both inside the Pallas kernel and in
# the pure-JAX reference) so the f32 correctness check is meaningful.
jax.config.update("jax_default_matmul_precision", "float32")

EPS = 1e-4
_PAD_PSQ = 1e6   # ||p||^2 fill for padded prototype columns -> activation ~ 0


def _round_up(n, m):
    return ((n + m - 1) // m) * m


def _largest_divisor_leq(n, cap):
    for d in range(min(n, cap), 0, -1):
        if n % d == 0:
            return d
    return 1


def _vmem_limit_bytes():
    # Per-generation VMEM budget (v5e/v6e: 128 MiB, v7x: 64 MiB physical).
    try:
        cap = int(pltpu.get_tpu_info().vmem_capacity_bytes)
        return min(int(cap * 3 // 4), 100 * 1024 * 1024)
    except Exception:
        return 64 * 1024 * 1024


def protopnet_kernel(x_ref, wbb_ref, bbb_ref, wao_ref, bao_ref,
                     protos_n2t_ref, p_sq_ref, whead_ref,
                     logits_ref, acts_ref, *, s_chunk):
    bt, s, cin = x_ref.shape
    n_chunks = s // s_chunk
    pp = protos_n2t_ref.shape[-1]

    # Constant blocks (same tile every grid step; Pallas keeps them resident).
    wbb = wbb_ref[...]
    bbb = bbb_ref[...]
    wao = wao_ref[...]
    bao = bao_ref[...]
    protos_n2t = protos_n2t_ref[...]        # (D, Pp), already scaled by -2

    def chunk_body(c, dmin):
        off = pl.multiple_of(c * s_chunk, s_chunk)
        x = x_ref[:, pl.ds(off, s_chunk), :].reshape(bt * s_chunk, cin)

        # ---- backbone: 1x1 conv (== matmul) + ReLU --------------------------
        feat = jnp.dot(x, wbb, preferred_element_type=jnp.float32) + bbb
        feat = jnp.maximum(feat, 0.0)                       # (bt*sc, D1) f32

        # ---- add_on_layers: 1x1 conv (== matmul) + Sigmoid (f32 VPU/EUP) ----
        z = jax.nn.sigmoid(
            jnp.dot(feat.astype(wao.dtype), wao,
                    preferred_element_type=jnp.float32) + bao)  # (bt*sc, D) f32

        # ---- partial squared L2 distance: ||z||^2 - 2 z.p -------------------
        # (-2 pre-folded into protos_n2t; "+||p||^2" and the clamp are applied
        #  after the min over S — they commute with it.)
        z_c = z.astype(protos_n2t.dtype)
        zp = jnp.dot(z_c, protos_n2t, preferred_element_type=jnp.float32)
        z_sq = jnp.sum(z_c.astype(jnp.float32) ** 2, axis=-1, keepdims=True)
        part = z_sq + zp                                    # (bt*sc, Pp)

        dmin_c = jnp.min(part.reshape(bt, s_chunk, pp), axis=1)
        return jnp.minimum(dmin, dmin_c)

    dmin = jax.lax.fori_loop(
        0, n_chunks, chunk_body,
        jnp.full((bt, pp), jnp.inf, dtype=jnp.float32),
        unroll=(n_chunks <= 4))

    # ---- epilogue on the S-times-smaller (bt, Pp) tile -----------------------
    dist2 = jnp.maximum(dmin + p_sq_ref[...], 0.0)
    # max over spatial of log((d+1)/(d+eps)) == log-activation of min-d
    # (the activation is strictly decreasing in d for d >= 0).
    sim = jnp.log((dist2 + 1.0) / (dist2 + EPS))
    acts_ref[...] = sim

    # ---- prediction head: Linear(P -> num_classes), no bias ------------------
    logits_ref[...] = jnp.dot(sim, whead_ref[...],
                              preferred_element_type=jnp.float32)


def protopnet_forward(x, params, *, block_b=None, s_chunk=None,
                      matmul_dtype=jnp.float32, channels_last=False):
    """x: (B, Cin, H, W) (PyTorch NCHW layout) or (B, H, W, Cin) if
    channels_last=True.  Returns (logits[B, NC], prototype_activations[B, P]).

    matmul_dtype=jnp.bfloat16 selects bf16 MXU operands with f32 accumulation
    (fast path on all of v5e/v6e/v7x); jnp.float32 gives f32-accurate results.
    """
    wbb, bbb, wao, bao, protos, whead = params
    if channels_last:
        B, H, W, Cin = x.shape
        x_tok = x.reshape(B, H * W, Cin)
    else:
        B, Cin, H, W = x.shape
        x_tok = jnp.transpose(x, (0, 2, 3, 1)).reshape(B, H * W, Cin)
    S = H * W
    D1 = wbb.shape[1]
    D = wao.shape[1]
    P = protos.shape[0]
    NC = whead.shape[1]

    # ---- wrapper-side layout prep + batch-invariant hoists -------------------
    # Lane-dense padded output dims.  (For realistic P ~ 2000, align the
    # prototype tile to 256 and add an innermost "arbitrary" prototype grid
    # axis with a logits accumulator; unnecessary at Pp = 128.)
    Pp = _round_up(P, 128)
    NCp = _round_up(NC, 128)

    protos_f = protos.astype(jnp.float32)
    if matmul_dtype != jnp.float32:
        # keep ||p||^2 consistent with the cast prototypes used on the MXU
        protos_f = protos_f.astype(matmul_dtype).astype(jnp.float32)
    p_sq = jnp.sum(protos_f * protos_f, axis=-1)                       # (P,)
    protos_n2t = jnp.pad((-2.0 * protos_f).T,
                         ((0, 0), (0, Pp - P))).astype(matmul_dtype)   # (D, Pp)
    p_sq_p = jnp.pad(p_sq, (0, Pp - P),
                     constant_values=_PAD_PSQ).reshape(1, Pp)          # (1, Pp)
    whead_p = jnp.pad(whead.astype(jnp.float32),
                      ((0, Pp - P), (0, NCp - NC)))                    # (Pp, NCp)

    # Spatial chunk: bounds the (block_b*s_chunk, Pp) intermediates in VMEM.
    if s_chunk is None:
        s_chunk = _largest_divisor_leq(S, 128)
    assert S % s_chunk == 0

    # Batch tile from a VMEM budget; sublane-aligned and >= 2 grid steps when
    # the batch allows (v7x has 2 TensorCores sharing the "parallel" axis).
    if block_b is None:
        itemsize = jnp.dtype(matmul_dtype).itemsize
        per_sample = (s_chunk * (2 * Pp + D + D1) * 4      # zp/part + z + feat
                      + S * max(Cin, 128) * itemsize)      # lane-padded x tile
        block_b = max(1, int((8 * 1024 * 1024) // per_sample))
        if B >= 16:
            block_b = max(8, (min(block_b, B // 2) // 8) * 8)
            block_b = min(block_b, 128)
        else:
            block_b = B      # tiny batch: single step, block == full array dims
    Bp = _round_up(B, block_b)
    if Bp != B:
        x_tok = jnp.pad(x_tok, ((0, Bp - B), (0, 0), (0, 0)))

    # MXU operand dtypes (biases / p_sq / head weight stay f32; accumulation is
    # always f32 via preferred_element_type).
    # TODO(synk): when Cin is tiny (e.g. 4) the x tile is lane-sparse; for such
    # configs the first 1x1 conv could be run in the wrapper instead.
    x_c = x_tok.astype(matmul_dtype)
    wbb_c = wbb.astype(matmul_dtype)
    wao_c = wao.astype(matmul_dtype)
    bbb_f = bbb.astype(jnp.float32).reshape(1, D1)
    bao_f = bao.astype(jnp.float32).reshape(1, D)

    grid = (Bp // block_b,)
    grid_spec = pltpu.PrefetchScalarGridSpec(
        num_scalar_prefetch=0,
        grid=grid,
        in_specs=[
            pl.BlockSpec((block_b, S, Cin), lambda b: (b, 0, 0)),  # x tokens
            pl.BlockSpec((Cin, D1), lambda b: (0, 0)),             # backbone W
            pl.BlockSpec((1, D1), lambda b: (0, 0)),               # backbone b
            pl.BlockSpec((D1, D), lambda b: (0, 0)),               # add-on W
            pl.BlockSpec((1, D), lambda b: (0, 0)),                # add-on b
            pl.BlockSpec((D, Pp), lambda b: (0, 0)),               # -2 * protos^T
            pl.BlockSpec((1, Pp), lambda b: (0, 0)),               # ||p||^2
            pl.BlockSpec((Pp, NCp), lambda b: (0, 0)),             # head W
        ],
        out_specs=[
            pl.BlockSpec((block_b, NCp), lambda b: (b, 0)),        # logits
            pl.BlockSpec((block_b, Pp), lambda b: (b, 0)),         # proto acts
        ],
    )

    logits_p, acts_p = pl.pallas_call(
        functools.partial(protopnet_kernel, s_chunk=s_chunk),
        out_shape=(
            jax.ShapeDtypeStruct((Bp, NCp), jnp.float32),
            jax.ShapeDtypeStruct((Bp, Pp), jnp.float32),
        ),
        grid_spec=grid_spec,
        compiler_params=pltpu.CompilerParams(
            dimension_semantics=("parallel",),   # megacore / v7x 2-TC sharding
            vmem_limit_bytes=_vmem_limit_bytes(),
        ),
    )(x_c, wbb_c, bbb_f, wao_c, bao_f, protos_n2t, p_sq_p, whead_p)

    # Slice off batch / lane padding (padded proto columns have ~0 activation
    # anyway thanks to the 1e6 ||p||^2 fill).
    return logits_p[:B, :NC], acts_p[:B, :P]


protopnet_forward_jit = jax.jit(
    protopnet_forward,
    static_argnames=("block_b", "s_chunk", "matmul_dtype", "channels_last"))


def init_params(key, Cin, D1, D, P, NC):
    k1, k2, k3, k4, _ = jax.random.split(key, 5)
    wbb = jax.random.normal(k1, (Cin, D1), jnp.float32) * 0.1
    bbb = jnp.zeros((1, D1), jnp.float32)
    wao = jax.random.normal(k2, (D1, D), jnp.float32) * 0.1
    bao = jnp.zeros((1, D), jnp.float32)
    protos = jax.random.uniform(k3, (P, D), jnp.float32)   # (P, D, 1, 1) squeezed
    whead = jax.random.normal(k4, (P, NC), jnp.float32) * 0.1
    return (wbb, bbb, wao, bao, protos, whead)


if __name__ == "__main__":
    # small shapes consistent with the forward pass
    B, Cin, H, W = 2, 4, 16, 16
    D1, D = 32, 32          # backbone latent channels / prototype latent channels
    P, NC = 16, 4           # num prototypes / num classes

    key = jax.random.PRNGKey(0)
    kx, kp = jax.random.split(key)
    x = jax.random.normal(kx, (B, Cin, H, W), jnp.float32)
    params = init_params(kp, Cin, D1, D, P, NC)

    # plain-JAX reference (original per-location clamp + max-over-log form)
    wbb, bbb, wao, bao, protos, whead = params
    xt = jnp.transpose(x, (0, 2, 3, 1)).reshape(B, H * W, Cin)
    feat = jnp.maximum(xt @ wbb + bbb, 0.0)
    z = jax.nn.sigmoid(feat @ wao + bao)
    d2 = jnp.maximum(jnp.sum(z * z, -1, keepdims=True)
                     - 2.0 * jnp.einsum("bsd,pd->bsp", z, protos)
                     + jnp.sum(protos * protos, -1)[None, None, :], 0.0)
    ref_acts = jnp.max(jnp.log((d2 + 1.0) / (d2 + EPS)), axis=1)
    ref_logits = ref_acts @ whead

    # f32 MXU path (tight check)
    logits, proto_acts = protopnet_forward_jit(x, params,
                                               matmul_dtype=jnp.float32)
    jax.block_until_ready((logits, proto_acts))
    assert logits.shape == (B, NC) and proto_acts.shape == (B, P)
    assert jnp.allclose(proto_acts, ref_acts, atol=1e-3), \
        "proto activations mismatch (f32)"
    assert jnp.allclose(logits, ref_logits, atol=1e-3), "logits mismatch (f32)"

    # bf16 MXU path (f32 accumulation / elementwise) -- looser tolerance
    logits_bf, proto_acts_bf = protopnet_forward_jit(x, params,
                                                     matmul_dtype=jnp.bfloat16)
    jax.block_until_ready((logits_bf, proto_acts_bf))
    assert jnp.allclose(proto_acts_bf, ref_acts, atol=5e-2), \
        "proto activations mismatch (bf16)"
    assert jnp.allclose(logits_bf, ref_logits, atol=5e-2), "logits mismatch (bf16)"

    print("KERNEL_OK")
</pallas_src>

<mosaic_0001>
module attributes {stable_mosaic.version = 11 : i64} {
  func.func @protopnet_kernel(%arg0: i32, %arg1: memref<2x256x4xf32, #tpu.memory_space<vmem>>, %arg2: memref<4x32xf32, #tpu.memory_space<vmem>>, %arg3: memref<1x32xf32, #tpu.memory_space<vmem>>, %arg4: memref<32x32xf32, #tpu.memory_space<vmem>>, %arg5: memref<1x32xf32, #tpu.memory_space<vmem>>, %arg6: memref<32x128xf32, #tpu.memory_space<vmem>>, %arg7: memref<1x128xf32, #tpu.memory_space<vmem>>, %arg8: memref<128x128xf32, #tpu.memory_space<vmem>>, %arg9: memref<2x128xf32, #tpu.memory_space<vmem>>, %arg10: memref<2x128xf32, #tpu.memory_space<vmem>>) attributes {dimension_semantics = [#tpu.dimension_semantics<parallel>], iteration_bounds = array<i64: 1>, scalar_prefetch = 0 : i64, scratch_operands = 0 : i64, tpu.core_type = #tpu.core_type<tc>, window_params = [{transform_indices = @transform_0, window_bounds = array<i64: 2, 256, 4>}, {pipeline_mode = #tpu.pipeline_mode<synchronous>, transform_indices = @transform_1, window_bounds = array<i64: 4, 32>}, {pipeline_mode = #tpu.pipeline_mode<synchronous>, transform_indices = @transform_2, window_bounds = array<i64: 1, 32>}, {pipeline_mode = #tpu.pipeline_mode<synchronous>, transform_indices = @transform_3, window_bounds = array<i64: 32, 32>}, {pipeline_mode = #tpu.pipeline_mode<synchronous>, transform_indices = @transform_4, window_bounds = array<i64: 1, 32>}, {pipeline_mode = #tpu.pipeline_mode<synchronous>, transform_indices = @transform_5, window_bounds = array<i64: 32, 128>}, {pipeline_mode = #tpu.pipeline_mode<synchronous>, transform_indices = @transform_6, window_bounds = array<i64: 1, 128>}, {pipeline_mode = #tpu.pipeline_mode<synchronous>, transform_indices = @transform_7, window_bounds = array<i64: 128, 128>}, {transform_indices = @transform_8, window_bounds = array<i64: 2, 128>}, {transform_indices = @transform_9, window_bounds = array<i64: 2, 128>}]} {
    %c0 = arith.constant 0 : index
    %c0_0 = arith.constant 0 : index
    %0 = vector.load %arg2[%c0, %c0_0] : memref<4x32xf32, #tpu.memory_space<vmem>>, vector<4x32xf32>
    %c0_1 = arith.constant 0 : index
    %c0_2 = arith.constant 0 : index
    %1 = vector.load %arg3[%c0_1, %c0_2] : memref<1x32xf32, #tpu.memory_space<vmem>>, vector<1x32xf32>
    %c0_3 = arith.constant 0 : index
    %c0_4 = arith.constant 0 : index
    %2 = vector.load %arg4[%c0_3, %c0_4] : memref<32x32xf32, #tpu.memory_space<vmem>>, vector<32x32xf32>
    %c0_5 = arith.constant 0 : index
    %c0_6 = arith.constant 0 : index
    %3 = vector.load %arg5[%c0_5, %c0_6] : memref<1x32xf32, #tpu.memory_space<vmem>>, vector<1x32xf32>
    %c0_7 = arith.constant 0 : index
    %c0_8 = arith.constant 0 : index
    %4 = vector.load %arg6[%c0_7, %c0_8] : memref<32x128xf32, #tpu.memory_space<vmem>>, vector<32x128xf32>
    %cst = arith.constant 0x7F800000 : f32
    %5 = vector.broadcast %cst : f32 to vector<2x128xf32>
    %c0_i32 = arith.constant 0 : i32
    %c128_i32 = arith.constant 128 : i32
    %6 = arith.muli %c0_i32, %c128_i32 : i32
    %7 = tpu.assume_multiple %6, 128 : i32
    %c0_9 = arith.constant 0 : index
    %8 = arith.index_cast %7 : i32 to index
    %c0_10 = arith.constant 0 : index
    %9 = vector.load %arg1[%c0_9, %8, %c0_10] : memref<2x256x4xf32, #tpu.memory_space<vmem>>, vector<2x128x4xf32>
    %10 = vector.shape_cast %9 : vector<2x128x4xf32> to vector<256x4xf32>
    %cst_11 = arith.constant dense<0.000000e+00> : vector<256x32xf32>
    %11 = tpu.matmul %10, %0, %cst_11 {dimension_numbers = #tpu.dot_dimension_numbers<[1], [0], [0], [1], [0, 0, 1, 1], [], []>, precision = #tpu.contract_precision<fp32>} : vector<256x4xf32>, vector<4x32xf32>, vector<256x32xf32> -> vector<256x32xf32>
    %12 = vector.broadcast %1 : vector<1x32xf32> to vector<256x32xf32>
    %13 = arith.addf %11, %12 : vector<256x32xf32>
    %cst_12 = arith.constant 0.000000e+00 : f32
    %14 = vector.broadcast %cst_12 : f32 to vector<256x32xf32>
    %15 = arith.maximumf %13, %14 : vector<256x32xf32>
    %cst_13 = arith.constant dense<0.000000e+00> : vector<256x32xf32>
    %16 = tpu.matmul %15, %2, %cst_13 {dimension_numbers = #tpu.dot_dimension_numbers<[1], [0], [0], [1], [0, 0, 1, 1], [], []>, precision = #tpu.contract_precision<fp32>} : vector<256x32xf32>, vector<32x32xf32>, vector<256x32xf32> -> vector<256x32xf32>
    %17 = vector.broadcast %3 : vector<1x32xf32> to vector<256x32xf32>
    %18 = arith.addf %16, %17 : vector<256x32xf32>
    %19 = arith.negf %18 : vector<256x32xf32>
    %20 = math.exp %19 : vector<256x32xf32>
    %cst_14 = arith.constant 1.000000e+00 : f32
    %21 = vector.broadcast %cst_14 : f32 to vector<256x32xf32>
    %22 = arith.addf %21, %20 : vector<256x32xf32>
    %23 = arith.divf %21, %22 : vector<256x32xf32>
    %cst_15 = arith.constant dense<0.000000e+00> : vector<256x128xf32>
    %24 = tpu.matmul %23, %4, %cst_15 {dimension_numbers = #tpu.dot_dimension_numbers<[1], [0], [0], [1], [0, 0, 1, 1], [], []>, precision = #tpu.contract_precision<fp32>} : vector<256x32xf32>, vector<32x128xf32>, vector<256x128xf32> -> vector<256x128xf32>
    %25 = arith.mulf %23, %23 : vector<256x32xf32>
    %cst_16 = arith.constant dense<0.000000e+00> : vector<256xf32>
    %26 = vector.multi_reduction <add>, %25, %cst_16 [1] : vector<256x32xf32> to vector<256xf32>
    %27 = vector.shape_cast %26 : vector<256xf32> to vector<256x1xf32>
    %28 = vector.broadcast %27 : vector<256x1xf32> to vector<256x128xf32>
    %29 = arith.addf %28, %24 : vector<256x128xf32>
    %30 = vector.shape_cast %29 : vector<256x128xf32> to vector<2x128x128xf32>
    %cst_17 = arith.constant dense<0x7F800000> : vector<2x128xf32>
    %31 = vector.multi_reduction <minimumf>, %30, %cst_17 [1] : vector<2x128x128xf32> to vector<2x128xf32>
    %32 = arith.minimumf %5, %31 : vector<2x128xf32>
    %c1_i32 = arith.constant 1 : i32
    %c128_i32_18 = arith.constant 128 : i32
    %33 = arith.muli %c1_i32, %c128_i32_18 : i32
    %34 = tpu.assume_multiple %33, 128 : i32
    %c0_19 = arith.constant 0 : index
    %35 = arith.index_cast %34 : i32 to index
    %c0_20 = arith.constant 0 : index
    %36 = vector.load %arg1[%c0_19, %35, %c0_20] : memref<2x256x4xf32, #tpu.memory_space<vmem>>, vector<2x128x4xf32>
    %37 = vector.shape_cast %36 : vector<2x128x4xf32> to vector<256x4xf32>
    %cst_21 = arith.constant dense<0.000000e+00> : vector<256x32xf32>
    %38 = tpu.matmul %37, %0, %cst_21 {dimension_numbers = #tpu.dot_dimension_numbers<[1], [0], [0], [1], [0, 0, 1, 1], [], []>, precision = #tpu.contract_precision<fp32>} : vector<256x4xf32>, vector<4x32xf32>, vector<256x32xf32> -> vector<256x32xf32>
    %39 = vector.broadcast %1 : vector<1x32xf32> to vector<256x32xf32>
    %40 = arith.addf %38, %39 : vector<256x32xf32>
    %cst_22 = arith.constant 0.000000e+00 : f32
    %41 = vector.broadcast %cst_22 : f32 to vector<256x32xf32>
    %42 = arith.maximumf %40, %41 : vector<256x32xf32>
    %cst_23 = arith.constant dense<0.000000e+00> : vector<256x32xf32>
    %43 = tpu.matmul %42, %2, %cst_23 {dimension_numbers = #tpu.dot_dimension_numbers<[1], [0], [0], [1], [0, 0, 1, 1], [], []>, precision = #tpu.contract_precision<fp32>} : vector<256x32xf32>, vector<32x32xf32>, vector<256x32xf32> -> vector<256x32xf32>
    %44 = vector.broadcast %3 : vector<1x32xf32> to vector<256x32xf32>
    %45 = arith.addf %43, %44 : vector<256x32xf32>
    %46 = arith.negf %45 : vector<256x32xf32>
    %47 = math.exp %46 : vector<256x32xf32>
    %cst_24 = arith.constant 1.000000e+00 : f32
    %48 = vector.broadcast %cst_24 : f32 to vector<256x32xf32>
    %49 = arith.addf %48, %47 : vector<256x32xf32>
    %50 = arith.divf %48, %49 : vector<256x32xf32>
    %cst_25 = arith.constant dense<0.000000e+00> : vector<256x128xf32>
    %51 = tpu.matmul %50, %4, %cst_25 {dimension_numbers = #tpu.dot_dimension_numbers<[1], [0], [0], [1], [0, 0, 1, 1], [], []>, precision = #tpu.contract_precision<fp32>} : vector<256x32xf32>, vector<32x128xf32>, vector<256x128xf32> -> vector<256x128xf32>
    %52 = arith.mulf %50, %50 : vector<256x32xf32>
    %cst_26 = arith.constant dense<0.000000e+00> : vector<256xf32>
    %53 = vector.multi_reduction <add>, %52, %cst_26 [1] : vector<256x32xf32> to vector<256xf32>
    %54 = vector.shape_cast %53 : vector<256xf32> to vector<256x1xf32>
    %55 = vector.broadcast %54 : vector<256x1xf32> to vector<256x128xf32>
    %56 = arith.addf %55, %51 : vector<256x128xf32>
    %57 = vector.shape_cast %56 : vector<256x128xf32> to vector<2x128x128xf32>
    %cst_27 = arith.constant dense<0x7F800000> : vector<2x128xf32>
    %58 = vector.multi_reduction <minimumf>, %57, %cst_27 [1] : vector<2x128x128xf32> to vector<2x128xf32>
    %59 = arith.minimumf %32, %58 : vector<2x128xf32>
    %c2_i32 = arith.constant 2 : i32
    %c0_28 = arith.constant 0 : index
    %c0_29 = arith.constant 0 : index
    %60 = vector.load %arg7[%c0_28, %c0_29] : memref<1x128xf32, #tpu.memory_space<vmem>>, vector<1x128xf32>
    %61 = vector.broadcast %60 : vector<1x128xf32> to vector<2x128xf32>
    %62 = arith.addf %59, %61 : vector<2x128xf32>
    %cst_30 = arith.constant 0.000000e+00 : f32
    %63 = vector.broadcast %cst_30 : f32 to vector<2x128xf32>
    %64 = arith.maximumf %62, %63 : vector<2x128xf32>
    %cst_31 = arith.constant 1.000000e+00 : f32
    %65 = vector.broadcast %cst_31 : f32 to vector<2x128xf32>
    %66 = arith.addf %64, %65 : vector<2x128xf32>
    %cst_32 = arith.constant 9.99999974E-5 : f32
    %67 = vector.broadcast %cst_32 : f32 to vector<2x128xf32>
    %68 = arith.addf %64, %67 : vector<2x128xf32>
    %69 = arith.divf %66, %68 : vector<2x128xf32>
    %70 = math.log %69 : vector<2x128xf32>
    %c0_33 = arith.constant 0 : index
    %c0_34 = arith.constant 0 : index
    %71 = vector.load %arg10[%c0_33, %c0_34] : memref<2x128xf32, #tpu.memory_space<vmem>>, vector<2x128xf32>
    tpu.vector_store %arg10[%c0_33, %c0_34], %70 {strides = array<i32>} : memref<2x128xf32, #tpu.memory_space<vmem>>, vector<2x128xf32>,
    %c0_35 = arith.constant 0 : index
    %c0_36 = arith.constant 0 : index
    %72 = vector.load %arg8[%c0_35, %c0_36] : memref<128x128xf32, #tpu.memory_space<vmem>>, vector<128x128xf32>
    %cst_37 = arith.constant dense<0.000000e+00> : vector<2x128xf32>
    %73 = tpu.matmul %70, %72, %cst_37 {dimension_numbers = #tpu.dot_dimension_numbers<[1], [0], [0], [1], [0, 0, 1, 1], [], []>, precision = #tpu.contract_precision<fp32>} : vector<2x128xf32>, vector<128x128xf32>, vector<2x128xf32> -> vector<2x128xf32>
    %c0_38 = arith.constant 0 : index
    %c0_39 = arith.constant 0 : index
    %74 = vector.load %arg9[%c0_38, %c0_39] : memref<2x128xf32, #tpu.memory_space<vmem>>, vector<2x128xf32>
    tpu.vector_store %arg9[%c0_38, %c0_39], %73 {strides = array<i32>} : memref<2x128xf32, #tpu.memory_space<vmem>>, vector<2x128xf32>,
    return
  }
  func.func @transform_0(%arg0: i32) -> (i32, i32, i32) {
    %c0_i32 = arith.constant 0 : i32
    %c0_i32_0 = arith.constant 0 : i32
    %c0_i32_1 = arith.constant 0 : i32
    return %arg0, %c0_i32, %c0_i32_0 : i32, i32, i32
  }
  func.func @transform_1(%arg0: i32) -> (i32, i32) {
    %c0_i32 = arith.constant 0 : i32
    %c0_i32_0 = arith.constant 0 : i32
    %c0_i32_1 = arith.constant 0 : i32
    return %c0_i32, %c0_i32_0 : i32, i32
  }
  func.func @transform_2(%arg0: i32) -> (i32, i32) {
    %c0_i32 = arith.constant 0 : i32
    %c0_i32_0 = arith.constant 0 : i32
    %c0_i32_1 = arith.constant 0 : i32
    return %c0_i32, %c0_i32_0 : i32, i32
  }
  func.func @transform_3(%arg0: i32) -> (i32, i32) {
    %c0_i32 = arith.constant 0 : i32
    %c0_i32_0 = arith.constant 0 : i32
    %c0_i32_1 = arith.constant 0 : i32
    return %c0_i32, %c0_i32_0 : i32, i32
  }
  func.func @transform_4(%arg0: i32) -> (i32, i32) {
    %c0_i32 = arith.constant 0 : i32
    %c0_i32_0 = arith.constant 0 : i32
    %c0_i32_1 = arith.constant 0 : i32
    return %c0_i32, %c0_i32_0 : i32, i32
  }
  func.func @transform_5(%arg0: i32) -> (i32, i32) {
    %c0_i32 = arith.constant 0 : i32
    %c0_i32_0 = arith.constant 0 : i32
    %c0_i32_1 = arith.constant 0 : i32
    return %c0_i32, %c0_i32_0 : i32, i32
  }
  func.func @transform_6(%arg0: i32) -> (i32, i32) {
    %c0_i32 = arith.constant 0 : i32
    %c0_i32_0 = arith.constant 0 : i32
    %c0_i32_1 = arith.constant 0 : i32
    return %c0_i32, %c0_i32_0 : i32, i32
  }
  func.func @transform_7(%arg0: i32) -> (i32, i32) {
    %c0_i32 = arith.constant 0 : i32
    %c0_i32_0 = arith.constant 0 : i32
    %c0_i32_1 = arith.constant 0 : i32
    return %c0_i32, %c0_i32_0 : i32, i32
  }
  func.func @transform_8(%arg0: i32) -> (i32, i32) {
    %c0_i32 = arith.constant 0 : i32
    %c0_i32_0 = arith.constant 0 : i32
    return %arg0, %c0_i32 : i32, i32
  }
  func.func @transform_9(%arg0: i32) -> (i32, i32) {
    %c0_i32 = arith.constant 0 : i32
    %c0_i32_0 = arith.constant 0 : i32
    return %arg0, %c0_i32 : i32, i32
  }
}

</mosaic_0001>

<bundles_post_ra>
// kernel: protopnet_forward.1
= control target key start
LH: loop header
LB: loop body
LE: loop exit
PB: predicated region body
PF: predicated region fallthrough
CT: control target
= control target key end

     0   :  { %15 = vsyncpa [#allocation3], 0  ;;  %s23437_s0 = inlined_call_operand.hbm [shape: f32[2,256,4], index: 0, kind: input, shape index: {}]   ;;  %s23438_s1 = inlined_call_operand.hbm [shape: f32[4,32], index: 1, kind: input, shape index: {}]   ;;  %s23439_s2 = inlined_call_operand.hbm [shape: f32[1,32], index: 2, kind: input, shape index: {}]   ;;  %s23440_s3 = inlined_call_operand.hbm [shape: f32[32,32], index: 3, kind: input, shape index: {}]   ;;  %s23441_s4 = inlined_call_operand.hbm [shape: f32[1,32], index: 4, kind: input, shape index: {}]   ;;  %s23442_s5 = inlined_call_operand.hbm [shape: f32[32,128], index: 5, kind: input, shape index: {}]   ;;  %s23443_s6 = inlined_call_operand.hbm [shape: f32[1,128], index: 6, kind: input, shape index: {}]   ;;  %s23444_s7 = inlined_call_operand.hbm [shape: f32[128,128], index: 7, kind: input, shape index: {}]   ;;  %s23445_s8 = inlined_call_operand.hbm [shape: f32[2,128], index: 8, kind: output, shape index: {0}]   ;;  %s23446_s9 = inlined_call_operand.hbm [shape: f32[2,128], index: 9, kind: output, shape index: {1}]  }
   0x1   :  { %16 = vsyncpa [#allocation6], 0 }
   0x2   :  { %17 = vsyncpa [#allocation9], 0 }
   0x3   :  { %18 = vsyncpa [#allocation12], 0 }
   0x4   :  { %19 = vsyncpa [#allocation15], 0 }
   0x5   :  { %20 = vsyncpa [#allocation4], 0 }
   0x6   :  { %21 = vsyncpa [#allocation18], 0  ;;  %s18740_s30 = smov [#allocation5]   ;;  %s18506_s13 = scalar_lea.hbm %s23438_s1, 64 }
   0x7   :  { %s40_s10 = sshll.u32 %s18740_s30, 4  ;;  %p18507_p0 = scmp.ne.s32.totalorder %s23438_s1, %s18506_s13  ;;  %s41_s10 = int_to_ptr.vmem [resolvable:$true] %s40_s10 }
   0x8   :  { %p18510_p1 = scmp.lt.u32.totalorder %s18506_s13, %s23438_s1 }
   0xa   :  { %p18512_p2 = pnand %p18510_p1, %p18507_p0 }
   0xc   :  { %18515 = shalt.err (!%p18512_p2)
}
   0xd   :  { %s18516_s18 = scalar_lea.vmem %s41_s10, 64  ;;  %p18521_p4 = scmp.lt.s32.totalorder %s41_s10, %s41_s10 }
   0xe   :  { %p18517_p3 = scmp.ne.s32.totalorder %s41_s10, %s18516_s18  ;;  %p18522_p5 = scmp.lt.s32.totalorder %s18516_s18, %s18516_s18 }
  0x10   :  { %p18523_p6 = por %p18522_p5, %p18521_p4 }
  0x12   :  { %p18524_p7 = pnand %p18523_p6, %p18517_p3 }
  0x14   :  { %18527 = shalt.err (!%p18524_p7)
}
  0x15   :  { %43 = dma.hbm_to_vmem [thread:$0]  %s23438_s1, 64, %s41_s10, [#allocation6]  }
  0x16   :  { %s18741_s21 = smov [#allocation8]   ;;  %s18742_s23 = smov [#allocation11]  }
  0x17   :  { %s59_s22 = sshll.u32 %s18741_s21, 4  ;;  %s81_s24 = sshll.u32 %s18742_s23, 4  ;;  %s60_s22 = int_to_ptr.vmem [resolvable:$true] %s59_s22  ;;  %s82_s24 = int_to_ptr.vmem [resolvable:$true] %s81_s24 }
  0x18   :  { %s18528_s27 = scalar_lea.hbm %s23440_s3, 512 }
  0x19   :  { %p18529_p8 = scmp.ne.s32.totalorder %s23440_s3, %s18528_s27  ;;  %p18532_p9 = scmp.lt.u32.totalorder %s18528_s27, %s23440_s3 }
  0x1b   :  { %p18534_p10 = pnand %p18532_p9, %p18529_p8 }
  0x1d   :  { %18537 = shalt.err (!%p18534_p10)
}
  0x1e   :  { %s18538_s1 = scalar_lea.vmem %s60_s22, 512  ;;  %p18543_p12 = scmp.lt.s32.totalorder %s60_s22, %s60_s22 }
  0x1f   :  { %p18539_p11 = scmp.ne.s32.totalorder %s60_s22, %s18538_s1  ;;  %p18544_p13 = scmp.lt.s32.totalorder %s18538_s1, %s18538_s1 }
  0x21   :  { %p18545_p0 = por %p18544_p13, %p18543_p12 }
  0x23   :  { %p18546_p1 = pnand %p18545_p0, %p18539_p11 }
  0x25   :  { %18549 = shalt.err (!%p18546_p1)
}
  0x26   :  { %s18743_s10 = smov 128   ;;  %s18744_s12 = smov 8  }
  0x27   :  { %65 = dma.hbm_to_vmem [thread:$0]  %s23440_s3, 512, %s60_s22, [#allocation9], %s18743_s10, %s18743_s10, %s18744_s12  }
  0x28   :  { %s18550_s17 = scalar_lea.hbm %s23442_s5, 512 }
  0x29   :  { %p18551_p2 = scmp.ne.s32.totalorder %s23442_s5, %s18550_s17  ;;  %p18554_p3 = scmp.lt.u32.totalorder %s18550_s17, %s23442_s5 }
  0x2b   :  { %p18556_p4 = pnand %p18554_p3, %p18551_p2 }
  0x2d   :  { %18559 = shalt.err (!%p18556_p4)
}
  0x2e   :  { %s18560_s23 = scalar_lea.vmem %s82_s24, 512  ;;  %p18565_p6 = scmp.lt.s32.totalorder %s82_s24, %s82_s24 }
  0x2f   :  { %p18561_p5 = scmp.ne.s32.totalorder %s82_s24, %s18560_s23  ;;  %p18566_p7 = scmp.lt.s32.totalorder %s18560_s23, %s18560_s23 }
  0x31   :  { %p18567_p8 = por %p18566_p7, %p18565_p6 }
  0x33   :  { %p18568_p9 = pnand %p18567_p8, %p18561_p5 }
  0x35   :  { %18571 = shalt.err (!%p18568_p9)
}
  0x36   :  { %87 = dma.hbm_to_vmem [thread:$0]  %s23442_s5, 512, %s82_s24, [#allocation12], %s18743_s10, %s18743_s10, %s18744_s12  }
  0x37   :  { %s18745_s25 = smov [#allocation2]   ;;  %s18746_s27 = smov [#allocation7]  }
  0x38   :  { %s27_s26 = sshll.u32 %s18745_s25, 4  ;;  %s50_s28 = sshll.u32 %s18746_s27, 4  ;;  %s28_s26 = int_to_ptr.vmem [resolvable:$true] %s27_s26  ;;  %s51_s28 = int_to_ptr.vmem [resolvable:$true] %s50_s28 }
  0x39   :  { %s18572_s11 = scalar_lea.hbm %s23437_s0, 8192 }
  0x3a   :  { %p18573_p10 = scmp.ne.s32.totalorder %s23437_s0, %s18572_s11  ;;  %p18576_p11 = scmp.lt.u32.totalorder %s18572_s11, %s23437_s0 }
  0x3c   :  { %p18578_p12 = pnand %p18576_p11, %p18573_p10 }
  0x3e   :  { %18581 = shalt.err (!%p18578_p12)
}
  0x3f   :  { %s18582_s5 = scalar_lea.vmem %s28_s26, 8192  ;;  %p18587_p0 = scmp.lt.s32.totalorder %s28_s26, %s28_s26 }
  0x40   :  { %p18583_p13 = scmp.ne.s32.totalorder %s28_s26, %s18582_s5  ;;  %p18588_p1 = scmp.lt.s32.totalorder %s18582_s5, %s18582_s5 }
  0x42   :  { %p18589_p2 = por %p18588_p1, %p18587_p0 }
  0x44   :  { %p18590_p3 = pnand %p18589_p2, %p18583_p13 }
  0x46   :  { %18593 = shalt.err (!%p18590_p3)
}
  0x47   :  { %33 = dma.hbm_to_vmem [thread:$0]  %s23437_s0, 8192, %s28_s26, [#allocation3], %s18743_s10, %s18743_s10, %s18744_s12  }
  0x48   :  { %s18594_s19 = scalar_lea.hbm %s23439_s2, 16 }
  0x49   :  { %p18595_p4 = scmp.ne.s32.totalorder %s23439_s2, %s18594_s19  ;;  %p18598_p5 = scmp.lt.u32.totalorder %s18594_s19, %s23439_s2 }
  0x4b   :  { %p18600_p6 = pnand %p18598_p5, %p18595_p4 }
  0x4d   :  { %18603 = shalt.err (!%p18600_p6)
}
  0x4e   :  { %s18604_s22 = scalar_lea.vmem %s51_s28, 16  ;;  %s18608_s25 = scalar_lea.vmem %s51_s28, 32 }
  0x4f   :  { %p18605_p7 = scmp.ne.s32.totalorder %s51_s28, %s18604_s22  ;;  %p18609_p8 = scmp.lt.s32.totalorder %s51_s28, %s51_s28 }
  0x50   :  { %p18610_p9 = scmp.lt.s32.totalorder %s18608_s25, %s18604_s22 }
  0x52   :  { %p18611_p10 = por %p18610_p9, %p18609_p8 }
  0x54   :  { %p18612_p11 = pnand %p18611_p10, %p18605_p7 }
  0x56   :  { %18615 = shalt.err (!%p18612_p11)
}
  0x57   :  { %53 = dma.hbm_to_vmem [thread:$0]  %s23439_s2, 16, %s51_s28, [#allocation6]  }
  0x58   :  { %s18747_s27 = smov [#allocation10]   ;;  %s18748_s30 = smov [#allocation13]  }
  0x59   :  { %s72_s29 = sshll.u32 %s18747_s27, 4  ;;  %s94_s11 = sshll.u32 %s18748_s30, 4  ;;  %s73_s29 = int_to_ptr.vmem [resolvable:$true] %s72_s29  ;;  %s95_s11 = int_to_ptr.vmem [resolvable:$true] %s94_s11 }
  0x5a   :  { %s18616_s14 = scalar_lea.hbm %s23441_s4, 16 }
  0x5b   :  { %p18617_p12 = scmp.ne.s32.totalorder %s23441_s4, %s18616_s14  ;;  %p18620_p13 = scmp.lt.u32.totalorder %s18616_s14, %s23441_s4 }
  0x5d   :  { %p18622_p0 = pnand %p18620_p13, %p18617_p12 }
  0x5f   :  { %18625 = shalt.err (!%p18622_p0)
}
  0x60   :  { %s18626_s2 = scalar_lea.vmem %s73_s29, 16  ;;  %s18630_s28 = scalar_lea.vmem %s73_s29, 32 }
  0x61   :  { %p18627_p1 = scmp.ne.s32.totalorder %s73_s29, %s18626_s2  ;;  %p18631_p2 = scmp.lt.s32.totalorder %s73_s29, %s73_s29 }
  0x62   :  { %p18632_p3 = scmp.lt.s32.totalorder %s18630_s28, %s18626_s2 }
  0x64   :  { %p18633_p4 = por %p18632_p3, %p18631_p2 }
  0x66   :  { %p18634_p5 = pnand %p18633_p4, %p18627_p1 }
  0x68   :  { %18637 = shalt.err (!%p18634_p5)
}
  0x69   :  { %75 = dma.hbm_to_vmem [thread:$0]  %s23441_s4, 16, %s73_s29, [#allocation9]  }
  0x6a   :  { %s18638_s21 = scalar_lea.hbm %s23443_s6, 16 }
  0x6b   :  { %p18639_p6 = scmp.ne.s32.totalorder %s23443_s6, %s18638_s21  ;;  %p18642_p7 = scmp.lt.u32.totalorder %s18638_s21, %s23443_s6 }
  0x6d   :  { %p18644_p8 = pnand %p18642_p7, %p18639_p6 }
  0x6f   :  { %18647 = shalt.err (!%p18644_p8)
}
  0x70   :  { %s18648_s0 = scalar_lea.vmem %s95_s11, 16  ;;  %s18652_s26 = scalar_lea.vmem %s95_s11, 32 }
  0x71   :  { %p18649_p9 = scmp.ne.s32.totalorder %s95_s11, %s18648_s0  ;;  %p18653_p10 = scmp.lt.s32.totalorder %s95_s11, %s95_s11 }
  0x72   :  { %p18654_p11 = scmp.lt.s32.totalorder %s18652_s26, %s18648_s0 }
  0x74   :  { %p18655_p12 = por %p18654_p11, %p18653_p10 }
  0x76   :  { %p18656_p13 = pnand %p18655_p12, %p18649_p9 }
  0x78   :  { %18659 = shalt.err (!%p18656_p13)
}
  0x79   :  { %97 = dma.hbm_to_vmem [thread:$0]  %s23443_s6, 16, %s95_s11, [#allocation12]  }
  0x7a   :  { %s18749_s29 = smov [#allocation14]   ;;  %s18660_s14 = scalar_lea.hbm %s23444_s7, 2048 }
  0x7b   :  { %s103_s30 = sshll.u32 %s18749_s29, 4  ;;  %p18661_p0 = scmp.ne.s32.totalorder %s23444_s7, %s18660_s14  ;;  %s104_s30 = int_to_ptr.vmem [resolvable:$true] %s103_s30 }
  0x7c   :  { %p18664_p1 = scmp.lt.u32.totalorder %s18660_s14, %s23444_s7 }
  0x7e   :  { %p18666_p2 = pnand %p18664_p1, %p18661_p0 }
  0x80   :  { %18669 = shalt.err (!%p18666_p2)
}
  0x81   :  { %s18670_s2 = scalar_lea.vmem %s104_s30, 2048  ;;  %p18675_p4 = scmp.lt.s32.totalorder %s104_s30, %s104_s30 }
  0x82   :  { %p18671_p3 = scmp.ne.s32.totalorder %s104_s30, %s18670_s2  ;;  %p18676_p5 = scmp.lt.s32.totalorder %s18670_s2, %s18670_s2 }
  0x84   :  { %p18677_p6 = por %p18676_p5, %p18675_p4 }
  0x86   :  { %p18678_p7 = pnand %p18677_p6, %p18671_p3 }
  0x88   :  { %18681 = shalt.err (!%p18678_p7)
}
  0x89   :  { %109 = dma.hbm_to_vmem [thread:$0]  %s23444_s7, 2048, %s104_s30, [#allocation15], %s18743_s10, %s18743_s10, %s18744_s12  }
  0x8a   :  { %18726 = dma.done.wait [#allocation3], 8192  }
  0x8b   :  { %18727 = vsyncadd [#allocation3], 4294959104 }
  0x8c   :  { %18728 = dma.done.wait [#allocation6], 80  }
  0x8d   :  { %18729 = vsyncadd [#allocation6], 4294967216 }
  0x8e   :  { %18730 = dma.done.wait [#allocation9], 528  }
  0x8f   :  { %18731 = vsyncadd [#allocation9], 4294966768 }
  0x90   :  { %18732 = dma.done.wait [#allocation12], 528  }
  0x91   :  { %18733 = vsyncadd [#allocation12], 4294966768 }
  0x92   :  { %18734 = dma.done.wait [#allocation15], 2048  }
  0x93   :  { %18735 = vsyncadd [#allocation15], 4294965248  ;;  %vm280_vm0 = vcmask 1043456   ;;  %vm183_vm1 = vcmask 31744   ;;  %v134_v0 = vld [vmem:[#allocation5] sm:$0xf] }
  0x94   :  { %v145_v1 = vld [vmem:[#allocation2] sm:$0xff]  ;;  %v282_v2 = vsel %vm280_vm0, %v134_v0, 0  ;;  %v146_v7 = vld [vmem:[#allocation2 + $0x8] sm:$0xff]  ;;  %v147_v8 = vld [vmem:[#allocation2 + $0x10] sm:$0xff]  ;;  %vm2101_vm2 = vcmask 261120   ;;  %vm18751_vm3 = vmmov 0  }
  0x95   :  { %v18914_v3 = vsel %vm183_vm1, %v145_v1, 0  ;;  %v18916_v4 = vand.u32 4294901760, %v282_v2  ;;  %v18931_v10 = vsel %vm183_vm1, %v146_v7, 0  ;;  %v18936_v12 = vsel %vm183_vm1, %v147_v8, 0  ;;  %v148_v13 = vld [vmem:[#allocation2 + $0x18] sm:$0xff]  ;;  %v149_v14 = vld [vmem:[#allocation2 + $0x20] sm:$0xff] }
  0x96   :  { %v18919_v5 = vand.u32 4294901760, %v18914_v3  ;;  %v18941_v16 = vand.u32 4294901760, %v18931_v10  ;;  %v18944_v17 = vand.u32 4294901760, %v18936_v12  ;;  %v18947_v18 = vsel %vm183_vm1, %v148_v13, 0  ;;  %v150_v20 = vld [vmem:[#allocation2 + $0x28] sm:$0xff]  ;;  %v151_v21 = vld [vmem:[#allocation2 + $0x30] sm:$0xff] }
  0x97   :  { %24069 = vst [vmem:[#allocation26_spill] sm:$0xff] %v18916_v4  ;;  %v18922_v6 = vsub.f32 %v282_v2, %v18916_v4  ;;  %14638 = vmatprep.subr.mxu1 %v18916_v4  ;;  %v18951_v19 = vsel %vm183_vm1, %v149_v14, 0  ;;  %v18957_v22 = vand.u32 4294901760, %v18947_v18  ;;  %v18965_v24 = vsel %vm183_vm1, %v150_v20, 0  ;;  %v152_v26 = vld [vmem:[#allocation2 + $0x38] sm:$0xff]  ;;  %v153_v27 = vld [vmem:[#allocation2 + $0x40] sm:$0xff] }
  0x98   :  { %14690 = vmatprep.mubr.f32.mxu0 %v18919_v5  ;;  %14639 = vmatpush3.msra.mxu1 %v18916_v4  ;;  %v18962_v23 = vand.u32 4294901760, %v18951_v19  ;;  %v18968_v25 = vsel %vm183_vm1, %v151_v21, 0  ;;  %v18973_v28 = vand.u32 4294901760, %v18965_v24  ;;  %v18980_v30 = vsel %vm183_vm1, %v152_v26, 0  ;;  %v154_v32 = vld [vmem:[#allocation2 + $0x48] sm:$0xff]  ;;  %v155_v33 = vld [vmem:[#allocation2 + $0x50] sm:$0xff] }
  0x99   :  { %24070 = vst [vmem:[#allocation27_spill] sm:$0xff] %v18922_v6  ;;  %v18928_v9 = vand.u32 4294901760, %v18922_v6  ;;  %v18977_v29 = vand.u32 4294901760, %v18968_v25  ;;  %v18983_v31 = vsel %vm183_vm1, %v153_v27, 0  ;;  %v18987_v34 = vand.u32 4294901760, %v18980_v30  ;;  %v156_v38 = vld [vmem:[#allocation2 + $0x58] sm:$0xff] }
  0x9a   :  { %v18991_v35 = vand.u32 4294901760, %v18983_v31  ;;  %v18994_v36 = vsel %vm183_vm1, %v154_v32, 0  ;;  %v18997_v37 = vsel %vm183_vm1, %v155_v33, 0  ;;  %v157_v39 = vld [vmem:[#allocation2 + $0x60] sm:$0xff]  ;;  %v19008_v42 = vsel %vm183_vm1, %v156_v38, 0  ;;  %v158_v44 = vld [vmem:[#allocation2 + $0x68] sm:$0xff] }
  0x9b   :  { %24071 = vst [vmem:[#allocation28_spill] sm:$0xff] %v18928_v9  ;;  %v674_v11 = vsub.f32 %v18922_v6, %v18928_v9  ;;  %v19001_v40 = vand.u32 4294901760, %v18994_v36  ;;  %v19005_v41 = vand.u32 4294901760, %v18997_v37  ;;  %v19011_v43 = vsel %vm183_vm1, %v157_v39, 0  ;;  %v159_v45 = vld [vmem:[#allocation2 + $0x70] sm:$0xff]  ;;  %v160_v50 = vld [vmem:[#allocation2 + $0x78] sm:$0xff] }
  0x9c   :  { %v19015_v46 = vand.u32 4294901760, %v19008_v42  ;;  %v19019_v47 = vand.u32 4294901760, %v19011_v43  ;;  %v19022_v48 = vsel %vm183_vm1, %v158_v44, 0  ;;  %v19025_v49 = vsel %vm183_vm1, %v159_v45, 0  ;;  %v161_v51 = vld [vmem:[#allocation2 + $0x100] sm:$0xff]  ;;  %v162_v56 = vld [vmem:[#allocation2 + $0x108] sm:$0xff] }
  0x9d   :  { %v18938_v15 = vand.u32 4294901760, %v674_v11  ;;  %v19029_v52 = vand.u32 4294901760, %v19022_v48  ;;  %v19033_v53 = vand.u32 4294901760, %v19025_v49  ;;  %v19036_v54 = vsel %vm183_vm1, %v160_v50, 0  ;;  %v163_v57 = vld [vmem:[#allocation2 + $0x110] sm:$0xff]  ;;  %v164_v62 = vld [vmem:[#allocation2 + $0x118] sm:$0xff] }
  0x9e   :  { %v19039_v55 = vsel %vm183_vm1, %v161_v51, 0  ;;  %v19043_v58 = vand.u32 4294901760, %v19036_v54  ;;  %v19050_v60 = vsel %vm183_vm1, %v162_v56, 0  ;;  %v19053_v61 = vsel %vm183_vm1, %v163_v57, 0  ;;  %v165_v63 = vld [vmem:[#allocation2 + $0x120] sm:$0xff]  ;;  %v166_v8 = vld [vmem:[#allocation2 + $0x128] sm:$0xff] }
  0x9f   :  { %24072 = vst [vmem:[#allocation29_spill] sm:$0xff] %v18938_v15  ;;  %14688 = vmatprep.subr.mxu0 %v18938_v15  ;;  %v19047_v59 = vand.u32 4294901760, %v19039_v55  ;;  %v19057_v0 = vand.u32 4294901760, %v19050_v60  ;;  %v19061_v1 = vand.u32 4294901760, %v19053_v61  ;;  %v19064_v2 = vsel %vm183_vm1, %v164_v62, 0  ;;  %v167_v11 = vld [vmem:[#allocation2 + $0x130] sm:$0xff] }
  0xa0   :  { %14689 = vmatpush3.msra.mxu0 %v18938_v15  ;;  %v19067_v7 = vsel %vm183_vm1, %v165_v63, 0  ;;  %v19071_v13 = vand.u32 4294901760, %v19064_v2  ;;  %v19078_v20 = vsel %vm183_vm1, %v166_v8, 0  ;;  %v19081_v21 = vsel %vm183_vm1, %v167_v11, 0  ;;  %v168_v26 = vld [vmem:[#allocation2 + $0x138] sm:$0xff]  ;;  %v169_v27 = vld [vmem:[#allocation2 + $0x140] sm:$0xff] }
  0xa1   :  { %14691 = vmatmul.mubr.f32.vlgmr.msra.gmra.mrb[0].mxu0 %v18941_v16  ;;  %14738 = vmatprep.subr.mxu0 %v18922_v6  ;;  %24073 = vst [vmem:[#allocation30_spill] sm:$0xff] %v19061_v1  ;;  %v19075_v14 = vand.u32 4294901760, %v19067_v7  ;;  %v19085_v32 = vand.u32 4294901760, %v19078_v20  ;;  %v19089_v33 = vand.u32 4294901760, %v19081_v21  ;;  %v19092_v38 = vsel %vm183_vm1, %v168_v26, 0  ;;  %v170_v44 = vld [vmem:[#allocation2 + $0x148] sm:$0xff] }
  0xa2   :  { %14739 = vmatpush3.msra.mxu0 %v18922_v6  ;;  %14693 = vmatprep.mubr.f32.mxu0 %v18944_v17  ;;  %24074 = vst [vmem:[#allocation31_spill] sm:$0xff] %v19071_v13  ;;  %v19095_v39 = vsel %vm183_vm1, %v169_v27, 0  ;;  %v171_v45 = vld [vmem:[#allocation2 + $0x150] sm:$0xff]  ;;  %v19099_v50 = vand.u32 4294901760, %v19092_v38  ;;  %v19106_v56 = vsel %vm183_vm1, %v170_v44, 0  ;;  %v172_v62 = vld [vmem:[#allocation2 + $0x158] sm:$0xff] }
  0xa3   :  { %14788 = vmatprep.subr.mxu0 %v18916_v4  ;;  %24075 = vst [vmem:[#allocation32_spill] sm:$0xff] %v19075_v14  ;;  %24076 = vst [vmem:[#allocation33_spill] sm:$0xff] %v19085_v32  ;;  %v19103_v51 = vand.u32 4294901760, %v19095_v39  ;;  %v19109_v57 = vsel %vm183_vm1, %v171_v45, 0  ;;  %v173_v63 = vld [vmem:[#allocation2 + $0x160] sm:$0xff]  ;;  %v19113_v8 = vand.u32 4294901760, %v19106_v56 }
  0xa4   :  { %24077 = vst [vmem:[#allocation34_spill] sm:$0xff] %v19089_v33  ;;  %24078 = vst [vmem:[#allocation35_spill] sm:$0xff] %v19099_v50  ;;  %v19117_v11 = vand.u32 4294901760, %v19109_v57  ;;  %v19120_v26 = vsel %vm183_vm1, %v172_v62, 0  ;;  %v19123_v27 = vsel %vm183_vm1, %v173_v63, 0  ;;  %v174_v44 = vld [vmem:[#allocation2 + $0x168] sm:$0xff] }
  0xa5   :  { %14694 = vmatmul.mubr.f32.gmra.mrb[2].mxu0 %v18957_v22  ;;  %24079 = vst [vmem:[#allocation36_spill] sm:$0xff] %v19103_v51  ;;  %24080 = vst [vmem:[#allocation37_spill] sm:$0xff] %v19106_v56  ;;  %v175_v45 = vld [vmem:[#allocation2 + $0x170] sm:$0xff]  ;;  %v19127_v6 = vand.u32 4294901760, %v19120_v26  ;;  %v19131_v15 = vand.u32 4294901760, %v19123_v27  ;;  %v176_v63 = vld [vmem:[#allocation2 + $0x178] sm:$0xff] }
  0xa6   :  { %14696 = vmatprep.mubr.f32.mxu0 %v18962_v23  ;;  %24081 = vst [vmem:[#allocation38_spill] sm:$0xff] %v19109_v57  ;;  %24082 = vst [vmem:[#allocation39_spill] sm:$0xff] %v19113_v8  ;;  %v19134_v57 = vsel %vm183_vm1, %v174_v44, 0  ;;  %v19137_v62 = vsel %vm183_vm1, %v175_v45, 0  ;;  %v19157_v45 = vsub.f32 %v18914_v3, %v18919_v5  ;;  %v19178_v3 = vsub.f32 %v18951_v19, %v18962_v23  ;;  %s18753_s7 = smov [#allocation17]  }
  0xa7   :  { %24083 = vst [vmem:[#allocation40_spill] sm:$0xff] %v19117_v11  ;;  %24084 = vst [vmem:[#allocation41_spill] sm:$0xff] %v19120_v26  ;;  %v19141_v56 = vand.u32 4294901760, %v19134_v57  ;;  %v19145_v26 = vand.u32 4294901760, %v19137_v62  ;;  %v19199_v19 = vsub.f32 %v18983_v31, %v18991_v35  ;;  %v19219_v31 = vsub.f32 %v19011_v43, %v19019_v47  ;;  %s13192_s10 = sshll.u32 %s18753_s7, 4  ;;  %s13193_s10 = int_to_ptr.vmem [resolvable:$true] %s13192_s10 }
  0xa8   :  { %24085 = vst [vmem:[#allocation42_spill] sm:$0xff] %v19123_v27  ;;  %24086 = vst [vmem:[#allocation43_spill] sm:$0xff] %v19127_v6  ;;  %v19148_v27 = vsel %vm183_vm1, %v176_v63, 0  ;;  %v19167_v63 = vsub.f32 %v18936_v12, %v18944_v17  ;;  %v19189_v12 = vsub.f32 %v18968_v25, %v18977_v29  ;;  %v19209_v25 = vsub.f32 %v18997_v37, %v19005_v41  ;;  %s18682_s12 = scalar_lea.vmem %s13193_s10, 32  ;;  %p18687_p9 = scmp.lt.s32.totalorder %s13193_s10, %s13193_s10 }
  0xa9   :  { %14697 = vmatmul.mubr.f32.gmra.mrb[4].mxu0 %v18973_v28  ;;  %24087 = vst [vmem:[#allocation44_spill] sm:$0xff] %v19131_v15  ;;  %24088 = vst [vmem:[#allocation45_spill] sm:$0xff] %v19134_v57  ;;  %v19152_v44 = vand.u32 4294901760, %v19148_v27  ;;  %v19161_v57 = vsub.f32 %v18931_v10, %v18941_v16  ;;  %v19184_v10 = vsub.f32 %v18965_v24, %v18973_v28  ;;  %vm12514_vm4 = vcmask 1041409   ;;  %p18683_p8 = scmp.ne.s32.totalorder %s13193_s10, %s18682_s12  ;;  %p18688_p10 = scmp.lt.s32.totalorder %s18682_s12, %s18682_s12 }
  0xaa   :  { %14699 = vmatprep.mubr.f32.mxu0 %v18977_v29  ;;  %24089 = vst [vmem:[#allocation46_spill] sm:$0xff] %v19141_v56  ;;  %24090 = vst [vmem:[#allocation47_spill] sm:$0xff] %v19145_v26  ;;  %v19204_v24 = vsub.f32 %v18994_v36, %v19001_v40  ;;  %v19224_v36 = vsub.f32 %v19022_v48, %v19029_v52  ;;  %v19229_v37 = vsub.f32 %v19025_v49, %v19033_v53 }
  0xab   :  { %24091 = vst [vmem:[#allocation48_spill] sm:$0xff] %v19148_v27  ;;  %24092 = vst [vmem:[#allocation49_spill] sm:$0xff] %v19152_v44  ;;  %v19172_v27 = vsub.f32 %v18947_v18, %v18957_v22  ;;  %v19194_v18 = vsub.f32 %v18980_v30, %v18987_v34  ;;  %v19214_v30 = vsub.f32 %v19008_v42, %v19015_v46  ;;  %p18689_p11 = por %p18688_p10, %p18687_p9 }
  0xac   :  { %v19234_v42 = vsub.f32 %v19036_v54, %v19043_v58  ;;  %v19239_v43 = vsub.f32 %v19039_v55, %v19047_v59  ;;  %v19244_v48 = vsub.f32 %v19050_v60, %v19057_v0  ;;  %v19249_v49 = vsub.f32 %v19053_v61, %v19061_v1 }
  0xad   :  { %14700 = vmatmul.mubr.f32.gmra.mrb[6].mxu0 %v18987_v34  ;;  %v19254_v54 = vsub.f32 %v19064_v2, %v19071_v13  ;;  %v19259_v55 = vsub.f32 %v19067_v7, %v19075_v14  ;;  %v19264_v60 = vsub.f32 %v19078_v20, %v19085_v32  ;;  %v19269_v61 = vsub.f32 %v19081_v21, %v19089_v33  ;;  %v24093_v20 = vld [vmem:[#allocation37_spill] sm:$0xff]  ;;  %v24094_v21 = vld [vmem:[#allocation38_spill] sm:$0xff]  ;;  %p18690_p12 = pnand %p18689_p11, %p18683_p8 }
  0xae   :  { %14702 = vmatprep.mubr.f32.mxu0 %v18991_v35  ;;  %v19274_v2 = vsub.f32 %v19092_v38, %v19099_v50  ;;  %v19279_v7 = vsub.f32 %v19095_v39, %v19103_v51  ;;  %v24095_v38 = vld [vmem:[#allocation41_spill] sm:$0xff] }
  0xaf   :  { %v24096_v39 = vld [vmem:[#allocation42_spill] sm:$0xff] }
  0xb1   :  { %14703 = vmatmul.mubr.f32.gmra.mrb[8].mxu0 %v19001_v40 }
  0xb2   :  { %14705 = vmatprep.mubr.f32.mxu0 %v19005_v41 }
  0xb5   :  { %14706 = vmatmul.mubr.f32.gmra.mrb[10].mxu0 %v19015_v46 }
  0xb6   :  { %14708 = vmatprep.mubr.f32.mxu0 %v19019_v47 }
  0xb9   :  { %14709 = vmatmul.mubr.f32.gmra.mrb[12].mxu0 %v19029_v52 }
  0xba   :  { %14711 = vmatprep.mubr.f32.mxu0 %v19033_v53 }
  0xbd   :  { %14712 = vmatmul.mubr.f32.gmra.mrb[14].mxu0 %v19043_v58 }
  0xbe   :  { %14714 = vmatprep.mubr.f32.mxu0 %v19047_v59 }
  0xc1   :  { %14715 = vmatmul.mubr.f32.gmra.mrb[16].mxu0 %v19057_v0 }
  0xc2   :  { %14717 = vmatprep.mubr.f32.mxu0 %v19061_v1 }
  0xc5   :  { %14718 = vmatmul.mubr.f32.gmra.mrb[18].mxu0 %v19071_v13 }
  0xc6   :  { %14720 = vmatprep.mubr.f32.mxu0 %v19075_v14 }
  0xc9   :  { %14721 = vmatmul.mubr.f32.gmra.mrb[20].mxu0 %v19085_v32  ;;  %v19284_v32 = vsub.f32 %v24093_v20, %v19113_v8  ;;  %v24097_v20 = vld [vmem:[#allocation45_spill] sm:$0xff] }
  0xca   :  { %14723 = vmatprep.mubr.f32.mxu0 %v19089_v33  ;;  %v19289_v33 = vsub.f32 %v24094_v21, %v19117_v11  ;;  %v19309_v21 = vsub.f32 %v19137_v62, %v19145_v26 }
  0xcd   :  { %14724 = vmatmul.mubr.f32.gmra.mrb[22].mxu0 %v19099_v50  ;;  %v19294_v50 = vsub.f32 %v24095_v38, %v19127_v6  ;;  %v352_v38 = vand.u32 4294901760, %v19157_v45 }
  0xce   :  { %14726 = vmatprep.mubr.f32.mxu0 %v19103_v51  ;;  %v19299_v51 = vsub.f32 %v24096_v39, %v19131_v15  ;;  %v24098_v39 = vld [vmem:[#allocation48_spill] sm:$0xff] }
  0xd1   :  { %14727 = vmatmul.mubr.f32.gmra.mrb[24].mxu0 %v19113_v8  ;;  %v19304_v8 = vsub.f32 %v24097_v20, %v19141_v56 }
  0xd2   :  { %14729 = vmatprep.mubr.f32.mxu0 %v19117_v11  ;;  %v353_v11 = vsub.f32 %v19157_v45, %v352_v38 }
  0xd4   :  { %v354_v62 = vand.u32 4294901760, %v353_v11 }
  0xd5   :  { %14730 = vmatmul.mubr.f32.gmra.mrb[26].mxu0 %v19127_v6  ;;  %v362_v6 = vand.u32 4294901760, %v19161_v57 }
  0xd6   :  { %14732 = vmatprep.mubr.f32.mxu0 %v19131_v15  ;;  %v19316_v15 = vsub.f32 %v24098_v39, %v19152_v44  ;;  %14640 = vmatprep.mubr.f32.mxu1 %v354_v62  ;;  %v452_v62 = vand.u32 4294901760, %v19209_v25 }
  0xd7   :  { %v363_v20 = vsub.f32 %v19161_v57, %v362_v6 }
  0xd9   :  { %14733 = vmatmul.mubr.f32.gmra.mrb[28].mxu0 %v19141_v56  ;;  %v372_v56 = vand.u32 4294901760, %v19167_v63  ;;  %v364_v14 = vand.u32 4294901760, %v363_v20 }
  0xda   :  { %14735 = vmatprep.mubr.f32.mxu0 %v19145_v26  ;;  %v382_v26 = vand.u32 4294901760, %v19172_v27 }
  0xdb   :  { %v373_v13 = vsub.f32 %v19167_v63, %v372_v56  ;;  %14641 = vmatmul.mubr.f32.vlgmr.msra.gmra.mrb[0].mxu1 %v364_v14 }
  0xdc   :  { %v383_v39 = vsub.f32 %v19172_v27, %v382_v26 }
  0xdd   :  { %14736 = vmatmul.mubr.f32.gmra.mrb[30].mxu0 %v19152_v44  ;;  %v374_v44 = vand.u32 4294901760, %v373_v13  ;;  %v422_v13 = vand.u32 4294901760, %v19194_v18 }
  0xde   :  { %14740 = vmatprep.mubr.f32.mxu0 %v19157_v45  ;;  %v392_v45 = vand.u32 4294901760, %v19178_v3  ;;  %v384_v1 = vand.u32 4294901760, %v383_v39 }
  0xdf   :  { %14643 = vmatprep.mubr.f32.mxu1 %v374_v44  ;;  %v423_v44 = vsub.f32 %v19194_v18, %v422_v13 }
  0xe0   :  { %v393_v11 = vsub.f32 %v19178_v3, %v392_v45  ;;  %14644 = vmatmul.mubr.f32.gmra.mrb[2].mxu1 %v384_v1 }
  0xe1   :  { %14741 = vmatmul.mubr.f32.vlgmr.msra.gmra.mrb[0].mxu0 %v19161_v57  ;;  %v402_v57 = vand.u32 4294901760, %v19184_v10 }
  0xe2   :  { %14789 = vmatpush3.msra.mxu0 %v18916_v4  ;;  %14743 = vmatprep.mubr.f32.mxu0 %v19167_v63  ;;  %v412_v63 = vand.u32 4294901760, %v19189_v12  ;;  %v394_v14 = vand.u32 4294901760, %v393_v11  ;;  %v472_v11 = vand.u32 4294901760, %v19219_v31 }
  0xe3   :  { %14838 = vmatprep.subr.mxu0 %v18928_v9  ;;  %v403_v20 = vsub.f32 %v19184_v10, %v402_v57 }
  0xe4   :  { %14646 = vmatprep.mubr.f32.mxu1 %v394_v14 }
  0xe5   :  { %14744 = vmatmul.mubr.f32.gmra.mrb[2].mxu0 %v19172_v27  ;;  %v404_v27 = vand.u32 4294901760, %v403_v20 }
  0xe6   :  { %14746 = vmatprep.mubr.f32.mxu0 %v19178_v3 }
  0xe7   :  { %14647 = vmatmul.mubr.f32.gmra.mrb[4].mxu1 %v404_v27 }
  0xe9   :  { %14747 = vmatmul.mubr.f32.gmra.mrb[4].mxu0 %v19184_v10  ;;  %v442_v10 = vand.u32 4294901760, %v19204_v24 }
  0xea   :  { %14749 = vmatprep.mubr.f32.mxu0 %v19189_v12 }
  0xed   :  { %14750 = vmatmul.mubr.f32.gmra.mrb[6].mxu0 %v19194_v18  ;;  %v462_v18 = vand.u32 4294901760, %v19214_v30 }
  0xee   :  { %14752 = vmatprep.mubr.f32.mxu0 %v19199_v19 }
  0xf1   :  { %14753 = vmatmul.mubr.f32.gmra.mrb[8].mxu0 %v19204_v24 }
  0xf2   :  { %14755 = vmatprep.mubr.f32.mxu0 %v19209_v25 }
  0xf5   :  { %14756 = vmatmul.mubr.f32.gmra.mrb[10].mxu0 %v19214_v30 }
  0xf6   :  { %14758 = vmatprep.mubr.f32.mxu0 %v19219_v31 }
  0xf9   :  { %14759 = vmatmul.mubr.f32.gmra.mrb[12].mxu0 %v19224_v36 }
  0xfa   :  { %14761 = vmatprep.mubr.f32.mxu0 %v19229_v37 }
  0xfd   :  { %14762 = vmatmul.mubr.f32.gmra.mrb[14].mxu0 %v19234_v42 }
  0xfe   :  { %14764 = vmatprep.mubr.f32.mxu0 %v19239_v43 }
 0x101   :  { %14765 = vmatmul.mubr.f32.gmra.mrb[16].mxu0 %v19244_v48 }
 0x102   :  { %14767 = vmatprep.mubr.f32.mxu0 %v19249_v49 }
 0x105   :  { %14768 = vmatmul.mubr.f32.gmra.mrb[18].mxu0 %v19254_v54 }
 0x106   :  { %14770 = vmatprep.mubr.f32.mxu0 %v19259_v55 }
 0x109   :  { %14771 = vmatmul.mubr.f32.gmra.mrb[20].mxu0 %v19264_v60 }
 0x10a   :  { %14773 = vmatprep.mubr.f32.mxu0 %v19269_v61 }
 0x10d   :  { %14774 = vmatmul.mubr.f32.gmra.mrb[22].mxu0 %v19274_v2 }
 0x10e   :  { %14776 = vmatprep.mubr.f32.mxu0 %v19279_v7 }
 0x111   :  { %14777 = vmatmul.mubr.f32.gmra.mrb[24].mxu0 %v19284_v32 }
 0x112   :  { %14779 = vmatprep.mubr.f32.mxu0 %v19289_v33 }
 0x115   :  { %14780 = vmatmul.mubr.f32.gmra.mrb[26].mxu0 %v19294_v50 }
 0x116   :  { %14782 = vmatprep.mubr.f32.mxu0 %v19299_v51 }
 0x119   :  { %14783 = vmatmul.mubr.f32.gmra.mrb[28].mxu0 %v19304_v8 }
 0x11a   :  { %14785 = vmatprep.mubr.f32.mxu0 %v19309_v21 }
 0x11d   :  { %14786 = vmatmul.mubr.f32.gmra.mrb[30].mxu0 %v19316_v15 }
 0x11e   :  { %14790 = vmatprep.mubr.f32.mxu0 %v352_v38  ;;  %v424_v38 = vand.u32 4294901760, %v423_v44 }
 0x121   :  { %14791 = vmatmul.mubr.f32.vlgmr.msra.gmra.mrb[0].mxu0 %v362_v6  ;;  %v413_v6 = vsub.f32 %v19189_v12, %v412_v63 }
 0x122   :  { %14839 = vmatpush3.msra.mxu0 %v18928_v9  ;;  %14793 = vmatprep.mubr.f32.mxu0 %v372_v56  ;;  %v432_v56 = vand.u32 4294901760, %v19199_v19 }
 0x123   :  { %14888 = vmatprep.subr.mxu0 %v18916_v4  ;;  %v414_v3 = vand.u32 4294901760, %v413_v6 }
 0x124   :  { %v433_v1 = vsub.f32 %v19199_v19, %v432_v56 }
 0x125   :  { %14794 = vmatmul.mubr.f32.gmra.mrb[2].mxu0 %v382_v26  ;;  %14649 = vmatprep.mubr.f32.mxu1 %v414_v3  ;;  %v443_v26 = vsub.f32 %v19204_v24, %v442_v10  ;;  %v482_v24 = vand.u32 4294901760, %v19224_v36 }
 0x126   :  { %14796 = vmatprep.mubr.f32.mxu0 %v392_v45  ;;  %14650 = vmatmul.mubr.f32.gmra.mrb[6].mxu1 %v424_v38  ;;  %v434_v12 = vand.u32 4294901760, %v433_v1  ;;  %v453_v45 = vsub.f32 %v19209_v25, %v452_v62  ;;  %v532_v1 = vand.u32 4294901760, %v19249_v49 }
 0x127   :  { %v444_v39 = vand.u32 4294901760, %v443_v26  ;;  %v483_v14 = vsub.f32 %v19224_v36, %v482_v24  ;;  %v522_v36 = vand.u32 4294901760, %v19244_v48 }
 0x128   :  { %14652 = vmatprep.mubr.f32.mxu1 %v434_v12  ;;  %v454_v19 = vand.u32 4294901760, %v453_v45 }
 0x129   :  { %14797 = vmatmul.mubr.f32.gmra.mrb[4].mxu0 %v402_v57  ;;  %v463_v57 = vsub.f32 %v19214_v30, %v462_v18  ;;  %v502_v30 = vand.u32 4294901760, %v19234_v42  ;;  %v484_v27 = vand.u32 4294901760, %v483_v14  ;;  %v523_v38 = vsub.f32 %v19244_v48, %v522_v36 }
 0x12a   :  { %14799 = vmatprep.mubr.f32.mxu0 %v412_v63  ;;  %14653 = vmatmul.mubr.f32.gmra.mrb[8].mxu1 %v444_v39  ;;  %v473_v63 = vsub.f32 %v19219_v31, %v472_v11  ;;  %v562_v48 = vand.u32 4294901760, %v19264_v60 }
 0x12b   :  { %v464_v20 = vand.u32 4294901760, %v463_v57  ;;  %14655 = vmatprep.mubr.f32.mxu1 %v454_v19  ;;  %v503_v44 = vsub.f32 %v19234_v42, %v502_v30  ;;  %v542_v42 = vand.u32 4294901760, %v19254_v54  ;;  %v524_v26 = vand.u32 4294901760, %v523_v38 }
 0x12c   :  { %v474_v25 = vand.u32 4294901760, %v473_v63  ;;  %v563_v57 = vsub.f32 %v19264_v60, %v562_v48  ;;  %v592_v63 = vand.u32 4294901760, %v19279_v7  ;;  %v602_v60 = vand.u32 4294901760, %v19284_v32 }
 0x12d   :  { %14800 = vmatmul.mubr.f32.gmra.mrb[6].mxu0 %v422_v13  ;;  %v492_v13 = vand.u32 4294901760, %v19229_v37  ;;  %v504_v3 = vand.u32 4294901760, %v503_v44  ;;  %v543_v12 = vsub.f32 %v19254_v54, %v542_v42  ;;  %v582_v54 = vand.u32 4294901760, %v19274_v2 }
 0x12e   :  { %14802 = vmatprep.mubr.f32.mxu0 %v432_v56  ;;  %14656 = vmatmul.mubr.f32.gmra.mrb[10].mxu1 %v464_v20  ;;  %v512_v56 = vand.u32 4294901760, %v19239_v43  ;;  %v564_v19 = vand.u32 4294901760, %v563_v57  ;;  %v24102_v57 = vld [vmem:[#allocation31_spill] sm:$0xff] }
 0x12f   :  { %14658 = vmatprep.mubr.f32.mxu1 %v474_v25  ;;  %v493_v6 = vsub.f32 %v19229_v37, %v492_v13  ;;  %v544_v39 = vand.u32 4294901760, %v543_v12  ;;  %v583_v20 = vsub.f32 %v19274_v2, %v582_v54  ;;  %v603_v25 = vsub.f32 %v19284_v32, %v602_v60  ;;  %v19393_v12 = vld [vmem:[#allocation8 + $0x18] sm:$0xff] }
 0x130   :  { %v622_v2 = vand.u32 4294901760, %v19294_v50  ;;  %v642_v32 = vand.u32 4294901760, %v19304_v8 }
 0x131   :  { %14803 = vmatmul.mubr.f32.gmra.mrb[8].mxu0 %v442_v10  ;;  %v494_v31 = vand.u32 4294901760, %v493_v6  ;;  %v513_v10 = vsub.f32 %v19239_v43, %v512_v56  ;;  %v584_v14 = vand.u32 4294901760, %v583_v20  ;;  %v24108_v20 = vld [vmem:[#allocation39_spill] sm:$0xff] }
 0x132   :  { %14805 = vmatprep.mubr.f32.mxu0 %v452_v62  ;;  %14659 = vmatmul.mubr.f32.gmra.mrb[12].mxu1 %v484_v27  ;;  %v533_v62 = vsub.f32 %v19249_v49, %v532_v1  ;;  %v604_v27 = vand.u32 4294901760, %v603_v25  ;;  %v623_v44 = vsub.f32 %v19294_v50, %v622_v2  ;;  %v662_v50 = vand.u32 4294901760, %v19316_v15  ;;  %v24114_v25 = vld [vmem:[#allocation49_spill] sm:$0xff] }
 0x133   :  { %14661 = vmatprep.mubr.f32.mxu1 %v494_v31  ;;  %v514_v37 = vand.u32 4294901760, %v513_v10  ;;  %v652_v10 = vand.u32 4294901760, %v19309_v21 }
 0x134   :  { %v534_v43 = vand.u32 4294901760, %v533_v62  ;;  %v624_v31 = vand.u32 4294901760, %v623_v44  ;;  %v19388_v62 = vld [vmem:[#allocation8 + $0x10] sm:$0xff] }
 0x135   :  { %14806 = vmatmul.mubr.f32.gmra.mrb[10].mxu0 %v462_v18  ;;  %v552_v18 = vand.u32 4294901760, %v19259_v55 }
 0x136   :  { %14808 = vmatprep.mubr.f32.mxu0 %v472_v11  ;;  %14662 = vmatmul.mubr.f32.gmra.mrb[14].mxu1 %v504_v3  ;;  %v572_v11 = vand.u32 4294901760, %v19269_v61  ;;  %v643_v3 = vsub.f32 %v19304_v8, %v642_v32  ;;  %v19384_v8 = vld [vmem:[#allocation8] sm:$0xff] }
 0x137   :  { %14664 = vmatprep.mubr.f32.mxu1 %v514_v37  ;;  %v553_v45 = vsub.f32 %v19259_v55, %v552_v18  ;;  %v663_v37 = vsub.f32 %v19316_v15, %v662_v50 }
 0x138   :  { %v644_v38 = vand.u32 4294901760, %v643_v3 }
 0x139   :  { %14809 = vmatmul.mubr.f32.gmra.mrb[12].mxu0 %v482_v24  ;;  %v554_v49 = vand.u32 4294901760, %v553_v45  ;;  %v573_v24 = vsub.f32 %v19269_v61, %v572_v11  ;;  %v24101_v45 = vld [vmem:[#allocation30_spill] sm:$0xff] }
 0x13a   :  { %14811 = vmatprep.mubr.f32.mxu0 %v492_v13  ;;  %14665 = vmatmul.mubr.f32.gmra.mrb[16].mxu1 %v524_v26  ;;  %v593_v13 = vsub.f32 %v19279_v7, %v592_v63  ;;  %v19386_v26 = vld [vmem:[#allocation8 + $0x8] sm:$0xff] }
 0x13b   :  { %14667 = vmatprep.mubr.f32.mxu1 %v534_v43  ;;  %v574_v55 = vand.u32 4294901760, %v573_v24  ;;  %v2202_v15 = vand.u32 4294901760, %v19386_v26  ;;  %v2208_v43 = vand.u32 4294901760, %v19393_v12  ;;  %v24107_v24 = vld [vmem:[#allocation36_spill] sm:$0xff] }
 0x13c   :  { %v594_v61 = vand.u32 4294901760, %v593_v13  ;;  %v24113_v13 = vld [vmem:[#allocation47_spill] sm:$0xff] }
 0x13d   :  { %14812 = vmatmul.mubr.f32.gmra.mrb[14].mxu0 %v502_v30  ;;  %v612_v30 = vand.u32 4294901760, %v19289_v33 }
 0x13e   :  { %14814 = vmatprep.mubr.f32.mxu0 %v512_v56  ;;  %14668 = vmatmul.mubr.f32.gmra.mrb[18].mxu1 %v544_v39  ;;  %v632_v56 = vand.u32 4294901760, %v19299_v51 }
 0x13f   :  { %14670 = vmatprep.mubr.f32.mxu1 %v554_v49  ;;  %v613_v6 = vsub.f32 %v19289_v33, %v612_v30  ;;  %v24104_v49 = vld [vmem:[#allocation33_spill] sm:$0xff] }
 0x141   :  { %14815 = vmatmul.mubr.f32.gmra.mrb[16].mxu0 %v522_v36  ;;  %v614_v7 = vand.u32 4294901760, %v613_v6  ;;  %v633_v36 = vsub.f32 %v19299_v51, %v632_v56  ;;  %v664_v51 = vand.u32 4294901760, %v663_v37 }
 0x142   :  { %14817 = vmatprep.mubr.f32.mxu0 %v532_v1  ;;  %14671 = vmatmul.mubr.f32.gmra.mrb[20].mxu1 %v564_v19  ;;  %v653_v1 = vsub.f32 %v19309_v21, %v652_v10  ;;  %v2199_v21 = vand.u32 4294901760, %v19384_v8  ;;  %v24106_v19 = vld [vmem:[#allocation35_spill] sm:$0xff] }
 0x143   :  { %14673 = vmatprep.mubr.f32.mxu1 %v574_v55  ;;  %v634_v33 = vand.u32 4294901760, %v633_v36  ;;  %v24110_v55 = vld [vmem:[#allocation43_spill] sm:$0xff] }
 0x145   :  { %14818 = vmatmul.mubr.f32.gmra.mrb[18].mxu0 %v542_v42  ;;  %v654_v42 = vand.u32 4294901760, %v653_v1 }
 0x146   :  { %14820 = vmatprep.mubr.f32.mxu0 %v552_v18  ;;  %14674 = vmatmul.mubr.f32.gmra.mrb[22].mxu1 %v584_v14  ;;  %v2205_v18 = vand.u32 4294901760, %v19388_v62  ;;  %v24112_v14 = vld [vmem:[#allocation46_spill] sm:$0xff] }
 0x147   :  { %14676 = vmatprep.mubr.f32.mxu1 %v594_v61 }
 0x148   :  { %v19408_v39 = vpack.c.bf16 %v2208_v43, %v2205_v18 }
 0x149   :  { %14821 = vmatmul.mubr.f32.gmra.mrb[20].mxu0 %v562_v48  ;;  %v19401_v48 = vpack.c.bf16 %v2202_v15, %v2199_v21 }
 0x14a   :  { %14823 = vmatprep.mubr.f32.mxu0 %v572_v11  ;;  %14677 = vmatmul.mubr.f32.gmra.mrb[24].mxu1 %v604_v27  ;;  %24100 = vst [vmem:[#allocation38_spill] sm:$0xff] %v19408_v39  ;;  %v24103_v11 = vld [vmem:[#allocation32_spill] sm:$0xff] }
 0x14b   :  { %14679 = vmatprep.mubr.f32.mxu1 %v614_v7  ;;  %24099 = vst [vmem:[#allocation37_spill] sm:$0xff] %v19401_v48  ;;  %16793 = vmatprep.subr.bf16.mxu1 %v19401_v48 }
 0x14c   :  { %16795 = vmatpush3.bf16.msra.mxu1 %v19401_v48 }
 0x14d   :  { %14824 = vmatmul.mubr.f32.gmra.mrb[22].mxu0 %v582_v54  ;;  %16797 = vmatprep.subr.bf16.mxu1 %v19408_v39  ;;  %v24105_v54 = vld [vmem:[#allocation34_spill] sm:$0xff] }
 0x14e   :  { %14826 = vmatprep.mubr.f32.mxu0 %v592_v63  ;;  %14680 = vmatmul.mubr.f32.gmra.mrb[26].mxu1 %v624_v31  ;;  %v24109_v63 = vld [vmem:[#allocation40_spill] sm:$0xff] }
 0x14f   :  { %14682 = vmatprep.mubr.f32.mxu1 %v634_v33 }
 0x150   :  { %16799 = vmatpush3.bf16.msra.mxu1 %v19408_v39 }
 0x151   :  { %14827 = vmatmul.mubr.f32.gmra.mrb[24].mxu0 %v602_v60  ;;  %v24111_v60 = vld [vmem:[#allocation44_spill] sm:$0xff] }
 0x152   :  { %14829 = vmatprep.mubr.f32.mxu0 %v612_v30  ;;  %14683 = vmatmul.mubr.f32.gmra.mrb[28].mxu1 %v644_v38 }
 0x153   :  { %14685 = vmatprep.mubr.f32.mxu1 %v654_v42 }
 0x155   :  { %14830 = vmatmul.mubr.f32.gmra.mrb[26].mxu0 %v622_v2 }
 0x156   :  { %14832 = vmatprep.mubr.f32.mxu0 %v632_v56  ;;  %14686 = vmatmul.mubr.f32.gmra.mrb[30].mxu1 %v664_v51 }
 0x159   :  { %14833 = vmatmul.mubr.f32.gmra.mrb[28].mxu0 %v642_v32 }
 0x15a   :  { %14835 = vmatprep.mubr.f32.mxu0 %v652_v10 }
 0x15d   :  { %14836 = vmatmul.mubr.f32.gmra.mrb[30].mxu0 %v662_v50 }
 0x15e   :  { %14840 = vmatprep.mubr.f32.mxu0 %v18919_v5 }
 0x161   :  { %14841 = vmatmul.mubr.f32.vlgmr.msra.gmra.mrb[0].mxu0 %v18941_v16 }
 0x162   :  { %14889 = vmatpush3.msra.mxu0 %v18916_v4  ;;  %14843 = vmatprep.mubr.f32.mxu0 %v18944_v17 }
 0x165   :  { %14844 = vmatmul.mubr.f32.gmra.mrb[2].mxu0 %v18957_v22 }
 0x166   :  { %14846 = vmatprep.mubr.f32.mxu0 %v18962_v23 }
 0x169   :  { %14847 = vmatmul.mubr.f32.gmra.mrb[4].mxu0 %v18973_v28 }
 0x16a   :  { %14849 = vmatprep.mubr.f32.mxu0 %v18977_v29 }
 0x16d   :  { %14850 = vmatmul.mubr.f32.gmra.mrb[6].mxu0 %v18987_v34 }
 0x16e   :  { %14852 = vmatprep.mubr.f32.mxu0 %v18991_v35 }
 0x171   :  { %14853 = vmatmul.mubr.f32.gmra.mrb[8].mxu0 %v19001_v40 }
 0x172   :  { %14855 = vmatprep.mubr.f32.mxu0 %v19005_v41 }
 0x175   :  { %14856 = vmatmul.mubr.f32.gmra.mrb[10].mxu0 %v19015_v46 }
 0x176   :  { %14858 = vmatprep.mubr.f32.mxu0 %v19019_v47 }
 0x179   :  { %14859 = vmatmul.mubr.f32.gmra.mrb[12].mxu0 %v19029_v52 }
 0x17a   :  { %14861 = vmatprep.mubr.f32.mxu0 %v19033_v53 }
 0x17d   :  { %14862 = vmatmul.mubr.f32.gmra.mrb[14].mxu0 %v19043_v58 }
 0x17e   :  { %14864 = vmatprep.mubr.f32.mxu0 %v19047_v59 }
 0x181   :  { %14865 = vmatmul.mubr.f32.gmra.mrb[16].mxu0 %v19057_v0 }
 0x182   :  { %14867 = vmatprep.mubr.f32.mxu0 %v24101_v45 }
 0x185   :  { %14868 = vmatmul.mubr.f32.gmra.mrb[18].mxu0 %v24102_v57 }
 0x186   :  { %14870 = vmatprep.mubr.f32.mxu0 %v24103_v11 }
 0x189   :  { %14871 = vmatmul.mubr.f32.gmra.mrb[20].mxu0 %v24104_v49 }
 0x18a   :  { %14873 = vmatprep.mubr.f32.mxu0 %v24105_v54 }
 0x18d   :  { %14874 = vmatmul.mubr.f32.gmra.mrb[22].mxu0 %v24106_v19 }
 0x18e   :  { %14876 = vmatprep.mubr.f32.mxu0 %v24107_v24 }
 0x191   :  { %14877 = vmatmul.mubr.f32.gmra.mrb[24].mxu0 %v24108_v20 }
 0x192   :  { %14879 = vmatprep.mubr.f32.mxu0 %v24109_v63 }
 0x195   :  { %14880 = vmatmul.mubr.f32.gmra.mrb[26].mxu0 %v24110_v55 }
 0x196   :  { %14882 = vmatprep.mubr.f32.mxu0 %v24111_v60 }
 0x199   :  { %14883 = vmatmul.mubr.f32.gmra.mrb[28].mxu0 %v24112_v14 }
 0x19a   :  { %14885 = vmatprep.mubr.f32.mxu0 %v24113_v13 }
 0x19d   :  { %14886 = vmatmul.mubr.f32.gmra.mrb[30].mxu0 %v24114_v25 }
 0x19e   :  { %14890 = vmatprep.mubr.f32.mxu0 %v18919_v5 }
 0x1a1   :  { %14891 = vmatmul.mubr.f32.vlgmr.msra.gmra.mrb[0].mxu0 %v18941_v16 }
 0x1a2   :  { %14893 = vmatprep.mubr.f32.mxu0 %v18944_v17 }
 0x1a5   :  { %14894 = vmatmul.mubr.f32.gmra.mrb[2].mxu0 %v18957_v22 }
 0x1a6   :  { %14896 = vmatprep.mubr.f32.mxu0 %v18962_v23 }
 0x1a9   :  { %14897 = vmatmul.mubr.f32.gmra.mrb[4].mxu0 %v18973_v28 }
 0x1aa   :  { %14899 = vmatprep.mubr.f32.mxu0 %v18977_v29 }
 0x1ad   :  { %14900 = vmatmul.mubr.f32.gmra.mrb[6].mxu0 %v18987_v34 }
 0x1ae   :  { %14902 = vmatprep.mubr.f32.mxu0 %v18991_v35  ;;  %v14642_v5 = vpop.f32.mrb[0].mxu1 }
 0x1af   :  { %v356_v16 = vpop.f32.mrb[1].mxu1 }
 0x1b1   :  { %14903 = vmatmul.mubr.f32.gmra.mrb[8].mxu0 %v19001_v40 }
 0x1b2   :  { %14905 = vmatprep.mubr.f32.mxu0 %v19005_v41 }
 0x1b3   :  { %v14645_v17 = vpop.f32.mrb[2].mxu1 }
 0x1b4   :  { %v376_v22 = vpop.f32.mrb[3].mxu1 }
 0x1b5   :  { %14906 = vmatmul.mubr.f32.gmra.mrb[10].mxu0 %v19015_v46 }
 0x1b6   :  { %14908 = vmatprep.mubr.f32.mxu0 %v19019_v47 }
 0x1b9   :  { %14909 = vmatmul.mubr.f32.gmra.mrb[12].mxu0 %v19029_v52 }
 0x1ba   :  { %14911 = vmatprep.mubr.f32.mxu0 %v19033_v53  ;;  %v14648_v23 = vpop.f32.mrb[4].mxu1  ;;  %v19480_v53 = vsub.f32 %v19384_v8, %v2199_v21 }
 0x1bb   :  { %v396_v28 = vpop.f32.mrb[5].mxu1 }
 0x1bd   :  { %14912 = vmatmul.mubr.f32.gmra.mrb[14].mxu0 %v19043_v58  ;;  %v19485_v58 = vsub.f32 %v19386_v26, %v2202_v15 }
 0x1be   :  { %14914 = vmatprep.mubr.f32.mxu0 %v19047_v59  ;;  %v23489_v59 = vand.u32 4294901760, %v19480_v53 }
 0x1bf   :  { %v19504_v15 = vpack.c.bf16 %v19485_v58, %v19480_v53 }
 0x1c0   :  { %v2591_v2 = vsub.f32 %v19480_v53, %v23489_v59 }
 0x1c1   :  { %14915 = vmatmul.mubr.f32.gmra.mrb[16].mxu0 %v19057_v0  ;;  %v23488_v0 = vand.u32 4294901760, %v19485_v58  ;;  %24116 = vst [vmem:[#allocation42_spill] sm:$0xff] %v19504_v15 }
 0x1c2   :  { %14917 = vmatprep.mubr.f32.mxu0 %v24101_v45  ;;  %v2592_v6 = vand.u32 4294901760, %v2591_v2  ;;  %v19509_v45 = vsub.f32 %v19388_v62, %v2205_v18 }
 0x1c3   :  { %v2598_v27 = vsub.f32 %v19485_v58, %v23488_v0 }
 0x1c4   :  { %24117 = vst [vmem:[#allocation45_spill] sm:$0xff] %v19509_v45 }
 0x1c5   :  { %14918 = vmatmul.mubr.f32.gmra.mrb[18].mxu0 %v24102_v57  ;;  %v2599_v44 = vand.u32 4294901760, %v2598_v27  ;;  %v19514_v57 = vsub.f32 %v19393_v12, %v2208_v43 }
 0x1c6   :  { %14920 = vmatprep.mubr.f32.mxu0 %v24103_v11 }
 0x1c7   :  { %v19495_v32 = vpack.c.bf16 %v2599_v44, %v2592_v6  ;;  %24118 = vst [vmem:[#allocation48_spill] sm:$0xff] %v19514_v57  ;;  %v19518_v11 = vpack.c.bf16 %v19514_v57, %v19509_v45 }
 0x1c9   :  { %14921 = vmatmul.mubr.f32.gmra.mrb[20].mxu0 %v24104_v49  ;;  %24115 = vst [vmem:[#allocation41_spill] sm:$0xff] %v19495_v32  ;;  %16801 = vmatprep.subr.bf16.mxu1 %v19495_v32  ;;  %24119 = vst [vmem:[#allocation30_spill] sm:$0xff] %v19518_v11  ;;  %v19520_v49 = vld [vmem:[#allocation7] ss:$0 sm:$0xff] }
 0x1ca   :  { %14923 = vmatprep.mubr.f32.mxu0 %v24105_v54  ;;  %v367_v54 = vadd.f32 %v14642_v5, %v19520_v49  ;;  %v377_v62 = vadd.f32 %v19520_v49, %v376_v22  ;;  %v407_v18 = vadd.f32 %v14648_v23, %v19520_v49  ;;  %v397_v12 = vadd.f32 %v19520_v49, %v396_v28 }
 0x1cd   :  { %14924 = vmatmul.mubr.f32.gmra.mrb[22].mxu0 %v24106_v19  ;;  %v357_v19 = vadd.f32 %v19520_v49, %v356_v16 }
 0x1ce   :  { %14926 = vmatprep.mubr.f32.mxu0 %v24107_v24  ;;  %v387_v24 = vadd.f32 %v14645_v17, %v19520_v49  ;;  %v23487_v17 = vand.u32 4294901760, %v19509_v45 }
 0x1d1   :  { %14927 = vmatmul.mubr.f32.gmra.mrb[24].mxu0 %v24108_v20 }
 0x1d2   :  { %14929 = vmatprep.mubr.f32.mxu0 %v24109_v63 }
 0x1d5   :  { %14930 = vmatmul.mubr.f32.gmra.mrb[26].mxu0 %v24110_v55 }
 0x1d6   :  { %14932 = vmatprep.mubr.f32.mxu0 %v24111_v60 }
 0x1d9   :  { %14933 = vmatmul.mubr.f32.gmra.mrb[28].mxu0 %v24112_v14 }
 0x1da   :  { %14935 = vmatprep.mubr.f32.mxu0 %v24113_v13 }
 0x1dd   :  { %14936 = vmatmul.mubr.f32.gmra.mrb[30].mxu0 %v24114_v25 }
 0x1f9   :  { %v14651_v29 = vpop.f32.mrb[6].mxu1 }
 0x1fa   :  { %v416_v34 = vpop.f32.mrb[7].mxu1  ;;  %v19529_v43 = vadd.f32 %v14651_v29, %v19520_v49 }
 0x1fb   :  { %v19532_v20 = vadd.f32 %v19520_v49, %v416_v34  ;;  %v23485_v34 = vand.u32 4294901760, %v19514_v57 }
 0x1fd   :  { %v14654_v35 = vpop.f32.mrb[8].mxu1 }
 0x1fe   :  { %v436_v40 = vpop.f32.mrb[9].mxu1  ;;  %v19535_v63 = vadd.f32 %v14654_v35, %v19520_v49 }
 0x1ff   :  { %v19538_v55 = vadd.f32 %v19520_v49, %v436_v40 }
 0x201   :  { %v14657_v41 = vpop.f32.mrb[10].mxu1 }
 0x202   :  { %v456_v46 = vpop.f32.mrb[11].mxu1  ;;  %v19541_v60 = vadd.f32 %v14657_v41, %v19520_v49 }
 0x203   :  { %v19544_v14 = vadd.f32 %v19520_v49, %v456_v46 }
 0x205   :  { %v14660_v47 = vpop.f32.mrb[12].mxu1 }
 0x206   :  { %v476_v52 = vpop.f32.mrb[13].mxu1  ;;  %v19547_v25 = vadd.f32 %v14660_v47, %v19520_v49 }
 0x207   :  { %v19550_v5 = vadd.f32 %v19520_v49, %v476_v52 }
 0x209   :  { %v14663_v30 = vpop.f32.mrb[14].mxu1 }
 0x20a   :  { %v496_v61 = vpop.f32.mrb[15].mxu1  ;;  %v19553_v16 = vadd.f32 %v14663_v30, %v19520_v49 }
 0x20b   :  { %v19557_v28 = vadd.f32 %v19520_v49, %v496_v61 }
 0x20d   :  { %v14666_v56 = vpop.f32.mrb[16].mxu1 }
 0x20e   :  { %v516_v7 = vpop.f32.mrb[17].mxu1  ;;  %v19560_v29 = vadd.f32 %v14666_v56, %v19520_v49  ;;  %v2605_v56 = vsub.f32 %v19509_v45, %v23487_v17 }
 0x20f   :  { %v19564_v40 = vadd.f32 %v19520_v49, %v516_v7 }
 0x211   :  { %v14669_v31 = vpop.f32.mrb[18].mxu1 }
 0x212   :  { %v536_v36 = vpop.f32.mrb[19].mxu1  ;;  %v19567_v41 = vadd.f32 %v14669_v31, %v19520_v49 }
 0x213   :  { %v19570_v46 = vadd.f32 %v19520_v49, %v536_v36 }
 0x215   :  { %v14672_v3 = vpop.f32.mrb[20].mxu1 }
 0x216   :  { %v556_v10 = vpop.f32.mrb[21].mxu1  ;;  %v19573_v52 = vadd.f32 %v14672_v3, %v19520_v49 }
 0x217   :  { %v19576_v30 = vadd.f32 %v19520_v49, %v556_v10  ;;  %v2612_v10 = vsub.f32 %v19514_v57, %v23485_v34 }
 0x219   :  { %v14675_v33 = vpop.f32.mrb[22].mxu1 }
 0x21a   :  { %v576_v50 = vpop.f32.mrb[23].mxu1  ;;  %v19579_v61 = vadd.f32 %v14675_v33, %v19520_v49 }
 0x21b   :  { %v19582_v6 = vadd.f32 %v19520_v49, %v576_v50 }
 0x21d   :  { %v14678_v38 = vpop.f32.mrb[24].mxu1 }
 0x21e   :  { %v596_v1 = vpop.f32.mrb[25].mxu1  ;;  %v19585_v44 = vadd.f32 %v14678_v38, %v19520_v49 }
 0x21f   :  { %v19592_v3 = vadd.f32 %v19520_v49, %v596_v1 }
 0x221   :  { %v14681_v37 = vpop.f32.mrb[26].mxu1 }
 0x222   :  { %v616_v42 = vpop.f32.mrb[27].mxu1 }
 0x225   :  { %v14684_v51 = vpop.f32.mrb[28].mxu1 }
 0x226   :  { %v636_v8 = vpop.f32.mrb[29].mxu1  ;;  %v19609_v1 = vadd.f32 %v14684_v51, %v19520_v49 }
 0x229   :  { %v19498_v26 = vpop.f32.mrb[30].mxu1 }
 0x22a   :  { %v19500_v21 = vpop.f32.mrb[31].mxu1 }
 0x274   :  { %v14892_v13 = vpop.f32.mrb[0].mxu0 }
 0x275   :  { %v17129_v22 = vadd.f32 %v14892_v13, %v367_v54  ;;  %v1873_v23 = vpop.f32.mrb[1].mxu0  ;;  %v19601_v54 = vadd.f32 %v14681_v37, %v19520_v49 }
 0x276   :  { %v17131_v35 = vadd.f32 %v1873_v23, %v357_v19 }
 0x277   :  { %v2064_v47 = vmax.f32 %v17129_v22, 0.0 }
 0x278   :  { %v2063_v2 = vmax.f32 %v17131_v35, 0.0  ;;  %v14895_v27 = vpop.f32.mrb[2].mxu0 }
 0x279   :  { %v2106_v7 = vsel %vm2101_vm2, %v2064_v47, 0  ;;  %v17133_v31 = vadd.f32 %v14895_v27, %v387_v24  ;;  %v1885_v36 = vpop.f32.mrb[3].mxu0  ;;  %v19606_v24 = vadd.f32 %v19520_v49, %v616_v42  ;;  %v2606_v47 = vand.u32 4294901760, %v2605_v56 }
 0x27a   :  { %v19597_v33 = vand.u32 4294901760, %v2106_v7  ;;  %v2103_v50 = vsel %vm2101_vm2, %v2063_v2, 0  ;;  %v17135_v38 = vadd.f32 %v1885_v36, %v377_v62  ;;  %v19615_v62 = vadd.f32 %v19520_v49, %v636_v8 }
 0x27b   :  { %v19603_v19 = vand.u32 4294901760, %v2103_v50  ;;  %v2066_v13 = vmax.f32 %v17133_v31, 0.0  ;;  %v2613_v31 = vand.u32 4294901760, %v2612_v10 }
 0x27c   :  { %v19612_v22 = vsub.f32 %v2106_v7, %v19597_v33  ;;  %v2065_v23 = vmax.f32 %v17135_v38, 0.0  ;;  %v14898_v35 = vpop.f32.mrb[4].mxu0 }
 0x27d   :  { %v19618_v37 = vsub.f32 %v2103_v50, %v19603_v19  ;;  %v2112_v2 = vsel %vm2101_vm2, %v2066_v13, 0  ;;  %v17137_v27 = vadd.f32 %v14898_v35, %v407_v18  ;;  %v1897_v42 = vpop.f32.mrb[5].mxu0  ;;  %v19630_v50 = vadd.f32 %v19498_v26, %v19520_v49 }
 0x27e   :  { %v23486_v51 = vand.u32 4294901760, %v19612_v22  ;;  %v19622_v36 = vand.u32 4294901760, %v2112_v2  ;;  %v2109_v7 = vsel %vm2101_vm2, %v2065_v23, 0  ;;  %v17139_v38 = vadd.f32 %v1897_v42, %v397_v12 }
 0x27f   :  { %v19625_v34 = vand.u32 4294901760, %v2109_v7  ;;  %v2068_v56 = vmax.f32 %v17137_v27, 0.0  ;;  %v23490_v8 = vand.u32 4294901760, %v19618_v37  ;;  %v19640_v12 = vadd.f32 %v19520_v49, %v19500_v21 }
 0x280   :  { %v2280_v18 = vsub.f32 %v19612_v22, %v23486_v51  ;;  %v19636_v10 = vsub.f32 %v2112_v2, %v19622_v36  ;;  %v2067_v13 = vmax.f32 %v17139_v38, 0.0  ;;  %v14901_v35 = vpop.f32.mrb[6].mxu0  ;;  %v19654_v21 = vpack.c.bf16 %v2613_v31, %v2606_v47 }
 0x281   :  { %v19643_v23 = vsub.f32 %v2109_v7, %v19625_v34  ;;  %v2118_v27 = vsel %vm2101_vm2, %v2068_v56, 0  ;;  %v17141_v26 = vadd.f32 %v14901_v35, %v19529_v43  ;;  %v1909_v42 = vpop.f32.mrb[7].mxu0  ;;  %v2270_v51 = vsub.f32 %v19618_v37, %v23490_v8 }
 0x282   :  { %v19650_v2 = vand.u32 4294901760, %v2118_v27  ;;  %v2115_v38 = vsel %vm2101_vm2, %v2067_v13, 0  ;;  %v17143_v17 = vadd.f32 %v1909_v42, %v19532_v20  ;;  %24120 = vst [vmem:[#allocation31_spill] sm:$0xff] %v19654_v21  ;;  %v2281_v43 = vand.u32 4294901760, %v2280_v18 }
 0x283   :  { %v19656_v49 = vand.u32 4294901760, %v2115_v38  ;;  %v2070_v7 = vmax.f32 %v17141_v26, 0.0  ;;  %v2271_v0 = vand.u32 4294901760, %v2270_v51  ;;  %v23493_v56 = vand.u32 4294901760, %v19643_v23 }
 0x284   :  { %v19660_v35 = vsub.f32 %v2118_v27, %v19650_v2  ;;  %v2069_v59 = vmax.f32 %v17143_v17, 0.0  ;;  %v14904_v8 = vpop.f32.mrb[8].mxu0  ;;  %v23494_v9 = vand.u32 4294901760, %v19636_v10 }
 0x285   :  { %v19664_v13 = vsub.f32 %v2115_v38, %v19656_v49  ;;  %v2124_v20 = vsel %vm2101_vm2, %v2070_v7, 0  ;;  %v17145_v47 = vadd.f32 %v14904_v8, %v19535_v63  ;;  %v1921_v31 = vpop.f32.mrb[9].mxu0  ;;  %14946 = vmatprep.mubr.f32.mxu1 %v2271_v0  ;;  %v2290_v51 = vsub.f32 %v19643_v23, %v23493_v56 }
 0x286   :  { %v19671_v18 = vand.u32 4294901760, %v2124_v20  ;;  %v2121_v17 = vsel %vm2101_vm2, %v2069_v59, 0  ;;  %v17147_v27 = vadd.f32 %v1921_v31, %v19538_v55  ;;  %14947 = vmatmul.mubr.f32.vlgmr.msra.gmra.mrb[32].mxu1 %v2281_v43  ;;  %v2300_v26 = vsub.f32 %v19636_v10, %v23494_v9 }
 0x287   :  { %v19678_v42 = vand.u32 4294901760, %v2121_v17  ;;  %v2072_v63 = vmax.f32 %v17145_v47, 0.0  ;;  %16803 = vmatpush3.bf16.msra.mxu1 %v19495_v32  ;;  %v2291_v0 = vand.u32 4294901760, %v2290_v51  ;;  %v23495_v8 = vand.u32 4294901760, %v19664_v13 }
 0x288   :  { %v19683_v38 = vsub.f32 %v2124_v20, %v19671_v18  ;;  %v2071_v7 = vmax.f32 %v17147_v27, 0.0  ;;  %v14907_v59 = vpop.f32.mrb[10].mxu0  ;;  %v2301_v56 = vand.u32 4294901760, %v2300_v26  ;;  %v23500_v55 = vand.u32 4294901760, %v19660_v35  ;;  %16805 = vmatprep.subr.bf16.mxu1 %v19654_v21 }
 0x289   :  { %v19688_v43 = vsub.f32 %v2121_v17, %v19678_v42  ;;  %v2130_v47 = vsel %vm2101_vm2, %v2072_v63, 0  ;;  %v17149_v31 = vadd.f32 %v14907_v59, %v19541_v60  ;;  %v1933_v51 = vpop.f32.mrb[11].mxu0  ;;  %14949 = vmatprep.mubr.f32.mxu1 %v2291_v0  ;;  %v2310_v20 = vsub.f32 %v19664_v13, %v23495_v8 }
 0x28a   :  { %24121 = vst [vmem:[#allocation32_spill] sm:$0xff] %v19683_v38  ;;  %v19695_v27 = vand.u32 4294901760, %v2130_v47  ;;  %v2127_v26 = vsel %vm2101_vm2, %v2071_v7, 0  ;;  %v17151_v9 = vadd.f32 %v1933_v51, %v19544_v14  ;;  %14950 = vmatmul.mubr.f32.gmra.mrb[34].mxu1 %v2301_v56  ;;  %v2320_v17 = vsub.f32 %v19660_v35, %v23500_v55 }
 0x28b   :  { %v19702_v63 = vand.u32 4294901760, %v2127_v26  ;;  %v2074_v60 = vmax.f32 %v17149_v31, 0.0  ;;  %v2311_v59 = vand.u32 4294901760, %v2310_v20  ;;  %v23503_v0 = vand.u32 4294901760, %v19688_v43  ;;  %16807 = vmatpush3.bf16.msra.mxu1 %v19654_v21 }
 0x28c   :  { %v19707_v8 = vsub.f32 %v2130_v47, %v19695_v27  ;;  %v2073_v32 = vmax.f32 %v17151_v9, 0.0  ;;  %v14910_v7 = vpop.f32.mrb[12].mxu0  ;;  %v2321_v4 = vand.u32 4294901760, %v2320_v17  ;;  %v23506_v14 = vand.u32 4294901760, %v19683_v38  ;;  %16809 = vmatprep.subr.bf16.mxu1 %v19504_v15 }
 0x28d   :  { %v19712_v56 = vsub.f32 %v2127_v26, %v19702_v63  ;;  %v2136_v31 = vsel %vm2101_vm2, %v2074_v60, 0  ;;  %v17153_v51 = vadd.f32 %v14910_v7, %v19547_v25  ;;  %v1945_v20 = vpop.f32.mrb[13].mxu0  ;;  %14952 = vmatprep.mubr.f32.mxu1 %v2311_v59  ;;  %v2330_v47 = vsub.f32 %v19688_v43, %v23503_v0 }
 0x28e   :  { %24122 = vst [vmem:[#allocation33_spill] sm:$0xff] %v19707_v8  ;;  %v19719_v9 = vand.u32 4294901760, %v2136_v31  ;;  %v2133_v17 = vsel %vm2101_vm2, %v2073_v32, 0  ;;  %v17155_v55 = vadd.f32 %v1945_v20, %v19550_v5  ;;  %14953 = vmatmul.mubr.f32.gmra.mrb[36].mxu1 %v2321_v4  ;;  %v2340_v26 = vsub.f32 %v19683_v38, %v23506_v14 }
 0x28f   :  { %24123 = vst [vmem:[#allocation34_spill] sm:$0xff] %v19712_v56  ;;  %v19726_v60 = vand.u32 4294901760, %v2133_v17  ;;  %v2076_v25 = vmax.f32 %v17153_v51, 0.0  ;;  %v2331_v7 = vand.u32 4294901760, %v2330_v47  ;;  %v23507_v59 = vand.u32 4294901760, %v19712_v56 }
 0x290   :  { %v19730_v21 = vsub.f32 %v2136_v31, %v19719_v9  ;;  %v2075_v0 = vmax.f32 %v17155_v55, 0.0  ;;  %v14913_v57 = vpop.f32.mrb[14].mxu0  ;;  %v2341_v45 = vand.u32 4294901760, %v2340_v26  ;;  %v23512_v32 = vand.u32 4294901760, %v19707_v8 }
 0x291   :  { %v19734_v4 = vsub.f32 %v2133_v17, %v19726_v60  ;;  %v2142_v5 = vsel %vm2101_vm2, %v2076_v25, 0  ;;  %v17157_v20 = vadd.f32 %v14913_v57, %v19553_v16  ;;  %v1957_v14 = vpop.f32.mrb[15].mxu0  ;;  %14955 = vmatprep.mubr.f32.mxu1 %v2331_v7  ;;  %v2350_v51 = vsub.f32 %v19712_v56, %v23507_v59 }
 0x292   :  { %24124 = vst [vmem:[#allocation35_spill] sm:$0xff] %v19730_v21  ;;  %v19741_v31 = vand.u32 4294901760, %v2142_v5  ;;  %v2139_v55 = vsel %vm2101_vm2, %v2075_v0, 0  ;;  %v17159_v47 = vadd.f32 %v1957_v14, %v19557_v28  ;;  %14956 = vmatmul.mubr.f32.gmra.mrb[38].mxu1 %v2341_v45  ;;  %v2360_v17 = vsub.f32 %v19707_v8, %v23512_v32 }
 0x293   :  { %24125 = vst [vmem:[#allocation36_spill] sm:$0xff] %v19734_v4  ;;  %v19748_v26 = vand.u32 4294901760, %v2139_v55  ;;  %v2078_v57 = vmax.f32 %v17157_v20, 0.0  ;;  %v2351_v16 = vand.u32 4294901760, %v2350_v51  ;;  %v23513_v25 = vand.u32 4294901760, %v19734_v4 }
 0x294   :  { %v19752_v7 = vsub.f32 %v2142_v5, %v19741_v31  ;;  %v2077_v59 = vmax.f32 %v17159_v47, 0.0  ;;  %v14916_v56 = vpop.f32.mrb[16].mxu0  ;;  %v2361_v38 = vand.u32 4294901760, %v2360_v17  ;;  %v23518_v0 = vand.u32 4294901760, %v19730_v21 }
 0x295   :  { %v19756_v45 = vsub.f32 %v2139_v55, %v19748_v26  ;;  %v2148_v28 = vsel %vm2101_vm2, %v2078_v57, 0  ;;  %v17161_v14 = vadd.f32 %v14916_v56, %v19560_v29  ;;  %v1969_v32 = vpop.f32.mrb[17].mxu0  ;;  %14958 = vmatprep.mubr.f32.mxu1 %v2351_v16  ;;  %v2370_v20 = vsub.f32 %v19734_v4, %v23513_v25 }
 0x296   :  { %24126 = vst [vmem:[#allocation39_spill] sm:$0xff] %v19752_v7  ;;  %v19763_v5 = vand.u32 4294901760, %v2148_v28  ;;  %v2145_v51 = vsel %vm2101_vm2, %v2077_v59, 0  ;;  %v17163_v47 = vadd.f32 %v1969_v32, %v19564_v40  ;;  %14959 = vmatmul.mubr.f32.gmra.mrb[40].mxu1 %v2361_v38  ;;  %v2380_v55 = vsub.f32 %v19730_v21, %v23518_v0 }
 0x297   :  { %24127 = vst [vmem:[#allocation40_spill] sm:$0xff] %v19756_v45  ;;  %v19770_v17 = vand.u32 4294901760, %v2145_v51  ;;  %v2080_v29 = vmax.f32 %v17161_v14, 0.0  ;;  %v2371_v56 = vand.u32 4294901760, %v2370_v20  ;;  %v23519_v57 = vand.u32 4294901760, %v19756_v45 }
 0x298   :  { %v19774_v16 = vsub.f32 %v2148_v28, %v19763_v5  ;;  %v2079_v25 = vmax.f32 %v17163_v47, 0.0  ;;  %v14919_v4 = vpop.f32.mrb[18].mxu0  ;;  %v2381_v8 = vand.u32 4294901760, %v2380_v55  ;;  %v23524_v59 = vand.u32 4294901760, %v19752_v7 }
 0x299   :  { %v19778_v40 = vsub.f32 %v2145_v51, %v19770_v17  ;;  %v2154_v38 = vsel %vm2101_vm2, %v2080_v29, 0  ;;  %v17165_v32 = vadd.f32 %v14919_v4, %v19567_v41  ;;  %v1981_v0 = vpop.f32.mrb[19].mxu0  ;;  %14961 = vmatprep.mubr.f32.mxu1 %v2371_v56  ;;  %v2390_v14 = vsub.f32 %v19756_v45, %v23519_v57 }
 0x29a   :  { %24128 = vst [vmem:[#allocation43_spill] sm:$0xff] %v19774_v16  ;;  %v19785_v28 = vand.u32 4294901760, %v2154_v38  ;;  %v2151_v20 = vsel %vm2101_vm2, %v2079_v25, 0  ;;  %v17167_v47 = vadd.f32 %v1981_v0, %v19570_v46  ;;  %14962 = vmatmul.mubr.f32.gmra.mrb[42].mxu1 %v2381_v8  ;;  %v2400_v51 = vsub.f32 %v19752_v7, %v23524_v59 }
 0x29b   :  { %24129 = vst [vmem:[#allocation44_spill] sm:$0xff] %v19778_v40  ;;  %v19792_v55 = vand.u32 4294901760, %v2151_v20  ;;  %v2082_v41 = vmax.f32 %v17165_v32, 0.0  ;;  %v2391_v4 = vand.u32 4294901760, %v2390_v14  ;;  %v23525_v29 = vand.u32 4294901760, %v19778_v40 }
 0x29c   :  { %v19796_v56 = vsub.f32 %v2154_v38, %v19785_v28  ;;  %v2081_v57 = vmax.f32 %v17167_v47, 0.0  ;;  %v14922_v45 = vpop.f32.mrb[20].mxu0  ;;  %v2401_v21 = vand.u32 4294901760, %v2400_v51  ;;  %v23530_v25 = vand.u32 4294901760, %v19774_v16 }
 0x29d   :  { %v19800_v46 = vsub.f32 %v2151_v20, %v19792_v55  ;;  %v2160_v8 = vsel %vm2101_vm2, %v2082_v41, 0  ;;  %v17169_v0 = vadd.f32 %v14922_v45, %v19573_v52  ;;  %v1993_v59 = vpop.f32.mrb[21].mxu0  ;;  %14964 = vmatprep.mubr.f32.mxu1 %v2391_v4  ;;  %v2410_v32 = vsub.f32 %v19778_v40, %v23525_v29 }
 0x29e   :  { %24130 = vst [vmem:[#allocation46_spill] sm:$0xff] %v19796_v56  ;;  %v19807_v38 = vand.u32 4294901760, %v2160_v8  ;;  %v2157_v14 = vsel %vm2101_vm2, %v2081_v57, 0  ;;  %v17171_v47 = vadd.f32 %v1993_v59, %v19576_v30  ;;  %14965 = vmatmul.mubr.f32.gmra.mrb[44].mxu1 %v2401_v21  ;;  %v2420_v20 = vsub.f32 %v19774_v16, %v23530_v25 }
 0x29f   :  { %24131 = vst [vmem:[#allocation47_spill] sm:$0xff] %v19800_v46  ;;  %v19814_v51 = vand.u32 4294901760, %v2157_v14  ;;  %v2084_v52 = vmax.f32 %v17169_v0, 0.0  ;;  %v2411_v45 = vand.u32 4294901760, %v2410_v32  ;;  %v23531_v41 = vand.u32 4294901760, %v19800_v46 }
 0x2a0   :  { %v19818_v4 = vsub.f32 %v2160_v8, %v19807_v38  ;;  %v2083_v29 = vmax.f32 %v17171_v47, 0.0  ;;  %v14925_v40 = vpop.f32.mrb[22].mxu0  ;;  %v2421_v7 = vand.u32 4294901760, %v2420_v20  ;;  %v23536_v57 = vand.u32 4294901760, %v19796_v56 }
 0x2a1   :  { %v19822_v30 = vsub.f32 %v2157_v14, %v19814_v51  ;;  %v2166_v21 = vsel %vm2101_vm2, %v2084_v52, 0  ;;  %v17173_v59 = vadd.f32 %v14925_v40, %v19579_v61  ;;  %v2005_v25 = vpop.f32.mrb[23].mxu0  ;;  %14967 = vmatprep.mubr.f32.mxu1 %v2411_v45  ;;  %v2430_v0 = vsub.f32 %v19800_v46, %v23531_v41 }
 0x2a2   :  { %24132 = vst [vmem:[#allocation49_spill] sm:$0xff] %v19818_v4  ;;  %v19829_v8 = vand.u32 4294901760, %v2166_v21  ;;  %v2163_v32 = vsel %vm2101_vm2, %v2083_v29, 0  ;;  %v17175_v47 = vadd.f32 %v2005_v25, %v19582_v6  ;;  %14968 = vmatmul.mubr.f32.gmra.mrb[46].mxu1 %v2421_v7  ;;  %v2440_v14 = vsub.f32 %v19796_v56, %v23536_v57 }
 0x2a3   :  { %24133 = vst [vmem:[#allocation50_spill] sm:$0xff] %v19822_v30  ;;  %v19836_v20 = vand.u32 4294901760, %v2163_v32  ;;  %v2086_v61 = vmax.f32 %v17173_v59, 0.0  ;;  %v2431_v40 = vand.u32 4294901760, %v2430_v0  ;;  %v23537_v52 = vand.u32 4294901760, %v19822_v30 }
 0x2a4   :  { %24134 = vst [vmem:[#allocation51_spill] sm:$0xff] %v19829_v8  ;;  %v19840_v45 = vsub.f32 %v2166_v21, %v19829_v8  ;;  %v2085_v41 = vmax.f32 %v17175_v47, 0.0  ;;  %v14928_v46 = vpop.f32.mrb[24].mxu0  ;;  %v2441_v16 = vand.u32 4294901760, %v2440_v14  ;;  %v23542_v29 = vand.u32 4294901760, %v19818_v4 }
 0x2a5   :  { %24135 = vst [vmem:[#allocation52_spill] sm:$0xff] %v19836_v20  ;;  %v19844_v6 = vsub.f32 %v2163_v32, %v19836_v20  ;;  %v2172_v7 = vsel %vm2101_vm2, %v2086_v61, 0  ;;  %v17177_v25 = vadd.f32 %v14928_v46, %v19585_v44  ;;  %v2017_v57 = vpop.f32.mrb[25].mxu0  ;;  %14970 = vmatprep.mubr.f32.mxu1 %v2431_v40  ;;  %v2450_v59 = vsub.f32 %v19822_v30, %v23537_v52 }
 0x2a6   :  { %24136 = vst [vmem:[#allocation53_spill] sm:$0xff] %v19840_v45  ;;  %v19851_v21 = vand.u32 4294901760, %v2172_v7  ;;  %v2169_v0 = vsel %vm2101_vm2, %v2085_v41, 0  ;;  %v17179_v47 = vadd.f32 %v2017_v57, %v19592_v3  ;;  %14971 = vmatmul.mubr.f32.gmra.mrb[48].mxu1 %v2441_v16  ;;  %v2460_v32 = vsub.f32 %v19818_v4, %v23542_v29 }
 0x2a7   :  { %24137 = vst [vmem:[#allocation54_spill] sm:$0xff] %v19844_v6  ;;  %v19858_v14 = vand.u32 4294901760, %v2169_v0  ;;  %v2088_v44 = vmax.f32 %v17177_v25, 0.0  ;;  %v2451_v46 = vand.u32 4294901760, %v2450_v59  ;;  %v23543_v61 = vand.u32 4294901760, %v19844_v6 }
 0x2a8   :  { %24138 = vst [vmem:[#allocation55_spill] sm:$0xff] %v19851_v21  ;;  %v19862_v40 = vsub.f32 %v2172_v7, %v19851_v21  ;;  %v2087_v52 = vmax.f32 %v17179_v47, 0.0  ;;  %v14931_v30 = vpop.f32.mrb[26].mxu0  ;;  %v2461_v56 = vand.u32 4294901760, %v2460_v32  ;;  %v23548_v41 = vand.u32 4294901760, %v19840_v45 }
 0x2a9   :  { %24139 = vst [vmem:[#allocation56_spill] sm:$0xff] %v19858_v14  ;;  %v19866_v3 = vsub.f32 %v2169_v0, %v19858_v14  ;;  %v2178_v16 = vsel %vm2101_vm2, %v2088_v44, 0  ;;  %v17181_v57 = vadd.f32 %v14931_v30, %v19601_v54  ;;  %v2029_v29 = vpop.f32.mrb[27].mxu0  ;;  %14973 = vmatprep.mubr.f32.mxu1 %v2451_v46  ;;  %v2470_v25 = vsub.f32 %v19844_v6, %v23543_v61 }
 0x2aa   :  { %v19873_v7 = vand.u32 4294901760, %v2178_v16  ;;  %v2175_v59 = vsel %vm2101_vm2, %v2087_v52, 0  ;;  %v17183_v47 = vadd.f32 %v2029_v29, %v19606_v24  ;;  %14974 = vmatmul.mubr.f32.gmra.mrb[50].mxu1 %v2461_v56  ;;  %v2480_v0 = vsub.f32 %v19840_v45, %v23548_v41 }
 0x2ab   :  { %24140 = vst [vmem:[#allocation57_spill] sm:$0xff] %v19866_v3  ;;  %v19880_v32 = vand.u32 4294901760, %v2175_v59  ;;  %v2090_v54 = vmax.f32 %v17181_v57, 0.0  ;;  %v2471_v30 = vand.u32 4294901760, %v2470_v25  ;;  %v23549_v44 = vand.u32 4294901760, %v19866_v3 }
 0x2ac   :  { %24141 = vst [vmem:[#allocation58_spill] sm:$0xff] %v19873_v7  ;;  %v19884_v46 = vsub.f32 %v2178_v16, %v19873_v7  ;;  %v2089_v61 = vmax.f32 %v17183_v47, 0.0  ;;  %v14934_v6 = vpop.f32.mrb[28].mxu0  ;;  %v2481_v4 = vand.u32 4294901760, %v2480_v0  ;;  %v23554_v52 = vand.u32 4294901760, %v19862_v40 }
 0x2ad   :  { %24142 = vst [vmem:[#allocation59_spill] sm:$0xff] %v19880_v32  ;;  %v19888_v24 = vsub.f32 %v2175_v59, %v19880_v32  ;;  %v2184_v56 = vsel %vm2101_vm2, %v2090_v54, 0  ;;  %v17185_v29 = vadd.f32 %v14934_v6, %v19609_v1  ;;  %v2041_v41 = vpop.f32.mrb[29].mxu0  ;;  %14976 = vmatprep.mubr.f32.mxu1 %v2471_v30  ;;  %v2490_v57 = vsub.f32 %v19866_v3, %v23549_v44 }
 0x2ae   :  { %v19895_v16 = vand.u32 4294901760, %v2184_v56  ;;  %v2181_v25 = vsel %vm2101_vm2, %v2089_v61, 0  ;;  %v17187_v47 = vadd.f32 %v2041_v41, %v19615_v62  ;;  %14977 = vmatmul.mubr.f32.gmra.mrb[52].mxu1 %v2481_v4  ;;  %v2500_v59 = vsub.f32 %v19862_v40, %v23554_v52 }
 0x2af   :  { %24143 = vst [vmem:[#allocation60_spill] sm:$0xff] %v19888_v24  ;;  %v19902_v0 = vand.u32 4294901760, %v2181_v25  ;;  %v2092_v1 = vmax.f32 %v17185_v29, 0.0  ;;  %v2491_v6 = vand.u32 4294901760, %v2490_v57  ;;  %v23555_v54 = vand.u32 4294901760, %v19888_v24 }
 0x2b0   :  { %24144 = vst [vmem:[#allocation61_spill] sm:$0xff] %v19895_v16  ;;  %v19906_v30 = vsub.f32 %v2184_v56, %v19895_v16  ;;  %v2091_v44 = vmax.f32 %v17187_v47, 0.0  ;;  %v14937_v3 = vpop.f32.mrb[30].mxu0  ;;  %v2501_v45 = vand.u32 4294901760, %v2500_v59  ;;  %v23560_v61 = vand.u32 4294901760, %v19884_v46 }
 0x2b1   :  { %24145 = vst [vmem:[#allocation62_spill] sm:$0xff] %v19902_v0  ;;  %v19910_v62 = vsub.f32 %v2181_v25, %v19902_v0  ;;  %v2190_v4 = vsel %vm2101_vm2, %v2092_v1, 0  ;;  %v17189_v41 = vadd.f32 %v14937_v3, %v19630_v50  ;;  %v2053_v52 = vpop.f32.mrb[31].mxu0  ;;  %14979 = vmatprep.mubr.f32.mxu1 %v2491_v6  ;;  %v2510_v29 = vsub.f32 %v19888_v24, %v23555_v54 }
 0x2b2   :  { %24146 = vst [vmem:[#allocation63_spill] sm:$0xff] %v19906_v30  ;;  %v19917_v56 = vand.u32 4294901760, %v2190_v4  ;;  %v2187_v57 = vsel %vm2101_vm2, %v2091_v44, 0  ;;  %v17191_v47 = vadd.f32 %v2053_v52, %v19640_v12  ;;  %14980 = vmatmul.mubr.f32.gmra.mrb[54].mxu1 %v2501_v45  ;;  %v2520_v25 = vsub.f32 %v19884_v46, %v23560_v61 }
 0x2b3   :  { %v19924_v59 = vand.u32 4294901760, %v2187_v57  ;;  %v2094_v50 = vmax.f32 %v17189_v41, 0.0  ;;  %v2511_v3 = vand.u32 4294901760, %v2510_v29  ;;  %v23558_v1 = vand.u32 4294901760, %v19910_v62 }
 0x2b4   :  { %24147 = vst [vmem:[#allocation64_spill] sm:$0xff] %v19917_v56  ;;  %v19928_v6 = vsub.f32 %v2190_v4, %v19917_v56  ;;  %v2093_v54 = vmax.f32 %v17191_v47, 0.0  ;;  %v2521_v24 = vand.u32 4294901760, %v2520_v25  ;;  %v23559_v44 = vand.u32 4294901760, %v19906_v30 }
 0x2b5   :  { %24148 = vst [vmem:[#allocation65_spill] sm:$0xff] %v19924_v59  ;;  %v19932_v12 = vsub.f32 %v2187_v57, %v19924_v59  ;;  %v2196_v45 = vsel %vm2101_vm2, %v2094_v50, 0  ;;  %14982 = vmatprep.mubr.f32.mxu1 %v2511_v3  ;;  %v2530_v52 = vsub.f32 %v19910_v62, %v23558_v1 }
 0x2b6   :  { %v19938_v41 = vand.u32 4294901760, %v2196_v45  ;;  %v2193_v29 = vsel %vm2101_vm2, %v2093_v54, 0  ;;  %14983 = vmatmul.mubr.f32.gmra.mrb[56].mxu1 %v2521_v24  ;;  %v2540_v4 = vsub.f32 %v19906_v30, %v23559_v44  ;;  %v23563_v47 = vand.u32 4294901760, %v19928_v6 }
 0x2b7   :  { %v19945_v57 = vand.u32 4294901760, %v2193_v29  ;;  %v2531_v25 = vand.u32 4294901760, %v2530_v52  ;;  %v23566_v50 = vand.u32 4294901760, %v19932_v12 }
 0x2b8   :  { %24149 = vst [vmem:[#allocation66_spill] sm:$0xff] %v19938_v41  ;;  %v19949_v3 = vsub.f32 %v2196_v45, %v19938_v41  ;;  %v2541_v1 = vand.u32 4294901760, %v2540_v4  ;;  %v2560_v54 = vsub.f32 %v19928_v6, %v23563_v47 }
 0x2b9   :  { %24150 = vst [vmem:[#allocation67_spill] sm:$0xff] %v19945_v57  ;;  %v19955_v24 = vsub.f32 %v2193_v29, %v19945_v57  ;;  %14985 = vmatprep.mubr.f32.mxu1 %v2531_v25  ;;  %v2550_v44 = vsub.f32 %v19932_v12, %v23566_v50  ;;  %v24166_v50 = vld [vmem:[#allocation49_spill] sm:$0xff] }
 0x2ba   :  { %14986 = vmatmul.mubr.f32.gmra.mrb[58].mxu1 %v2541_v1  ;;  %v23564_v52 = vand.u32 4294901760, %v19949_v3  ;;  %v2561_v30 = vand.u32 4294901760, %v2560_v54  ;;  %v24158_v54 = vld [vmem:[#allocation35_spill] sm:$0xff] }
 0x2bb   :  { %v2551_v61 = vand.u32 4294901760, %v2550_v44  ;;  %v23565_v45 = vand.u32 4294901760, %v19955_v24  ;;  %v24154_v44 = vld [vmem:[#allocation32_spill] sm:$0xff] }
 0x2bc   :  { %v2580_v4 = vsub.f32 %v19949_v3, %v23564_v52  ;;  %v24164_v52 = vld [vmem:[#allocation46_spill] sm:$0xff] }
 0x2bd   :  { %14988 = vmatprep.mubr.f32.mxu1 %v2551_v61  ;;  %v2570_v29 = vsub.f32 %v19955_v24, %v23565_v45  ;;  %v24152_v61 = vand.u32 4294901760, %v19485_v58  ;;  %v24157_v58 = vld [vmem:[#allocation36_spill] sm:$0xff]  ;;  %v24165_v45 = vld [vmem:[#allocation50_spill] sm:$0xff] }
 0x2be   :  { %14989 = vmatmul.mubr.f32.gmra.mrb[60].mxu1 %v2561_v30  ;;  %v2581_v47 = vand.u32 4294901760, %v2580_v4  ;;  %v24151_v30 = vand.u32 4294901760, %v19480_v53  ;;  %v24156_v53 = vld [vmem:[#allocation33_spill] sm:$0xff]  ;;  %v24159_v4 = vld [vmem:[#allocation40_spill] sm:$0xff] }
 0x2bf   :  { %v2571_v25 = vand.u32 4294901760, %v2570_v29  ;;  %v24160_v29 = vld [vmem:[#allocation39_spill] sm:$0xff] }
 0x2c0   :  { %v20013_v1 = vpack.c.bf16 %v24152_v61, %v24151_v30  ;;  %v24162_v30 = vld [vmem:[#allocation43_spill] sm:$0xff] }
 0x2c1   :  { %14991 = vmatprep.mubr.f32.mxu1 %v2571_v25  ;;  %v24161_v25 = vld [vmem:[#allocation44_spill] sm:$0xff]  ;;  %v24163_v61 = vld [vmem:[#allocation47_spill] sm:$0xff] }
 0x2c2   :  { %14992 = vmatmul.mubr.f32.gmra.mrb[62].mxu1 %v2581_v47  ;;  %24153 = vst [vmem:[#allocation68_spill] sm:$0xff] %v20013_v1  ;;  %v24155_v47 = vld [vmem:[#allocation34_spill] sm:$0xff] }
 0x2c3   :  { %15002 = vmatprep.mubr.f32.mxu1 %v19603_v19 }
 0x2c6   :  { %15003 = vmatmul.mubr.f32.vlgmr.msra.gmra.mrb[32].mxu1 %v19597_v33 }
 0x2c7   :  { %15005 = vmatprep.mubr.f32.mxu1 %v19625_v34  ;;  %16811 = vmatpush3.bf16.msra.mxu1 %v19504_v15  ;;  %v24168_v15 = vld [vmem:[#allocation53_spill] sm:$0xff] }
 0x2c8   :  { %16813 = vmatprep.subr.bf16.mxu1 %v19518_v11 }
 0x2ca   :  { %15006 = vmatmul.mubr.f32.gmra.mrb[34].mxu1 %v19622_v36 }
 0x2cb   :  { %15008 = vmatprep.mubr.f32.mxu1 %v19656_v49  ;;  %16815 = vmatpush3.bf16.msra.mxu1 %v19518_v11  ;;  %v24167_v11 = vld [vmem:[#allocation54_spill] sm:$0xff] }
 0x2cc   :  { %16817 = vmatprep.subr.bf16.mxu1 %v19401_v48 }
 0x2ce   :  { %15009 = vmatmul.mubr.f32.gmra.mrb[36].mxu1 %v19650_v2 }
 0x2cf   :  { %15011 = vmatprep.mubr.f32.mxu1 %v19678_v42 }
 0x2d2   :  { %15012 = vmatmul.mubr.f32.gmra.mrb[38].mxu1 %v19671_v18 }
 0x2d3   :  { %15014 = vmatprep.mubr.f32.mxu1 %v19702_v63 }
 0x2d6   :  { %15015 = vmatmul.mubr.f32.gmra.mrb[40].mxu1 %v19695_v27 }
 0x2d7   :  { %15017 = vmatprep.mubr.f32.mxu1 %v19726_v60 }
 0x2da   :  { %15018 = vmatmul.mubr.f32.gmra.mrb[42].mxu1 %v19719_v9 }
 0x2db   :  { %15020 = vmatprep.mubr.f32.mxu1 %v19748_v26 }
 0x2de   :  { %15021 = vmatmul.mubr.f32.gmra.mrb[44].mxu1 %v19741_v31 }
 0x2df   :  { %15023 = vmatprep.mubr.f32.mxu1 %v19770_v17 }
 0x2e2   :  { %15024 = vmatmul.mubr.f32.gmra.mrb[46].mxu1 %v19763_v5 }
 0x2e3   :  { %15026 = vmatprep.mubr.f32.mxu1 %v19792_v55 }
 0x2e6   :  { %15027 = vmatmul.mubr.f32.gmra.mrb[48].mxu1 %v19785_v28 }
 0x2e7   :  { %15029 = vmatprep.mubr.f32.mxu1 %v19814_v51 }
 0x2ea   :  { %15030 = vmatmul.mubr.f32.gmra.mrb[50].mxu1 %v19807_v38 }
 0x2eb   :  { %15032 = vmatprep.mubr.f32.mxu1 %v19836_v20  ;;  %v24180_v20 = vand.u32 4294901760, %v19636_v10 }
 0x2ee   :  { %15033 = vmatmul.mubr.f32.gmra.mrb[52].mxu1 %v19829_v8  ;;  %v24179_v8 = vand.u32 4294901760, %v19643_v23 }
 0x2ef   :  { %15035 = vmatprep.mubr.f32.mxu1 %v19858_v14  ;;  %v24178_v14 = vand.u32 4294901760, %v19612_v22 }
 0x2f2   :  { %15036 = vmatmul.mubr.f32.gmra.mrb[54].mxu1 %v19851_v21 }
 0x2f3   :  { %15038 = vmatprep.mubr.f32.mxu1 %v19880_v32 }
 0x2f6   :  { %15039 = vmatmul.mubr.f32.gmra.mrb[56].mxu1 %v19873_v7  ;;  %v24175_v7 = vld [vmem:[#allocation48_spill] sm:$0xff] }
 0x2f7   :  { %15041 = vmatprep.mubr.f32.mxu1 %v19902_v0  ;;  %v24176_v32 = vand.u32 4294901760, %v24175_v7  ;;  %v24191_v7 = vand.u32 4294901760, %v24161_v25 }
 0x2fa   :  { %15042 = vmatmul.mubr.f32.gmra.mrb[58].mxu1 %v19895_v16  ;;  %v24173_v16 = vld [vmem:[#allocation45_spill] sm:$0xff] }
 0x2fb   :  { %15044 = vmatprep.mubr.f32.mxu1 %v19924_v59  ;;  %v24172_v59 = vand.u32 4294901760, %v19618_v37  ;;  %v24174_v0 = vand.u32 4294901760, %v24173_v16  ;;  %v24193_v16 = vand.u32 4294901760, %v24163_v61 }
 0x2fd   :  { %v20052_v21 = vpack.c.bf16 %v24176_v32, %v24174_v0  ;;  %v24192_v32 = vand.u32 4294901760, %v24162_v30  ;;  %v24194_v0 = vand.u32 4294901760, %v24164_v52 }
 0x2fe   :  { %15045 = vmatmul.mubr.f32.gmra.mrb[60].mxu1 %v19917_v56  ;;  %v24171_v56 = vld [vmem:[#allocation63_spill] sm:$0xff] }
 0x2ff   :  { %15047 = vmatprep.mubr.f32.mxu1 %v19945_v57  ;;  %v24170_v57 = vld [vmem:[#allocation60_spill] sm:$0xff]  ;;  %24177 = vst [vmem:[#allocation32_spill] sm:$0xff] %v20052_v21 }
 0x302   :  { %15048 = vmatmul.mubr.f32.gmra.mrb[62].mxu1 %v19938_v41  ;;  %v24169_v41 = vld [vmem:[#allocation57_spill] sm:$0xff] }
 0x303   :  { %15058 = vmatprep.mubr.f32.mxu1 %v19618_v37  ;;  %v24181_v37 = vand.u32 4294901760, %v19664_v13 }
 0x306   :  { %15059 = vmatmul.mubr.f32.vlgmr.msra.gmra.mrb[32].mxu1 %v19612_v22  ;;  %v24182_v22 = vand.u32 4294901760, %v19660_v35 }
 0x307   :  { %15061 = vmatprep.mubr.f32.mxu1 %v19643_v23  ;;  %16819 = vmatpush3.bf16.msra.mxu1 %v19401_v48  ;;  %v24183_v23 = vand.u32 4294901760, %v19688_v43 }
 0x308   :  { %16821 = vmatprep.subr.bf16.mxu1 %v19408_v39 }
 0x30a   :  { %15062 = vmatmul.mubr.f32.gmra.mrb[34].mxu1 %v19636_v10  ;;  %v24186_v10 = vand.u32 4294901760, %v24156_v53 }
 0x30b   :  { %15064 = vmatprep.mubr.f32.mxu1 %v19664_v13  ;;  %16823 = vmatpush3.bf16.msra.mxu1 %v19408_v39  ;;  %v24187_v13 = vand.u32 4294901760, %v24157_v58 }
 0x30c   :  { %16825 = vmatprep.subr.bf16.mxu1 %v20013_v1 }
 0x30e   :  { %15065 = vmatmul.mubr.f32.gmra.mrb[36].mxu1 %v19660_v35  ;;  %v24189_v35 = vand.u32 4294901760, %v24159_v4 }
 0x30f   :  { %15067 = vmatprep.mubr.f32.mxu1 %v19688_v43  ;;  %v24190_v43 = vand.u32 4294901760, %v24160_v29 }
 0x312   :  { %15068 = vmatmul.mubr.f32.gmra.mrb[38].mxu1 %v24154_v44 }
 0x313   :  { %15070 = vmatprep.mubr.f32.mxu1 %v24155_v47 }
 0x316   :  { %15071 = vmatmul.mubr.f32.gmra.mrb[40].mxu1 %v24156_v53  ;;  %v24198_v53 = vand.u32 4294901760, %v24168_v15 }
 0x317   :  { %15073 = vmatprep.mubr.f32.mxu1 %v24157_v58  ;;  %v24199_v58 = vand.u32 4294901760, %v24169_v41 }
 0x31a   :  { %15074 = vmatmul.mubr.f32.gmra.mrb[42].mxu1 %v24158_v54 }
 0x31b   :  { %15076 = vmatprep.mubr.f32.mxu1 %v24159_v4  ;;  %v24216_v4 = vld [vmem:[#allocation62_spill] sm:$0xff] }
 0x31e   :  { %15077 = vmatmul.mubr.f32.gmra.mrb[44].mxu1 %v24160_v29  ;;  %v24217_v29 = vld [vmem:[#allocation61_spill] sm:$0xff] }
 0x31f   :  { %15079 = vmatprep.mubr.f32.mxu1 %v24161_v25  ;;  %v24218_v25 = vld [vmem:[#allocation65_spill] sm:$0xff] }
 0x322   :  { %15080 = vmatmul.mubr.f32.gmra.mrb[46].mxu1 %v24162_v30  ;;  %v24219_v30 = vld [vmem:[#allocation64_spill] sm:$0xff] }
 0x323   :  { %15082 = vmatprep.mubr.f32.mxu1 %v24163_v61  ;;  %v24220_v61 = vld [vmem:[#allocation67_spill] sm:$0xff] }
 0x326   :  { %15083 = vmatmul.mubr.f32.gmra.mrb[48].mxu1 %v24164_v52  ;;  %v24201_v52 = vand.u32 4294901760, %v24170_v57 }
 0x327   :  { %15085 = vmatprep.mubr.f32.mxu1 %v24165_v45 }
 0x32a   :  { %15086 = vmatmul.mubr.f32.gmra.mrb[50].mxu1 %v24166_v50 }
 0x32b   :  { %15088 = vmatprep.mubr.f32.mxu1 %v24167_v11 }
 0x32e   :  { %15089 = vmatmul.mubr.f32.gmra.mrb[52].mxu1 %v24168_v15  ;;  %v24205_v15 = vand.u32 4294901760, %v19932_v12 }
 0x32f   :  { %15091 = vmatprep.mubr.f32.mxu1 %v24169_v41  ;;  %v24206_v41 = vand.u32 4294901760, %v19928_v6 }
 0x332   :  { %15092 = vmatmul.mubr.f32.gmra.mrb[54].mxu1 %v19862_v40 }
 0x333   :  { %15094 = vmatprep.mubr.f32.mxu1 %v24170_v57  ;;  %v24208_v57 = vand.u32 4294901760, %v19949_v3 }
 0x336   :  { %15095 = vmatmul.mubr.f32.gmra.mrb[56].mxu1 %v19884_v46 }
 0x337   :  { %15097 = vmatprep.mubr.f32.mxu1 %v19910_v62 }
 0x33a   :  { %15098 = vmatmul.mubr.f32.gmra.mrb[58].mxu1 %v24171_v56 }
 0x33b   :  { %15100 = vmatprep.mubr.f32.mxu1 %v19932_v12  ;;  %v24213_v12 = vld [vmem:[#allocation55_spill] sm:$0xff] }
 0x33e   :  { %15101 = vmatmul.mubr.f32.gmra.mrb[60].mxu1 %v19928_v6  ;;  %v24212_v6 = vld [vmem:[#allocation56_spill] sm:$0xff] }
 0x33f   :  { %15103 = vmatprep.mubr.f32.mxu1 %v19955_v24 }
 0x342   :  { %15104 = vmatmul.mubr.f32.gmra.mrb[62].mxu1 %v19949_v3  ;;  %v24214_v3 = vld [vmem:[#allocation59_spill] sm:$0xff] }
 0x343   :  { %15114 = vmatprep.mubr.f32.mxu1 %v24172_v59  ;;  %v24195_v59 = vand.u32 4294901760, %v24165_v45  ;;  %v24202_v45 = vand.u32 4294901760, %v19884_v46  ;;  %v24209_v46 = vld [vmem:[#allocation26_spill] sm:$0xff] }
 0x346   :  { %15115 = vmatmul.mubr.f32.vlgmr.msra.gmra.mrb[32].mxu1 %v24178_v14  ;;  %v24185_v14 = vand.u32 4294901760, %v24155_v47  ;;  %v24197_v47 = vand.u32 4294901760, %v24167_v11  ;;  %v24204_v11 = vand.u32 4294901760, %v24171_v56  ;;  %v24211_v56 = vld [vmem:[#allocation51_spill] sm:$0xff] }
 0x347   :  { %15117 = vmatprep.mubr.f32.mxu1 %v24179_v8  ;;  %16827 = vmatpush3.bf16.msra.mxu1 %v20013_v1  ;;  %v24184_v8 = vand.u32 4294901760, %v24154_v44  ;;  %v24196_v44 = vand.u32 4294901760, %v24166_v50  ;;  %v24203_v50 = vand.u32 4294901760, %v19910_v62  ;;  %v24210_v62 = vld [vmem:[#allocation52_spill] sm:$0xff] }
 0x348   :  { %16829 = vmatprep.subr.bf16.mxu1 %v20052_v21 }
 0x34a   :  { %15118 = vmatmul.mubr.f32.gmra.mrb[34].mxu1 %v24180_v20  ;;  %v24188_v20 = vand.u32 4294901760, %v24158_v54  ;;  %v24200_v54 = vand.u32 4294901760, %v19862_v40  ;;  %v24207_v40 = vand.u32 4294901760, %v19955_v24  ;;  %v24215_v24 = vld [vmem:[#allocation58_spill] sm:$0xff] }
 0x34b   :  { %15120 = vmatprep.mubr.f32.mxu1 %v24181_v37  ;;  %16831 = vmatpush3.bf16.msra.mxu1 %v20052_v21  ;;  %v24221_v37 = vld [vmem:[#allocation66_spill] sm:$0xff] }
 0x34c   :  { %16833 = vmatprep.subr.bf16.mxu1 %v19401_v48 }
 0x34e   :  { %15121 = vmatmul.mubr.f32.gmra.mrb[36].mxu1 %v24182_v22  ;;  %v24222_v22 = vld [vmem:[#allocation29_spill] sm:$0xff] }
 0x34f   :  { %15123 = vmatprep.mubr.f32.mxu1 %v24183_v23 }
 0x352   :  { %15124 = vmatmul.mubr.f32.gmra.mrb[38].mxu1 %v24184_v8 }
 0x353   :  { %15126 = vmatprep.mubr.f32.mxu1 %v24185_v14  ;;  %v6332_v14 = vld [vmem:[#allocation2 + $0xb8] sm:$0xff] }
 0x356   :  { %15127 = vmatmul.mubr.f32.gmra.mrb[40].mxu1 %v24186_v10 }
 0x357   :  { %15129 = vmatprep.mubr.f32.mxu1 %v24187_v13 }
 0x35a   :  { %15130 = vmatmul.mubr.f32.gmra.mrb[42].mxu1 %v24188_v20 }
 0x35b   :  { %15132 = vmatprep.mubr.f32.mxu1 %v24189_v35 }
 0x35e   :  { %15133 = vmatmul.mubr.f32.gmra.mrb[44].mxu1 %v24190_v43 }
 0x35f   :  { %15135 = vmatprep.mubr.f32.mxu1 %v24191_v7  ;;  %v6333_v7 = vld [vmem:[#allocation2 + $0xc0] sm:$0xff] }
 0x362   :  { %15136 = vmatmul.mubr.f32.gmra.mrb[46].mxu1 %v24192_v32 }
 0x363   :  { %15138 = vmatprep.mubr.f32.mxu1 %v24193_v16 }
 0x366   :  { %15139 = vmatmul.mubr.f32.gmra.mrb[48].mxu1 %v24194_v0  ;;  %v6379_v0 = vsel %vm183_vm1, %v6332_v14, 0 }
 0x367   :  { %15141 = vmatprep.mubr.f32.mxu1 %v24195_v59 }
 0x36a   :  { %15142 = vmatmul.mubr.f32.gmra.mrb[50].mxu1 %v24196_v44 }
 0x36b   :  { %15144 = vmatprep.mubr.f32.mxu1 %v24197_v47  ;;  %v6382_v47 = vsel %vm183_vm1, %v6333_v7, 0 }
 0x36e   :  { %15145 = vmatmul.mubr.f32.gmra.mrb[52].mxu1 %v24198_v53  ;;  %v6334_v53 = vld [vmem:[#allocation2 + $0xc8] sm:$0xff] }
 0x36f   :  { %15147 = vmatprep.mubr.f32.mxu1 %v24199_v58  ;;  %v6335_v58 = vld [vmem:[#allocation2 + $0xd0] sm:$0xff] }
 0x372   :  { %15148 = vmatmul.mubr.f32.gmra.mrb[54].mxu1 %v24200_v54 }
 0x373   :  { %15150 = vmatprep.mubr.f32.mxu1 %v24201_v52 }
 0x376   :  { %15151 = vmatmul.mubr.f32.gmra.mrb[56].mxu1 %v24202_v45 }
 0x377   :  { %15153 = vmatprep.mubr.f32.mxu1 %v24203_v50  ;;  %v20241_v50 = vand.u32 4294901760, %v6379_v0 }
 0x379   :  { %24229 = vst [vmem:[#allocation44_spill] sm:$0xff] %v20241_v50 }
 0x37a   :  { %15154 = vmatmul.mubr.f32.gmra.mrb[58].mxu1 %v24204_v11 }
 0x37b   :  { %15156 = vmatprep.mubr.f32.mxu1 %v24205_v15 }
 0x37e   :  { %15157 = vmatmul.mubr.f32.gmra.mrb[60].mxu1 %v24206_v41 }
 0x37f   :  { %15159 = vmatprep.mubr.f32.mxu1 %v24207_v40  ;;  %v20249_v40 = vand.u32 4294901760, %v6382_v47 }
 0x381   :  { %24230 = vst [vmem:[#allocation43_spill] sm:$0xff] %v20249_v40 }
 0x382   :  { %15160 = vmatmul.mubr.f32.gmra.mrb[62].mxu1 %v24208_v57  ;;  %v6385_v57 = vsel %vm183_vm1, %v6334_v53, 0 }
 0x383   :  { %15170 = vmatprep.mubr.f32.mxu1 %v19603_v19 }
 0x386   :  { %15171 = vmatmul.mubr.f32.vlgmr.msra.gmra.mrb[32].mxu1 %v19597_v33 }
 0x387   :  { %15173 = vmatprep.mubr.f32.mxu1 %v19625_v34  ;;  %16835 = vmatpush3.bf16.msra.mxu1 %v19401_v48 }
 0x388   :  { %16837 = vmatprep.subr.bf16.mxu1 %v19408_v39 }
 0x38a   :  { %15174 = vmatmul.mubr.f32.gmra.mrb[34].mxu1 %v19622_v36 }
 0x38b   :  { %15176 = vmatprep.mubr.f32.mxu1 %v19656_v49  ;;  %16839 = vmatpush3.bf16.msra.mxu1 %v19408_v39 }
 0x38c   :  { %15610 = vmatprep.subr.mxu1 %v24209_v46 }
 0x38e   :  { %15177 = vmatmul.mubr.f32.gmra.mrb[36].mxu1 %v19650_v2 }
 0x38f   :  { %15179 = vmatprep.mubr.f32.mxu1 %v19678_v42 }
 0x392   :  { %15180 = vmatmul.mubr.f32.gmra.mrb[38].mxu1 %v19671_v18 }
 0x393   :  { %15182 = vmatprep.mubr.f32.mxu1 %v19702_v63 }
 0x396   :  { %15183 = vmatmul.mubr.f32.gmra.mrb[40].mxu1 %v19695_v27 }
 0x397   :  { %15185 = vmatprep.mubr.f32.mxu1 %v19726_v60 }
 0x39a   :  { %15186 = vmatmul.mubr.f32.gmra.mrb[42].mxu1 %v19719_v9 }
 0x39b   :  { %15188 = vmatprep.mubr.f32.mxu1 %v19748_v26 }
 0x39e   :  { %15189 = vmatmul.mubr.f32.gmra.mrb[44].mxu1 %v19741_v31 }
 0x39f   :  { %15191 = vmatprep.mubr.f32.mxu1 %v19770_v17 }
 0x3a2   :  { %15192 = vmatmul.mubr.f32.gmra.mrb[46].mxu1 %v19763_v5 }
 0x3a3   :  { %15194 = vmatprep.mubr.f32.mxu1 %v19792_v55 }
 0x3a6   :  { %15195 = vmatmul.mubr.f32.gmra.mrb[48].mxu1 %v19785_v28 }
 0x3a7   :  { %15197 = vmatprep.mubr.f32.mxu1 %v19814_v51 }
 0x3aa   :  { %15198 = vmatmul.mubr.f32.gmra.mrb[50].mxu1 %v19807_v38 }
 0x3ab   :  { %15200 = vmatprep.mubr.f32.mxu1 %v24210_v62 }
 0x3ae   :  { %15201 = vmatmul.mubr.f32.gmra.mrb[52].mxu1 %v24211_v56 }
 0x3af   :  { %15203 = vmatprep.mubr.f32.mxu1 %v24212_v6 }
 0x3b2   :  { %15204 = vmatmul.mubr.f32.gmra.mrb[54].mxu1 %v24213_v12 }
 0x3b3   :  { %15206 = vmatprep.mubr.f32.mxu1 %v24214_v3 }
 0x3b6   :  { %15207 = vmatmul.mubr.f32.gmra.mrb[56].mxu1 %v24215_v24 }
 0x3b7   :  { %15209 = vmatprep.mubr.f32.mxu1 %v24216_v4 }
 0x3ba   :  { %15210 = vmatmul.mubr.f32.gmra.mrb[58].mxu1 %v24217_v29 }
 0x3bb   :  { %15212 = vmatprep.mubr.f32.mxu1 %v24218_v25 }
 0x3be   :  { %15213 = vmatmul.mubr.f32.gmra.mrb[60].mxu1 %v24219_v30 }
 0x3bf   :  { %15215 = vmatprep.mubr.f32.mxu1 %v24220_v61 }
 0x3c2   :  { %15216 = vmatmul.mubr.f32.gmra.mrb[62].mxu1 %v24221_v37 }
 0x3c3   :  { %15226 = vmatprep.mubr.f32.mxu1 %v19603_v19  ;;  %v6326_v19 = vld [vmem:[#allocation2 + $0x88] sm:$0xff] }
 0x3c6   :  { %15227 = vmatmul.mubr.f32.vlgmr.msra.gmra.mrb[32].mxu1 %v19597_v33 }
 0x3c7   :  { %15229 = vmatprep.mubr.f32.mxu1 %v19625_v34  ;;  %15611 = vmatpush3.msra.mxu1 %v24209_v46  ;;  %v6325_v34 = vld [vmem:[#allocation2 + $0x80] sm:$0xff] }
 0x3c8   :  { %15660 = vmatprep.subr.mxu1 %v24222_v22  ;;  %v6358_v33 = vsel %vm183_vm1, %v6325_v34, 0 }
 0x3ca   :  { %15230 = vmatmul.mubr.f32.gmra.mrb[34].mxu1 %v19622_v36  ;;  %v6327_v36 = vld [vmem:[#allocation2 + $0x90] sm:$0xff] }
 0x3cb   :  { %15232 = vmatprep.mubr.f32.mxu1 %v19656_v49  ;;  %v6361_v49 = vsel %vm183_vm1, %v6326_v19, 0  ;;  %v20271_v19 = vld [vmem:[#allocation11 + $0x8] sm:$0xff] }
 0x3ce   :  { %15233 = vmatmul.mubr.f32.gmra.mrb[36].mxu1 %v19650_v2  ;;  %v20181_v2 = vand.u32 4294901760, %v6358_v33 }
 0x3cf   :  { %15235 = vmatprep.mubr.f32.mxu1 %v19678_v42  ;;  %v6328_v42 = vld [vmem:[#allocation2 + $0x98] sm:$0xff] }
 0x3d2   :  { %15236 = vmatmul.mubr.f32.gmra.mrb[38].mxu1 %v19671_v18  ;;  %v6364_v18 = vsel %vm183_vm1, %v6327_v36, 0 }
 0x3d3   :  { %15238 = vmatprep.mubr.f32.mxu1 %v19702_v63  ;;  %v20186_v63 = vand.u32 4294901760, %v6361_v49 }
 0x3d5   :  { %24223 = vst [vmem:[#allocation34_spill] sm:$0xff] %v20186_v63 }
 0x3d6   :  { %15239 = vmatmul.mubr.f32.gmra.mrb[40].mxu1 %v19695_v27  ;;  %v6329_v27 = vld [vmem:[#allocation2 + $0xa0] sm:$0xff] }
 0x3d7   :  { %15241 = vmatprep.mubr.f32.mxu1 %v19726_v60  ;;  %v6367_v60 = vsel %vm183_vm1, %v6328_v42, 0 }
 0x3da   :  { %15242 = vmatmul.mubr.f32.gmra.mrb[42].mxu1 %v19719_v9  ;;  %v20188_v9 = vand.u32 4294901760, %v6364_v18 }
 0x3db   :  { %15244 = vmatprep.mubr.f32.mxu1 %v19748_v26  ;;  %v6370_v26 = vsel %vm183_vm1, %v6329_v27, 0  ;;  %v23607_v27 = vand.u32 4294901760, %v20271_v19 }
 0x3dc   :  { %24224 = vst [vmem:[#allocation33_spill] sm:$0xff] %v20188_v9  ;;  %v20207_v23 = vand.u32 4294901760, %v6370_v26 }
 0x3de   :  { %15245 = vmatmul.mubr.f32.gmra.mrb[44].mxu1 %v19741_v31  ;;  %v20193_v31 = vsub.f32 %v6358_v33, %v20181_v2  ;;  %24226 = vst [vmem:[#allocation35_spill] sm:$0xff] %v20207_v23  ;;  %v20224_v16 = vsub.f32 %v6370_v26, %v20207_v23  ;;  %v20269_v33 = vld [vmem:[#allocation11] sm:$0xff] }
 0x3df   :  { %15247 = vmatprep.mubr.f32.mxu1 %v19770_v17  ;;  %v20197_v17 = vand.u32 4294901760, %v6367_v60  ;;  %v23608_v42 = vand.u32 4294901760, %v20269_v33 }
 0x3e0   :  { %v23599_v15 = vand.u32 4294901760, %v20224_v16 }
 0x3e1   :  { %24225 = vst [vmem:[#allocation36_spill] sm:$0xff] %v20197_v17  ;;  %v20212_v10 = vsub.f32 %v6367_v60, %v20197_v17  ;;  %v20290_v14 = vpack.c.bf16 %v23607_v27, %v23608_v42  ;;  %v6347_v42 = vld [vmem:[#allocation2 + $0x1b0] sm:$0xff] }
 0x3e2   :  { %15248 = vmatmul.mubr.f32.gmra.mrb[46].mxu1 %v19763_v5  ;;  %v6330_v5 = vld [vmem:[#allocation2 + $0xa8] sm:$0xff] }
 0x3e3   :  { %15250 = vmatprep.mubr.f32.mxu1 %v19792_v55  ;;  %v20203_v55 = vsub.f32 %v6364_v18, %v20188_v9  ;;  %v6373_v8 = vsel %vm183_vm1, %v6330_v5, 0  ;;  %v23600_v44 = vand.u32 4294901760, %v20212_v10  ;;  %v6339_v18 = vld [vmem:[#allocation2 + $0xf0] sm:$0xff]  ;;  %24235 = vst [vmem:[#allocation54_spill] sm:$0xff] %v20290_v14  ;;  %16841 = vmatprep.subr.bf16.mxu0 %v20290_v14 }
 0x3e4   :  { %v20217_v43 = vand.u32 4294901760, %v6373_v8  ;;  %16843 = vmatpush3.bf16.msra.mxu0 %v20290_v14 }
 0x3e5   :  { %v23602_v35 = vand.u32 4294901760, %v20203_v55 }
 0x3e6   :  { %15251 = vmatmul.mubr.f32.gmra.mrb[48].mxu1 %v19785_v28  ;;  %v20200_v28 = vsub.f32 %v6361_v49, %v20186_v63  ;;  %24227 = vst [vmem:[#allocation40_spill] sm:$0xff] %v20217_v43  ;;  %v20239_v45 = vsub.f32 %v6373_v8, %v20217_v43  ;;  %v20275_v49 = vsub.f32 %v6382_v47, %v20249_v40 }
 0x3e7   :  { %15253 = vmatprep.mubr.f32.mxu1 %v19814_v51  ;;  %v23605_v51 = vand.u32 4294901760, %v20193_v31  ;;  %v6542_v52 = vsub.f32 %v20203_v55, %v23602_v35 }
 0x3e8   :  { %v23604_v20 = vand.u32 4294901760, %v20200_v28  ;;  %24233 = vst [vmem:[#allocation50_spill] sm:$0xff] %v20275_v49 }
 0x3e9   :  { %v6522_v32 = vsub.f32 %v20193_v31, %v23605_v51 }
 0x3ea   :  { %15254 = vmatmul.mubr.f32.gmra.mrb[50].mxu1 %v19807_v38  ;;  %v6331_v38 = vld [vmem:[#allocation2 + $0xb0] sm:$0xff]  ;;  %v6532_v54 = vsub.f32 %v20200_v28, %v23604_v20 }
 0x3eb   :  { %15256 = vmatprep.mubr.f32.mxu1 %v24210_v62  ;;  %v6376_v13 = vsel %vm183_vm1, %v6331_v38, 0  ;;  %v6523_v11 = vand.u32 4294901760, %v6522_v32  ;;  %v6388_v62 = vsel %vm183_vm1, %v6335_v58, 0  ;;  %v23598_v58 = vand.u32 4294901760, %v20275_v49 }
 0x3ec   :  { %v20228_v59 = vand.u32 4294901760, %v6376_v13 }
 0x3ee   :  { %15257 = vmatmul.mubr.f32.gmra.mrb[52].mxu1 %v24211_v56  ;;  %24228 = vst [vmem:[#allocation39_spill] sm:$0xff] %v20228_v59  ;;  %v20247_v41 = vsub.f32 %v6376_v13, %v20228_v59  ;;  %v6336_v56 = vld [vmem:[#allocation2 + $0xd8] sm:$0xff] }
 0x3ef   :  { %15259 = vmatprep.mubr.f32.mxu1 %v24212_v6  ;;  %v6552_v6 = vsub.f32 %v20212_v10, %v23600_v44  ;;  %v6391_v34 = vsel %vm183_vm1, %v6336_v56, 0 }
 0x3f0   :  { %v23596_v36 = vand.u32 4294901760, %v20247_v41  ;;  %v20284_v8 = vand.u32 4294901760, %v6391_v34 }
 0x3f1   :  { %v6553_v60 = vand.u32 4294901760, %v6552_v6 }
 0x3f2   :  { %15260 = vmatmul.mubr.f32.gmra.mrb[54].mxu1 %v24213_v12  ;;  %v6533_v12 = vand.u32 4294901760, %v6532_v54  ;;  %24234 = vst [vmem:[#allocation49_spill] sm:$0xff] %v20284_v8  ;;  %v6582_v53 = vsub.f32 %v20247_v41, %v23596_v36 }
 0x3f3   :  { %15262 = vmatprep.mubr.f32.mxu1 %v24214_v3  ;;  %v6543_v3 = vand.u32 4294901760, %v6542_v52  ;;  %v6340_v52 = vld [vmem:[#allocation2 + $0xf8] sm:$0xff] }
 0x3f6   :  { %15263 = vmatmul.mubr.f32.gmra.mrb[56].mxu1 %v24215_v24  ;;  %v23597_v24 = vand.u32 4294901760, %v20239_v45 }
 0x3f7   :  { %15265 = vmatprep.mubr.f32.mxu1 %v24216_v4  ;;  %v20258_v4 = vsub.f32 %v6379_v0, %v20241_v50  ;;  %v6400_v0 = vsel %vm183_vm1, %v6339_v18, 0 }
 0x3f8   :  { %v6572_v5 = vsub.f32 %v20239_v45, %v23597_v24  ;;  %v20314_v6 = vand.u32 4294901760, %v6400_v0 }
 0x3f9   :  { %v23595_v38 = vand.u32 4294901760, %v20258_v4 }
 0x3fa   :  { %15266 = vmatmul.mubr.f32.gmra.mrb[58].mxu1 %v24217_v29  ;;  %v6337_v29 = vld [vmem:[#allocation2 + $0xe0] sm:$0xff]  ;;  %24242 = vst [vmem:[#allocation48_spill] sm:$0xff] %v20314_v6  ;;  %v20335_v24 = vsub.f32 %v6400_v0, %v20314_v6 }
 0x3fb   :  { %15268 = vmatprep.mubr.f32.mxu1 %v24218_v25  ;;  %v6562_v25 = vsub.f32 %v20224_v16, %v23599_v15  ;;  %v6394_v26 = vsel %vm183_vm1, %v6337_v29, 0 }
 0x3fc   :  { %v20304_v54 = vand.u32 4294901760, %v6394_v26  ;;  %24245 = vst [vmem:[#allocation51_spill] sm:$0xff] %v20335_v24  ;;  %v23615_v35 = vand.u32 4294901760, %v20335_v24 }
 0x3fd   :  { %v6563_v47 = vand.u32 4294901760, %v6562_v25  ;;  %v6403_v25 = vsel %vm183_vm1, %v6340_v52, 0 }
 0x3fe   :  { %15269 = vmatmul.mubr.f32.gmra.mrb[60].mxu1 %v24219_v30  ;;  %v20264_v30 = vand.u32 4294901760, %v6385_v57  ;;  %24238 = vst [vmem:[#allocation60_spill] sm:$0xff] %v20304_v54  ;;  %v20327_v18 = vsub.f32 %v6394_v26, %v20304_v54 }
 0x3ff   :  { %15271 = vmatprep.mubr.f32.mxu1 %v24220_v61  ;;  %v20266_v61 = vand.u32 4294901760, %v6388_v62 }
 0x400   :  { %24231 = vst [vmem:[#allocation47_spill] sm:$0xff] %v20264_v30  ;;  %v20293_v13 = vsub.f32 %v6385_v57, %v20264_v30  ;;  %v6573_v57 = vand.u32 4294901760, %v6572_v5  ;;  %24243 = vst [vmem:[#allocation26_spill] sm:$0xff] %v20327_v18  ;;  %v6342_v5 = vld [vmem:[#allocation2 + $0x188] sm:$0xff] }
 0x401   :  { %24232 = vst [vmem:[#allocation46_spill] sm:$0xff] %v20266_v61  ;;  %v20296_v7 = vsub.f32 %v6388_v62, %v20266_v61  ;;  %v20310_v62 = vsub.f32 %v6391_v34, %v20284_v8  ;;  %v6583_v34 = vand.u32 4294901760, %v6582_v53  ;;  %v6343_v53 = vld [vmem:[#allocation2 + $0x190] sm:$0xff]  ;;  %v6409_v0 = vsel %vm183_vm1, %v6342_v5, 0 }
 0x402   :  { %15272 = vmatmul.mubr.f32.gmra.mrb[62].mxu1 %v24221_v37  ;;  %v6338_v37 = vld [vmem:[#allocation2 + $0xe8] sm:$0xff]  ;;  %24236 = vst [vmem:[#allocation53_spill] sm:$0xff] %v20293_v13  ;;  %v6412_v44 = vsel %vm183_vm1, %v6343_v53, 0  ;;  %v20358_v51 = vand.u32 4294901760, %v6409_v0 }
 0x403   :  { %15612 = vmatprep.mubr.f32.mxu1 %v6523_v11  ;;  %24237 = vst [vmem:[#allocation57_spill] sm:$0xff] %v20296_v7  ;;  %v6397_v32 = vsel %vm183_vm1, %v6338_v37, 0  ;;  %v24239_v11 = vld [vmem:[#allocation27_spill] sm:$0xff]  ;;  %24240 = vst [vmem:[#allocation63_spill] sm:$0xff] %v20310_v62  ;;  %v23603_v29 = vand.u32 4294901760, %v20296_v7  ;;  %v6602_v37 = vsub.f32 %v20275_v49, %v23598_v58 }
 0x404   :  { %v20312_v56 = vand.u32 4294901760, %v6397_v32  ;;  %24249 = vst [vmem:[#allocation58_spill] sm:$0xff] %v20358_v51 }
 0x405   :  { %v6603_v58 = vand.u32 4294901760, %v6602_v37  ;;  %v6345_v37 = vld [vmem:[#allocation2 + $0x1a0] sm:$0xff] }
 0x406   :  { %15613 = vmatmul.mubr.f32.vlgmr.msra.gmra.mrb[64].mxu1 %v6533_v12  ;;  %24241 = vst [vmem:[#allocation45_spill] sm:$0xff] %v20312_v56  ;;  %v6341_v12 = vld [vmem:[#allocation2 + $0x180] sm:$0xff]  ;;  %v20332_v36 = vsub.f32 %v6397_v32, %v20312_v56  ;;  %v23609_v32 = vand.u32 4294901760, %v20327_v18 }
 0x407   :  { %15615 = vmatprep.mubr.f32.mxu1 %v6543_v3  ;;  %15661 = vmatpush3.msra.mxu1 %v24222_v22  ;;  %v6592_v22 = vsub.f32 %v20258_v4, %v23595_v38  ;;  %v23601_v3 = vand.u32 4294901760, %v20293_v13  ;;  %v23606_v38 = vand.u32 4294901760, %v20310_v62 }
 0x408   :  { %15710 = vmatprep.subr.mxu1 %v24239_v11  ;;  %24244 = vst [vmem:[#allocation52_spill] sm:$0xff] %v20332_v36  ;;  %v6642_v5 = vsub.f32 %v20327_v18, %v23609_v32  ;;  %v20378_v32 = vsub.f32 %v6409_v0, %v20358_v51 }
 0x409   :  { %v6593_v52 = vand.u32 4294901760, %v6592_v22  ;;  %v6612_v26 = vsub.f32 %v20293_v13, %v23601_v3  ;;  %v6632_v22 = vsub.f32 %v20310_v62, %v23606_v38  ;;  %v23612_v3 = vand.u32 4294901760, %v20332_v36 }
 0x40a   :  { %15616 = vmatmul.mubr.f32.gmra.mrb[66].mxu1 %v6553_v60  ;;  %v6406_v60 = vsel %vm183_vm1, %v6341_v12, 0  ;;  %v6622_v12 = vsub.f32 %v20296_v7, %v23603_v29  ;;  %v20366_v38 = vand.u32 4294901760, %v6412_v44  ;;  %24252 = vst [vmem:[#allocation65_spill] sm:$0xff] %v20378_v32  ;;  %v6355_v7 = vld [vmem:[#allocation2 + $0x1f0] sm:$0xff] }
 0x40b   :  { %15618 = vmatprep.mubr.f32.mxu1 %v6563_v47  ;;  %v20337_v47 = vand.u32 4294901760, %v6403_v25  ;;  %v20346_v15 = vand.u32 4294901760, %v6406_v60  ;;  %v6613_v29 = vand.u32 4294901760, %v6612_v26  ;;  %v6633_v26 = vand.u32 4294901760, %v6632_v22 }
 0x40c   :  { %v6623_v20 = vand.u32 4294901760, %v6622_v12  ;;  %24251 = vst [vmem:[#allocation61_spill] sm:$0xff] %v20366_v38  ;;  %v6662_v12 = vsub.f32 %v20335_v24, %v23615_v35  ;;  %v6424_v22 = vsel %vm183_vm1, %v6347_v42, 0  ;;  %v20386_v1 = vsub.f32 %v6412_v44, %v20366_v38 }
 0x40d   :  { %24246 = vst [vmem:[#allocation56_spill] sm:$0xff] %v20337_v47  ;;  %24247 = vst [vmem:[#allocation55_spill] sm:$0xff] %v20346_v15  ;;  %v20364_v53 = vsub.f32 %v6406_v60, %v20346_v15  ;;  %v6348_v60 = vld [vmem:[#allocation2 + $0x1b8] sm:$0xff] }
 0x40e   :  { %15619 = vmatmul.mubr.f32.gmra.mrb[68].mxu1 %v6573_v57  ;;  %v6344_v57 = vld [vmem:[#allocation2 + $0x198] sm:$0xff]  ;;  %24254 = vst [vmem:[#allocation67_spill] sm:$0xff] %v20386_v1 }
 0x40f   :  { %15621 = vmatprep.mubr.f32.mxu1 %v6583_v34  ;;  %v20356_v34 = vsub.f32 %v6403_v25, %v20337_v47  ;;  %24250 = vst [vmem:[#allocation62_spill] sm:$0xff] %v20364_v53  ;;  %v6415_v27 = vsel %vm183_vm1, %v6344_v57, 0  ;;  %v6346_v25 = vld [vmem:[#allocation2 + $0x1a8] sm:$0xff] }
 0x410   :  { %v20380_v57 = vand.u32 4294901760, %v6415_v27  ;;  %v6421_v21 = vsel %vm183_vm1, %v6346_v25, 0  ;;  %v20395_v25 = vand.u32 4294901760, %v6424_v22 }
 0x411   :  { %24248 = vst [vmem:[#allocation59_spill] sm:$0xff] %v20356_v34  ;;  %v24256_v0 = vand.u32 4294901760, %v20356_v34  ;;  %v20393_v14 = vand.u32 4294901760, %v6421_v21 }
 0x412   :  { %15622 = vmatmul.mubr.f32.gmra.mrb[70].mxu1 %v6593_v52  ;;  %v6418_v52 = vsel %vm183_vm1, %v6345_v37, 0  ;;  %24253 = vst [vmem:[#allocation64_spill] sm:$0xff] %v20380_v57  ;;  %v6643_v37 = vand.u32 4294901760, %v6642_v5  ;;  %24258 = vst [vmem:[#allocation27_spill] sm:$0xff] %v20395_v25  ;;  %v20399_v44 = vsub.f32 %v6415_v27, %v20380_v57  ;;  %v6427_v5 = vsel %vm183_vm1, %v6348_v60, 0 }
 0x413   :  { %15624 = vmatprep.mubr.f32.mxu1 %v6603_v58  ;;  %v6652_v58 = vsub.f32 %v20332_v36, %v23612_v3  ;;  %v23626_v3 = vand.u32 4294901760, %v20364_v53  ;;  %v20388_v35 = vand.u32 4294901760, %v6418_v52  ;;  %v6672_v48 = vsub.f32 %v20356_v34, %v24256_v0  ;;  %24257 = vst [vmem:[#allocation29_spill] sm:$0xff] %v20393_v14 }
 0x414   :  { %24259 = vst [vmem:[#allocation69_spill] sm:$0xff] %v20399_v44  ;;  %v20411_v42 = vsub.f32 %v6421_v21, %v20393_v14  ;;  %v20414_v27 = vsub.f32 %v6424_v22, %v20395_v25  ;;  %v20416_v60 = vand.u32 4294901760, %v6427_v5  ;;  %v24266_v21 = vand.u32 4294901760, %v20386_v1 }
 0x415   :  { %24255 = vst [vmem:[#allocation66_spill] sm:$0xff] %v20388_v35  ;;  %v6653_v39 = vand.u32 4294901760, %v6652_v58  ;;  %v6682_v58 = vsub.f32 %v20364_v53, %v23626_v3  ;;  %v20407_v34 = vsub.f32 %v6418_v52, %v20388_v35  ;;  %v6673_v24 = vand.u32 4294901760, %v6672_v48 }
 0x416   :  { %15625 = vmatmul.mubr.f32.gmra.mrb[72].mxu1 %v6613_v29  ;;  %v6349_v29 = vld [vmem:[#allocation2 + $0x1c0] sm:$0xff]  ;;  %24261 = vst [vmem:[#allocation71_spill] sm:$0xff] %v20411_v42  ;;  %24262 = vst [vmem:[#allocation72_spill] sm:$0xff] %v20414_v27  ;;  %v24264_v3 = vand.u32 4294901760, %v20378_v32  ;;  %v6702_v22 = vsub.f32 %v20386_v1, %v24266_v21  ;;  %v20433_v52 = vsub.f32 %v6427_v5, %v20416_v60  ;;  %v6354_v1 = vld [vmem:[#allocation2 + $0x1e8] sm:$0xff] }
 0x417   :  { %15627 = vmatprep.mubr.f32.mxu1 %v6623_v20  ;;  %v6663_v20 = vand.u32 4294901760, %v6662_v12  ;;  %24260 = vst [vmem:[#allocation70_spill] sm:$0xff] %v20407_v34  ;;  %v6350_v12 = vld [vmem:[#allocation2 + $0x1c8] sm:$0xff]  ;;  %24263 = vst [vmem:[#allocation73_spill] sm:$0xff] %v20416_v60  ;;  %v24271_v62 = vand.u32 4294901760, %v20407_v34 }
 0x418   :  { %v6692_v0 = vsub.f32 %v20378_v32, %v24264_v3  ;;  %v6433_v18 = vsel %vm183_vm1, %v6350_v12, 0  ;;  %24267 = vst [vmem:[#allocation75_spill] sm:$0xff] %v20433_v52  ;;  %v24268_v32 = vand.u32 4294901760, %v20399_v44 }
 0x419   :  { %v20441_v12 = vand.u32 4294901760, %v6433_v18  ;;  %v6722_v3 = vsub.f32 %v20407_v34, %v24271_v62  ;;  %v24277_v34 = vand.u32 4294901760, %v20433_v52 }
 0x41a   :  { %15628 = vmatmul.mubr.f32.gmra.mrb[74].mxu1 %v6633_v26  ;;  %v6430_v26 = vsel %vm183_vm1, %v6349_v29, 0  ;;  %v6683_v29 = vand.u32 4294901760, %v6682_v58  ;;  %v6693_v58 = vand.u32 4294901760, %v6692_v0  ;;  %v6712_v21 = vsub.f32 %v20399_v44, %v24268_v32 }
 0x41b   :  { %15630 = vmatprep.mubr.f32.mxu1 %v6643_v37  ;;  %v6351_v37 = vld [vmem:[#allocation2 + $0x1d0] sm:$0xff]  ;;  %v20422_v53 = vand.u32 4294901760, %v6430_v26  ;;  %24270 = vst [vmem:[#allocation77_spill] sm:$0xff] %v20441_v12  ;;  %v24273_v32 = vand.u32 4294901760, %v20411_v42  ;;  %v24274_v44 = vand.u32 4294901760, %v20414_v27  ;;  %v6723_v13 = vand.u32 4294901760, %v6722_v3 }
 0x41c   :  { %v6436_v48 = vsel %vm183_vm1, %v6351_v37, 0  ;;  %v6703_v37 = vand.u32 4294901760, %v6702_v22  ;;  %v6713_v62 = vand.u32 4294901760, %v6712_v21  ;;  %v6448_v22 = vsel %vm183_vm1, %v6355_v7, 0 }
 0x41d   :  { %24265 = vst [vmem:[#allocation74_spill] sm:$0xff] %v20422_v53  ;;  %v20439_v36 = vsub.f32 %v6430_v26, %v20422_v53  ;;  %v20446_v5 = vand.u32 4294901760, %v6436_v48  ;;  %v6732_v26 = vsub.f32 %v20411_v42, %v24273_v32 }
 0x41e   :  { %15631 = vmatmul.mubr.f32.gmra.mrb[76].mxu1 %v6653_v39  ;;  %v6352_v39 = vld [vmem:[#allocation2 + $0x1d8] sm:$0xff] }
 0x41f   :  { %15633 = vmatprep.mubr.f32.mxu1 %v6663_v20  ;;  %v6353_v20 = vld [vmem:[#allocation2 + $0x1e0] sm:$0xff]  ;;  %24269 = vst [vmem:[#allocation76_spill] sm:$0xff] %v20439_v36  ;;  %24272 = vst [vmem:[#allocation78_spill] sm:$0xff] %v20446_v5  ;;  %v20464_v32 = vsub.f32 %v6436_v48, %v20446_v5  ;;  %v6733_v21 = vand.u32 4294901760, %v6732_v26 }
 0x420   :  { %v6442_v0 = vsel %vm183_vm1, %v6353_v20, 0 }
 0x421   :  { %v20466_v42 = vand.u32 4294901760, %v6442_v0  ;;  %v23658_v7 = vand.u32 4294901760, %v20464_v32 }
 0x422   :  { %15634 = vmatmul.mubr.f32.gmra.mrb[78].mxu1 %v6673_v24  ;;  %v6439_v24 = vsel %vm183_vm1, %v6352_v39, 0  ;;  %v20459_v39 = vsub.f32 %v6433_v18, %v20441_v12  ;;  %v6752_v18 = vsub.f32 %v20433_v52, %v24277_v34 }
 0x423   :  { %15636 = vmatprep.mubr.f32.mxu1 %v6683_v29  ;;  %v6742_v29 = vsub.f32 %v20414_v27, %v24274_v44  ;;  %v20461_v20 = vand.u32 4294901760, %v6439_v24  ;;  %24276 = vst [vmem:[#allocation80_spill] sm:$0xff] %v20466_v42  ;;  %v6445_v44 = vsel %vm183_vm1, %v6354_v1, 0  ;;  %v20484_v26 = vsub.f32 %v6442_v0, %v20466_v42 }
 0x424   :  { %v23657_v48 = vand.u32 4294901760, %v20459_v39  ;;  %v20480_v1 = vand.u32 4294901760, %v6445_v44  ;;  %v6782_v52 = vsub.f32 %v20464_v32, %v23658_v7 }
 0x425   :  { %24275 = vst [vmem:[#allocation79_spill] sm:$0xff] %v20461_v20  ;;  %v6743_v27 = vand.u32 4294901760, %v6742_v29  ;;  %v20478_v49 = vsub.f32 %v6439_v24, %v20461_v20  ;;  %v20486_v29 = vand.u32 4294901760, %v6448_v22 }
 0x426   :  { %15637 = vmatmul.mubr.f32.gmra.mrb[80].mxu1 %v6693_v58  ;;  %v6356_v58 = vld [vmem:[#allocation2 + $0x1f8] sm:$0xff]  ;;  %24280 = vst [vmem:[#allocation82_spill] sm:$0xff] %v20480_v1 }
 0x427   :  { %15639 = vmatprep.mubr.f32.mxu1 %v6703_v37  ;;  %v24278_v37 = vand.u32 4294901760, %v20439_v36  ;;  %24279 = vst [vmem:[#allocation81_spill] sm:$0xff] %v20478_v49  ;;  %24281 = vst [vmem:[#allocation83_spill] sm:$0xff] %v20486_v29  ;;  %v6451_v34 = vsel %vm183_vm1, %v6356_v58, 0  ;;  %v23659_v24 = vand.u32 4294901760, %v20478_v49  ;;  %v23662_v58 = vand.u32 4294901760, %v20484_v26 }
 0x429   :  { %v6762_v3 = vsub.f32 %v20439_v36, %v24278_v37  ;;  %v6772_v37 = vsub.f32 %v20459_v39, %v23657_v48  ;;  %v20494_v36 = vsub.f32 %v6445_v44, %v20480_v1  ;;  %v6792_v44 = vsub.f32 %v20478_v49, %v23659_v24 }
 0x42a   :  { %15640 = vmatmul.mubr.f32.gmra.mrb[82].mxu1 %v6713_v62  ;;  %v6753_v62 = vand.u32 4294901760, %v6752_v18  ;;  %v6802_v7 = vsub.f32 %v20484_v26, %v23662_v58 }
 0x42b   :  { %15642 = vmatprep.mubr.f32.mxu1 %v6723_v13  ;;  %v20496_v13 = vand.u32 4294901760, %v6451_v34  ;;  %v6763_v0 = vand.u32 4294901760, %v6762_v3  ;;  %v6773_v18 = vand.u32 4294901760, %v6772_v37  ;;  %v23663_v48 = vand.u32 4294901760, %v20494_v36 }
 0x42c   :  { %v6783_v3 = vand.u32 4294901760, %v6782_v52  ;;  %v6803_v49 = vand.u32 4294901760, %v6802_v7 }
 0x42d   :  { %24282 = vst [vmem:[#allocation84_spill] sm:$0xff] %v20496_v13  ;;  %v6812_v37 = vsub.f32 %v20494_v36, %v23663_v48 }
 0x42e   :  { %15643 = vmatmul.mubr.f32.gmra.mrb[84].mxu1 %v6733_v21  ;;  %v20503_v21 = vsub.f32 %v6448_v22, %v20486_v29 }
 0x42f   :  { %15645 = vmatprep.mubr.f32.mxu1 %v6743_v27  ;;  %v20510_v27 = vsub.f32 %v6451_v34, %v20496_v13  ;;  %v20523_v34 = vld [vmem:[#allocation11 + $0x10] sm:$0xff]  ;;  %v6813_v58 = vand.u32 4294901760, %v6812_v37 }
 0x430   :  { %v23664_v22 = vand.u32 4294901760, %v20503_v21 }
 0x431   :  { %v23667_v24 = vand.u32 4294901760, %v20510_v27 }
 0x432   :  { %15646 = vmatmul.mubr.f32.gmra.mrb[86].mxu1 %v6753_v62  ;;  %v6793_v62 = vand.u32 4294901760, %v6792_v44  ;;  %v6822_v52 = vsub.f32 %v20503_v21, %v23664_v22  ;;  %v23669_v44 = vand.u32 4294901760, %v20523_v34 }
 0x433   :  { %15648 = vmatprep.mubr.f32.mxu1 %v6763_v0  ;;  %v20525_v0 = vld [vmem:[#allocation11 + $0x18] sm:$0xff] }
 0x434   :  { %v23668_v48 = vand.u32 4294901760, %v20525_v0  ;;  %v6823_v7 = vand.u32 4294901760, %v6822_v52 }
 0x436   :  { %15649 = vmatmul.mubr.f32.gmra.mrb[88].mxu1 %v6773_v18  ;;  %v6832_v18 = vsub.f32 %v20510_v27, %v23667_v24  ;;  %v24293_v24 = vld [vmem:[#allocation63_spill] sm:$0xff] }
 0x437   :  { %15651 = vmatprep.mubr.f32.mxu1 %v6783_v3  ;;  %v20536_v3 = vpack.c.bf16 %v23668_v48, %v23669_v44  ;;  %v24294_v44 = vld [vmem:[#allocation26_spill] sm:$0xff] }
 0x438   :  { %v6833_v22 = vand.u32 4294901760, %v6832_v18 }
 0x439   :  { %24283 = vst [vmem:[#allocation85_spill] sm:$0xff] %v20536_v3  ;;  %16845 = vmatprep.subr.bf16.mxu0 %v20536_v3 }
 0x43a   :  { %15652 = vmatmul.mubr.f32.gmra.mrb[90].mxu1 %v6793_v62  ;;  %16847 = vmatpush3.bf16.msra.mxu0 %v20536_v3 }
 0x43b   :  { %15654 = vmatprep.mubr.f32.mxu1 %v6803_v49  ;;  %v24284_v49 = vand.u32 4294901760, %v20269_v33 }
 0x43e   :  { %15655 = vmatmul.mubr.f32.gmra.mrb[92].mxu1 %v6813_v58  ;;  %v20554_v58 = vsub.f32 %v20269_v33, %v24284_v49  ;;  %v24289_v49 = vld [vmem:[#allocation28_spill] sm:$0xff] }
 0x43f   :  { %15657 = vmatprep.mubr.f32.mxu1 %v6823_v7 }
 0x440   :  { %24285 = vst [vmem:[#allocation86_spill] sm:$0xff] %v20554_v58  ;;  %v23666_v62 = vand.u32 4294901760, %v20554_v58 }
 0x442   :  { %15658 = vmatmul.mubr.f32.gmra.mrb[94].mxu1 %v6833_v22  ;;  %v4697_v52 = vsub.f32 %v20554_v58, %v23666_v62 }
 0x443   :  { %15662 = vmatprep.mubr.f32.mxu1 %v20181_v2 }
 0x446   :  { %15663 = vmatmul.mubr.f32.vlgmr.msra.gmra.mrb[64].mxu1 %v20186_v63 }
 0x447   :  { %15665 = vmatprep.mubr.f32.mxu1 %v20188_v9  ;;  %15711 = vmatpush3.msra.mxu1 %v24239_v11  ;;  %v24286_v11 = vand.u32 4294901760, %v20271_v19 }
 0x448   :  { %15760 = vmatprep.subr.mxu1 %v24209_v46 }
 0x449   :  { %v20559_v22 = vsub.f32 %v20271_v19, %v24286_v11  ;;  %v4698_v19 = vand.u32 4294901760, %v4697_v52  ;;  %v24290_v11 = vld [vmem:[#allocation50_spill] sm:$0xff]  ;;  %v24291_v52 = vld [vmem:[#allocation53_spill] sm:$0xff] }
 0x44a   :  { %15666 = vmatmul.mubr.f32.gmra.mrb[66].mxu1 %v20197_v17 }
 0x44b   :  { %15668 = vmatprep.mubr.f32.mxu1 %v20207_v23  ;;  %24287 = vst [vmem:[#allocation87_spill] sm:$0xff] %v20559_v22  ;;  %v23665_v37 = vand.u32 4294901760, %v20559_v22 }
 0x44d   :  { %v4704_v33 = vsub.f32 %v20559_v22, %v23665_v37 }
 0x44e   :  { %15669 = vmatmul.mubr.f32.gmra.mrb[68].mxu1 %v20217_v43 }
 0x44f   :  { %15671 = vmatprep.mubr.f32.mxu1 %v20228_v59  ;;  %v4705_v18 = vand.u32 4294901760, %v4704_v33  ;;  %v20607_v33 = vld [vmem:[#allocation10] ss:$0 sm:$0xff] }
 0x451   :  { %v20573_v7 = vpack.c.bf16 %v4705_v18, %v4698_v19  ;;  %v24292_v19 = vld [vmem:[#allocation57_spill] sm:$0xff] }
 0x452   :  { %15672 = vmatmul.mubr.f32.gmra.mrb[70].mxu1 %v20241_v50 }
 0x453   :  { %15674 = vmatprep.mubr.f32.mxu1 %v20249_v40  ;;  %24288 = vst [vmem:[#allocation88_spill] sm:$0xff] %v20573_v7  ;;  %16849 = vmatprep.subr.bf16.mxu0 %v20573_v7 }
 0x456   :  { %15675 = vmatmul.mubr.f32.gmra.mrb[72].mxu1 %v20264_v30  ;;  %v24312_v30 = vld [vmem:[#allocation76_spill] sm:$0xff] }
 0x457   :  { %15677 = vmatprep.mubr.f32.mxu1 %v20266_v61 }
 0x45a   :  { %15678 = vmatmul.mubr.f32.gmra.mrb[74].mxu1 %v20284_v8 }
 0x45b   :  { %15680 = vmatprep.mubr.f32.mxu1 %v20304_v54 }
 0x45e   :  { %15681 = vmatmul.mubr.f32.gmra.mrb[76].mxu1 %v20312_v56 }
 0x45f   :  { %15683 = vmatprep.mubr.f32.mxu1 %v20314_v6 }
 0x462   :  { %15684 = vmatmul.mubr.f32.gmra.mrb[78].mxu1 %v20337_v47  ;;  %v24306_v47 = vld [vmem:[#allocation70_spill] sm:$0xff] }
 0x463   :  { %15686 = vmatprep.mubr.f32.mxu1 %v20346_v15 }
 0x466   :  { %15687 = vmatmul.mubr.f32.gmra.mrb[80].mxu1 %v20358_v51 }
 0x467   :  { %15689 = vmatprep.mubr.f32.mxu1 %v20366_v38 }
 0x46a   :  { %15690 = vmatmul.mubr.f32.gmra.mrb[82].mxu1 %v20380_v57 }
 0x46b   :  { %15692 = vmatprep.mubr.f32.mxu1 %v20388_v35  ;;  %v24304_v35 = vld [vmem:[#allocation67_spill] sm:$0xff] }
 0x46e   :  { %15693 = vmatmul.mubr.f32.gmra.mrb[84].mxu1 %v20393_v14 }
 0x46f   :  { %15695 = vmatprep.mubr.f32.mxu1 %v20395_v25 }
 0x472   :  { %15696 = vmatmul.mubr.f32.gmra.mrb[86].mxu1 %v20416_v60 }
 0x473   :  { %15698 = vmatprep.mubr.f32.mxu1 %v20422_v53 }
 0x476   :  { %15699 = vmatmul.mubr.f32.gmra.mrb[88].mxu1 %v20441_v12 }
 0x477   :  { %15701 = vmatprep.mubr.f32.mxu1 %v20446_v5 }
 0x47a   :  { %15702 = vmatmul.mubr.f32.gmra.mrb[90].mxu1 %v20461_v20  ;;  %v24295_v20 = vld [vmem:[#allocation52_spill] sm:$0xff] }
 0x47b   :  { %15704 = vmatprep.mubr.f32.mxu1 %v20466_v42 }
 0x47e   :  { %15705 = vmatmul.mubr.f32.gmra.mrb[92].mxu1 %v20480_v1 }
 0x47f   :  { %15707 = vmatprep.mubr.f32.mxu1 %v20486_v29 }
 0x482   :  { %15708 = vmatmul.mubr.f32.gmra.mrb[94].mxu1 %v20496_v13 }
 0x483   :  { %15712 = vmatprep.mubr.f32.mxu1 %v20193_v31 }
 0x486   :  { %15713 = vmatmul.mubr.f32.vlgmr.msra.gmra.mrb[64].mxu1 %v20200_v28 }
 0x487   :  { %15715 = vmatprep.mubr.f32.mxu1 %v20203_v55  ;;  %15761 = vmatpush3.msra.mxu1 %v24209_v46 }
 0x488   :  { %15810 = vmatprep.subr.mxu1 %v24289_v49 }
 0x48a   :  { %15716 = vmatmul.mubr.f32.gmra.mrb[66].mxu1 %v20212_v10 }
 0x48b   :  { %15718 = vmatprep.mubr.f32.mxu1 %v20224_v16 }
 0x48e   :  { %15719 = vmatmul.mubr.f32.gmra.mrb[68].mxu1 %v20239_v45 }
 0x48f   :  { %15721 = vmatprep.mubr.f32.mxu1 %v20247_v41 }
 0x492   :  { %15722 = vmatmul.mubr.f32.gmra.mrb[70].mxu1 %v20258_v4 }
 0x493   :  { %15724 = vmatprep.mubr.f32.mxu1 %v24290_v11 }
 0x496   :  { %15725 = vmatmul.mubr.f32.gmra.mrb[72].mxu1 %v24291_v52 }
 0x497   :  { %15727 = vmatprep.mubr.f32.mxu1 %v24292_v19 }
 0x499   :  { %v15228_v18 = vpop.f32.mrb[32].mxu1 }
 0x49a   :  { %v17192_v37 = vadd.f32 %v15228_v18, %v20607_v33  ;;  %v3826_v62 = vpop.f32.mrb[33].mxu1  ;;  %15728 = vmatmul.mubr.f32.gmra.mrb[74].mxu1 %v24293_v24  ;;  %v24296_v18 = vld [vmem:[#allocation51_spill] sm:$0xff] }
 0x49b   :  { %v17193_v48 = vadd.f32 %v20607_v33, %v3826_v62  ;;  %15730 = vmatprep.mubr.f32.mxu1 %v24294_v44 }
 0x49c   :  { %v13212_v3 = vmul.f32 -1.442695, %v17192_v37 }
 0x49d   :  { %v13211_v13 = vmul.f32 -1.442695, %v17193_v48  ;;  %v15231_v29 = vpop.f32.mrb[34].mxu1  ;;  %v24297_v48 = vld [vmem:[#allocation59_spill] sm:$0xff] }
 0x49e   :  { %18240 = vpow2.f32 %v13212_v3  ;;  %v17194_v1 = vadd.f32 %v15231_v29, %v20607_v33  ;;  %v3838_v42 = vpop.f32.mrb[35].mxu1  ;;  %15731 = vmatmul.mubr.f32.gmra.mrb[76].mxu1 %v24295_v20  ;;  %v24298_v3 = vld [vmem:[#allocation62_spill] sm:$0xff] }
 0x49f   :  { %18242 = vpow2.f32 %v13211_v13  ;;  %v17195_v5 = vadd.f32 %v20607_v33, %v3838_v42  ;;  %15733 = vmatprep.mubr.f32.mxu1 %v24296_v18  ;;  %v24299_v13 = vand.u32 4294901760, %v20523_v34 }
 0x4a0   :  { %v13214_v12 = vmul.f32 -1.442695, %v17194_v1 }
 0x4a1   :  { %v13213_v53 = vmul.f32 -1.442695, %v17195_v5  ;;  %v15234_v60 = vpop.f32.mrb[36].mxu1  ;;  %v20625_v42 = vsub.f32 %v20523_v34, %v24299_v13  ;;  %v24301_v5 = vand.u32 4294901760, %v20525_v0 }
 0x4a2   :  { %18244 = vpow2.f32 %v13214_v12  ;;  %v17196_v62 = vadd.f32 %v15234_v60, %v20607_v33  ;;  %v3850_v37 = vpop.f32.mrb[37].mxu1  ;;  %15734 = vmatmul.mubr.f32.gmra.mrb[78].mxu1 %v24297_v48 }
 0x4a3   :  { %18246 = vpow2.f32 %v13213_v53  ;;  %v17197_v29 = vadd.f32 %v20607_v33, %v3850_v37  ;;  %15736 = vmatprep.mubr.f32.mxu1 %v24298_v3  ;;  %24300 = vst [vmem:[#allocation28_spill] sm:$0xff] %v20625_v42  ;;  %v20630_v12 = vsub.f32 %v20525_v0, %v24301_v5  ;;  %v24303_v37 = vld [vmem:[#allocation65_spill] sm:$0xff]  ;;  %v24307_v0 = vand.u32 4294901760, %v20625_v42 }
 0x4a4   :  { %v13216_v25 = vmul.f32 -1.442695, %v17196_v62 }
 0x4a5   :  { %24302 = vst [vmem:[#allocation50_spill] sm:$0xff] %v20630_v12  ;;  %v13215_v60 = vmul.f32 -1.442695, %v17197_v29  ;;  %v15237_v1 = vpop.f32.mrb[38].mxu1 }
 0x4a6   :  { %18248 = vpow2.f32 %v13216_v25  ;;  %v17198_v53 = vadd.f32 %v15237_v1, %v20607_v33  ;;  %v3862_v14 = vpop.f32.mrb[39].mxu1  ;;  %15737 = vmatmul.mubr.f32.gmra.mrb[80].mxu1 %v24303_v37 }
 0x4a7   :  { %18250 = vpow2.f32 %v13215_v60  ;;  %v17199_v62 = vadd.f32 %v20607_v33, %v3862_v14  ;;  %15739 = vmatprep.mubr.f32.mxu1 %v24304_v35  ;;  %v24305_v60 = vld [vmem:[#allocation69_spill] sm:$0xff] }
 0x4a8   :  { %v18241_v34 = vpop.eup %18240  ;;  %v13218_v13 = vmul.f32 -1.442695, %v17198_v53 }
 0x4a9   :  { %v18243_v5 = vpop.eup %18242  ;;  %v4113_v29 = vadd.f32 1.0, %v18241_v34  ;;  %v13217_v38 = vmul.f32 -1.442695, %v17199_v62  ;;  %v15240_v25 = vpop.f32.mrb[40].mxu1  ;;  %v4711_v62 = vsub.f32 %v20625_v42, %v24307_v0  ;;  %v24308_v34 = vand.u32 4294901760, %v20630_v12  ;;  %v24310_v0 = vld [vmem:[#allocation72_spill] sm:$0xff] }
 0x4aa   :  { %v4112_v51 = vadd.f32 1.0, %v18243_v5  ;;  %18252 = vpow2.f32 %v13218_v13  ;;  %v17200_v1 = vadd.f32 %v15240_v25, %v20607_v33  ;;  %v3874_v15 = vpop.f32.mrb[41].mxu1  ;;  %15740 = vmatmul.mubr.f32.gmra.mrb[82].mxu1 %v24305_v60 }
 0x4ab   :  { %18254 = vrcp.f32 %v4113_v29  ;;  %v17201_v14 = vadd.f32 %v20607_v33, %v3874_v15  ;;  %15742 = vmatprep.mubr.f32.mxu1 %v24306_v47  ;;  %v4718_v13 = vsub.f32 %v20630_v12, %v24308_v34  ;;  %v4712_v12 = vand.u32 4294901760, %v4711_v62 }
 0x4ac   :  { %v18245_v53 = vpop.eup %18244  ;;  %18256 = vrcp.f32 %v4112_v51  ;;  %v13220_v57 = vmul.f32 -1.442695, %v17200_v1  ;;  %v24309_v51 = vld [vmem:[#allocation71_spill] sm:$0xff] }
 0x4ad   :  { %v18247_v5 = vpop.eup %18246  ;;  %v4115_v25 = vadd.f32 1.0, %v18245_v53  ;;  %18258 = vpow2.f32 %v13217_v38  ;;  %v13219_v6 = vmul.f32 -1.442695, %v17201_v14  ;;  %v15243_v29 = vpop.f32.mrb[42].mxu1  ;;  %v4719_v53 = vand.u32 4294901760, %v4718_v13 }
 0x4ae   :  { %v4114_v56 = vadd.f32 1.0, %v18247_v5  ;;  %18260 = vpow2.f32 %v13220_v57  ;;  %v17202_v15 = vadd.f32 %v15243_v29, %v20607_v33  ;;  %v3886_v54 = vpop.f32.mrb[43].mxu1  ;;  %15743 = vmatmul.mubr.f32.gmra.mrb[84].mxu1 %v24309_v51 }
 0x4af   :  { %18262 = vrcp.f32 %v4115_v25  ;;  %v17203_v1 = vadd.f32 %v20607_v33, %v3886_v54  ;;  %15745 = vmatprep.mubr.f32.mxu1 %v24310_v0  ;;  %v24311_v25 = vld [vmem:[#allocation75_spill] sm:$0xff]  ;;  %v20656_v13 = vpack.c.bf16 %v4719_v53, %v4712_v12 }
 0x4b0   :  { %v18249_v8 = vpop.eup %18248  ;;  %18264 = vrcp.f32 %v4114_v56  ;;  %v13222_v34 = vmul.f32 -1.442695, %v17202_v15 }
 0x4b1   :  { %v18251_v38 = vpop.eup %18250  ;;  %v4117_v14 = vadd.f32 1.0, %v18249_v8  ;;  %18266 = vpow2.f32 %v13219_v6  ;;  %v13221_v5 = vmul.f32 -1.442695, %v17203_v1  ;;  %v15246_v57 = vpop.f32.mrb[44].mxu1  ;;  %24313 = vst [vmem:[#allocation53_spill] sm:$0xff] %v20656_v13 }
 0x4b2   :  { %v4116_v42 = vadd.f32 1.0, %v18251_v38  ;;  %18268 = vpow2.f32 %v13222_v34  ;;  %v17204_v29 = vadd.f32 %v15246_v57, %v20607_v33  ;;  %v3898_v61 = vpop.f32.mrb[45].mxu1  ;;  %15746 = vmatmul.mubr.f32.gmra.mrb[86].mxu1 %v24311_v25  ;;  %v20660_v34 = vpack.c.bf16 %v20559_v22, %v20554_v58 }
 0x4b3   :  { %18270 = vrcp.f32 %v4117_v14  ;;  %v17205_v54 = vadd.f32 %v20607_v33, %v3898_v61  ;;  %15748 = vmatprep.mubr.f32.mxu1 %v24312_v30 }
 0x4b4   :  { %v18253_v56 = vpop.eup %18252  ;;  %18272 = vrcp.f32 %v4116_v42  ;;  %v13224_v62 = vmul.f32 -1.442695, %v17204_v29  ;;  %24314 = vst [vmem:[#allocation57_spill] sm:$0xff] %v20660_v34 }
 0x4b5   :  { %v18255_v8 = vpop.eup %18254  ;;  %v4119_v6 = vadd.f32 1.0, %v18253_v56  ;;  %18274 = vpow2.f32 %v13221_v5  ;;  %v13223_v15 = vmul.f32 -1.442695, %v17205_v54  ;;  %v15249_v1 = vpop.f32.mrb[46].mxu1 }
 0x4b6   :  { %v18257_v38 = vpop.eup %18256  ;;  %v4212_v14 = vsel %vm2101_vm2, %v18255_v8, 0  ;;  %18276 = vpow2.f32 %v13224_v62  ;;  %v17206_v61 = vadd.f32 %v15249_v1, %v20607_v33  ;;  %v3910_v57 = vpop.f32.mrb[47].mxu1  ;;  %15749 = vmatmul.mubr.f32.gmra.mrb[88].mxu1 %v20459_v39  ;;  %v6123_v42 = vmul.f32 %v18255_v8, %v18255_v8 }
 0x4b7   :  { %v18259_v12 = vpop.eup %18258  ;;  %v20665_v53 = vand.u32 4294901760, %v4212_v14  ;;  %18278 = vrcp.f32 %v4119_v6  ;;  %v17207_v5 = vadd.f32 %v20607_v33, %v3910_v57  ;;  %15751 = vmatprep.mubr.f32.mxu1 %v20464_v32  ;;  %v6122_v29 = vmul.f32 %v18257_v38, %v18257_v38 }
 0x4b8   :  { %v18261_v54 = vpop.eup %18260  ;;  %v4118_v56 = vadd.f32 1.0, %v18259_v12  ;;  %18280 = vpow2.f32 %v13223_v15  ;;  %v13226_v22 = vmul.f32 -1.442695, %v17206_v61  ;;  %v6157_v62 = vsel %vm2101_vm2, %v6123_v42, 0.0  ;;  %v24317_v61 = vld [vmem:[#allocation81_spill] sm:$0xff] }
 0x4b9   :  { %24315 = vst [vmem:[#allocation63_spill] sm:$0xff] %v20665_v53  ;;  %v20670_v1 = vpop.eup %18262  ;;  %v20673_v58 = vsub.f32 %v4212_v14, %v20665_v53  ;;  %v4121_v8 = vadd.f32 1.0, %v18261_v54  ;;  %v13225_v40 = vmul.f32 -1.442695, %v17207_v5  ;;  %6158 = vadd.xlane.f32.xlu1 %v6157_v62  ;;  %v15252_v6 = vpop.f32.mrb[48].mxu1  ;;  %v6154_v57 = vsel %vm2101_vm2, %v6122_v29, 0.0 }
 0x4ba   :  { %v20676_v50 = vpop.eup %18264  ;;  %18282 = vrcp.f32 %v4118_v56  ;;  %v17208_v12 = vadd.f32 %v15252_v6, %v20607_v33  ;;  %v3922_v15 = vpop.f32.mrb[49].mxu1  ;;  %15752 = vmatmul.mubr.f32.gmra.mrb[90].mxu1 %v24317_v61  ;;  %6155 = vadd.xlane.f32.xlu0 %v6154_v57  ;;  %v6125_v42 = vmul.f32 %v20670_v1, %v20670_v1  ;;  %v4209_v14 = vsel %vm2101_vm2, %v18257_v38, 0 }
 0x4bb   :  { %24316 = vst [vmem:[#allocation26_spill] sm:$0xff] %v20673_v58  ;;  %v18267_v54 = vpop.eup %18266  ;;  %18284 = vrcp.f32 %v4121_v8  ;;  %v17209_v5 = vadd.f32 %v20607_v33, %v3922_v15  ;;  %15754 = vmatprep.mubr.f32.mxu1 %v20484_v26  ;;  %v6124_v29 = vmul.f32 %v20676_v50, %v20676_v50  ;;  %v20687_v56 = vand.u32 4294901760, %v4209_v14 }
 0x4bc   :  { %v18269_v62 = vpop.eup %18268  ;;  %v4120_v6 = vadd.f32 1.0, %v18267_v54  ;;  %18286 = vpow2.f32 %v13226_v22  ;;  %v13228_v57 = vmul.f32 -1.442695, %v17208_v12  ;;  %v6163_v53 = vsel %vm2101_vm2, %v6125_v42, 0.0 }
 0x4bd   :  { %24318 = vst [vmem:[#allocation52_spill] sm:$0xff] %v20687_v56  ;;  %v20690_v59 = vpop.eup %18270  ;;  %v4123_v38 = vadd.f32 1.0, %v18269_v62  ;;  %18288 = vpow2.f32 %v13225_v40  ;;  %v13227_v8 = vmul.f32 -1.442695, %v17209_v5  ;;  %6164 = vadd.xlane.f32.xlu1 %v6163_v53  ;;  %v15255_v15 = vpop.f32.mrb[50].mxu1  ;;  %v6160_v43 = vsel %vm2101_vm2, %v6124_v29, 0.0 }
 0x4be   :  { %v20693_v23 = vpop.eup %18272  ;;  %18290 = vrcp.f32 %v4120_v6  ;;  %v17210_v17 = vadd.f32 %v15255_v15, %v20607_v33  ;;  %v3934_v9 = vpop.f32.mrb[51].mxu1  ;;  %15755 = vmatmul.mubr.f32.gmra.mrb[92].mxu1 %v20494_v36  ;;  %6161 = vadd.xlane.f32.xlu0 %v6160_v43  ;;  %v6127_v22 = vmul.f32 %v20690_v59, %v20690_v59  ;;  %v20700_v12 = vsub.f32 %v4209_v14, %v20687_v56 }
 0x4bf   :  { %v18275_v40 = vpop.eup %18274  ;;  %18292 = vrcp.f32 %v4123_v38  ;;  %v17211_v53 = vadd.f32 %v20607_v33, %v3934_v9  ;;  %15757 = vmatprep.mubr.f32.mxu1 %v20503_v21  ;;  %v6126_v42 = vmul.f32 %v20693_v23, %v20693_v23 }
 0x4c0   :  { %v18277_v5 = vpop.eup %18276  ;;  %v4122_v29 = vadd.f32 1.0, %v18275_v40  ;;  %18294 = vpow2.f32 %v13228_v57  ;;  %v13230_v43 = vmul.f32 -1.442695, %v17210_v17  ;;  %v6169_v62 = vsel %vm2101_vm2, %v6127_v22, 0.0 }
 0x4c1   :  { %v20708_v6 = vpop.eup %18278  ;;  %v4125_v14 = vadd.f32 1.0, %v18277_v5  ;;  %18296 = vpow2.f32 %v13227_v8  ;;  %v13229_v38 = vmul.f32 -1.442695, %v17211_v53  ;;  %6170 = vadd.xlane.f32.xlu1 %v6169_v62  ;;  %v15258_v9 = vpop.f32.mrb[52].mxu1  ;;  %v6166_v15 = vsel %vm2101_vm2, %v6126_v42, 0.0 }
 0x4c2   :  { %v18281_v56 = vpop.eup %18280  ;;  %18298 = vrcp.f32 %v4122_v29  ;;  %v17212_v63 = vadd.f32 %v15258_v9, %v20607_v33  ;;  %v3946_v54 = vpop.f32.mrb[53].mxu1  ;;  %15758 = vmatmul.mubr.f32.gmra.mrb[94].mxu1 %v20510_v27  ;;  %6167 = vadd.xlane.f32.xlu0 %v6166_v15  ;;  %v23744_v17 = vand.u32 4294901760, %v20700_v12  ;;  %v24319_v57 = vand.u32 4294901760, %v20673_v58 }
 0x4c3   :  { %18300 = vrcp.f32 %v4125_v14  ;;  %v4124_v8 = vadd.f32 1.0, %v18281_v56  ;;  %v17213_v40 = vadd.f32 %v20607_v33, %v3946_v54  ;;  %v24320_v53 = vand.u32 4294901760, %v20193_v31 }
 0x4c4   :  { %v4386_v22 = vsub.f32 %v20673_v58, %v24319_v57  ;;  %v6129_v42 = vmul.f32 %v20708_v6, %v20708_v6  ;;  %v20722_v5 = vpop.eup %18282  ;;  %18302 = vpow2.f32 %v13230_v43  ;;  %v13232_v29 = vmul.f32 -1.442695, %v17212_v63 }
 0x4c5   :  { %15762 = vmatprep.mubr.f32.mxu1 %v24320_v53  ;;  %v4376_v62 = vsub.f32 %v20700_v12, %v23744_v17  ;;  %v20727_v15 = vpop.eup %18284  ;;  %18304 = vrcp.f32 %v4124_v8  ;;  %v13231_v56 = vmul.f32 -1.442695, %v17213_v40  ;;  %v15261_v31 = vpop.f32.mrb[54].mxu1  ;;  %v6128_v14 = vmul.f32 %v20722_v5, %v20722_v5 }
 0x4c6   :  { %v4387_v9 = vand.u32 4294901760, %v4386_v22  ;;  %v6175_v54 = vsel %vm2101_vm2, %v6129_v42, 0.0  ;;  %v18287_v57 = vpop.eup %18286  ;;  %18306 = vpow2.f32 %v13229_v38  ;;  %v17214_v63 = vadd.f32 %v15261_v31, %v20607_v33  ;;  %v3958_v43 = vpop.f32.mrb[55].mxu1 }
 0x4c7   :  { %v4377_v53 = vand.u32 4294901760, %v4376_v62  ;;  %6176 = vadd.xlane.f32.xlu1 %v6175_v54  ;;  %v24321_v17 = vand.u32 4294901760, %v20200_v28  ;;  %v4215_v22 = vsel %vm2101_vm2, %v20676_v50, 0  ;;  %v18289_v8 = vpop.eup %18288  ;;  %v4127_v40 = vadd.f32 1.0, %v18287_v57 }
 0x4c8   :  { %18308 = vpow2.f32 %v13232_v29  ;;  %v17215_v42 = vadd.f32 %v20607_v33, %v3958_v43  ;;  %v6172_v58 = vsel %vm2101_vm2, %v6128_v14, 0.0  ;;  %v24322_v38 = vand.u32 4294901760, %v20203_v55  ;;  %v20742_v62 = vpop.eup %18290 }
 0x4c9   :  { %15763 = vmatmul.mubr.f32.vlgmr.msra.gmra.mrb[64].mxu1 %v24321_v17  ;;  %v4126_v54 = vadd.f32 1.0, %v18289_v8  ;;  %18310 = vpow2.f32 %v13231_v56  ;;  %15282 = vmatprep.mubr.f32.mxu0 %v4377_v53  ;;  %v13234_v28 = vmul.f32 -1.442695, %v17214_v63  ;;  %v20744_v50 = vand.u32 4294901760, %v4215_v22  ;;  %v20746_v17 = vpop.eup %18292  ;;  %v15264_v31 = vpop.f32.mrb[56].mxu1 }
 0x4ca   :  { %15765 = vmatprep.mubr.f32.mxu1 %v24322_v38  ;;  %15811 = vmatpush3.msra.mxu1 %v24289_v49  ;;  %18312 = vrcp.f32 %v4127_v40  ;;  %v13233_v29 = vmul.f32 -1.442695, %v17215_v42  ;;  %v4218_v55 = vsel %vm2101_vm2, %v20670_v1, 0  ;;  %v6131_v49 = vmul.f32 %v20727_v15, %v20727_v15  ;;  %v18295_v56 = vpop.eup %18294  ;;  %v3970_v57 = vpop.f32.mrb[57].mxu1 }
 0x4cb   :  { %6173 = vadd.xlane.f32.xlu0 %v6172_v58  ;;  %24323 = vst [vmem:[#allocation51_spill] sm:$0xff] %v20744_v50  ;;  %15283 = vmatmul.mubr.f32.vlgmr.msra.gmra.mrb[32].mxu0 %v4387_v9  ;;  %18314 = vrcp.f32 %v4126_v54  ;;  %v20755_v58 = vsub.f32 %v4215_v22, %v20744_v50  ;;  %v20757_v14 = vand.u32 4294901760, %v4218_v55  ;;  %v17216_v9 = vadd.f32 %v15264_v31, %v20607_v33  ;;  %v18297_v53 = vpop.eup %18296 }
 0x4cc   :  { %15860 = vmatprep.subr.mxu1 %v24209_v46  ;;  %16851 = vmatpush3.bf16.msra.mxu0 %v20573_v7  ;;  %v24326_v1 = vand.u32 4294901760, %v20212_v10  ;;  %v4129_v63 = vadd.f32 1.0, %v18295_v56  ;;  %18316 = vpow2.f32 %v13234_v28  ;;  %v6181_v43 = vsel %vm2101_vm2, %v6131_v49, 0.0  ;;  %v20767_v22 = vpop.eup %18298 }
 0x4cd   :  { %24324 = vst [vmem:[#allocation59_spill] sm:$0xff] %v20755_v58  ;;  %24325 = vst [vmem:[#allocation62_spill] sm:$0xff] %v20757_v14  ;;  %v17217_v8 = vadd.f32 %v20607_v33, %v3970_v57  ;;  %v24327_v40 = vand.u32 4294901760, %v20224_v16  ;;  %16853 = vmatprep.subr.bf16.mxu0 %v20656_v13  ;;  %v4128_v42 = vadd.f32 1.0, %v18297_v53  ;;  %18318 = vpow2.f32 %v13233_v29  ;;  %6182 = vadd.xlane.f32.xlu1 %v6181_v43  ;;  %v20773_v54 = vpop.eup %18300  ;;  %v15267_v31 = vpop.f32.mrb[58].mxu1 }
 0x4ce   :  { %15766 = vmatmul.mubr.f32.gmra.mrb[66].mxu1 %v24326_v1  ;;  %v23747_v38 = vand.u32 4294901760, %v20755_v58  ;;  %v20771_v10 = vsub.f32 %v4218_v55, %v20757_v14  ;;  %18320 = vrcp.f32 %v4129_v63  ;;  %v13236_v28 = vmul.f32 -1.442695, %v17216_v9  ;;  %v18303_v56 = vpop.eup %18302  ;;  %v3982_v1 = vpop.f32.mrb[59].mxu1 }
 0x4cf   :  { %15768 = vmatprep.mubr.f32.mxu1 %v24327_v40  ;;  %v13235_v49 = vmul.f32 -1.442695, %v17217_v8  ;;  %v6130_v16 = vmul.f32 %v20742_v62, %v20742_v62  ;;  %18322 = vrcp.f32 %v4128_v42  ;;  %v4221_v55 = vsel %vm2101_vm2, %v20693_v23, 0  ;;  %v20786_v9 = vpop.eup %18304 }
 0x4d0   :  { %24328 = vst [vmem:[#allocation65_spill] sm:$0xff] %v20771_v10  ;;  %v4396_v29 = vsub.f32 %v20755_v58, %v23747_v38  ;;  %v23750_v57 = vand.u32 4294901760, %v20771_v10  ;;  %v24329_v53 = vand.u32 4294901760, %v20239_v45  ;;  %16855 = vmatpush3.bf16.msra.mxu0 %v20656_v13  ;;  %v4131_v63 = vadd.f32 1.0, %v18303_v56  ;;  %v18307_v23 = vpop.eup %18306 }
 0x4d1   :  { %18324 = vpow2.f32 %v13236_v28  ;;  %v6178_v43 = vsel %vm2101_vm2, %v6130_v16, 0.0  ;;  %v20789_v8 = vand.u32 4294901760, %v4221_v55  ;;  %v24331_v40 = vand.u32 4294901760, %v20247_v41  ;;  %16857 = vmatprep.subr.bf16.mxu0 %v20660_v34 }
 0x4d2   :  { %15769 = vmatmul.mubr.f32.gmra.mrb[68].mxu1 %v24329_v53  ;;  %v4397_v42 = vand.u32 4294901760, %v4396_v29  ;;  %v4406_v45 = vsub.f32 %v20771_v10, %v23750_v57  ;;  %18326 = vpow2.f32 %v13235_v49  ;;  %6179 = vadd.xlane.f32.xlu0 %v6178_v43  ;;  %v4224_v28 = vsel %vm2101_vm2, %v20690_v59, 0  ;;  %v18309_v56 = vpop.eup %18308 }
 0x4d3   :  { %24330 = vst [vmem:[#allocation67_spill] sm:$0xff] %v20789_v8  ;;  %15771 = vmatprep.mubr.f32.mxu1 %v24331_v40  ;;  %18328 = vrcp.f32 %v4131_v63  ;;  %v4130_v16 = vadd.f32 1.0, %v18307_v23  ;;  %v20800_v53 = vsub.f32 %v4221_v55, %v20789_v8  ;;  %v20802_v41 = vand.u32 4294901760, %v4224_v28  ;;  %v15270_v40 = vpop.f32.mrb[60].mxu1  ;;  %v18311_v38 = vpop.eup %18310 }
 0x4d4   :  { %v4133_v29 = vadd.f32 1.0, %v18309_v56  ;;  %15285 = vmatprep.mubr.f32.mxu0 %v4397_v42  ;;  %v4407_v13 = vand.u32 4294901760, %v4406_v45  ;;  %v6133_v49 = vmul.f32 %v20746_v17, %v20746_v17  ;;  %v17218_v43 = vadd.f32 %v15267_v31, %v20607_v33  ;;  %v3994_v57 = vpop.f32.mrb[61].mxu1  ;;  %v20809_v63 = vpop.eup %18312 }
 0x4d5   :  { %24332 = vst [vmem:[#allocation69_spill] sm:$0xff] %v20800_v53  ;;  %24333 = vst [vmem:[#allocation70_spill] sm:$0xff] %v20802_v41  ;;  %v24334_v59 = vand.u32 4294901760, %v20258_v4  ;;  %18330 = vrcp.f32 %v4130_v16  ;;  %v4132_v55 = vadd.f32 1.0, %v18311_v38  ;;  %v23753_v23 = vand.u32 4294901760, %v20800_v53  ;;  %v20817_v45 = vpop.eup %18314  ;;  %v20827_v16 = vpop.f32.mrb[62].mxu1 }
 0x4d6   :  { %v20813_v10 = vsub.f32 %v4224_v28, %v20802_v41  ;;  %v24335_v42 = vand.u32 4294901760, %v24290_v11  ;;  %18332 = vrcp.f32 %v4133_v29  ;;  %15286 = vmatmul.mubr.f32.gmra.mrb[34].mxu0 %v4407_v13  ;;  %v6187_v31 = vsel %vm2101_vm2, %v6133_v49, 0.0 }
 0x4d7   :  { %15772 = vmatmul.mubr.f32.gmra.mrb[70].mxu1 %v24334_v59  ;;  %v13238_v4 = vmul.f32 -1.442695, %v17218_v43  ;;  %v17219_v56 = vadd.f32 %v20607_v33, %v3982_v1  ;;  %v18317_v59 = vpop.eup %18316  ;;  %18334 = vrcp.f32 %v4132_v55  ;;  %v4416_v38 = vsub.f32 %v20800_v53, %v23753_v23  ;;  %6188 = vadd.xlane.f32.xlu1 %v6187_v31  ;;  %v4006_v43 = vpop.f32.mrb[63].mxu1 }
 0x4d8   :  { %15774 = vmatprep.mubr.f32.mxu1 %v24335_v42  ;;  %v23758_v28 = vand.u32 4294901760, %v20813_v10  ;;  %v6132_v11 = vmul.f32 %v20767_v22, %v20767_v22  ;;  %v18319_v13 = vpop.eup %18318  ;;  %v4135_v29 = vadd.f32 1.0, %v18317_v59  ;;  %v4227_v1 = vsel %vm2101_vm2, %v20722_v5, 0 }
 0x4d9   :  { %18336 = vpow2.f32 %v13238_v4  ;;  %v13237_v49 = vmul.f32 -1.442695, %v17219_v56  ;;  %v24336_v55 = vand.u32 4294901760, %v24291_v52  ;;  %v20833_v42 = vpop.eup %18320  ;;  %v4134_v23 = vadd.f32 1.0, %v18319_v13 }
 0x4da   :  { %v4417_v31 = vand.u32 4294901760, %v4416_v38  ;;  %v4426_v53 = vsub.f32 %v20813_v10, %v23758_v28  ;;  %v6184_v58 = vsel %vm2101_vm2, %v6132_v11, 0.0  ;;  %v24337_v4 = vand.u32 4294901760, %v24292_v19  ;;  %v20841_v56 = vpop.eup %18322 }
 0x4db   :  { %15775 = vmatmul.mubr.f32.gmra.mrb[72].mxu1 %v24336_v55  ;;  %18338 = vrcp.f32 %v4135_v29  ;;  %6185 = vadd.xlane.f32.xlu0 %v6184_v58  ;;  %v20843_v5 = vand.u32 4294901760, %v4227_v1  ;;  %v4230_v52 = vsel %vm2101_vm2, %v20708_v6, 0  ;;  %v6135_v59 = vmul.f32 %v20773_v54, %v20773_v54  ;;  %v18325_v38 = vpop.eup %18324 }
 0x4dc   :  { %15777 = vmatprep.mubr.f32.mxu1 %v24337_v4  ;;  %18340 = vrcp.f32 %v4134_v23  ;;  %15288 = vmatprep.mubr.f32.mxu0 %v4417_v31  ;;  %v4427_v13 = vand.u32 4294901760, %v4426_v53  ;;  %v20849_v11 = vand.u32 4294901760, %v4230_v52  ;;  %v17220_v19 = vadd.f32 %v15270_v40, %v20607_v33  ;;  %v18327_v55 = vpop.eup %18326 }
 0x4dd   :  { %24338 = vst [vmem:[#allocation71_spill] sm:$0xff] %v20843_v5  ;;  %v4137_v4 = vadd.f32 1.0, %v18325_v38  ;;  %18342 = vpow2.f32 %v13237_v49  ;;  %v20853_v58 = vsub.f32 %v4227_v1, %v20843_v5  ;;  %v6193_v29 = vsel %vm2101_vm2, %v6135_v59, 0.0  ;;  %v20858_v28 = vpop.eup %18328 }
 0x4de   :  { %24339 = vst [vmem:[#allocation72_spill] sm:$0xff] %v20849_v11  ;;  %v24340_v6 = vand.u32 4294901760, %v24293_v24  ;;  %v4136_v23 = vadd.f32 1.0, %v18327_v55  ;;  %15289 = vmatmul.mubr.f32.gmra.mrb[36].mxu0 %v4427_v13  ;;  %v20861_v53 = vsub.f32 %v4230_v52, %v20849_v11  ;;  %6194 = vadd.xlane.f32.xlu1 %v6193_v29  ;;  %v13240_v40 = vmul.f32 -1.442695, %v17220_v19 }
 0x4df   :  { %v17221_v31 = vadd.f32 %v20607_v33, %v3994_v57  ;;  %18344 = vrcp.f32 %v4137_v4  ;;  %v23760_v49 = vand.u32 4294901760, %v20853_v58  ;;  %v6134_v1 = vmul.f32 %v20786_v9, %v20786_v9  ;;  %v20871_v38 = vpop.eup %18330 }
 0x4e0   :  { %15778 = vmatmul.mubr.f32.gmra.mrb[74].mxu1 %v24340_v6  ;;  %24341 = vst [vmem:[#allocation75_spill] sm:$0xff] %v20861_v53  ;;  %v4233_v24 = vsel %vm2101_vm2, %v20742_v62, 0  ;;  %v24342_v59 = vand.u32 4294901760, %v24294_v44  ;;  %18346 = vrcp.f32 %v4136_v23  ;;  %v23759_v52 = vand.u32 4294901760, %v20861_v53  ;;  %v20876_v57 = vpop.eup %18332 }
 0x4e1   :  { %v13239_v13 = vmul.f32 -1.442695, %v17221_v31  ;;  %v20874_v19 = vand.u32 4294901760, %v4233_v24  ;;  %v4436_v55 = vsub.f32 %v20853_v58, %v23760_v49  ;;  %18348 = vpow2.f32 %v13240_v40  ;;  %v20886_v29 = vpop.eup %18334 }
 0x4e2   :  { %15780 = vmatprep.mubr.f32.mxu1 %v24342_v59  ;;  %v6190_v62 = vsel %vm2101_vm2, %v6134_v1, 0.0  ;;  %v4236_v44 = vsel %vm2101_vm2, %v20727_v15, 0  ;;  %v24344_v4 = vand.u32 4294901760, %v24295_v20  ;;  %v4446_v6 = vsub.f32 %v20861_v53, %v23759_v52 }
 0x4e3   :  { %24343 = vst [vmem:[#allocation76_spill] sm:$0xff] %v20874_v19  ;;  %18350 = vpow2.f32 %v13239_v13  ;;  %6191 = vadd.xlane.f32.xlu0 %v6190_v62  ;;  %v20892_v23 = vsub.f32 %v4233_v24, %v20874_v19  ;;  %v20894_v40 = vand.u32 4294901760, %v4236_v44  ;;  %v24346_v31 = vand.u32 4294901760, %v24296_v18  ;;  %v18337_v15 = vpop.eup %18336 }
 0x4e4   :  { %15781 = vmatmul.mubr.f32.gmra.mrb[76].mxu1 %v24344_v4  ;;  %v4437_v1 = vand.u32 4294901760, %v4436_v55  ;;  %v6137_v20 = vmul.f32 %v20809_v63, %v20809_v63  ;;  %v17222_v59 = vadd.f32 %v20827_v16, %v20607_v33  ;;  %v17223_v4 = vadd.f32 %v20607_v33, %v4006_v43 }
 0x4e5   :  { %24345 = vst [vmem:[#allocation81_spill] sm:$0xff] %v20894_v40  ;;  %15783 = vmatprep.mubr.f32.mxu1 %v24346_v31  ;;  %v4139_v13 = vadd.f32 1.0, %v18337_v15  ;;  %v4447_v62 = vand.u32 4294901760, %v4446_v6  ;;  %v23765_v24 = vand.u32 4294901760, %v20892_v23  ;;  %v20905_v52 = vsub.f32 %v4236_v44, %v20894_v40  ;;  %v20907_v49 = vpop.eup %18338 }
 0x4e6   :  { %15291 = vmatprep.mubr.f32.mxu0 %v4437_v1  ;;  %v6199_v18 = vsel %vm2101_vm2, %v6137_v20, 0.0  ;;  %v13242_v55 = vmul.f32 -1.442695, %v17222_v59  ;;  %v13241_v31 = vmul.f32 -1.442695, %v17223_v4  ;;  %v6136_v53 = vmul.f32 %v20817_v45, %v20817_v45  ;;  %v20914_v33 = vpop.eup %18340 }
 0x4e7   :  { %v24347_v16 = vand.u32 4294901760, %v24297_v48  ;;  %18352 = vrcp.f32 %v4139_v13  ;;  %15292 = vmatmul.mubr.f32.gmra.mrb[38].mxu0 %v4447_v62  ;;  %v4456_v43 = vsub.f32 %v20892_v23, %v23765_v24  ;;  %v23763_v44 = vand.u32 4294901760, %v20905_v52  ;;  %6200 = vadd.xlane.f32.xlu1 %v6199_v18  ;;  %v18343_v15 = vpop.eup %18342 }
 0x4e8   :  { %v4239_v6 = vsel %vm2101_vm2, %v20767_v22, 0  ;;  %18354 = vpow2.f32 %v13242_v55  ;;  %v6196_v1 = vsel %vm2101_vm2, %v6136_v53, 0.0  ;;  %v4242_v20 = vsel %vm2101_vm2, %v20746_v17, 0 }
 0x4e9   :  { %15784 = vmatmul.mubr.f32.gmra.mrb[78].mxu1 %v24347_v16  ;;  %v20923_v48 = vand.u32 4294901760, %v4239_v6  ;;  %v24349_v59 = vand.u32 4294901760, %v24298_v3  ;;  %v4138_v4 = vadd.f32 1.0, %v18343_v15  ;;  %v4457_v13 = vand.u32 4294901760, %v4456_v43  ;;  %6197 = vadd.xlane.f32.xlu0 %v6196_v1  ;;  %v20932_v22 = vpop.eup %18344 }
 0x4ea   :  { %v4466_v62 = vsub.f32 %v20905_v52, %v23763_v44  ;;  %18356 = vpow2.f32 %v13241_v31  ;;  %v20937_v18 = vand.u32 4294901760, %v4242_v20  ;;  %v6139_v17 = vmul.f32 %v20833_v42, %v20833_v42  ;;  %v20945_v16 = vpop.eup %18346 }
 0x4eb   :  { %24348 = vst [vmem:[#allocation89_spill] sm:$0xff] %v20923_v48  ;;  %15786 = vmatprep.mubr.f32.mxu1 %v24349_v59  ;;  %v20935_v53 = vsub.f32 %v4239_v6, %v20923_v48  ;;  %v4245_v3 = vsel %vm2101_vm2, %v20786_v9, 0  ;;  %v24351_v55 = vand.u32 4294901760, %v24303_v37  ;;  %18358 = vrcp.f32 %v4138_v4  ;;  %15294 = vmatprep.mubr.f32.mxu0 %v4457_v13  ;;  %v18349_v1 = vpop.eup %18348 }
 0x4ec   :  { %24350 = vst [vmem:[#allocation90_spill] sm:$0xff] %v20937_v18  ;;  %v4467_v31 = vand.u32 4294901760, %v4466_v62  ;;  %v20947_v43 = vand.u32 4294901760, %v4245_v3  ;;  %v4248_v6 = vsel %vm2101_vm2, %v20773_v54, 0  ;;  %v24353_v15 = vand.u32 4294901760, %v24304_v35 }
 0x4ed   :  { %15787 = vmatmul.mubr.f32.gmra.mrb[80].mxu1 %v24351_v55  ;;  %v23764_v59 = vand.u32 4294901760, %v20935_v53  ;;  %v20955_v9 = vsub.f32 %v4242_v20, %v20937_v18  ;;  %v6205_v37 = vsel %vm2101_vm2, %v6139_v17, 0.0  ;;  %v20958_v55 = vand.u32 4294901760, %v4248_v6  ;;  %v18351_v4 = vpop.eup %18350 }
 0x4ee   :  { %24352 = vst [vmem:[#allocation91_spill] sm:$0xff] %v20947_v43  ;;  %15789 = vmatprep.mubr.f32.mxu1 %v24353_v15  ;;  %v4141_v13 = vadd.f32 1.0, %v18349_v1  ;;  %15295 = vmatmul.mubr.f32.gmra.mrb[40].mxu0 %v4467_v31  ;;  %v20961_v62 = vsub.f32 %v4245_v3, %v20947_v43  ;;  %v6141_v35 = vmul.f32 %v20858_v28, %v20858_v28  ;;  %v4140_v15 = vadd.f32 1.0, %v18351_v4 }
 0x4ef   :  { %24354 = vst [vmem:[#allocation92_spill] sm:$0xff] %v20958_v55  ;;  %6206 = vadd.xlane.f32.xlu0 %v6205_v37  ;;  %v6138_v54 = vmul.f32 %v20841_v56, %v20841_v56  ;;  %v4476_v20 = vsub.f32 %v20935_v53, %v23764_v59  ;;  %v23767_v17 = vand.u32 4294901760, %v20955_v9  ;;  %v20972_v1 = vsub.f32 %v4248_v6, %v20958_v55 }
 0x4f0   :  { %24355 = vst [vmem:[#allocation93_spill] sm:$0xff] %v20961_v62  ;;  %v24357_v31 = vand.u32 4294901760, %v24305_v60  ;;  %18360 = vrcp.f32 %v4141_v13  ;;  %v23766_v3 = vand.u32 4294901760, %v20961_v62  ;;  %v6211_v37 = vsel %vm2101_vm2, %v6141_v35, 0.0 }
 0x4f1   :  { %24356 = vst [vmem:[#allocation94_spill] sm:$0xff] %v20972_v1  ;;  %v6202_v44 = vsel %vm2101_vm2, %v6138_v54, 0.0  ;;  %v24358_v4 = vand.u32 4294901760, %v24306_v47  ;;  %18362 = vrcp.f32 %v4140_v15  ;;  %v4477_v59 = vand.u32 4294901760, %v4476_v20  ;;  %6212 = vadd.xlane.f32.xlu1 %v6211_v37  ;;  %v20985_v60 = vpop.eup %18352 }
 0x4f2   :  { %15790 = vmatmul.mubr.f32.gmra.mrb[82].mxu1 %v24357_v31  ;;  %v4486_v6 = vsub.f32 %v20955_v9, %v23767_v17  ;;  %v23770_v24 = vand.u32 4294901760, %v20972_v1  ;;  %v4496_v13 = vsub.f32 %v20961_v62, %v23766_v3  ;;  %v4251_v47 = vsel %vm2101_vm2, %v20817_v45, 0  ;;  %v18355_v15 = vpop.eup %18354 }
 0x4f3   :  { %15792 = vmatprep.mubr.f32.mxu1 %v24358_v4  ;;  %6203 = vadd.xlane.f32.xlu0 %v6202_v44  ;;  %v4254_v35 = vsel %vm2101_vm2, %v20809_v63, 0  ;;  %v6140_v54 = vmul.f32 %v20871_v38, %v20871_v38  ;;  %v20999_v37 = vand.u32 4294901760, %v4251_v47  ;;  %v24361_v44 = vand.u32 4294901760, %v24309_v51 }
 0x4f4   :  { %15297 = vmatprep.mubr.f32.mxu0 %v4477_v59  ;;  %v4487_v20 = vand.u32 4294901760, %v4486_v6  ;;  %v4506_v31 = vsub.f32 %v20972_v1, %v23770_v24  ;;  %v21001_v4 = vand.u32 4294901760, %v4254_v35  ;;  %v18357_v45 = vpop.eup %18356  ;;  %v4143_v3 = vadd.f32 1.0, %v18355_v15 }
 0x4f5   :  { %24359 = vst [vmem:[#allocation95_spill] sm:$0xff] %v20999_v37  ;;  %v4497_v63 = vand.u32 4294901760, %v4496_v13  ;;  %v6208_v17 = vsel %vm2101_vm2, %v6140_v54, 0.0  ;;  %v6142_v59 = vmul.f32 %v20886_v29, %v20886_v29  ;;  %v24362_v6 = vand.u32 4294901760, %v24310_v0  ;;  %v21016_v15 = vpop.eup %18358 }
 0x4f6   :  { %24360 = vst [vmem:[#allocation96_spill] sm:$0xff] %v21001_v4  ;;  %15793 = vmatmul.mubr.f32.gmra.mrb[84].mxu1 %v24361_v44  ;;  %v4142_v62 = vadd.f32 1.0, %v18357_v45  ;;  %15298 = vmatmul.mubr.f32.gmra.mrb[42].mxu0 %v4487_v20  ;;  %v4507_v24 = vand.u32 4294901760, %v4506_v31  ;;  %v21011_v1 = vsub.f32 %v4251_v47, %v20999_v37  ;;  %v21014_v51 = vsub.f32 %v4254_v35, %v21001_v4 }
 0x4f7   :  { %15795 = vmatprep.mubr.f32.mxu1 %v24362_v6  ;;  %6209 = vadd.xlane.f32.xlu1 %v6208_v17  ;;  %18364 = vrcp.f32 %v4143_v3  ;;  %v6214_v13 = vsel %vm2101_vm2, %v6142_v59, 0.0  ;;  %v4257_v0 = vsel %vm2101_vm2, %v20841_v56, 0  ;;  %v4260_v54 = vsel %vm2101_vm2, %v20833_v42, 0 }
 0x4f8   :  { %15300 = vmatprep.mubr.f32.mxu0 %v4497_v63  ;;  %18366 = vrcp.f32 %v4142_v62  ;;  %v23774_v47 = vand.u32 4294901760, %v21011_v1  ;;  %v23773_v20 = vand.u32 4294901760, %v21014_v51  ;;  %6215 = vadd.xlane.f32.xlu0 %v6214_v13  ;;  %v21025_v35 = vand.u32 4294901760, %v4257_v0 }
 0x4f9   :  { %v24363_v17 = vand.u32 4294901760, %v24311_v25  ;;  %v21029_v3 = vand.u32 4294901760, %v4260_v54  ;;  %v6143_v31 = vmul.f32 %v20876_v57, %v20876_v57  ;;  %v6144_v56 = vmul.f32 %v20914_v33, %v20914_v33 }
 0x4fa   :  { %v4263_v42 = vsel %vm2101_vm2, %v20871_v38, 0  ;;  %v24364_v62 = vand.u32 4294901760, %v24312_v30  ;;  %15301 = vmatmul.mubr.f32.gmra.mrb[44].mxu0 %v4507_v24  ;;  %v4516_v25 = vsub.f32 %v21011_v1, %v23774_v47  ;;  %v4526_v44 = vsub.f32 %v21014_v51, %v23773_v20  ;;  %v21050_v59 = vpop.eup %18360 }
 0x4fb   :  { %15796 = vmatmul.mubr.f32.gmra.mrb[86].mxu1 %v24363_v17  ;;  %v21046_v45 = vsub.f32 %v4257_v0, %v21025_v35  ;;  %v21048_v63 = vand.u32 4294901760, %v4263_v42  ;;  %v21053_v38 = vsub.f32 %v4260_v54, %v21029_v3  ;;  %v6217_v30 = vsel %vm2101_vm2, %v6143_v31, 0.0  ;;  %v21059_v13 = vpop.eup %18362 }
 0x4fc   :  { %15798 = vmatprep.mubr.f32.mxu1 %v24364_v62  ;;  %v6220_v24 = vsel %vm2101_vm2, %v6144_v56, 0.0  ;;  %v4266_v6 = vsel %vm2101_vm2, %v20858_v28, 0  ;;  %v4517_v17 = vand.u32 4294901760, %v4516_v25  ;;  %v4527_v62 = vand.u32 4294901760, %v4526_v44  ;;  %6218 = vadd.xlane.f32.xlu1 %v6217_v30 }
 0x4fd   :  { %24365 = vst [vmem:[#allocation97_spill] sm:$0xff] %v21046_v45  ;;  %24366 = vst [vmem:[#allocation98_spill] sm:$0xff] %v21053_v38  ;;  %v23775_v0 = vand.u32 4294901760, %v21046_v45  ;;  %6221 = vadd.xlane.f32.xlu0 %v6220_v24  ;;  %v21063_v20 = vsub.f32 %v4263_v42, %v21048_v63  ;;  %v23776_v54 = vand.u32 4294901760, %v21053_v38  ;;  %v21066_v47 = vand.u32 4294901760, %v4266_v6 }
 0x4fe   :  { %v6145_v31 = vmul.f32 %v20907_v49, %v20907_v49  ;;  %v6146_v28 = vmul.f32 %v20945_v16, %v20945_v16  ;;  %v24369_v56 = vand.u32 4294901760, %v20459_v39  ;;  %15303 = vmatprep.mubr.f32.mxu0 %v4517_v17  ;;  %v4269_v44 = vsel %vm2101_vm2, %v20886_v29, 0 }
 0x4ff   :  { %24367 = vst [vmem:[#allocation99_spill] sm:$0xff] %v21063_v20  ;;  %24368 = vst [vmem:[#allocation100_spill] sm:$0xff] %v21066_v47  ;;  %v4536_v25 = vsub.f32 %v21046_v45, %v23775_v0  ;;  %v4272_v30 = vsel %vm2101_vm2, %v20876_v57, 0  ;;  %v24370_v24 = vand.u32 4294901760, %v20464_v32  ;;  %15304 = vmatmul.mubr.f32.gmra.mrb[46].mxu0 %v4527_v62  ;;  %v4546_v39 = vsub.f32 %v21053_v38, %v23776_v54  ;;  %v24405_v45 = vld [vmem:[#allocation49_spill] sm:$0xff] }
 0x500   :  { %15799 = vmatmul.mubr.f32.gmra.mrb[88].mxu1 %v24369_v56  ;;  %v21088_v17 = vsub.f32 %v4266_v6, %v21066_v47  ;;  %v6223_v56 = vsel %vm2101_vm2, %v6145_v31, 0.0  ;;  %v6226_v0 = vsel %vm2101_vm2, %v6146_v28, 0.0  ;;  %v24372_v29 = vand.u32 4294901760, %v21063_v20 }
 0x501   :  { %15801 = vmatprep.mubr.f32.mxu1 %v24370_v24  ;;  %v4537_v42 = vand.u32 4294901760, %v4536_v25  ;;  %6224 = vadd.xlane.f32.xlu1 %v6223_v56  ;;  %v21095_v32 = vand.u32 4294901760, %v4269_v44  ;;  %v21097_v62 = vand.u32 4294901760, %v4272_v30  ;;  %v21099_v24 = vpop.eup %18364  ;;  %v4547_v54 = vand.u32 4294901760, %v4546_v39 }
 0x502   :  { %24371 = vst [vmem:[#allocation101_spill] sm:$0xff] %v21088_v17  ;;  %v4556_v57 = vsub.f32 %v21063_v20, %v24372_v29  ;;  %6227 = vadd.xlane.f32.xlu0 %v6226_v0  ;;  %v6147_v31 = vmul.f32 %v20932_v22, %v20932_v22  ;;  %v6148_v28 = vmul.f32 %v21016_v15, %v21016_v15  ;;  %v24373_v25 = vand.u32 4294901760, %v24317_v61  ;;  %v21108_v56 = vpop.eup %18366 }
 0x503   :  { %15306 = vmatprep.mubr.f32.mxu0 %v4537_v42  ;;  %v21111_v29 = vsub.f32 %v4269_v44, %v21095_v32  ;;  %v21114_v39 = vsub.f32 %v4272_v30, %v21097_v62  ;;  %v4275_v6 = vsel %vm2101_vm2, %v20914_v33, 0  ;;  %v24376_v20 = vand.u32 4294901760, %v20484_v26 }
 0x504   :  { %15802 = vmatmul.mubr.f32.gmra.mrb[90].mxu1 %v24373_v25  ;;  %v4557_v0 = vand.u32 4294901760, %v4556_v57  ;;  %15307 = vmatmul.mubr.f32.gmra.mrb[48].mxu0 %v4547_v54  ;;  %v24377_v61 = vand.u32 4294901760, %v21088_v17  ;;  %v6229_v42 = vsel %vm2101_vm2, %v6147_v31, 0.0  ;;  %v6232_v57 = vsel %vm2101_vm2, %v6148_v28, 0.0 }
 0x505   :  { %24374 = vst [vmem:[#allocation102_spill] sm:$0xff] %v21111_v29  ;;  %24375 = vst [vmem:[#allocation103_spill] sm:$0xff] %v21114_v39  ;;  %15804 = vmatprep.mubr.f32.mxu1 %v24376_v20  ;;  %v21125_v44 = vand.u32 4294901760, %v4275_v6  ;;  %v23781_v30 = vand.u32 4294901760, %v21111_v29  ;;  %v23784_v38 = vand.u32 4294901760, %v21114_v39  ;;  %6230 = vadd.xlane.f32.xlu1 %v6229_v42  ;;  %v4278_v26 = vsel %vm2101_vm2, %v20907_v49, 0 }
 0x506   :  { %v4566_v25 = vsub.f32 %v21088_v17, %v24377_v61  ;;  %15309 = vmatprep.mubr.f32.mxu0 %v4557_v0  ;;  %v6149_v33 = vmul.f32 %v20985_v60, %v20985_v60  ;;  %6233 = vadd.xlane.f32.xlu0 %v6232_v57  ;;  %v21136_v31 = vand.u32 4294901760, %v4278_v26  ;;  %v6150_v28 = vmul.f32 %v21059_v13, %v21059_v13  ;;  %v24395_v17 = vld [vmem:[#allocation40_spill] sm:$0xff] }
 0x507   :  { %v21134_v54 = vsub.f32 %v4275_v6, %v21125_v44  ;;  %v24379_v0 = vand.u32 4294901760, %v20494_v36  ;;  %v4576_v49 = vsub.f32 %v21111_v29, %v23781_v30  ;;  %v4586_v61 = vsub.f32 %v21114_v39, %v23784_v38 }
 0x508   :  { %v4567_v20 = vand.u32 4294901760, %v4566_v25  ;;  %v6235_v25 = vsel %vm2101_vm2, %v6149_v33, 0.0  ;;  %v4281_v6 = vsel %vm2101_vm2, %v20945_v16, 0  ;;  %v24380_v42 = vand.u32 4294901760, %v20503_v21 }
 0x509   :  { %24378 = vst [vmem:[#allocation104_spill] sm:$0xff] %v21134_v54  ;;  %15805 = vmatmul.mubr.f32.gmra.mrb[92].mxu1 %v24379_v0  ;;  %v23786_v36 = vand.u32 4294901760, %v21134_v54  ;;  %v21155_v57 = vsub.f32 %v4278_v26, %v21136_v31  ;;  %v6238_v0 = vsel %vm2101_vm2, %v6150_v28, 0.0  ;;  %v21158_v30 = vand.u32 4294901760, %v4281_v6  ;;  %6236 = vadd.xlane.f32.xlu1 %v6235_v25 }
 0x50a   :  { %15807 = vmatprep.mubr.f32.mxu1 %v24380_v42  ;;  %15310 = vmatmul.mubr.f32.gmra.mrb[50].mxu0 %v4567_v20  ;;  %v4577_v29 = vand.u32 4294901760, %v4576_v49  ;;  %v4587_v38 = vand.u32 4294901760, %v4586_v61  ;;  %v4284_v33 = vsel %vm2101_vm2, %v20932_v22, 0  ;;  %v6151_v21 = vmul.f32 %v21050_v59, %v21050_v59 }
 0x50b   :  { %24381 = vst [vmem:[#allocation105_spill] sm:$0xff] %v21155_v57  ;;  %v4596_v16 = vsub.f32 %v21134_v54, %v23786_v36  ;;  %v23785_v26 = vand.u32 4294901760, %v21155_v57  ;;  %6239 = vadd.xlane.f32.xlu0 %v6238_v0  ;;  %v21169_v20 = vsub.f32 %v4281_v6, %v21158_v30  ;;  %v21171_v28 = vand.u32 4294901760, %v4284_v33  ;;  %v24394_v54 = vld [vmem:[#allocation35_spill] sm:$0xff] }
 0x50c   :  { %v24383_v49 = vand.u32 4294901760, %v20510_v27  ;;  %15312 = vmatprep.mubr.f32.mxu0 %v4577_v29  ;;  %v6241_v22 = vsel %vm2101_vm2, %v6151_v21, 0.0  ;;  %v6152_v61 = vmul.f32 %v21108_v56, %v21108_v56  ;;  %v4287_v25 = vsel %vm2101_vm2, %v21016_v15, 0 }
 0x50d   :  { %24382 = vst [vmem:[#allocation106_spill] sm:$0xff] %v21169_v20  ;;  %v4290_v42 = vsel %vm2101_vm2, %v20985_v60, 0  ;;  %v4597_v6 = vand.u32 4294901760, %v4596_v16  ;;  %v4606_v27 = vsub.f32 %v21155_v57, %v23785_v26  ;;  %v23787_v29 = vand.u32 4294901760, %v21169_v20  ;;  %6242 = vadd.xlane.f32.xlu1 %v6241_v22 }
 0x50e   :  { %15808 = vmatmul.mubr.f32.gmra.mrb[94].mxu1 %v24383_v49  ;;  %15313 = vmatmul.mubr.f32.gmra.mrb[52].mxu0 %v4587_v38  ;;  %v21188_v0 = vsub.f32 %v4284_v33, %v21171_v28  ;;  %v6244_v21 = vsel %vm2101_vm2, %v6152_v61, 0.0  ;;  %v21191_v15 = vand.u32 4294901760, %v4287_v25  ;;  %v21193_v49 = vand.u32 4294901760, %v4290_v42 }
 0x50f   :  { %15812 = vmatprep.mubr.f32.mxu1 %v20181_v2  ;;  %v6153_v60 = vmul.f32 %v21099_v24, %v21099_v24  ;;  %15315 = vmatprep.mubr.f32.mxu0 %v4597_v6  ;;  %v4607_v38 = vand.u32 4294901760, %v4606_v27  ;;  %v4616_v16 = vsub.f32 %v21169_v20, %v23787_v29  ;;  %v4293_v33 = vsel %vm2101_vm2, %v21059_v13, 0  ;;  %v24387_v27 = vld [vmem:[#allocation34_spill] sm:$0xff] }
 0x510   :  { %24384 = vst [vmem:[#allocation107_spill] sm:$0xff] %v21188_v0  ;;  %v23790_v26 = vand.u32 4294901760, %v21188_v0  ;;  %6245 = vadd.xlane.f32.xlu0 %v6244_v21  ;;  %v21204_v22 = vsub.f32 %v4287_v25, %v21191_v15  ;;  %v21207_v61 = vsub.f32 %v4290_v42, %v21193_v49  ;;  %v21210_v6 = vand.u32 4294901760, %v4293_v33  ;;  %v24388_v42 = vld [vmem:[#allocation33_spill] sm:$0xff] }
 0x511   :  { %v6247_v36 = vsel %vm2101_vm2, %v6153_v60, 0.0  ;;  %v4617_v29 = vand.u32 4294901760, %v4616_v16  ;;  %v4296_v13 = vsel %vm2101_vm2, %v21050_v59, 0  ;;  %v4299_v25 = vsel %vm2101_vm2, %v21108_v56, 0 }
 0x512   :  { %24385 = vst [vmem:[#allocation108_spill] sm:$0xff] %v21204_v22  ;;  %24386 = vst [vmem:[#allocation109_spill] sm:$0xff] %v21207_v61  ;;  %15813 = vmatmul.mubr.f32.vlgmr.msra.gmra.mrb[64].mxu1 %v24387_v27  ;;  %15316 = vmatmul.mubr.f32.gmra.mrb[54].mxu0 %v4607_v38  ;;  %v4626_v21 = vsub.f32 %v21188_v0, %v23790_v26  ;;  %v23797_v60 = vand.u32 4294901760, %v21204_v22  ;;  %v23798_v20 = vand.u32 4294901760, %v21207_v61  ;;  %v21226_v16 = vand.u32 4294901760, %v4296_v13  ;;  %v24390_v0 = vld [vmem:[#allocation54_spill] sm:$0xff] }
 0x513   :  { %15815 = vmatprep.mubr.f32.mxu1 %v24388_v42  ;;  %6248 = vadd.xlane.f32.xlu1 %v6247_v36  ;;  %v21224_v38 = vsub.f32 %v4293_v33, %v21210_v6  ;;  %v21229_v59 = vand.u32 4294901760, %v4299_v25  ;;  %v4302_v56 = vsel %vm2101_vm2, %v21099_v24, 0 }
 0x514   :  { %15861 = vmatpush3.msra.mxu1 %v24209_v46  ;;  %15318 = vmatprep.mubr.f32.mxu0 %v4617_v29  ;;  %v4627_v26 = vand.u32 4294901760, %v4626_v21  ;;  %v4636_v36 = vsub.f32 %v21204_v22, %v23797_v60  ;;  %v4646_v33 = vsub.f32 %v21207_v61, %v23798_v20  ;;  %v21242_v46 = vsub.f32 %v4296_v13, %v21226_v16  ;;  %v24392_v29 = vld [vmem:[#allocation36_spill] sm:$0xff] }
 0x515   :  { %24389 = vst [vmem:[#allocation34_spill] sm:$0xff] %v21224_v38  ;;  %16937 = vmatprep.subr.bf16.mxu1 %v24390_v0  ;;  %v23807_v57 = vand.u32 4294901760, %v21224_v38  ;;  %v21246_v24 = vsub.f32 %v4299_v25, %v21229_v59  ;;  %v21248_v21 = vand.u32 4294901760, %v4302_v56 }
 0x516   :  { %24391 = vst [vmem:[#allocation33_spill] sm:$0xff] %v21242_v46  ;;  %15816 = vmatmul.mubr.f32.gmra.mrb[66].mxu1 %v24392_v29  ;;  %15319 = vmatmul.mubr.f32.gmra.mrb[56].mxu0 %v4627_v26  ;;  %v4637_v60 = vand.u32 4294901760, %v4636_v36  ;;  %v23810_v61 = vand.u32 4294901760, %v21242_v46  ;;  %v4647_v22 = vand.u32 4294901760, %v4646_v33 }
 0x517   :  { %24393 = vst [vmem:[#allocation36_spill] sm:$0xff] %v21246_v24  ;;  %15818 = vmatprep.mubr.f32.mxu1 %v24394_v54  ;;  %v4656_v20 = vsub.f32 %v21224_v38, %v23807_v57  ;;  %v23813_v13 = vand.u32 4294901760, %v21246_v24  ;;  %v21257_v39 = vsub.f32 %v4302_v56, %v21248_v21  ;;  %v24396_v57 = vld [vmem:[#allocation39_spill] sm:$0xff] }
 0x518   :  { %15321 = vmatprep.mubr.f32.mxu0 %v4637_v60  ;;  %v4666_v25 = vsub.f32 %v21242_v46, %v23810_v61  ;;  %v24397_v60 = vld [vmem:[#allocation44_spill] sm:$0xff]  ;;  %v24398_v61 = vld [vmem:[#allocation43_spill] sm:$0xff] }
 0x519   :  { %v4657_v26 = vand.u32 4294901760, %v4656_v20  ;;  %v4676_v36 = vsub.f32 %v21246_v24, %v23813_v13  ;;  %v23818_v33 = vand.u32 4294901760, %v21257_v39  ;;  %v24399_v46 = vld [vmem:[#allocation47_spill] sm:$0xff]  ;;  %v24400_v13 = vld [vmem:[#allocation46_spill] sm:$0xff]  ;;  %v24401_v24 = vld [vmem:[#allocation52_spill] sm:$0xff] }
 0x51a   :  { %15819 = vmatmul.mubr.f32.gmra.mrb[68].mxu1 %v24395_v17  ;;  %15322 = vmatmul.mubr.f32.gmra.mrb[58].mxu0 %v4647_v22  ;;  %v4667_v56 = vand.u32 4294901760, %v4666_v25  ;;  %v24403_v25 = vld [vmem:[#allocation50_spill] sm:$0xff] }
 0x51b   :  { %15821 = vmatprep.mubr.f32.mxu1 %v24396_v57  ;;  %15324 = vmatprep.mubr.f32.mxu0 %v4657_v26  ;;  %v4677_v38 = vand.u32 4294901760, %v4676_v36  ;;  %v4686_v20 = vsub.f32 %v21257_v39, %v23818_v33  ;;  %v24402_v26 = vld [vmem:[#allocation28_spill] sm:$0xff]  ;;  %v24406_v33 = vld [vmem:[#allocation63_spill] sm:$0xff] }
 0x51c   :  { %v21278_v36 = vpack.c.bf16 %v24403_v25, %v24402_v26 }
 0x51d   :  { %v4687_v22 = vand.u32 4294901760, %v4686_v20  ;;  %v24409_v20 = vld [vmem:[#allocation48_spill] sm:$0xff] }
 0x51e   :  { %15822 = vmatmul.mubr.f32.gmra.mrb[70].mxu1 %v24397_v60  ;;  %15325 = vmatmul.mubr.f32.gmra.mrb[60].mxu0 %v4667_v56  ;;  %24404 = vst [vmem:[#allocation35_spill] sm:$0xff] %v21278_v36  ;;  %v24407_v56 = vld [vmem:[#allocation60_spill] sm:$0xff] }
 0x51f   :  { %15824 = vmatprep.mubr.f32.mxu1 %v24398_v61  ;;  %15327 = vmatprep.mubr.f32.mxu0 %v4677_v38  ;;  %v24408_v38 = vld [vmem:[#allocation45_spill] sm:$0xff] }
 0x522   :  { %15825 = vmatmul.mubr.f32.gmra.mrb[72].mxu1 %v24399_v46  ;;  %15328 = vmatmul.mubr.f32.gmra.mrb[62].mxu0 %v4687_v22  ;;  %v24410_v22 = vld [vmem:[#allocation56_spill] sm:$0xff] }
 0x523   :  { %15827 = vmatprep.mubr.f32.mxu1 %v24400_v13  ;;  %15338 = vmatprep.mubr.f32.mxu0 %v24401_v24 }
 0x526   :  { %15828 = vmatmul.mubr.f32.gmra.mrb[74].mxu1 %v24405_v45  ;;  %15339 = vmatmul.mubr.f32.vlgmr.msra.gmra.mrb[32].mxu0 %v24406_v33 }
 0x527   :  { %15830 = vmatprep.mubr.f32.mxu1 %v24407_v56  ;;  %15341 = vmatprep.mubr.f32.mxu0 %v20744_v50  ;;  %v24411_v50 = vld [vmem:[#allocation55_spill] sm:$0xff] }
 0x528   :  { %16859 = vmatpush3.bf16.msra.mxu0 %v20660_v34  ;;  %v24412_v34 = vld [vmem:[#allocation58_spill] sm:$0xff] }
 0x529   :  { %16861 = vmatprep.subr.bf16.mxu0 %v21278_v36 }
 0x52a   :  { %15831 = vmatmul.mubr.f32.gmra.mrb[76].mxu1 %v24408_v38  ;;  %15342 = vmatmul.mubr.f32.gmra.mrb[34].mxu0 %v20757_v14  ;;  %v24413_v14 = vld [vmem:[#allocation61_spill] sm:$0xff] }
 0x52b   :  { %15833 = vmatprep.mubr.f32.mxu1 %v24409_v20  ;;  %15344 = vmatprep.mubr.f32.mxu0 %v20789_v8  ;;  %v24414_v8 = vld [vmem:[#allocation64_spill] sm:$0xff] }
 0x52c   :  { %16863 = vmatpush3.bf16.msra.mxu0 %v21278_v36  ;;  %v24415_v36 = vld [vmem:[#allocation66_spill] sm:$0xff] }
 0x52d   :  { %16865 = vmatprep.subr.bf16.mxu0 %v24390_v0 }
 0x52e   :  { %15834 = vmatmul.mubr.f32.gmra.mrb[78].mxu1 %v24410_v22  ;;  %15345 = vmatmul.mubr.f32.gmra.mrb[36].mxu0 %v20802_v41  ;;  %v24416_v41 = vld [vmem:[#allocation29_spill] sm:$0xff] }
 0x52f   :  { %15836 = vmatprep.mubr.f32.mxu1 %v24411_v50  ;;  %15347 = vmatprep.mubr.f32.mxu0 %v20843_v5  ;;  %v24417_v5 = vld [vmem:[#allocation27_spill] sm:$0xff] }
 0x532   :  { %15837 = vmatmul.mubr.f32.gmra.mrb[80].mxu1 %v24412_v34  ;;  %15348 = vmatmul.mubr.f32.gmra.mrb[38].mxu0 %v20849_v11  ;;  %v24418_v11 = vld [vmem:[#allocation73_spill] sm:$0xff] }
 0x533   :  { %15839 = vmatprep.mubr.f32.mxu1 %v24413_v14  ;;  %15350 = vmatprep.mubr.f32.mxu0 %v20874_v19  ;;  %v24419_v19 = vld [vmem:[#allocation74_spill] sm:$0xff] }
 0x536   :  { %15840 = vmatmul.mubr.f32.gmra.mrb[82].mxu1 %v24414_v8  ;;  %15351 = vmatmul.mubr.f32.gmra.mrb[40].mxu0 %v20894_v40  ;;  %v24420_v40 = vld [vmem:[#allocation77_spill] sm:$0xff] }
 0x537   :  { %15842 = vmatprep.mubr.f32.mxu1 %v24415_v36  ;;  %15353 = vmatprep.mubr.f32.mxu0 %v20923_v48  ;;  %v24421_v48 = vld [vmem:[#allocation78_spill] sm:$0xff] }
 0x53a   :  { %15843 = vmatmul.mubr.f32.gmra.mrb[84].mxu1 %v24416_v41  ;;  %15354 = vmatmul.mubr.f32.gmra.mrb[42].mxu0 %v20937_v18  ;;  %v24422_v18 = vld [vmem:[#allocation79_spill] sm:$0xff] }
 0x53b   :  { %15845 = vmatprep.mubr.f32.mxu1 %v24417_v5  ;;  %15356 = vmatprep.mubr.f32.mxu0 %v20947_v43  ;;  %v24423_v43 = vld [vmem:[#allocation80_spill] sm:$0xff] }
 0x53e   :  { %15846 = vmatmul.mubr.f32.gmra.mrb[86].mxu1 %v24418_v11  ;;  %15357 = vmatmul.mubr.f32.gmra.mrb[44].mxu0 %v20958_v55  ;;  %v24424_v55 = vld [vmem:[#allocation82_spill] sm:$0xff] }
 0x53f   :  { %15848 = vmatprep.mubr.f32.mxu1 %v24419_v19  ;;  %15359 = vmatprep.mubr.f32.mxu0 %v20999_v37  ;;  %v24425_v37 = vld [vmem:[#allocation83_spill] sm:$0xff] }
 0x542   :  { %15849 = vmatmul.mubr.f32.gmra.mrb[88].mxu1 %v24420_v40  ;;  %15360 = vmatmul.mubr.f32.gmra.mrb[46].mxu0 %v21001_v4  ;;  %v24426_v4 = vld [vmem:[#allocation84_spill] sm:$0xff] }
 0x543   :  { %15851 = vmatprep.mubr.f32.mxu1 %v24421_v48  ;;  %15362 = vmatprep.mubr.f32.mxu0 %v21025_v35 }
 0x546   :  { %15852 = vmatmul.mubr.f32.gmra.mrb[90].mxu1 %v24422_v18  ;;  %15363 = vmatmul.mubr.f32.gmra.mrb[48].mxu0 %v21029_v3 }
 0x547   :  { %15854 = vmatprep.mubr.f32.mxu1 %v24423_v43  ;;  %15365 = vmatprep.mubr.f32.mxu0 %v21048_v63 }
 0x54a   :  { %15855 = vmatmul.mubr.f32.gmra.mrb[92].mxu1 %v24424_v55  ;;  %15366 = vmatmul.mubr.f32.gmra.mrb[50].mxu0 %v21066_v47  ;;  %v24427_v47 = vld [vmem:[#allocation85_spill] sm:$0xff] }
 0x54b   :  { %15857 = vmatprep.mubr.f32.mxu1 %v24425_v37  ;;  %15368 = vmatprep.mubr.f32.mxu0 %v21095_v32 }
 0x54e   :  { %15858 = vmatmul.mubr.f32.gmra.mrb[94].mxu1 %v24426_v4  ;;  %15369 = vmatmul.mubr.f32.gmra.mrb[52].mxu0 %v21097_v62 }
 0x54f   :  { %15862 = vmatprep.mubr.f32.mxu1 %v20181_v2  ;;  %15371 = vmatprep.mubr.f32.mxu0 %v21125_v44  ;;  %v24428_v2 = vld [vmem:[#allocation26_spill] sm:$0xff] }
 0x552   :  { %15863 = vmatmul.mubr.f32.vlgmr.msra.gmra.mrb[64].mxu1 %v24387_v27  ;;  %15372 = vmatmul.mubr.f32.gmra.mrb[54].mxu0 %v21136_v31 }
 0x553   :  { %15865 = vmatprep.mubr.f32.mxu1 %v24388_v42  ;;  %15374 = vmatprep.mubr.f32.mxu0 %v21158_v30 }
 0x554   :  { %16939 = vmatpush3.bf16.msra.mxu1 %v24390_v0 }
 0x555   :  { %16941 = vmatprep.subr.bf16.mxu1 %v24427_v47 }
 0x556   :  { %15866 = vmatmul.mubr.f32.gmra.mrb[66].mxu1 %v24392_v29  ;;  %15375 = vmatmul.mubr.f32.gmra.mrb[56].mxu0 %v21171_v28  ;;  %v24437_v29 = vld [vmem:[#allocation75_spill] sm:$0xff] }
 0x557   :  { %15868 = vmatprep.mubr.f32.mxu1 %v24394_v54  ;;  %15377 = vmatprep.mubr.f32.mxu0 %v21191_v15  ;;  %v24430_v54 = vld [vmem:[#allocation86_spill] sm:$0xff] }
 0x558   :  { %16943 = vmatpush3.bf16.msra.mxu1 %v24427_v47 }
 0x559   :  { %16945 = vmatprep.subr.bf16.mxu1 %v20573_v7 }
 0x55a   :  { %15869 = vmatmul.mubr.f32.gmra.mrb[68].mxu1 %v24395_v17  ;;  %15378 = vmatmul.mubr.f32.gmra.mrb[58].mxu0 %v21193_v49  ;;  %v24429_v17 = vld [vmem:[#allocation59_spill] sm:$0xff] }
 0x55b   :  { %15871 = vmatprep.mubr.f32.mxu1 %v24396_v57  ;;  %15380 = vmatprep.mubr.f32.mxu0 %v21210_v6  ;;  %v24431_v57 = vand.u32 4294901760, %v24430_v54  ;;  %v24460_v54 = vand.u32 4294901760, %v24429_v17 }
 0x55e   :  { %15872 = vmatmul.mubr.f32.gmra.mrb[70].mxu1 %v24397_v60  ;;  %15381 = vmatmul.mubr.f32.gmra.mrb[60].mxu0 %v21226_v16  ;;  %v24452_v60 = vld [vmem:[#allocation34_spill] sm:$0xff] }
 0x55f   :  { %15874 = vmatprep.mubr.f32.mxu1 %v24398_v61  ;;  %15383 = vmatprep.mubr.f32.mxu0 %v21229_v59  ;;  %v24432_v61 = vld [vmem:[#allocation87_spill] sm:$0xff] }
 0x560   :  { %v24433_v27 = vand.u32 4294901760, %v24432_v61  ;;  %v24467_v61 = vand.u32 4294901760, %v20905_v52 }
 0x562   :  { %15875 = vmatmul.mubr.f32.gmra.mrb[72].mxu1 %v24399_v46  ;;  %15384 = vmatmul.mubr.f32.gmra.mrb[62].mxu0 %v21248_v21  ;;  %v21362_v42 = vpack.c.bf16 %v24433_v27, %v24431_v57  ;;  %v24435_v46 = vld [vmem:[#allocation65_spill] sm:$0xff]  ;;  %v24468_v27 = vand.u32 4294901760, %v20935_v53 }
 0x563   :  { %15877 = vmatprep.mubr.f32.mxu1 %v24400_v13  ;;  %15394 = vmatprep.mubr.f32.mxu0 %v20700_v12  ;;  %v24450_v13 = vld [vmem:[#allocation108_spill] sm:$0xff]  ;;  %v24461_v57 = vand.u32 4294901760, %v24435_v46 }
 0x564   :  { %24434 = vst [vmem:[#allocation40_spill] sm:$0xff] %v21362_v42 }
 0x566   :  { %15878 = vmatmul.mubr.f32.gmra.mrb[74].mxu1 %v24405_v45  ;;  %15395 = vmatmul.mubr.f32.vlgmr.msra.gmra.mrb[32].mxu0 %v24428_v2  ;;  %v24436_v45 = vld [vmem:[#allocation69_spill] sm:$0xff] }
 0x567   :  { %15880 = vmatprep.mubr.f32.mxu1 %v24407_v56  ;;  %15397 = vmatprep.mubr.f32.mxu0 %v24429_v17  ;;  %v24456_v56 = vand.u32 4294901760, %v24402_v26  ;;  %v24463_v26 = vand.u32 4294901760, %v20813_v10  ;;  %v24466_v17 = vand.u32 4294901760, %v20892_v23 }
 0x568   :  { %16867 = vmatpush3.bf16.msra.mxu0 %v24390_v0 }
 0x569   :  { %16869 = vmatprep.subr.bf16.mxu0 %v24427_v47 }
 0x56a   :  { %15881 = vmatmul.mubr.f32.gmra.mrb[76].mxu1 %v24408_v38  ;;  %15398 = vmatmul.mubr.f32.gmra.mrb[34].mxu0 %v24435_v46  ;;  %v24457_v38 = vand.u32 4294901760, %v24403_v25  ;;  %v24464_v25 = vand.u32 4294901760, %v20853_v58  ;;  %v24469_v46 = vand.u32 4294901760, %v20955_v9 }
 0x56b   :  { %15883 = vmatprep.mubr.f32.mxu1 %v24409_v20  ;;  %15400 = vmatprep.mubr.f32.mxu0 %v24436_v45 }
 0x56c   :  { %16871 = vmatpush3.bf16.msra.mxu0 %v24427_v47  ;;  %v21420_v20 = vpack.c.bf16 %v24457_v38, %v24456_v56  ;;  %v24499_v56 = vld [vmem:[#allocation89_spill] sm:$0xff]  ;;  %v24500_v38 = vld [vmem:[#allocation90_spill] sm:$0xff] }
 0x56d   :  { %16873 = vmatprep.subr.bf16.mxu0 %v21362_v42 }
 0x56e   :  { %15884 = vmatmul.mubr.f32.gmra.mrb[78].mxu1 %v24410_v22  ;;  %15401 = vmatmul.mubr.f32.gmra.mrb[36].mxu0 %v20813_v10  ;;  %24458 = vst [vmem:[#allocation39_spill] sm:$0xff] %v21420_v20  ;;  %v24459_v22 = vand.u32 4294901760, %v24428_v2  ;;  %v24465_v2 = vand.u32 4294901760, %v24437_v29 }
 0x56f   :  { %15886 = vmatprep.mubr.f32.mxu1 %v24411_v50  ;;  %15403 = vmatprep.mubr.f32.mxu0 %v20853_v58  ;;  %v24439_v50 = vld [vmem:[#allocation94_spill] sm:$0xff] }
 0x570   :  { %v24471_v58 = vand.u32 4294901760, %v24439_v50 }
 0x572   :  { %15887 = vmatmul.mubr.f32.gmra.mrb[80].mxu1 %v24412_v34  ;;  %15404 = vmatmul.mubr.f32.gmra.mrb[38].mxu0 %v24437_v29  ;;  %v24438_v34 = vld [vmem:[#allocation93_spill] sm:$0xff] }
 0x573   :  { %15889 = vmatprep.mubr.f32.mxu1 %v24413_v14  ;;  %15406 = vmatprep.mubr.f32.mxu0 %v20892_v23  ;;  %v24440_v14 = vld [vmem:[#allocation97_spill] sm:$0xff]  ;;  %v24470_v10 = vand.u32 4294901760, %v24438_v34  ;;  %v24473_v23 = vand.u32 4294901760, %v21014_v51 }
 0x576   :  { %15890 = vmatmul.mubr.f32.gmra.mrb[82].mxu1 %v24414_v8  ;;  %15407 = vmatmul.mubr.f32.gmra.mrb[40].mxu0 %v20905_v52  ;;  %v24441_v8 = vld [vmem:[#allocation98_spill] sm:$0xff]  ;;  %v24474_v52 = vand.u32 4294901760, %v24440_v14 }
 0x577   :  { %15892 = vmatprep.mubr.f32.mxu1 %v24415_v36  ;;  %15409 = vmatprep.mubr.f32.mxu0 %v20935_v53  ;;  %v24454_v36 = vld [vmem:[#allocation36_spill] sm:$0xff]  ;;  %v24475_v53 = vand.u32 4294901760, %v24441_v8 }
 0x57a   :  { %15893 = vmatmul.mubr.f32.gmra.mrb[84].mxu1 %v24416_v41  ;;  %15410 = vmatmul.mubr.f32.gmra.mrb[42].mxu0 %v20955_v9  ;;  %v24442_v41 = vld [vmem:[#allocation99_spill] sm:$0xff] }
 0x57b   :  { %15895 = vmatprep.mubr.f32.mxu1 %v24417_v5  ;;  %15412 = vmatprep.mubr.f32.mxu0 %v24438_v34  ;;  %v24443_v5 = vld [vmem:[#allocation101_spill] sm:$0xff]  ;;  %v24476_v9 = vand.u32 4294901760, %v24442_v41 }
 0x57c   :  { %v24477_v29 = vand.u32 4294901760, %v24443_v5 }
 0x57e   :  { %15896 = vmatmul.mubr.f32.gmra.mrb[86].mxu1 %v24418_v11  ;;  %15413 = vmatmul.mubr.f32.gmra.mrb[44].mxu0 %v24439_v50  ;;  %v24444_v11 = vld [vmem:[#allocation102_spill] sm:$0xff] }
 0x57f   :  { %15898 = vmatprep.mubr.f32.mxu1 %v24419_v19  ;;  %15415 = vmatprep.mubr.f32.mxu0 %v21011_v1  ;;  %v24445_v19 = vld [vmem:[#allocation103_spill] sm:$0xff]  ;;  %v24478_v34 = vand.u32 4294901760, %v24444_v11 }
 0x582   :  { %15899 = vmatmul.mubr.f32.gmra.mrb[88].mxu1 %v24420_v40  ;;  %15416 = vmatmul.mubr.f32.gmra.mrb[46].mxu0 %v21014_v51  ;;  %v24446_v40 = vld [vmem:[#allocation104_spill] sm:$0xff] }
 0x583   :  { %15901 = vmatprep.mubr.f32.mxu1 %v24421_v48  ;;  %15418 = vmatprep.mubr.f32.mxu0 %v24440_v14  ;;  %v24447_v48 = vld [vmem:[#allocation105_spill] sm:$0xff]  ;;  %v24480_v51 = vand.u32 4294901760, %v24446_v40 }
 0x584   :  { %v24481_v50 = vand.u32 4294901760, %v24447_v48 }
 0x586   :  { %15902 = vmatmul.mubr.f32.gmra.mrb[90].mxu1 %v24422_v18  ;;  %15419 = vmatmul.mubr.f32.gmra.mrb[48].mxu0 %v24441_v8  ;;  %v24448_v18 = vld [vmem:[#allocation106_spill] sm:$0xff] }
 0x587   :  { %15904 = vmatprep.mubr.f32.mxu1 %v24423_v43  ;;  %15421 = vmatprep.mubr.f32.mxu0 %v24442_v41  ;;  %v24449_v43 = vld [vmem:[#allocation107_spill] sm:$0xff]  ;;  %v24482_v14 = vand.u32 4294901760, %v24448_v18  ;;  %v24484_v41 = vand.u32 4294901760, %v24450_v13 }
 0x588   :  { %v24483_v8 = vand.u32 4294901760, %v24449_v43 }
 0x58a   :  { %15905 = vmatmul.mubr.f32.gmra.mrb[92].mxu1 %v24424_v55  ;;  %15422 = vmatmul.mubr.f32.gmra.mrb[50].mxu0 %v24443_v5  ;;  %v24451_v55 = vld [vmem:[#allocation109_spill] sm:$0xff] }
 0x58b   :  { %15907 = vmatprep.mubr.f32.mxu1 %v24425_v37  ;;  %15424 = vmatprep.mubr.f32.mxu0 %v24444_v11  ;;  %v24453_v37 = vld [vmem:[#allocation33_spill] sm:$0xff]  ;;  %v24485_v5 = vand.u32 4294901760, %v24451_v55  ;;  %v24486_v11 = vand.u32 4294901760, %v24452_v60 }
 0x58e   :  { %15908 = vmatmul.mubr.f32.gmra.mrb[94].mxu1 %v24426_v4  ;;  %15425 = vmatmul.mubr.f32.gmra.mrb[52].mxu0 %v24445_v19  ;;  %v24455_v4 = vand.u32 4294901760, %v20700_v12  ;;  %v24462_v12 = vand.u32 4294901760, %v24436_v45  ;;  %v24472_v45 = vand.u32 4294901760, %v21011_v1  ;;  %v24479_v1 = vand.u32 4294901760, %v24445_v19 }
 0x58f   :  { %15427 = vmatprep.mubr.f32.mxu0 %v24446_v40  ;;  %v24487_v19 = vand.u32 4294901760, %v24453_v37  ;;  %v24488_v40 = vand.u32 4294901760, %v24454_v36 }
 0x592   :  { %15428 = vmatmul.mubr.f32.gmra.mrb[54].mxu0 %v24447_v48  ;;  %v24489_v48 = vand.u32 4294901760, %v21257_v39 }
 0x593   :  { %15430 = vmatprep.mubr.f32.mxu0 %v24448_v18  ;;  %v24490_v18 = vld [vmem:[#allocation51_spill] sm:$0xff] }
 0x596   :  { %15431 = vmatmul.mubr.f32.gmra.mrb[56].mxu0 %v24449_v43  ;;  %v24491_v43 = vld [vmem:[#allocation62_spill] sm:$0xff] }
 0x597   :  { %15433 = vmatprep.mubr.f32.mxu0 %v24450_v13  ;;  %v24492_v13 = vld [vmem:[#allocation67_spill] sm:$0xff] }
 0x59a   :  { %15434 = vmatmul.mubr.f32.gmra.mrb[58].mxu0 %v24451_v55  ;;  %v24493_v55 = vld [vmem:[#allocation37_spill] sm:$0xff] }
 0x59b   :  { %15436 = vmatprep.mubr.f32.mxu0 %v24452_v60  ;;  %v24495_v60 = vld [vmem:[#allocation71_spill] sm:$0xff] }
 0x59e   :  { %15437 = vmatmul.mubr.f32.gmra.mrb[60].mxu0 %v24453_v37  ;;  %v24496_v37 = vld [vmem:[#allocation72_spill] sm:$0xff] }
 0x59f   :  { %15439 = vmatprep.mubr.f32.mxu0 %v24454_v36  ;;  %v24497_v36 = vld [vmem:[#allocation76_spill] sm:$0xff] }
 0x5a2   :  { %15440 = vmatmul.mubr.f32.gmra.mrb[62].mxu0 %v21257_v39  ;;  %v24494_v39 = vld [vmem:[#allocation70_spill] sm:$0xff] }
 0x5a3   :  { %15450 = vmatprep.mubr.f32.mxu0 %v24455_v4  ;;  %v24498_v4 = vld [vmem:[#allocation81_spill] sm:$0xff] }
 0x5a6   :  { %15451 = vmatmul.mubr.f32.vlgmr.msra.gmra.mrb[32].mxu0 %v24459_v22  ;;  %v24501_v22 = vld [vmem:[#allocation91_spill] sm:$0xff] }
 0x5a7   :  { %15453 = vmatprep.mubr.f32.mxu0 %v24460_v54  ;;  %16875 = vmatpush3.bf16.msra.mxu0 %v21362_v42  ;;  %v24502_v54 = vld [vmem:[#allocation92_spill] sm:$0xff] }
 0x5a8   :  { %16877 = vmatprep.subr.bf16.mxu0 %v21420_v20 }
 0x5aa   :  { %15454 = vmatmul.mubr.f32.gmra.mrb[34].mxu0 %v24461_v57  ;;  %v24503_v57 = vld [vmem:[#allocation95_spill] sm:$0xff] }
 0x5ab   :  { %15456 = vmatprep.mubr.f32.mxu0 %v24462_v12  ;;  %16879 = vmatpush3.bf16.msra.mxu0 %v21420_v20  ;;  %v24504_v12 = vld [vmem:[#allocation96_spill] sm:$0xff] }
 0x5ac   :  { %16881 = vmatprep.subr.bf16.mxu0 %v24390_v0 }
 0x5ae   :  { %15457 = vmatmul.mubr.f32.gmra.mrb[36].mxu0 %v24463_v26  ;;  %v24505_v26 = vld [vmem:[#allocation100_spill] sm:$0xff] }
 0x5af   :  { %15459 = vmatprep.mubr.f32.mxu0 %v24464_v25 }
 0x5b2   :  { %15460 = vmatmul.mubr.f32.gmra.mrb[38].mxu0 %v24465_v2 }
 0x5b3   :  { %15462 = vmatprep.mubr.f32.mxu0 %v24466_v17 }
 0x5b6   :  { %15463 = vmatmul.mubr.f32.gmra.mrb[40].mxu0 %v24467_v61  ;;  %v24506_v61 = vld [vmem:[#allocation38_spill] sm:$0xff] }
 0x5b7   :  { %15465 = vmatprep.mubr.f32.mxu0 %v24468_v27 }
 0x5ba   :  { %15466 = vmatmul.mubr.f32.gmra.mrb[42].mxu0 %v24469_v46 }
 0x5bb   :  { %15468 = vmatprep.mubr.f32.mxu0 %v24470_v10 }
 0x5be   :  { %15469 = vmatmul.mubr.f32.gmra.mrb[44].mxu0 %v24471_v58 }
 0x5bf   :  { %15471 = vmatprep.mubr.f32.mxu0 %v24472_v45 }
 0x5c2   :  { %15472 = vmatmul.mubr.f32.gmra.mrb[46].mxu0 %v24473_v23 }
 0x5c3   :  { %15474 = vmatprep.mubr.f32.mxu0 %v24474_v52 }
 0x5c6   :  { %15475 = vmatmul.mubr.f32.gmra.mrb[48].mxu0 %v24475_v53 }
 0x5c7   :  { %15477 = vmatprep.mubr.f32.mxu0 %v24476_v9 }
 0x5ca   :  { %15478 = vmatmul.mubr.f32.gmra.mrb[50].mxu0 %v24477_v29 }
 0x5cb   :  { %15480 = vmatprep.mubr.f32.mxu0 %v24478_v34 }
 0x5ce   :  { %15481 = vmatmul.mubr.f32.gmra.mrb[52].mxu0 %v24479_v1 }
 0x5cf   :  { %15483 = vmatprep.mubr.f32.mxu0 %v24480_v51  ;;  %v21558_v51 = vld [vmem:[#allocation7] ss:$0 sm:$0xff] }
 0x5d2   :  { %15484 = vmatmul.mubr.f32.gmra.mrb[54].mxu0 %v24481_v50 }
 0x5d3   :  { %15486 = vmatprep.mubr.f32.mxu0 %v24482_v14 }
 0x5d6   :  { %15487 = vmatmul.mubr.f32.gmra.mrb[56].mxu0 %v24483_v8 }
 0x5d7   :  { %15489 = vmatprep.mubr.f32.mxu0 %v24484_v41 }
 0x5da   :  { %15490 = vmatmul.mubr.f32.gmra.mrb[58].mxu0 %v24485_v5 }
 0x5db   :  { %15492 = vmatprep.mubr.f32.mxu0 %v24486_v11 }
 0x5de   :  { %15493 = vmatmul.mubr.f32.gmra.mrb[60].mxu0 %v24487_v19 }
 0x5df   :  { %15495 = vmatprep.mubr.f32.mxu0 %v24488_v40 }
 0x5e2   :  { %15496 = vmatmul.mubr.f32.gmra.mrb[62].mxu0 %v24489_v48 }
 0x5e3   :  { %15506 = vmatprep.mubr.f32.mxu0 %v24401_v24 }
 0x5e6   :  { %15507 = vmatmul.mubr.f32.vlgmr.msra.gmra.mrb[32].mxu0 %v24406_v33 }
 0x5e7   :  { %15509 = vmatprep.mubr.f32.mxu0 %v24490_v18  ;;  %16883 = vmatpush3.bf16.msra.mxu0 %v24390_v0 }
 0x5e8   :  { %16885 = vmatprep.subr.bf16.mxu0 %v24427_v47 }
 0x5ea   :  { %15510 = vmatmul.mubr.f32.gmra.mrb[34].mxu0 %v24491_v43 }
 0x5eb   :  { %15512 = vmatprep.mubr.f32.mxu0 %v24492_v13  ;;  %16887 = vmatpush3.bf16.msra.mxu0 %v24427_v47 }
 0x5ec   :  { %16889 = vmatprep.subr.bf16.mxu0 %v24493_v55 }
 0x5ee   :  { %15513 = vmatmul.mubr.f32.gmra.mrb[36].mxu0 %v24494_v39 }
 0x5ef   :  { %15515 = vmatprep.mubr.f32.mxu0 %v24495_v60 }
 0x5f2   :  { %15516 = vmatmul.mubr.f32.gmra.mrb[38].mxu0 %v24496_v37 }
 0x5f3   :  { %15518 = vmatprep.mubr.f32.mxu0 %v24497_v36 }
 0x5f6   :  { %15519 = vmatmul.mubr.f32.gmra.mrb[40].mxu0 %v24498_v4 }
 0x5f7   :  { %15521 = vmatprep.mubr.f32.mxu0 %v24499_v56 }
 0x5fa   :  { %15522 = vmatmul.mubr.f32.gmra.mrb[42].mxu0 %v24500_v38 }
 0x5fb   :  { %15524 = vmatprep.mubr.f32.mxu0 %v24501_v22 }
 0x5fe   :  { %15525 = vmatmul.mubr.f32.gmra.mrb[44].mxu0 %v24502_v54 }
 0x5ff   :  { %15527 = vmatprep.mubr.f32.mxu0 %v24503_v57 }
 0x602   :  { %15528 = vmatmul.mubr.f32.gmra.mrb[46].mxu0 %v24504_v12 }
 0x603   :  { %15530 = vmatprep.mubr.f32.mxu0 %v21025_v35 }
 0x606   :  { %15531 = vmatmul.mubr.f32.gmra.mrb[48].mxu0 %v21029_v3 }
 0x607   :  { %15533 = vmatprep.mubr.f32.mxu0 %v21048_v63 }
 0x60a   :  { %15534 = vmatmul.mubr.f32.gmra.mrb[50].mxu0 %v24505_v26 }
 0x60b   :  { %15536 = vmatprep.mubr.f32.mxu0 %v21095_v32 }
 0x60e   :  { %15537 = vmatmul.mubr.f32.gmra.mrb[52].mxu0 %v21097_v62 }
 0x60f   :  { %15539 = vmatprep.mubr.f32.mxu0 %v21125_v44 }
 0x612   :  { %15540 = vmatmul.mubr.f32.gmra.mrb[54].mxu0 %v21136_v31 }
 0x613   :  { %15542 = vmatprep.mubr.f32.mxu0 %v21158_v30 }
 0x616   :  { %15543 = vmatmul.mubr.f32.gmra.mrb[56].mxu0 %v21171_v28 }
 0x617   :  { %15545 = vmatprep.mubr.f32.mxu0 %v21191_v15 }
 0x61a   :  { %15546 = vmatmul.mubr.f32.gmra.mrb[58].mxu0 %v21193_v49 }
 0x61b   :  { %15548 = vmatprep.mubr.f32.mxu0 %v21210_v6 }
 0x61e   :  { %15549 = vmatmul.mubr.f32.gmra.mrb[60].mxu0 %v21226_v16 }
 0x61f   :  { %15551 = vmatprep.mubr.f32.mxu0 %v21229_v59 }
 0x622   :  { %15552 = vmatmul.mubr.f32.gmra.mrb[62].mxu0 %v21248_v21 }
 0x623   :  { %15562 = vmatprep.mubr.f32.mxu0 %v24401_v24  ;;  %v24507_v24 = vld [vmem:[#allocation41_spill] sm:$0xff] }
 0x625   :  { %v15864_v25 = vpop.f32.mrb[64].mxu1 }
 0x626   :  { %v8042_v2 = vpop.f32.mrb[65].mxu1  ;;  %15563 = vmatmul.mubr.f32.vlgmr.msra.gmra.mrb[32].mxu0 %v24406_v33  ;;  %v17224_v41 = vadd.f32 %v21558_v51, %v15864_v25 }
 0x627   :  { %15565 = vmatprep.mubr.f32.mxu0 %v24490_v18  ;;  %16891 = vmatpush3.bf16.msra.mxu0 %v24493_v55  ;;  %v17225_v50 = vadd.f32 %v21558_v51, %v8042_v2 }
 0x628   :  { %16893 = vmatprep.subr.bf16.mxu0 %v24506_v61  ;;  %v8233_v48 = vmax.f32 %v17224_v41, 0.0 }
 0x629   :  { %v15867_v17 = vpop.f32.mrb[66].mxu1  ;;  %v8232_v5 = vmax.f32 %v17225_v50, 0.0 }
 0x62a   :  { %v8054_v27 = vpop.f32.mrb[67].mxu1  ;;  %15566 = vmatmul.mubr.f32.gmra.mrb[34].mxu0 %v24491_v43 }
 0x62b   :  { %15568 = vmatprep.mubr.f32.mxu0 %v24492_v13  ;;  %16895 = vmatpush3.bf16.msra.mxu0 %v24506_v61  ;;  %v17227_v19 = vadd.f32 %v21558_v51, %v8054_v27  ;;  %v8265_v18 = vsel %vm2101_vm2, %v8232_v5, 0 }
 0x62c   :  { %16897 = vmatprep.subr.bf16.mxu0 %v24507_v24 }
 0x62d   :  { %v15870_v46 = vpop.f32.mrb[68].mxu1 }
 0x62e   :  { %v8066_v10 = vpop.f32.mrb[69].mxu1  ;;  %15569 = vmatmul.mubr.f32.gmra.mrb[36].mxu0 %v24494_v39  ;;  %v21583_v39 = vand.u32 4294901760, %v8265_v18 }
 0x62f   :  { %15571 = vmatprep.mubr.f32.mxu0 %v24495_v60 }
 0x631   :  { %v15873_v33 = vpop.f32.mrb[70].mxu1 }
 0x632   :  { %v8078_v58 = vpop.f32.mrb[71].mxu1  ;;  %15572 = vmatmul.mubr.f32.gmra.mrb[38].mxu0 %v24496_v37  ;;  %v17229_v37 = vadd.f32 %v21558_v51, %v8066_v10 }
 0x633   :  { %15574 = vmatprep.mubr.f32.mxu0 %v24497_v36  ;;  %v17228_v36 = vadd.f32 %v21558_v51, %v15870_v46 }
 0x635   :  { %v21537_v45 = vpop.f32.mrb[72].mxu1 }
 0x636   :  { %v8090_v23 = vpop.f32.mrb[73].mxu1  ;;  %15575 = vmatmul.mubr.f32.gmra.mrb[40].mxu0 %v24498_v4 }
 0x637   :  { %15577 = vmatprep.mubr.f32.mxu0 %v24499_v56 }
 0x639   :  { %v21541_v52 = vpop.f32.mrb[74].mxu1 }
 0x63a   :  { %v21543_v53 = vpop.f32.mrb[75].mxu1  ;;  %15578 = vmatmul.mubr.f32.gmra.mrb[42].mxu0 %v24500_v38  ;;  %v17231_v38 = vadd.f32 %v21558_v51, %v8078_v58  ;;  %v17232_v58 = vadd.f32 %v21558_v51, %v21537_v45 }
 0x63b   :  { %15580 = vmatprep.mubr.f32.mxu0 %v24501_v22  ;;  %v17235_v5 = vadd.f32 %v21558_v51, %v21543_v53 }
 0x63c   :  { %v8238_v27 = vmax.f32 %v17231_v38, 0.0 }
 0x63d   :  { %v21547_v9 = vpop.f32.mrb[76].mxu1 }
 0x63e   :  { %v21549_v29 = vpop.f32.mrb[77].mxu1  ;;  %15581 = vmatmul.mubr.f32.gmra.mrb[44].mxu0 %v24502_v54  ;;  %v21598_v54 = vsub.f32 %v8265_v18, %v21583_v39 }
 0x63f   :  { %15583 = vmatprep.mubr.f32.mxu0 %v24503_v57 }
 0x641   :  { %v21553_v34 = vpop.f32.mrb[78].mxu1 }
 0x642   :  { %v21555_v1 = vpop.f32.mrb[79].mxu1  ;;  %15584 = vmatmul.mubr.f32.gmra.mrb[46].mxu0 %v24504_v12 }
 0x643   :  { %15586 = vmatprep.mubr.f32.mxu0 %v21025_v35  ;;  %v17226_v35 = vadd.f32 %v21558_v51, %v15867_v17 }
 0x645   :  { %v21562_v14 = vpop.f32.mrb[80].mxu1  ;;  %v8235_v60 = vmax.f32 %v17226_v35, 0.0 }
 0x646   :  { %v21564_v8 = vpop.f32.mrb[81].mxu1  ;;  %15587 = vmatmul.mubr.f32.gmra.mrb[48].mxu0 %v21029_v3  ;;  %v8234_v3 = vmax.f32 %v17227_v19, 0.0 }
 0x647   :  { %15589 = vmatprep.mubr.f32.mxu0 %v21048_v63  ;;  %v8268_v63 = vsel %vm2101_vm2, %v8233_v48, 0  ;;  %v8274_v57 = vsel %vm2101_vm2, %v8235_v60, 0  ;;  %v8283_v48 = vsel %vm2101_vm2, %v8238_v27, 0  ;;  %v17234_v60 = vadd.f32 %v21558_v51, %v21541_v52 }
 0x648   :  { %v8271_v56 = vsel %vm2101_vm2, %v8234_v3, 0  ;;  %v21611_v17 = vand.u32 4294901760, %v8274_v57 }
 0x649   :  { %v21569_v11 = vpop.f32.mrb[82].mxu1  ;;  %v21604_v12 = vand.u32 4294901760, %v8271_v56 }
 0x64a   :  { %v21572_v40 = vpop.f32.mrb[83].mxu1  ;;  %15590 = vmatmul.mubr.f32.gmra.mrb[50].mxu0 %v24505_v26  ;;  %v8237_v26 = vmax.f32 %v17228_v36, 0.0  ;;  %v8242_v36 = vmax.f32 %v17235_v5, 0.0 }
 0x64b   :  { %15592 = vmatprep.mubr.f32.mxu0 %v21095_v32  ;;  %v21591_v32 = vand.u32 4294901760, %v8268_v63  ;;  %v21623_v50 = vsub.f32 %v8271_v56, %v21604_v12 }
 0x64c   :  { %v8280_v41 = vsel %vm2101_vm2, %v8237_v26, 0  ;;  %v17237_v26 = vadd.f32 %v21558_v51, %v21549_v29 }
 0x64d   :  { %v21578_v43 = vpop.f32.mrb[84].mxu1  ;;  %v21609_v2 = vsub.f32 %v8268_v63, %v21591_v32  ;;  %v21644_v3 = vand.u32 4294901760, %v8280_v41  ;;  %v8241_v63 = vmax.f32 %v17232_v58, 0.0  ;;  %v23853_v56 = vand.u32 4294901760, %v21623_v50 }
 0x64e   :  { %v21580_v13 = vpop.f32.mrb[85].mxu1  ;;  %15593 = vmatmul.mubr.f32.gmra.mrb[52].mxu0 %v21097_v62  ;;  %v8236_v62 = vmax.f32 %v17229_v37, 0.0  ;;  %v21649_v37 = vand.u32 4294901760, %v8283_v48  ;;  %v17236_v58 = vadd.f32 %v21558_v51, %v21547_v9 }
 0x64f   :  { %15595 = vmatprep.mubr.f32.mxu0 %v21125_v44  ;;  %v17230_v44 = vadd.f32 %v21558_v51, %v15873_v33  ;;  %24508 = vst [vmem:[#allocation44_spill] sm:$0xff] %v21644_v3  ;;  %v8452_v29 = vsub.f32 %v21623_v50, %v23853_v56 }
 0x650   :  { %v8277_v10 = vsel %vm2101_vm2, %v8236_v62, 0  ;;  %24509 = vst [vmem:[#allocation43_spill] sm:$0xff] %v21649_v37  ;;  %v21677_v5 = vsub.f32 %v8283_v48, %v21649_v37 }
 0x651   :  { %v21589_v4 = vpop.f32.mrb[86].mxu1  ;;  %v8239_v33 = vmax.f32 %v17230_v44, 0.0  ;;  %v8453_v20 = vand.u32 4294901760, %v8452_v29 }
 0x652   :  { %v21595_v22 = vpop.f32.mrb[87].mxu1  ;;  %15596 = vmatmul.mubr.f32.gmra.mrb[54].mxu0 %v21136_v31  ;;  %v17233_v31 = vadd.f32 %v21558_v51, %v8090_v23  ;;  %v21631_v23 = vsub.f32 %v8274_v57, %v21611_v17  ;;  %24511 = vst [vmem:[#allocation46_spill] sm:$0xff] %v21677_v5 }
 0x653   :  { %15598 = vmatprep.mubr.f32.mxu0 %v21158_v30  ;;  %v23855_v30 = vand.u32 4294901760, %v21598_v54  ;;  %v8286_v35 = vsel %vm2101_vm2, %v8239_v33, 0  ;;  %v8292_v33 = vsel %vm2101_vm2, %v8241_v63, 0 }
 0x654   :  { %v8240_v18 = vmax.f32 %v17233_v31, 0.0  ;;  %v21657_v57 = vand.u32 4294901760, %v8286_v35  ;;  %v23856_v62 = vand.u32 4294901760, %v21631_v23  ;;  %v8243_v31 = vmax.f32 %v17234_v60, 0.0 }
 0x655   :  { %v21606_v25 = vpop.f32.mrb[88].mxu1  ;;  %v8432_v53 = vsub.f32 %v21598_v54, %v23855_v30  ;;  %v21698_v60 = vand.u32 4294901760, %v8292_v33 }
 0x656   :  { %v21613_v46 = vpop.f32.mrb[89].mxu1  ;;  %15599 = vmatmul.mubr.f32.gmra.mrb[56].mxu0 %v21171_v28  ;;  %v21633_v28 = vand.u32 4294901760, %v8277_v10  ;;  %24510 = vst [vmem:[#allocation47_spill] sm:$0xff] %v21657_v57  ;;  %v8289_v52 = vsel %vm2101_vm2, %v8240_v18, 0  ;;  %v8295_v18 = vsel %vm2101_vm2, %v8242_v36, 0  ;;  %v8244_v36 = vmax.f32 %v17237_v26, 0.0 }
 0x657   :  { %15601 = vmatprep.mubr.f32.mxu0 %v21191_v15  ;;  %v23854_v15 = vand.u32 4294901760, %v21609_v2  ;;  %v8433_v27 = vand.u32 4294901760, %v8432_v53  ;;  %v21688_v53 = vsub.f32 %v8286_v35, %v21657_v57  ;;  %v21690_v9 = vand.u32 4294901760, %v8289_v52  ;;  %24514 = vst [vmem:[#allocation50_spill] sm:$0xff] %v21698_v60 }
 0x658   :  { %v8298_v56 = vsel %vm2101_vm2, %v8243_v31, 0  ;;  %v21702_v35 = vand.u32 4294901760, %v8295_v18 }
 0x659   :  { %v21628_v19 = vpop.f32.mrb[90].mxu1  ;;  %24512 = vst [vmem:[#allocation52_spill] sm:$0xff] %v21688_v53  ;;  %24513 = vst [vmem:[#allocation28_spill] sm:$0xff] %v21690_v9  ;;  %v21709_v42 = vsub.f32 %v8289_v52, %v21690_v9  ;;  %v21718_v30 = vand.u32 4294901760, %v8298_v56 }
 0x65a   :  { %v21636_v45 = vpop.f32.mrb[91].mxu1  ;;  %15602 = vmatmul.mubr.f32.gmra.mrb[58].mxu0 %v21193_v49  ;;  %v21655_v49 = vsub.f32 %v8277_v10, %v21633_v28  ;;  %v21670_v10 = vsub.f32 %v8280_v41, %v21644_v3  ;;  %24515 = vst [vmem:[#allocation49_spill] sm:$0xff] %v21702_v35  ;;  %v21724_v52 = vsub.f32 %v8295_v18, %v21702_v35  ;;  %v24522_v18 = vld [vmem:[#allocation31_spill] sm:$0xff] }
 0x65b   :  { %15604 = vmatprep.mubr.f32.mxu0 %v21210_v6  ;;  %v8442_v6 = vsub.f32 %v21609_v2, %v23854_v15  ;;  %v8245_v15 = vmax.f32 %v17236_v58, 0.0  ;;  %24516 = vst [vmem:[#allocation63_spill] sm:$0xff] %v21709_v42  ;;  %24519 = vst [vmem:[#allocation45_spill] sm:$0xff] %v21718_v30 }
 0x65c   :  { %24520 = vst [vmem:[#allocation48_spill] sm:$0xff] %v21724_v52  ;;  %v23872_v7 = vand.u32 4294901760, %v21724_v52 }
 0x65d   :  { %v21652_v38 = vpop.f32.mrb[92].mxu1  ;;  %v8304_v29 = vsel %vm2101_vm2, %v8245_v15, 0 }
 0x65e   :  { %v21660_v44 = vpop.f32.mrb[93].mxu1  ;;  %15605 = vmatmul.mubr.f32.gmra.mrb[60].mxu0 %v21226_v16  ;;  %v17239_v16 = vadd.f32 %v21558_v51, %v21555_v1  ;;  %v8443_v1 = vand.u32 4294901760, %v8442_v6  ;;  %v23861_v6 = vand.u32 4294901760, %v21677_v5 }
 0x65f   :  { %15607 = vmatprep.mubr.f32.mxu0 %v21229_v59  ;;  %v8462_v59 = vsub.f32 %v21631_v23, %v23856_v62  ;;  %v17238_v62 = vadd.f32 %v21558_v51, %v21553_v34  ;;  %v8301_v34 = vsel %vm2101_vm2, %v8244_v36, 0 }
 0x660   :  { %v8246_v48 = vmax.f32 %v17239_v16, 0.0  ;;  %v17241_v16 = vadd.f32 %v21558_v51, %v21564_v8  ;;  %v17243_v8 = vadd.f32 %v21558_v51, %v21572_v40  ;;  %v8492_v15 = vsub.f32 %v21677_v5, %v23861_v6 }
 0x661   :  { %v21685_v41 = vpop.f32.mrb[94].mxu1  ;;  %v8463_v26 = vand.u32 4294901760, %v8462_v59  ;;  %v17240_v59 = vadd.f32 %v21558_v51, %v21562_v14  ;;  %v8247_v36 = vmax.f32 %v17238_v62, 0.0  ;;  %v21740_v14 = vand.u32 4294901760, %v8301_v34 }
 0x662   :  { %v21696_v63 = vpop.f32.mrb[95].mxu1  ;;  %15608 = vmatmul.mubr.f32.gmra.mrb[62].mxu0 %v21248_v21  ;;  %v24517_v21 = vand.u32 4294901760, %v21655_v49  ;;  %v8307_v58 = vsel %vm2101_vm2, %v8246_v48, 0  ;;  %v21747_v48 = vsub.f32 %v8298_v56, %v21718_v30  ;;  %v8248_v40 = vmax.f32 %v17241_v16, 0.0  ;;  %v24528_v16 = vld [vmem:[#allocation42_spill] sm:$0xff] }
 0x663   :  { %15918 = vmatprep.mubr.f32.mxu0 %v8433_v27  ;;  %v21716_v27 = vsub.f32 %v8292_v33, %v21698_v60  ;;  %v24521_v33 = vand.u32 4294901760, %v21670_v10  ;;  %24523 = vst [vmem:[#allocation56_spill] sm:$0xff] %v21740_v14  ;;  %v21752_v47 = vand.u32 4294901760, %v8307_v58  ;;  %v8249_v0 = vmax.f32 %v17240_v59, 0.0 }
 0x664   :  { %v8472_v31 = vsub.f32 %v21655_v49, %v24517_v21  ;;  %24525 = vst [vmem:[#allocation55_spill] sm:$0xff] %v21747_v48  ;;  %v17242_v56 = vadd.f32 %v21558_v51, %v21569_v11  ;;  %v8250_v62 = vmax.f32 %v17243_v8, 0.0  ;;  %v17245_v59 = vadd.f32 %v21558_v51, %v21580_v13 }
 0x665   :  { %24518 = vst [vmem:[#allocation60_spill] sm:$0xff] %v21716_v27  ;;  %v8482_v21 = vsub.f32 %v21670_v10, %v24521_v33  ;;  %v21749_v33 = vand.u32 4294901760, %v8304_v29  ;;  %v23867_v6 = vand.u32 4294901760, %v21716_v27  ;;  %24527 = vst [vmem:[#allocation61_spill] sm:$0xff] %v21752_v47  ;;  %v8313_v11 = vsel %vm2101_vm2, %v8248_v40, 0 }
 0x666   :  { %15919 = vmatmul.mubr.f32.vlgmr.msra.gmra.mrb[64].mxu0 %v8443_v1  ;;  %v21779_v13 = vsub.f32 %v8307_v58, %v21752_v47  ;;  %v8251_v40 = vmax.f32 %v17242_v56, 0.0  ;;  %v8252_v58 = vmax.f32 %v17245_v59, 0.0  ;;  %v24536_v56 = vand.u32 4294901760, %v21747_v48 }
 0x667   :  { %15921 = vmatprep.mubr.f32.mxu0 %v8453_v20  ;;  %16899 = vmatpush3.bf16.msra.mxu0 %v24507_v24  ;;  %v8473_v20 = vand.u32 4294901760, %v8472_v31  ;;  %v24524_v24 = vand.u32 4294901760, %v21688_v53  ;;  %24526 = vst [vmem:[#allocation58_spill] sm:$0xff] %v21749_v33  ;;  %v8483_v31 = vand.u32 4294901760, %v8482_v21  ;;  %v8522_v8 = vsub.f32 %v21716_v27, %v23867_v6 }
 0x668   :  { %16901 = vmatprep.subr.bf16.mxu0 %v24522_v18  ;;  %24533 = vst [vmem:[#allocation27_spill] sm:$0xff] %v21779_v13  ;;  %v17247_v6 = vadd.f32 %v21558_v51, %v21595_v22 }
 0x669   :  { %v8502_v1 = vsub.f32 %v21688_v53, %v24524_v24  ;;  %v8310_v24 = vsel %vm2101_vm2, %v8247_v36, 0  ;;  %v8493_v53 = vand.u32 4294901760, %v8492_v15  ;;  %v21769_v36 = vsub.f32 %v8304_v29, %v21749_v33 }
 0x66a   :  { %15922 = vmatmul.mubr.f32.gmra.mrb[66].mxu0 %v8463_v26  ;;  %v21761_v26 = vsub.f32 %v8301_v34, %v21740_v14  ;;  %v21776_v15 = vand.u32 4294901760, %v8310_v24  ;;  %v8532_v29 = vsub.f32 %v21724_v52, %v23872_v7  ;;  %v21790_v34 = vand.u32 4294901760, %v8313_v11 }
 0x66b   :  { %15924 = vmatprep.mubr.f32.mxu0 %v8473_v20  ;;  %16903 = vmatpush3.bf16.msra.mxu0 %v24522_v18  ;;  %v8503_v21 = vand.u32 4294901760, %v8502_v1  ;;  %v24530_v20 = vand.u32 4294901760, %v21709_v42  ;;  %24531 = vst [vmem:[#allocation66_spill] sm:$0xff] %v21769_v36  ;;  %v8316_v1 = vsel %vm2101_vm2, %v8249_v0, 0  ;;  %v8322_v0 = vsel %vm2101_vm2, %v8251_v40, 0 }
 0x66c   :  { %16905 = vmatprep.subr.bf16.mxu0 %v24528_v16  ;;  %24529 = vst [vmem:[#allocation64_spill] sm:$0xff] %v21761_v26  ;;  %24532 = vst [vmem:[#allocation29_spill] sm:$0xff] %v21776_v15  ;;  %v8533_v59 = vand.u32 4294901760, %v8532_v29  ;;  %v8325_v7 = vsel %vm2101_vm2, %v8252_v58, 0 }
 0x66d   :  { %v8512_v18 = vsub.f32 %v21709_v42, %v24530_v20  ;;  %v17244_v20 = vadd.f32 %v21558_v51, %v21578_v43  ;;  %24534 = vst [vmem:[#allocation73_spill] sm:$0xff] %v21790_v34  ;;  %v8523_v42 = vand.u32 4294901760, %v8522_v8  ;;  %v21800_v43 = vsub.f32 %v8310_v24, %v21776_v15 }
 0x66e   :  { %15925 = vmatmul.mubr.f32.gmra.mrb[68].mxu0 %v8483_v31  ;;  %v8319_v31 = vsel %vm2101_vm2, %v8250_v62, 0  ;;  %v8542_v62 = vsub.f32 %v21747_v48, %v24536_v56  ;;  %v8254_v8 = vmax.f32 %v17247_v6, 0.0  ;;  %v21809_v56 = vsub.f32 %v8313_v11, %v21790_v34 }
 0x66f   :  { %15927 = vmatprep.mubr.f32.mxu0 %v8493_v53  ;;  %v8513_v27 = vand.u32 4294901760, %v8512_v18  ;;  %v21793_v53 = vand.u32 4294901760, %v8316_v1  ;;  %24537 = vst [vmem:[#allocation77_spill] sm:$0xff] %v21800_v43  ;;  %v21802_v22 = vand.u32 4294901760, %v8319_v31  ;;  %v8253_v52 = vmax.f32 %v17244_v20, 0.0 }
 0x670   :  { %24539 = vst [vmem:[#allocation79_spill] sm:$0xff] %v21809_v56  ;;  %v17249_v24 = vadd.f32 %v21558_v51, %v21613_v46  ;;  %v8543_v40 = vand.u32 4294901760, %v8542_v62  ;;  %v21823_v11 = vand.u32 4294901760, %v8322_v0  ;;  %v24544_v46 = vand.u32 4294901760, %v21779_v13 }
 0x671   :  { %24535 = vst [vmem:[#allocation74_spill] sm:$0xff] %v21793_v53  ;;  %24538 = vst [vmem:[#allocation78_spill] sm:$0xff] %v21802_v22  ;;  %v21818_v18 = vsub.f32 %v8316_v1, %v21793_v53  ;;  %v21826_v20 = vsub.f32 %v8319_v31, %v21802_v22  ;;  %v8328_v1 = vsel %vm2101_vm2, %v8253_v52, 0  ;;  %v17251_v48 = vadd.f32 %v21558_v51, %v21636_v45 }
 0x672   :  { %15928 = vmatmul.mubr.f32.gmra.mrb[70].mxu0 %v8503_v21  ;;  %v17246_v21 = vadd.f32 %v21558_v51, %v21589_v4  ;;  %v24542_v4 = vand.u32 4294901760, %v21769_v36  ;;  %24543 = vst [vmem:[#allocation82_spill] sm:$0xff] %v21823_v11  ;;  %v8572_v58 = vsub.f32 %v21779_v13, %v24544_v46  ;;  %v21843_v52 = vsub.f32 %v8322_v0, %v21823_v11 }
 0x673   :  { %15930 = vmatprep.mubr.f32.mxu0 %v8513_v27  ;;  %v24540_v27 = vand.u32 4294901760, %v21761_v26  ;;  %24541 = vst [vmem:[#allocation80_spill] sm:$0xff] %v21818_v18  ;;  %v8258_v5 = vmax.f32 %v17251_v48, 0.0 }
 0x674   :  { %v8562_v6 = vsub.f32 %v21769_v36, %v24542_v4  ;;  %v8255_v62 = vmax.f32 %v17246_v21, 0.0  ;;  %v17248_v4 = vadd.f32 %v21558_v51, %v21606_v25  ;;  %v8256_v36 = vmax.f32 %v17249_v24, 0.0 }
 0x675   :  { %v8552_v29 = vsub.f32 %v21761_v26, %v24540_v27  ;;  %v8331_v26 = vsel %vm2101_vm2, %v8254_v8, 0  ;;  %v21845_v21 = vand.u32 4294901760, %v8328_v1  ;;  %v24548_v25 = vand.u32 4294901760, %v21800_v43 }
 0x676   :  { %15931 = vmatmul.mubr.f32.gmra.mrb[72].mxu0 %v8523_v42  ;;  %v21833_v42 = vand.u32 4294901760, %v8325_v7  ;;  %v8563_v46 = vand.u32 4294901760, %v8562_v6  ;;  %v21847_v8 = vand.u32 4294901760, %v8331_v26  ;;  %v8334_v45 = vsel %vm2101_vm2, %v8255_v62, 0 }
 0x677   :  { %15933 = vmatprep.mubr.f32.mxu0 %v8533_v59  ;;  %v8553_v31 = vand.u32 4294901760, %v8552_v29  ;;  %24546 = vst [vmem:[#allocation84_spill] sm:$0xff] %v21845_v21  ;;  %v8582_v24 = vsub.f32 %v21800_v43, %v24548_v25  ;;  %v23891_v6 = vand.u32 4294901760, %v21826_v20  ;;  %v8257_v27 = vmax.f32 %v17248_v4, 0.0 }
 0x678   :  { %24545 = vst [vmem:[#allocation83_spill] sm:$0xff] %v21833_v42  ;;  %24547 = vst [vmem:[#allocation26_spill] sm:$0xff] %v21847_v8  ;;  %v21853_v29 = vsub.f32 %v8325_v7, %v21833_v42  ;;  %v8337_v0 = vsel %vm2101_vm2, %v8256_v36, 0  ;;  %v17250_v59 = vadd.f32 %v21558_v51, %v21628_v19  ;;  %v17253_v7 = vadd.f32 %v21558_v51, %v21660_v44 }
 0x679   :  { %v24551_v62 = vand.u32 4294901760, %v21818_v18  ;;  %v21869_v4 = vsub.f32 %v8328_v1, %v21845_v21  ;;  %v21871_v36 = vand.u32 4294901760, %v8334_v45  ;;  %v21874_v19 = vsub.f32 %v8331_v26, %v21847_v8 }
 0x67a   :  { %15934 = vmatmul.mubr.f32.gmra.mrb[74].mxu0 %v8543_v40  ;;  %24549 = vst [vmem:[#allocation59_spill] sm:$0xff] %v21853_v29  ;;  %v8573_v40 = vand.u32 4294901760, %v8572_v58  ;;  %v21877_v48 = vand.u32 4294901760, %v8337_v0  ;;  %v8612_v44 = vsub.f32 %v21826_v20, %v23891_v6  ;;  %v8340_v1 = vsel %vm2101_vm2, %v8257_v27, 0 }
 0x67b   :  { %15936 = vmatprep.mubr.f32.mxu0 %v8553_v31  ;;  %v24550_v31 = vand.u32 4294901760, %v21809_v56  ;;  %v8602_v58 = vsub.f32 %v21818_v18, %v24551_v62  ;;  %24552 = vst [vmem:[#allocation86_spill] sm:$0xff] %v21871_v36  ;;  %24553 = vst [vmem:[#allocation87_spill] sm:$0xff] %v21874_v19  ;;  %v8259_v62 = vmax.f32 %v17250_v59, 0.0  ;;  %v17252_v18 = vadd.f32 %v21558_v51, %v21652_v38 }
 0x67c   :  { %24554 = vst [vmem:[#allocation65_spill] sm:$0xff] %v21877_v48  ;;  %v17255_v25 = vadd.f32 %v21558_v51, %v21696_v63  ;;  %v21890_v43 = vsub.f32 %v8334_v45, %v21871_v36  ;;  %v24555_v6 = vand.u32 4294901760, %v21843_v52  ;;  %v23895_v59 = vand.u32 4294901760, %v21869_v4 }
 0x67d   :  { %v8592_v13 = vsub.f32 %v21809_v56, %v24550_v31  ;;  %v8583_v31 = vand.u32 4294901760, %v8582_v24  ;;  %v8260_v56 = vmax.f32 %v17253_v7, 0.0  ;;  %v8603_v24 = vand.u32 4294901760, %v8602_v58 }
 0x67e   :  { %15937 = vmatmul.mubr.f32.gmra.mrb[76].mxu0 %v8563_v46  ;;  %v23892_v46 = vand.u32 4294901760, %v21853_v29  ;;  %v8622_v27 = vsub.f32 %v21843_v52, %v24555_v6  ;;  %v8613_v63 = vand.u32 4294901760, %v8612_v44  ;;  %v8346_v7 = vsel %vm2101_vm2, %v8259_v62, 0 }
 0x67f   :  { %15939 = vmatprep.mubr.f32.mxu0 %v8573_v40  ;;  %v8593_v26 = vand.u32 4294901760, %v8592_v13  ;;  %v8343_v40 = vsel %vm2101_vm2, %v8258_v5, 0  ;;  %v21897_v13 = vand.u32 4294901760, %v8340_v1  ;;  %v21900_v5 = vsub.f32 %v8337_v0, %v21877_v48 }
 0x680   :  { %v8632_v45 = vsub.f32 %v21853_v29, %v23892_v46  ;;  %v21906_v58 = vand.u32 4294901760, %v8343_v40  ;;  %v17254_v6 = vadd.f32 %v21558_v51, %v21685_v41  ;;  %v8262_v38 = vmax.f32 %v17255_v25, 0.0 }
 0x681   :  { %24556 = vst [vmem:[#allocation69_spill] sm:$0xff] %v21897_v13  ;;  %24557 = vst [vmem:[#allocation75_spill] sm:$0xff] %v21900_v5  ;;  %v8623_v0 = vand.u32 4294901760, %v8622_v27  ;;  %v8642_v44 = vsub.f32 %v21869_v4, %v23895_v59  ;;  %v24559_v46 = vand.u32 4294901760, %v21874_v19  ;;  %v23898_v29 = vand.u32 4294901760, %v21890_v43 }
 0x682   :  { %15940 = vmatmul.mubr.f32.gmra.mrb[78].mxu0 %v8583_v31  ;;  %24558 = vst [vmem:[#allocation93_spill] sm:$0xff] %v21906_v58  ;;  %v8261_v31 = vmax.f32 %v17252_v18, 0.0  ;;  %v21919_v18 = vsub.f32 %v8340_v1, %v21897_v13  ;;  %v21921_v51 = vand.u32 4294901760, %v8346_v7  ;;  %v8633_v41 = vand.u32 4294901760, %v8632_v45 }
 0x683   :  { %15942 = vmatprep.mubr.f32.mxu0 %v8593_v26  ;;  %v8349_v26 = vsel %vm2101_vm2, %v8260_v56, 0  ;;  %v8652_v62 = vsub.f32 %v21874_v19, %v24559_v46  ;;  %v21925_v25 = vsub.f32 %v8343_v40, %v21906_v58  ;;  %v8355_v46 = vsel %vm2101_vm2, %v8262_v38, 0 }
 0x684   :  { %24560 = vst [vmem:[#allocation94_spill] sm:$0xff] %v21919_v18  ;;  %24561 = vst [vmem:[#allocation97_spill] sm:$0xff] %v21921_v51  ;;  %v21928_v27 = vand.u32 4294901760, %v8349_v26  ;;  %v8643_v59 = vand.u32 4294901760, %v8642_v44  ;;  %v8662_v45 = vsub.f32 %v21890_v43, %v23898_v29  ;;  %v21935_v56 = vsub.f32 %v8346_v7, %v21921_v51 }
 0x685   :  { %v8653_v1 = vand.u32 4294901760, %v8652_v62  ;;  %v21947_v44 = vand.u32 4294901760, %v8355_v46  ;;  %v23904_v62 = vand.u32 4294901760, %v21925_v25 }
 0x686   :  { %15943 = vmatmul.mubr.f32.gmra.mrb[80].mxu0 %v8603_v24  ;;  %v8352_v24 = vsel %vm2101_vm2, %v8261_v31, 0  ;;  %24562 = vst [vmem:[#allocation98_spill] sm:$0xff] %v21928_v27  ;;  %v24564_v31 = vand.u32 4294901760, %v21900_v5  ;;  %v21944_v38 = vsub.f32 %v8349_v26, %v21928_v27  ;;  %v8663_v7 = vand.u32 4294901760, %v8662_v45 }
 0x687   :  { %15945 = vmatprep.mubr.f32.mxu0 %v8613_v63  ;;  %v8263_v63 = vmax.f32 %v17254_v6, 0.0  ;;  %v21937_v40 = vand.u32 4294901760, %v8352_v24  ;;  %v23901_v6 = vand.u32 4294901760, %v21919_v18  ;;  %24565 = vst [vmem:[#allocation101_spill] sm:$0xff] %v21947_v44  ;;  %v23905_v26 = vand.u32 4294901760, %v21935_v56 }
 0x688   :  { %v8672_v19 = vsub.f32 %v21900_v5, %v24564_v31 }
 0x689   :  { %24563 = vst [vmem:[#allocation99_spill] sm:$0xff] %v21937_v40  ;;  %v8682_v31 = vsub.f32 %v21919_v18, %v23901_v6  ;;  %v8702_v6 = vsub.f32 %v21935_v56, %v23905_v26 }
 0x68a   :  { %15946 = vmatmul.mubr.f32.gmra.mrb[82].mxu0 %v8623_v0  ;;  %v8358_v0 = vsel %vm2101_vm2, %v8263_v63, 0  ;;  %v21960_v63 = vsub.f32 %v8355_v46, %v21947_v44  ;;  %v8673_v5 = vand.u32 4294901760, %v8672_v19 }
 0x68b   :  { %15948 = vmatprep.mubr.f32.mxu0 %v8633_v41  ;;  %v21951_v41 = vsub.f32 %v8352_v24, %v21937_v40  ;;  %v21953_v29 = vand.u32 4294901760, %v8358_v0  ;;  %v8683_v45 = vand.u32 4294901760, %v8682_v31 }
 0x68d   :  { %24566 = vst [vmem:[#allocation102_spill] sm:$0xff] %v21953_v29  ;;  %v21967_v24 = vsub.f32 %v8358_v0, %v21953_v29  ;;  %v23908_v46 = vand.u32 4294901760, %v21951_v41 }
 0x68e   :  { %15949 = vmatmul.mubr.f32.gmra.mrb[84].mxu0 %v8643_v59  ;;  %v8692_v59 = vsub.f32 %v21925_v25, %v23904_v62  ;;  %v23907_v62 = vand.u32 4294901760, %v21960_v63 }
 0x68f   :  { %15951 = vmatprep.mubr.f32.mxu0 %v8653_v1  ;;  %v23909_v1 = vand.u32 4294901760, %v21944_v38  ;;  %v8722_v0 = vsub.f32 %v21951_v41, %v23908_v46 }
 0x690   :  { %v8693_v18 = vand.u32 4294901760, %v8692_v59  ;;  %v8732_v59 = vsub.f32 %v21960_v63, %v23907_v62  ;;  %v24571_v62 = vld [vmem:[#allocation63_spill] sm:$0xff] }
 0x691   :  { %v8712_v19 = vsub.f32 %v21944_v38, %v23909_v1  ;;  %v8723_v26 = vand.u32 4294901760, %v8722_v0 }
 0x692   :  { %15952 = vmatmul.mubr.f32.gmra.mrb[86].mxu0 %v8663_v7  ;;  %v23906_v7 = vand.u32 4294901760, %v21967_v24 }
 0x693   :  { %15954 = vmatprep.mubr.f32.mxu0 %v8673_v5  ;;  %v8703_v5 = vand.u32 4294901760, %v8702_v6  ;;  %v8713_v31 = vand.u32 4294901760, %v8712_v19  ;;  %v24567_v19 = vld [vmem:[#allocation30_spill] sm:$0xff] }
 0x696   :  { %15955 = vmatmul.mubr.f32.gmra.mrb[88].mxu0 %v8683_v45  ;;  %v8742_v45 = vsub.f32 %v21967_v24, %v23906_v7  ;;  %v24570_v7 = vld [vmem:[#allocation52_spill] sm:$0xff] }
 0x697   :  { %15957 = vmatprep.mubr.f32.mxu0 %v8693_v18  ;;  %v8733_v18 = vand.u32 4294901760, %v8732_v59 }
 0x698   :  { %v8743_v6 = vand.u32 4294901760, %v8742_v45  ;;  %v24568_v45 = vld [vmem:[#allocation68_spill] sm:$0xff] }
 0x69a   :  { %15958 = vmatmul.mubr.f32.gmra.mrb[90].mxu0 %v8703_v5 }
 0x69b   :  { %15960 = vmatprep.mubr.f32.mxu0 %v8713_v31 }
 0x69e   :  { %15961 = vmatmul.mubr.f32.gmra.mrb[92].mxu0 %v8723_v26  ;;  %v6159_v26 = vpop.xlane.xlu1 %6158 }
 0x69f   :  { %15963 = vmatprep.mubr.f32.mxu0 %v8733_v18 }
 0x6a2   :  { %15964 = vmatmul.mubr.f32.gmra.mrb[94].mxu0 %v8743_v6  ;;  %v6165_v0 = vpop.xlane.xlu1 %6164 }
 0x6a3   :  { %15974 = vmatprep.mubr.f32.mxu0 %v21583_v39 }
 0x6a6   :  { %15975 = vmatmul.mubr.f32.vlgmr.msra.gmra.mrb[64].mxu0 %v21591_v32  ;;  %v6171_v59 = vpop.xlane.xlu1 %6170 }
 0x6a7   :  { %15977 = vmatprep.mubr.f32.mxu0 %v21604_v12  ;;  %16907 = vmatpush3.bf16.msra.mxu0 %v24528_v16  ;;  %v6156_v16 = vpop.xlane.xlu0 %6155 }
 0x6a8   :  { %16909 = vmatprep.subr.bf16.mxu0 %v24567_v19 }
 0x6aa   :  { %15978 = vmatmul.mubr.f32.gmra.mrb[66].mxu0 %v21611_v17  ;;  %v6177_v6 = vpop.xlane.xlu1 %6176 }
 0x6ab   :  { %15980 = vmatprep.mubr.f32.mxu0 %v21633_v28  ;;  %16911 = vmatpush3.bf16.msra.mxu0 %v24567_v19  ;;  %v6162_v5 = vpop.xlane.xlu0 %6161  ;;  %v24569_v19 = vld [vmem:[#allocation46_spill] sm:$0xff] }
 0x6ac   :  { %16913 = vmatprep.subr.bf16.mxu0 %v24493_v55 }
 0x6ae   :  { %15981 = vmatmul.mubr.f32.gmra.mrb[68].mxu0 %v21644_v3  ;;  %v6183_v1 = vpop.xlane.xlu1 %6182 }
 0x6af   :  { %15983 = vmatprep.mubr.f32.mxu0 %v21649_v37  ;;  %v6168_v31 = vpop.xlane.xlu0 %6167  ;;  %v24579_v37 = vld [vmem:[#allocation79_spill] sm:$0xff] }
 0x6b2   :  { %15984 = vmatmul.mubr.f32.gmra.mrb[70].mxu0 %v21657_v57 }
 0x6b3   :  { %15986 = vmatprep.mubr.f32.mxu0 %v21690_v9  ;;  %v6174_v18 = vpop.xlane.xlu0 %6173  ;;  %v24578_v9 = vld [vmem:[#allocation77_spill] sm:$0xff] }
 0x6b6   :  { %15987 = vmatmul.mubr.f32.gmra.mrb[72].mxu0 %v21698_v60 }
 0x6b7   :  { %15989 = vmatprep.mubr.f32.mxu0 %v21702_v35  ;;  %v6180_v46 = vpop.xlane.xlu0 %6179 }
 0x6ba   :  { %15990 = vmatmul.mubr.f32.gmra.mrb[74].mxu0 %v21718_v30 }
 0x6bb   :  { %15992 = vmatprep.mubr.f32.mxu0 %v21740_v14 }
 0x6be   :  { %15993 = vmatmul.mubr.f32.gmra.mrb[76].mxu0 %v21749_v33 }
 0x6bf   :  { %15995 = vmatprep.mubr.f32.mxu0 %v21752_v47 }
 0x6c2   :  { %15996 = vmatmul.mubr.f32.gmra.mrb[78].mxu0 %v21776_v15 }
 0x6c3   :  { %15998 = vmatprep.mubr.f32.mxu0 %v21790_v34  ;;  %v24577_v34 = vld [vmem:[#allocation27_spill] sm:$0xff] }
 0x6c6   :  { %15999 = vmatmul.mubr.f32.gmra.mrb[80].mxu0 %v21793_v53 }
 0x6c7   :  { %16001 = vmatprep.mubr.f32.mxu0 %v21802_v22 }
 0x6ca   :  { %16002 = vmatmul.mubr.f32.gmra.mrb[82].mxu0 %v21823_v11  ;;  %v24576_v11 = vld [vmem:[#allocation66_spill] sm:$0xff] }
 0x6cb   :  { %16004 = vmatprep.mubr.f32.mxu0 %v21833_v42 }
 0x6ce   :  { %16005 = vmatmul.mubr.f32.gmra.mrb[84].mxu0 %v21845_v21 }
 0x6cf   :  { %16007 = vmatprep.mubr.f32.mxu0 %v21847_v8 }
 0x6d2   :  { %16008 = vmatmul.mubr.f32.gmra.mrb[86].mxu0 %v21871_v36 }
 0x6d3   :  { %16010 = vmatprep.mubr.f32.mxu0 %v21877_v48  ;;  %v24575_v48 = vld [vmem:[#allocation64_spill] sm:$0xff] }
 0x6d6   :  { %16011 = vmatmul.mubr.f32.gmra.mrb[88].mxu0 %v21897_v13  ;;  %v6189_v13 = vpop.xlane.xlu1 %6188 }
 0x6d7   :  { %16013 = vmatprep.mubr.f32.mxu0 %v21906_v58  ;;  %v24574_v58 = vld [vmem:[#allocation55_spill] sm:$0xff] }
 0x6da   :  { %16014 = vmatmul.mubr.f32.gmra.mrb[90].mxu0 %v21921_v51  ;;  %v6195_v33 = vpop.xlane.xlu1 %6194 }
 0x6db   :  { %16016 = vmatprep.mubr.f32.mxu0 %v21928_v27  ;;  %v6186_v27 = vpop.xlane.xlu0 %6185 }
 0x6de   :  { %16017 = vmatmul.mubr.f32.gmra.mrb[92].mxu0 %v21937_v40 }
 0x6df   :  { %16019 = vmatprep.mubr.f32.mxu0 %v21947_v44  ;;  %v24573_v44 = vld [vmem:[#allocation48_spill] sm:$0xff]  ;;  %v6192_v15 = vpop.xlane.xlu0 %6191 }
 0x6e2   :  { %16020 = vmatmul.mubr.f32.gmra.mrb[94].mxu0 %v21953_v29  ;;  %v24572_v29 = vld [vmem:[#allocation60_spill] sm:$0xff] }
 0x6e3   :  { %16030 = vmatprep.mubr.f32.mxu0 %v21598_v54 }
 0x6e6   :  { %16031 = vmatmul.mubr.f32.vlgmr.msra.gmra.mrb[64].mxu0 %v21609_v2 }
 0x6e7   :  { %16033 = vmatprep.mubr.f32.mxu0 %v21623_v50  ;;  %16915 = vmatpush3.bf16.msra.mxu0 %v24493_v55 }
 0x6e8   :  { %16917 = vmatprep.subr.bf16.mxu0 %v24506_v61 }
 0x6ea   :  { %16034 = vmatmul.mubr.f32.gmra.mrb[66].mxu0 %v21631_v23 }
 0x6eb   :  { %16036 = vmatprep.mubr.f32.mxu0 %v21655_v49  ;;  %16919 = vmatpush3.bf16.msra.mxu0 %v24506_v61 }
 0x6ec   :  { %16921 = vmatprep.subr.bf16.mxu0 %v24568_v45 }
 0x6ee   :  { %16037 = vmatmul.mubr.f32.gmra.mrb[68].mxu0 %v21670_v10 }
 0x6ef   :  { %16039 = vmatprep.mubr.f32.mxu0 %v24569_v19 }
 0x6f2   :  { %16040 = vmatmul.mubr.f32.gmra.mrb[70].mxu0 %v24570_v7 }
 0x6f3   :  { %16042 = vmatprep.mubr.f32.mxu0 %v24571_v62 }
 0x6f6   :  { %16043 = vmatmul.mubr.f32.gmra.mrb[72].mxu0 %v24572_v29 }
 0x6f7   :  { %16045 = vmatprep.mubr.f32.mxu0 %v24573_v44 }
 0x6f9   :  { %v15564_v40 = vpop.f32.mrb[32].mxu0 }
 0x6fa   :  { %v5932_v51 = vpop.f32.mrb[33].mxu0  ;;  %16046 = vmatmul.mubr.f32.gmra.mrb[74].mxu0 %v24574_v58  ;;  %v6251_v8 = vadd.f32 %v15564_v40, %v6159_v26 }
 0x6fb   :  { %16048 = vmatprep.mubr.f32.mxu0 %v24575_v48  ;;  %v6250_v22 = vadd.f32 %v6156_v16, %v5932_v51  ;;  %v24580_v16 = vld [vmem:[#allocation80_spill] sm:$0xff] }
 0x6fd   :  { %v15567_v36 = vpop.f32.mrb[34].mxu0 }
 0x6fe   :  { %v6253_v21 = vadd.f32 %v15567_v36, %v6165_v0  ;;  %v5944_v42 = vpop.f32.mrb[35].mxu0  ;;  %16049 = vmatmul.mubr.f32.gmra.mrb[76].mxu0 %v24576_v11  ;;  %v6198_v0 = vpop.xlane.xlu0 %6197 }
 0x6ff   :  { %v6252_v53 = vadd.f32 %v6162_v5, %v5944_v42  ;;  %16051 = vmatprep.mubr.f32.mxu0 %v24577_v34  ;;  %v6201_v5 = vpop.xlane.xlu1 %6200 }
 0x700   :  { %v6283_v47 = vmin.f32 %v6251_v8, %v6253_v21 }
 0x701   :  { %v6282_v14 = vmin.f32 %v6250_v22, %v6252_v53  ;;  %v15570_v30 = vpop.f32.mrb[36].mxu0 }
 0x702   :  { %v6255_v35 = vadd.f32 %v15570_v30, %v6171_v59  ;;  %v5956_v60 = vpop.f32.mrb[37].mxu0  ;;  %16052 = vmatmul.mubr.f32.gmra.mrb[78].mxu0 %v24578_v9 }
 0x703   :  { %v6254_v57 = vadd.f32 %v6168_v31, %v5956_v60  ;;  %16054 = vmatprep.mubr.f32.mxu0 %v24579_v37  ;;  %v6213_v60 = vpop.xlane.xlu1 %6212 }
 0x704   :  { %v6285_v36 = vmin.f32 %v6283_v47, %v6255_v35  ;;  %v6207_v35 = vpop.xlane.xlu0 %6206 }
 0x705   :  { %v6284_v40 = vmin.f32 %v6282_v14, %v6254_v57  ;;  %v15573_v26 = vpop.f32.mrb[38].mxu0  ;;  %v24581_v57 = vld [vmem:[#allocation59_spill] sm:$0xff] }
 0x706   :  { %v6257_v51 = vadd.f32 %v15573_v26, %v6177_v6  ;;  %v5968_v42 = vpop.f32.mrb[39].mxu0  ;;  %16055 = vmatmul.mubr.f32.gmra.mrb[80].mxu0 %v24580_v16 }
 0x707   :  { %v6256_v21 = vadd.f32 %v6174_v18, %v5968_v42  ;;  %16057 = vmatprep.mubr.f32.mxu0 %v21826_v20 }
 0x708   :  { %v6287_v53 = vmin.f32 %v6285_v36, %v6257_v51  ;;  %v24582_v36 = vld [vmem:[#allocation87_spill] sm:$0xff] }
 0x709   :  { %v6286_v30 = vmin.f32 %v6284_v40, %v6256_v21  ;;  %v15576_v22 = vpop.f32.mrb[40].mxu0  ;;  %v6204_v21 = vpop.xlane.xlu0 %6203 }
 0x70a   :  { %v6259_v8 = vadd.f32 %v15576_v22, %v6183_v1  ;;  %v5980_v59 = vpop.f32.mrb[41].mxu0  ;;  %16058 = vmatmul.mubr.f32.gmra.mrb[82].mxu0 %v21843_v52  ;;  %v6210_v1 = vpop.xlane.xlu1 %6209 }
 0x70b   :  { %v6258_v47 = vadd.f32 %v6180_v46, %v5980_v59  ;;  %16060 = vmatprep.mubr.f32.mxu0 %v24581_v57 }
 0x70c   :  { %v6289_v14 = vmin.f32 %v6287_v53, %v6259_v8  ;;  %v24583_v53 = vld [vmem:[#allocation75_spill] sm:$0xff] }
 0x70d   :  { %v6288_v31 = vmin.f32 %v6286_v30, %v6258_v47  ;;  %v15579_v6 = vpop.f32.mrb[42].mxu0 }
 0x70e   :  { %v6261_v26 = vadd.f32 %v15579_v6, %v6189_v13  ;;  %v5992_v3 = vpop.f32.mrb[43].mxu0  ;;  %16061 = vmatmul.mubr.f32.gmra.mrb[84].mxu0 %v21869_v4 }
 0x70f   :  { %v6260_v18 = vadd.f32 %v6186_v27, %v5992_v3  ;;  %16063 = vmatprep.mubr.f32.mxu0 %v24582_v36  ;;  %v24584_v3 = vld [vmem:[#allocation94_spill] sm:$0xff]  ;;  %v6219_v27 = vpop.xlane.xlu1 %6218 }
 0x710   :  { %v6291_v40 = vmin.f32 %v6289_v14, %v6261_v26 }
 0x711   :  { %v6290_v51 = vmin.f32 %v6288_v31, %v6260_v18  ;;  %v15582_v42 = vpop.f32.mrb[44].mxu0  ;;  %v6216_v31 = vpop.xlane.xlu0 %6215 }
 0x712   :  { %v6263_v22 = vadd.f32 %v15582_v42, %v6195_v33  ;;  %v6004_v46 = vpop.f32.mrb[45].mxu0  ;;  %16064 = vmatmul.mubr.f32.gmra.mrb[86].mxu0 %v21890_v43 }
 0x713   :  { %v6262_v59 = vadd.f32 %v6192_v15, %v6004_v46  ;;  %16066 = vmatprep.mubr.f32.mxu0 %v24583_v53 }
 0x714   :  { %v6293_v30 = vmin.f32 %v6291_v40, %v6263_v22  ;;  %v6225_v40 = vpop.xlane.xlu1 %6224 }
 0x715   :  { %v6292_v13 = vmin.f32 %v6290_v51, %v6262_v59  ;;  %v15585_v8 = vpop.f32.mrb[46].mxu0  ;;  %v6222_v51 = vpop.xlane.xlu0 %6221 }
 0x716   :  { %v6265_v47 = vadd.f32 %v15585_v8, %v6201_v5  ;;  %v6016_v6 = vpop.f32.mrb[47].mxu0  ;;  %16067 = vmatmul.mubr.f32.gmra.mrb[88].mxu0 %v24584_v3 }
 0x717   :  { %v6264_v14 = vadd.f32 %v6198_v0, %v6016_v6  ;;  %16069 = vmatprep.mubr.f32.mxu0 %v21925_v25 }
 0x718   :  { %v6295_v26 = vmin.f32 %v6293_v30, %v6265_v47 }
 0x719   :  { %v6294_v33 = vmin.f32 %v6292_v13, %v6264_v14  ;;  %v15588_v18 = vpop.f32.mrb[48].mxu0 }
 0x71a   :  { %v6028_v42 = vpop.f32.mrb[49].mxu0  ;;  %16070 = vmatmul.mubr.f32.gmra.mrb[90].mxu0 %v21935_v56  ;;  %v6267_v22 = vadd.f32 %v15588_v18, %v6207_v35 }
 0x71b   :  { %v22055_v15 = vmin.f32 %v6294_v33, %v6295_v26  ;;  %16072 = vmatprep.mubr.f32.mxu0 %v21944_v38  ;;  %v6266_v0 = vadd.f32 %v6204_v21, %v6028_v42  ;;  %v6231_v26 = vpop.xlane.xlu1 %6230  ;;  %v24587_v42 = vand.u32 4294901760, %v21609_v2 }
 0x71d   :  { %24585 = vst [vmem:[#allocation103_spill] sm:$0xff] %v22055_v15  ;;  %v15591_v5 = vpop.f32.mrb[50].mxu0  ;;  %v24586_v15 = vand.u32 4294901760, %v21598_v54 }
 0x71e   :  { %v6269_v46 = vadd.f32 %v15591_v5, %v6213_v60  ;;  %v6040_v59 = vpop.f32.mrb[51].mxu0  ;;  %16073 = vmatmul.mubr.f32.gmra.mrb[92].mxu0 %v21951_v41  ;;  %v6228_v60 = vpop.xlane.xlu0 %6227 }
 0x71f   :  { %v6268_v8 = vadd.f32 %v6210_v1, %v6040_v59  ;;  %16075 = vmatprep.mubr.f32.mxu0 %v21960_v63  ;;  %v6237_v54 = vpop.xlane.xlu1 %6236 }
 0x720   :  { %v6304_v30 = vmin.f32 %v6267_v22, %v6269_v46 }
 0x721   :  { %v6303_v13 = vmin.f32 %v6266_v0, %v6268_v8  ;;  %v15594_v47 = vpop.f32.mrb[52].mxu0 }
 0x722   :  { %v6271_v6 = vadd.f32 %v15594_v47, %v6219_v27  ;;  %v6052_v14 = vpop.f32.mrb[53].mxu0  ;;  %16076 = vmatmul.mubr.f32.gmra.mrb[94].mxu0 %v21967_v24  ;;  %v24588_v27 = vand.u32 4294901760, %v21623_v50  ;;  %v6234_v0 = vpop.xlane.xlu0 %6233 }
 0x723   :  { %v6270_v33 = vadd.f32 %v6216_v31, %v6052_v14  ;;  %16086 = vmatprep.mubr.f32.mxu0 %v24586_v15  ;;  %v24589_v31 = vld [vmem:[#allocation32_spill] sm:$0xff]  ;;  %v24592_v14 = vand.u32 4294901760, %v21670_v10 }
 0x724   :  { %v6306_v35 = vmin.f32 %v6304_v30, %v6271_v6 }
 0x725   :  { %v6305_v18 = vmin.f32 %v6303_v13, %v6270_v33  ;;  %v15597_v5 = vpop.f32.mrb[54].mxu0 }
 0x726   :  { %v6273_v21 = vadd.f32 %v15597_v5, %v6225_v40  ;;  %v6064_v1 = vpop.f32.mrb[55].mxu0  ;;  %16087 = vmatmul.mubr.f32.vlgmr.msra.gmra.mrb[64].mxu0 %v24587_v42  ;;  %v24590_v40 = vand.u32 4294901760, %v21631_v23  ;;  %v24593_v23 = vand.u32 4294901760, %v24569_v19 }
 0x727   :  { %v6272_v22 = vadd.f32 %v6222_v51, %v6064_v1  ;;  %16089 = vmatprep.mubr.f32.mxu0 %v24588_v27  ;;  %16923 = vmatpush3.bf16.msra.mxu0 %v24568_v45  ;;  %v24591_v51 = vand.u32 4294901760, %v21655_v49  ;;  %v24594_v1 = vand.u32 4294901760, %v24570_v7 }
 0x728   :  { %v6308_v46 = vmin.f32 %v6306_v35, %v6273_v21  ;;  %16925 = vmatprep.subr.bf16.mxu0 %v24589_v31 }
 0x729   :  { %v6307_v15 = vmin.f32 %v6305_v18, %v6272_v22  ;;  %v15600_v59 = vpop.f32.mrb[56].mxu0  ;;  %v24595_v22 = vand.u32 4294901760, %v24571_v62 }
 0x72a   :  { %v6275_v8 = vadd.f32 %v15600_v59, %v6231_v26  ;;  %v6076_v30 = vpop.f32.mrb[57].mxu0  ;;  %16090 = vmatmul.mubr.f32.gmra.mrb[66].mxu0 %v24590_v40  ;;  %v6243_v26 = vpop.xlane.xlu1 %6242  ;;  %v24596_v59 = vand.u32 4294901760, %v24572_v29  ;;  %v24598_v40 = vand.u32 4294901760, %v24574_v58  ;;  %v24602_v29 = vand.u32 4294901760, %v24577_v34 }
 0x72b   :  { %v6274_v2 = vadd.f32 %v6228_v60, %v6076_v30  ;;  %16092 = vmatprep.mubr.f32.mxu0 %v24591_v51  ;;  %16927 = vmatpush3.bf16.msra.mxu0 %v24589_v31  ;;  %v6240_v60 = vpop.xlane.xlu0 %6239  ;;  %v24601_v51 = vand.u32 4294901760, %v24576_v11  ;;  %v24605_v58 = vand.u32 4294901760, %v24580_v16  ;;  %v24608_v11 = vand.u32 4294901760, %v24581_v57 }
 0x72c   :  { %v6310_v50 = vmin.f32 %v6308_v46, %v6275_v8  ;;  %16929 = vmatprep.subr.bf16.mxu0 %v24493_v55  ;;  %v24597_v8 = vand.u32 4294901760, %v24573_v44  ;;  %v24604_v44 = vand.u32 4294901760, %v24579_v37  ;;  %v24609_v34 = vand.u32 4294901760, %v21869_v4 }
 0x72d   :  { %v6309_v45 = vmin.f32 %v6307_v15, %v6274_v2  ;;  %v15603_v13 = vpop.f32.mrb[58].mxu0  ;;  %v24600_v2 = vand.u32 4294901760, %v24575_v48  ;;  %v24607_v48 = vand.u32 4294901760, %v21843_v52  ;;  %v24611_v37 = vand.u32 4294901760, %v21890_v43 }
 0x72e   :  { %v6277_v47 = vadd.f32 %v15603_v13, %v6237_v54  ;;  %v6088_v6 = vpop.f32.mrb[59].mxu0  ;;  %16093 = vmatmul.mubr.f32.gmra.mrb[68].mxu0 %v24592_v14  ;;  %v6249_v27 = vpop.xlane.xlu1 %6248  ;;  %v24612_v16 = vand.u32 4294901760, %v24583_v53  ;;  %v24614_v52 = vand.u32 4294901760, %v21925_v25  ;;  %v24615_v57 = vand.u32 4294901760, %v21935_v56  ;;  %v24620_v56 = vld [vmem:[#allocation44_spill] sm:$0xff]  ;;  %v24621_v25 = vld [vmem:[#allocation43_spill] sm:$0xff] }
 0x72f   :  { %v6276_v33 = vadd.f32 %v6234_v0, %v6088_v6  ;;  %16095 = vmatprep.mubr.f32.mxu0 %v24593_v23  ;;  %v6246_v54 = vpop.xlane.xlu0 %6245  ;;  %v24616_v4 = vand.u32 4294901760, %v21944_v38  ;;  %v24618_v43 = vand.u32 4294901760, %v21960_v63  ;;  %v24619_v53 = vand.u32 4294901760, %v21967_v24  ;;  %v24622_v38 = vld [vmem:[#allocation47_spill] sm:$0xff]  ;;  %v24624_v63 = vld [vmem:[#allocation50_spill] sm:$0xff]  ;;  %v24625_v24 = vld [vmem:[#allocation49_spill] sm:$0xff] }
 0x730   :  { %v6312_v49 = vmin.f32 %v6310_v50, %v6277_v47  ;;  %v24603_v50 = vand.u32 4294901760, %v24578_v9  ;;  %v24610_v9 = vand.u32 4294901760, %v24582_v36  ;;  %v24617_v36 = vand.u32 4294901760, %v21951_v41  ;;  %v24623_v41 = vld [vmem:[#allocation28_spill] sm:$0xff]  ;;  %v24628_v13 = vld [vmem:[#allocation58_spill] sm:$0xff]  ;;  %v24629_v47 = vld [vmem:[#allocation61_spill] sm:$0xff] }
 0x731   :  { %v6311_v35 = vmin.f32 %v6309_v45, %v6276_v33  ;;  %v15606_v18 = vpop.f32.mrb[60].mxu0  ;;  %v24606_v45 = vand.u32 4294901760, %v21826_v20  ;;  %v24613_v20 = vand.u32 4294901760, %v24584_v3  ;;  %v24627_v3 = vld [vmem:[#allocation56_spill] sm:$0xff]  ;;  %v24631_v6 = vld [vmem:[#allocation73_spill] sm:$0xff]  ;;  %v24632_v14 = vld [vmem:[#allocation74_spill] sm:$0xff] }
 0x732   :  { %v6279_v5 = vadd.f32 %v15606_v18, %v6243_v26  ;;  %v6100_v21 = vpop.f32.mrb[61].mxu0  ;;  %16096 = vmatmul.mubr.f32.gmra.mrb[70].mxu0 %v24594_v1  ;;  %v24633_v26 = vld [vmem:[#allocation78_spill] sm:$0xff]  ;;  %v24635_v23 = vld [vmem:[#allocation83_spill] sm:$0xff]  ;;  %v24639_v18 = vld [vmem:[#allocation65_spill] sm:$0xff] }
 0x733   :  { %v6278_v42 = vadd.f32 %v6240_v60, %v6100_v21  ;;  %16098 = vmatprep.mubr.f32.mxu0 %v24595_v22  ;;  %v24634_v33 = vld [vmem:[#allocation82_spill] sm:$0xff]  ;;  %v24636_v60 = vld [vmem:[#allocation84_spill] sm:$0xff]  ;;  %v24641_v21 = vld [vmem:[#allocation93_spill] sm:$0xff] }
 0x734   :  { %v6314_v10 = vmin.f32 %v6312_v49, %v6279_v5  ;;  %v24637_v49 = vld [vmem:[#allocation26_spill] sm:$0xff]  ;;  %v24640_v5 = vld [vmem:[#allocation69_spill] sm:$0xff]  ;;  %v24644_v22 = vld [vmem:[#allocation99_spill] sm:$0xff] }
 0x735   :  { %v6313_v46 = vmin.f32 %v6311_v35, %v6278_v42  ;;  %v15609_v31 = vpop.f32.mrb[62].mxu0  ;;  %v24638_v35 = vld [vmem:[#allocation86_spill] sm:$0xff]  ;;  %v24642_v1 = vld [vmem:[#allocation97_spill] sm:$0xff] }
 0x736   :  { %v6281_v19 = vadd.f32 %v15609_v31, %v6249_v27  ;;  %v6112_v15 = vpop.f32.mrb[63].mxu0  ;;  %16099 = vmatmul.mubr.f32.gmra.mrb[72].mxu0 %v24596_v59  ;;  %v24643_v42 = vld [vmem:[#allocation98_spill] sm:$0xff] }
 0x737   :  { %v6280_v0 = vadd.f32 %v6246_v54, %v6112_v15  ;;  %16101 = vmatprep.mubr.f32.mxu0 %v24597_v8  ;;  %v24646_v27 = vld [vmem:[#allocation102_spill] sm:$0xff] }
 0x738   :  { %v6316_v7 = vmin.f32 %v6314_v10, %v6281_v19  ;;  %v24645_v10 = vld [vmem:[#allocation101_spill] sm:$0xff] }
 0x739   :  { %v6315_v30 = vmin.f32 %v6313_v46, %v6280_v0 }
 0x73a   :  { %16102 = vmatmul.mubr.f32.gmra.mrb[74].mxu0 %v24598_v40 }
 0x73b   :  { %v22089_v62 = vmin.f32 %v6315_v30, %v6316_v7  ;;  %16104 = vmatprep.mubr.f32.mxu0 %v24600_v2 }
 0x73d   :  { %24599 = vst [vmem:[#allocation104_spill] sm:$0xff] %v22089_v62 }
 0x73e   :  { %16105 = vmatmul.mubr.f32.gmra.mrb[76].mxu0 %v24601_v51 }
 0x73f   :  { %16107 = vmatprep.mubr.f32.mxu0 %v24602_v29 }
 0x742   :  { %16108 = vmatmul.mubr.f32.gmra.mrb[78].mxu0 %v24603_v50 }
 0x743   :  { %16110 = vmatprep.mubr.f32.mxu0 %v24604_v44 }
 0x746   :  { %16111 = vmatmul.mubr.f32.gmra.mrb[80].mxu0 %v24605_v58 }
 0x747   :  { %16113 = vmatprep.mubr.f32.mxu0 %v24606_v45 }
 0x74a   :  { %16114 = vmatmul.mubr.f32.gmra.mrb[82].mxu0 %v24607_v48 }
 0x74b   :  { %16116 = vmatprep.mubr.f32.mxu0 %v24608_v11 }
 0x74e   :  { %16117 = vmatmul.mubr.f32.gmra.mrb[84].mxu0 %v24609_v34 }
 0x74f   :  { %16119 = vmatprep.mubr.f32.mxu0 %v24610_v9 }
 0x752   :  { %16120 = vmatmul.mubr.f32.gmra.mrb[86].mxu0 %v24611_v37 }
 0x753   :  { %16122 = vmatprep.mubr.f32.mxu0 %v24612_v16 }
 0x756   :  { %16123 = vmatmul.mubr.f32.gmra.mrb[88].mxu0 %v24613_v20 }
 0x757   :  { %16125 = vmatprep.mubr.f32.mxu0 %v24614_v52 }
 0x75a   :  { %16126 = vmatmul.mubr.f32.gmra.mrb[90].mxu0 %v24615_v57 }
 0x75b   :  { %16128 = vmatprep.mubr.f32.mxu0 %v24616_v4 }
 0x75e   :  { %16129 = vmatmul.mubr.f32.gmra.mrb[92].mxu0 %v24617_v36 }
 0x75f   :  { %16131 = vmatprep.mubr.f32.mxu0 %v24618_v43 }
 0x762   :  { %16132 = vmatmul.mubr.f32.gmra.mrb[94].mxu0 %v24619_v53 }
 0x763   :  { %16142 = vmatprep.mubr.f32.mxu0 %v21583_v39 }
 0x766   :  { %16143 = vmatmul.mubr.f32.vlgmr.msra.gmra.mrb[64].mxu0 %v21591_v32 }
 0x767   :  { %16145 = vmatprep.mubr.f32.mxu0 %v21604_v12  ;;  %16931 = vmatpush3.bf16.msra.mxu0 %v24493_v55  ;;  %v24626_v55 = vld [vmem:[#allocation45_spill] sm:$0xff] }
 0x768   :  { %16933 = vmatprep.subr.bf16.mxu0 %v24506_v61 }
 0x76a   :  { %16146 = vmatmul.mubr.f32.gmra.mrb[66].mxu0 %v21611_v17 }
 0x76b   :  { %16148 = vmatprep.mubr.f32.mxu0 %v21633_v28  ;;  %16935 = vmatpush3.bf16.msra.mxu0 %v24506_v61  ;;  %v24630_v61 = vld [vmem:[#allocation29_spill] sm:$0xff] }
 0x76e   :  { %16149 = vmatmul.mubr.f32.gmra.mrb[68].mxu0 %v24620_v56 }
 0x76f   :  { %16151 = vmatprep.mubr.f32.mxu0 %v24621_v25 }
 0x772   :  { %16152 = vmatmul.mubr.f32.gmra.mrb[70].mxu0 %v24622_v38 }
 0x773   :  { %16154 = vmatprep.mubr.f32.mxu0 %v24623_v41 }
 0x776   :  { %16155 = vmatmul.mubr.f32.gmra.mrb[72].mxu0 %v24624_v63 }
 0x777   :  { %16157 = vmatprep.mubr.f32.mxu0 %v24625_v24 }
 0x77a   :  { %16158 = vmatmul.mubr.f32.gmra.mrb[74].mxu0 %v24626_v55 }
 0x77b   :  { %16160 = vmatprep.mubr.f32.mxu0 %v24627_v3 }
 0x77e   :  { %16161 = vmatmul.mubr.f32.gmra.mrb[76].mxu0 %v24628_v13 }
 0x77f   :  { %16163 = vmatprep.mubr.f32.mxu0 %v24629_v47 }
 0x782   :  { %16164 = vmatmul.mubr.f32.gmra.mrb[78].mxu0 %v24630_v61 }
 0x783   :  { %16166 = vmatprep.mubr.f32.mxu0 %v24631_v6 }
 0x786   :  { %16167 = vmatmul.mubr.f32.gmra.mrb[80].mxu0 %v24632_v14 }
 0x787   :  { %16169 = vmatprep.mubr.f32.mxu0 %v24633_v26 }
 0x78a   :  { %16170 = vmatmul.mubr.f32.gmra.mrb[82].mxu0 %v24634_v33 }
 0x78b   :  { %16172 = vmatprep.mubr.f32.mxu0 %v24635_v23 }
 0x78e   :  { %16173 = vmatmul.mubr.f32.gmra.mrb[84].mxu0 %v24636_v60 }
 0x78f   :  { %16175 = vmatprep.mubr.f32.mxu0 %v24637_v49 }
 0x792   :  { %16176 = vmatmul.mubr.f32.gmra.mrb[86].mxu0 %v24638_v35 }
 0x793   :  { %16178 = vmatprep.mubr.f32.mxu0 %v24639_v18 }
 0x796   :  { %16179 = vmatmul.mubr.f32.gmra.mrb[88].mxu0 %v24640_v5 }
 0x797   :  { %16181 = vmatprep.mubr.f32.mxu0 %v24641_v21 }
 0x79a   :  { %16182 = vmatmul.mubr.f32.gmra.mrb[90].mxu0 %v24642_v1 }
 0x79b   :  { %16184 = vmatprep.mubr.f32.mxu0 %v24643_v42 }
 0x79e   :  { %16185 = vmatmul.mubr.f32.gmra.mrb[92].mxu0 %v24644_v22 }
 0x79f   :  { %16187 = vmatprep.mubr.f32.mxu0 %v24645_v10 }
 0x7a2   :  { %16188 = vmatmul.mubr.f32.gmra.mrb[94].mxu0 %v24646_v27 }
 0x7a3   :  { %16198 = vmatprep.mubr.f32.mxu0 %v21583_v39 }
 0x7a6   :  { %16199 = vmatmul.mubr.f32.vlgmr.msra.gmra.mrb[64].mxu0 %v21591_v32  ;;  %v22198_v32 = vld [vmem:[#allocation10] ss:$0 sm:$0xff] }
 0x7a7   :  { %16201 = vmatprep.mubr.f32.mxu0 %v21604_v12 }
 0x7aa   :  { %16202 = vmatmul.mubr.f32.gmra.mrb[66].mxu0 %v21611_v17 }
 0x7ab   :  { %16204 = vmatprep.mubr.f32.mxu0 %v21633_v28 }
 0x7ae   :  { %16205 = vmatmul.mubr.f32.gmra.mrb[68].mxu0 %v24620_v56 }
 0x7af   :  { %16207 = vmatprep.mubr.f32.mxu0 %v24621_v25 }
 0x7b2   :  { %16208 = vmatmul.mubr.f32.gmra.mrb[70].mxu0 %v24622_v38 }
 0x7b3   :  { %16210 = vmatprep.mubr.f32.mxu0 %v24623_v41 }
 0x7b6   :  { %16211 = vmatmul.mubr.f32.gmra.mrb[72].mxu0 %v24624_v63 }
 0x7b7   :  { %16213 = vmatprep.mubr.f32.mxu0 %v24625_v24 }
 0x7ba   :  { %16214 = vmatmul.mubr.f32.gmra.mrb[74].mxu0 %v24626_v55 }
 0x7bb   :  { %16216 = vmatprep.mubr.f32.mxu0 %v24627_v3 }
 0x7be   :  { %16217 = vmatmul.mubr.f32.gmra.mrb[76].mxu0 %v24628_v13 }
 0x7bf   :  { %16219 = vmatprep.mubr.f32.mxu0 %v24629_v47 }
 0x7c2   :  { %16220 = vmatmul.mubr.f32.gmra.mrb[78].mxu0 %v24630_v61 }
 0x7c3   :  { %16222 = vmatprep.mubr.f32.mxu0 %v24631_v6 }
 0x7c6   :  { %16223 = vmatmul.mubr.f32.gmra.mrb[80].mxu0 %v24632_v14 }
 0x7c7   :  { %16225 = vmatprep.mubr.f32.mxu0 %v24633_v26 }
 0x7ca   :  { %16226 = vmatmul.mubr.f32.gmra.mrb[82].mxu0 %v24634_v33 }
 0x7cb   :  { %16228 = vmatprep.mubr.f32.mxu0 %v24635_v23 }
 0x7ce   :  { %16229 = vmatmul.mubr.f32.gmra.mrb[84].mxu0 %v24636_v60 }
 0x7cf   :  { %16231 = vmatprep.mubr.f32.mxu0 %v24637_v49 }
 0x7d2   :  { %16232 = vmatmul.mubr.f32.gmra.mrb[86].mxu0 %v24638_v35 }
 0x7d3   :  { %16234 = vmatprep.mubr.f32.mxu0 %v24639_v18 }
 0x7d6   :  { %16235 = vmatmul.mubr.f32.gmra.mrb[88].mxu0 %v24640_v5 }
 0x7d7   :  { %16237 = vmatprep.mubr.f32.mxu0 %v24641_v21 }
 0x7da   :  { %16238 = vmatmul.mubr.f32.gmra.mrb[90].mxu0 %v24642_v1 }
 0x7db   :  { %16240 = vmatprep.mubr.f32.mxu0 %v24643_v42 }
 0x7de   :  { %16241 = vmatmul.mubr.f32.gmra.mrb[92].mxu0 %v24644_v22 }
 0x7df   :  { %16243 = vmatprep.mubr.f32.mxu0 %v24645_v10 }
 0x7e2   :  { %16244 = vmatmul.mubr.f32.gmra.mrb[94].mxu0 %v24646_v27 }
 0x879   :  { %v16200_v39 = vpop.f32.mrb[64].mxu0 }
 0x87a   :  { %v17256_v12 = vadd.f32 %v22198_v32, %v16200_v39  ;;  %v9988_v17 = vpop.f32.mrb[65].mxu0 }
 0x87b   :  { %v17257_v28 = vadd.f32 %v22198_v32, %v9988_v17 }
 0x87c   :  { %v13244_v46 = vmul.f32 -1.442695, %v17256_v12 }
 0x87d   :  { %v13243_v31 = vmul.f32 -1.442695, %v17257_v28  ;;  %v16203_v54 = vpop.f32.mrb[66].mxu0 }
 0x87e   :  { %18368 = vpow2.f32 %v13244_v46  ;;  %v17258_v19 = vadd.f32 %v22198_v32, %v16203_v54  ;;  %v10000_v15 = vpop.f32.mrb[67].mxu0 }
 0x87f   :  { %18370 = vpow2.f32 %v13243_v31  ;;  %v17259_v59 = vadd.f32 %v22198_v32, %v10000_v15 }
 0x880   :  { %v13246_v0 = vmul.f32 -1.442695, %v17258_v19 }
 0x881   :  { %v13245_v8 = vmul.f32 -1.442695, %v17259_v59  ;;  %v16206_v7 = vpop.f32.mrb[68].mxu0 }
 0x882   :  { %18372 = vpow2.f32 %v13246_v0  ;;  %v17260_v30 = vadd.f32 %v22198_v32, %v16206_v7  ;;  %v10012_v40 = vpop.f32.mrb[69].mxu0 }
 0x883   :  { %18374 = vpow2.f32 %v13245_v8  ;;  %v17261_v2 = vadd.f32 %v22198_v32, %v10012_v40 }
 0x884   :  { %v13248_v51 = vmul.f32 -1.442695, %v17260_v30 }
 0x885   :  { %v13247_v29 = vmul.f32 -1.442695, %v17261_v2  ;;  %v16209_v50 = vpop.f32.mrb[70].mxu0 }
 0x886   :  { %18376 = vpow2.f32 %v13248_v51  ;;  %v17262_v44 = vadd.f32 %v22198_v32, %v16209_v50  ;;  %v10024_v58 = vpop.f32.mrb[71].mxu0 }
 0x887   :  { %18378 = vpow2.f32 %v13247_v29  ;;  %v17263_v45 = vadd.f32 %v22198_v32, %v10024_v58 }
 0x888   :  { %v18369_v48 = vpop.eup %18368  ;;  %v13250_v11 = vmul.f32 -1.442695, %v17262_v44 }
 0x889   :  { %v18371_v34 = vpop.eup %18370  ;;  %v10275_v9 = vadd.f32 1.0, %v18369_v48  ;;  %v13249_v37 = vmul.f32 -1.442695, %v17263_v45  ;;  %v16212_v16 = vpop.f32.mrb[72].mxu0 }
 0x88a   :  { %v10274_v20 = vadd.f32 1.0, %v18371_v34  ;;  %18380 = vpow2.f32 %v13250_v11  ;;  %v17264_v52 = vadd.f32 %v22198_v32, %v16212_v16  ;;  %v10036_v57 = vpop.f32.mrb[73].mxu0 }
 0x88b   :  { %18382 = vrcp.f32 %v10275_v9  ;;  %v17265_v4 = vadd.f32 %v22198_v32, %v10036_v57 }
 0x88c   :  { %v18373_v36 = vpop.eup %18372  ;;  %18384 = vrcp.f32 %v10274_v20  ;;  %v13252_v43 = vmul.f32 -1.442695, %v17264_v52 }
 0x88d   :  { %v18375_v53 = vpop.eup %18374  ;;  %v10277_v56 = vadd.f32 1.0, %v18373_v36  ;;  %18386 = vpow2.f32 %v13249_v37  ;;  %v13251_v25 = vmul.f32 -1.442695, %v17265_v4  ;;  %v16215_v38 = vpop.f32.mrb[74].mxu0 }
 0x88e   :  { %v10276_v41 = vadd.f32 1.0, %v18375_v53  ;;  %18388 = vpow2.f32 %v13252_v43  ;;  %v17266_v63 = vadd.f32 %v22198_v32, %v16215_v38  ;;  %v10048_v24 = vpop.f32.mrb[75].mxu0 }
 0x88f   :  { %18390 = vrcp.f32 %v10277_v56  ;;  %v17267_v55 = vadd.f32 %v22198_v32, %v10048_v24 }
 0x890   :  { %v18377_v3 = vpop.eup %18376  ;;  %18392 = vrcp.f32 %v10276_v41  ;;  %v13254_v13 = vmul.f32 -1.442695, %v17266_v63 }
 0x891   :  { %v18379_v47 = vpop.eup %18378  ;;  %v10279_v61 = vadd.f32 1.0, %v18377_v3  ;;  %18394 = vpow2.f32 %v13251_v25  ;;  %v13253_v6 = vmul.f32 -1.442695, %v17267_v55  ;;  %v16218_v14 = vpop.f32.mrb[76].mxu0 }
 0x892   :  { %v10278_v26 = vadd.f32 1.0, %v18379_v47  ;;  %18396 = vpow2.f32 %v13254_v13  ;;  %v17268_v33 = vadd.f32 %v22198_v32, %v16218_v14  ;;  %v10060_v23 = vpop.f32.mrb[77].mxu0 }
 0x893   :  { %18398 = vrcp.f32 %v10279_v61  ;;  %v17269_v60 = vadd.f32 %v22198_v32, %v10060_v23 }
 0x894   :  { %v18381_v49 = vpop.eup %18380  ;;  %18400 = vrcp.f32 %v10278_v26  ;;  %v13256_v35 = vmul.f32 -1.442695, %v17268_v33 }
 0x895   :  { %v18383_v18 = vpop.eup %18382  ;;  %v10281_v5 = vadd.f32 1.0, %v18381_v49  ;;  %18402 = vpow2.f32 %v13253_v6  ;;  %v13255_v21 = vmul.f32 -1.442695, %v17269_v60  ;;  %v16221_v1 = vpop.f32.mrb[78].mxu0 }
 0x896   :  { %v18385_v42 = vpop.eup %18384  ;;  %v10374_v22 = vsel %vm2101_vm2, %v18383_v18, 0  ;;  %18404 = vpow2.f32 %v13256_v35  ;;  %v17270_v10 = vadd.f32 %v22198_v32, %v16221_v1  ;;  %v10072_v27 = vpop.f32.mrb[79].mxu0  ;;  %v12285_v39 = vmul.f32 %v18383_v18, %v18383_v18 }
 0x897   :  { %v18387_v12 = vpop.eup %18386  ;;  %v22216_v17 = vand.u32 4294901760, %v10374_v22  ;;  %18406 = vrcp.f32 %v10281_v5  ;;  %v17271_v28 = vadd.f32 %v22198_v32, %v10072_v27  ;;  %v12284_v46 = vmul.f32 %v18385_v42, %v18385_v42 }
 0x898   :  { %v18389_v31 = vpop.eup %18388  ;;  %v10280_v54 = vadd.f32 1.0, %v18387_v12  ;;  %18408 = vpow2.f32 %v13255_v21  ;;  %v13258_v19 = vmul.f32 -1.442695, %v17270_v10  ;;  %v12319_v15 = vsel %vm2101_vm2, %v12285_v39, 0.0 }
 0x899   :  { %v22220_v59 = vpop.eup %18390  ;;  %v22223_v0 = vsub.f32 %v10374_v22, %v22216_v17  ;;  %v10283_v8 = vadd.f32 1.0, %v18389_v31  ;;  %v13257_v7 = vmul.f32 -1.442695, %v17271_v28  ;;  %12320 = vadd.xlane.f32.xlu1 %v12319_v15  ;;  %v16224_v30 = vpop.f32.mrb[80].mxu0  ;;  %v12316_v40 = vsel %vm2101_vm2, %v12284_v46, 0.0 }
 0x89a   :  { %v22226_v2 = vpop.eup %18392  ;;  %18410 = vrcp.f32 %v10280_v54  ;;  %v17272_v51 = vadd.f32 %v22198_v32, %v16224_v30  ;;  %v10084_v29 = vpop.f32.mrb[81].mxu0  ;;  %12317 = vadd.xlane.f32.xlu0 %v12316_v40  ;;  %v12287_v50 = vmul.f32 %v22220_v59, %v22220_v59  ;;  %v10371_v44 = vsel %vm2101_vm2, %v18385_v42, 0 }
 0x89b   :  { %v18395_v58 = vpop.eup %18394  ;;  %18412 = vrcp.f32 %v10283_v8  ;;  %v17273_v45 = vadd.f32 %v22198_v32, %v10084_v29  ;;  %v12286_v48 = vmul.f32 %v22226_v2, %v22226_v2  ;;  %v22235_v11 = vand.u32 4294901760, %v10371_v44 }
 0x89c   :  { %v18397_v34 = vpop.eup %18396  ;;  %v10282_v9 = vadd.f32 1.0, %v18395_v58  ;;  %18414 = vpow2.f32 %v13258_v19  ;;  %v13260_v37 = vmul.f32 -1.442695, %v17272_v51  ;;  %v12325_v16 = vsel %vm2101_vm2, %v12287_v50, 0.0 }
 0x89d   :  { %v22238_v20 = vpop.eup %18398  ;;  %v10285_v52 = vadd.f32 1.0, %v18397_v34  ;;  %18416 = vpow2.f32 %v13257_v7  ;;  %v13259_v57 = vmul.f32 -1.442695, %v17273_v45  ;;  %12326 = vadd.xlane.f32.xlu1 %v12325_v16  ;;  %v16227_v4 = vpop.f32.mrb[82].mxu0  ;;  %v12322_v36 = vsel %vm2101_vm2, %v12286_v48, 0.0 }
 0x89e   :  { %v22241_v43 = vpop.eup %18400  ;;  %18418 = vrcp.f32 %v10282_v9  ;;  %v17274_v53 = vadd.f32 %v22198_v32, %v16227_v4  ;;  %v10096_v56 = vpop.f32.mrb[83].mxu0  ;;  %12323 = vadd.xlane.f32.xlu0 %v12322_v36  ;;  %v12289_v25 = vmul.f32 %v22238_v20, %v22238_v20  ;;  %v22247_v38 = vsub.f32 %v10371_v44, %v22235_v11 }
 0x89f   :  { %v18403_v41 = vpop.eup %18402  ;;  %18420 = vrcp.f32 %v10285_v52  ;;  %v17275_v63 = vadd.f32 %v22198_v32, %v10096_v56  ;;  %v12288_v24 = vmul.f32 %v22241_v43, %v22241_v43  ;;  %v23976_v55 = vand.u32 4294901760, %v22223_v0 }
 0x8a0   :  { %v18405_v3 = vpop.eup %18404  ;;  %v10284_v13 = vadd.f32 1.0, %v18403_v41  ;;  %18422 = vpow2.f32 %v13260_v37  ;;  %v13262_v47 = vmul.f32 -1.442695, %v17274_v53  ;;  %v12331_v61 = vsel %vm2101_vm2, %v12289_v25, 0.0 }
 0x8a1   :  { %v22254_v6 = vpop.eup %18406  ;;  %v10287_v14 = vadd.f32 1.0, %v18405_v3  ;;  %18424 = vpow2.f32 %v13259_v57  ;;  %v13261_v26 = vmul.f32 -1.442695, %v17275_v63  ;;  %12332 = vadd.xlane.f32.xlu1 %v12331_v61  ;;  %v16230_v33 = vpop.f32.mrb[84].mxu0  ;;  %v12328_v23 = vsel %vm2101_vm2, %v12288_v24, 0.0  ;;  %v24647_v57 = vld [vmem:[#allocation88_spill] sm:$0xff] }
 0x8a2   :  { %v18409_v60 = vpop.eup %18408  ;;  %18426 = vrcp.f32 %v10284_v13  ;;  %v17276_v49 = vadd.f32 %v22198_v32, %v16230_v33  ;;  %v10108_v35 = vpop.f32.mrb[85].mxu0  ;;  %12329 = vadd.xlane.f32.xlu0 %v12328_v23  ;;  %v23980_v18 = vand.u32 4294901760, %v22247_v38  ;;  %v10548_v5 = vsub.f32 %v22223_v0, %v23976_v55  ;;  %v24648_v24 = vld [vmem:[#allocation53_spill] sm:$0xff] }
 0x8a3   :  { %18428 = vrcp.f32 %v10287_v14  ;;  %v10286_v21 = vadd.f32 1.0, %v18409_v60  ;;  %v17277_v1 = vadd.f32 %v22198_v32, %v10108_v35  ;;  %v12291_v42 = vmul.f32 %v22254_v6, %v22254_v6 }
 0x8a4   :  { %v22265_v22 = vpop.eup %18410  ;;  %18430 = vpow2.f32 %v13262_v47  ;;  %v13264_v10 = vmul.f32 -1.442695, %v17276_v49  ;;  %v10538_v27 = vsub.f32 %v22247_v38, %v23980_v18  ;;  %v10549_v39 = vand.u32 4294901760, %v10548_v5 }
 0x8a5   :  { %v22270_v12 = vpop.eup %18412  ;;  %18432 = vrcp.f32 %v10286_v21  ;;  %v13263_v28 = vmul.f32 -1.442695, %v17277_v1  ;;  %v12337_v46 = vsel %vm2101_vm2, %v12291_v42, 0.0  ;;  %v16233_v31 = vpop.f32.mrb[86].mxu0  ;;  %v12290_v54 = vmul.f32 %v22265_v22, %v22265_v22 }
 0x8a6   :  { %v18415_v19 = vpop.eup %18414  ;;  %18434 = vpow2.f32 %v13261_v26  ;;  %v10539_v15 = vand.u32 4294901760, %v10538_v27  ;;  %12338 = vadd.xlane.f32.xlu1 %v12337_v46  ;;  %v17278_v8 = vadd.f32 %v22198_v32, %v16233_v31  ;;  %v10120_v7 = vpop.f32.mrb[87].mxu0  ;;  %v10377_v30 = vsel %vm2101_vm2, %v22226_v2, 0 }
 0x8a7   :  { %v18417_v40 = vpop.eup %18416  ;;  %v10289_v51 = vadd.f32 1.0, %v18415_v19  ;;  %18436 = vpow2.f32 %v13264_v10  ;;  %v17279_v29 = vadd.f32 %v22198_v32, %v10120_v7  ;;  %v12334_v50 = vsel %vm2101_vm2, %v12290_v54, 0.0 }
 0x8a8   :  { %v22280_v44 = vpop.eup %18418  ;;  %v10288_v58 = vadd.f32 1.0, %v18417_v40  ;;  %18438 = vpow2.f32 %v13263_v28  ;;  %16254 = vmatprep.mubr.f32.mxu1 %v10539_v15  ;;  %v13266_v45 = vmul.f32 -1.442695, %v17278_v8  ;;  %12335 = vadd.xlane.f32.xlu0 %v12334_v50  ;;  %v22282_v48 = vand.u32 4294901760, %v10377_v30  ;;  %v24649_v28 = vld [vmem:[#allocation57_spill] sm:$0xff] }
 0x8a9   :  { %v22284_v34 = vpop.eup %18420  ;;  %18440 = vrcp.f32 %v10289_v51  ;;  %16255 = vmatmul.mubr.f32.vlgmr.msra.gmra.mrb[96].mxu1 %v10549_v39  ;;  %v13265_v2 = vmul.f32 -1.442695, %v17279_v29  ;;  %v10380_v9 = vsel %vm2101_vm2, %v22220_v59, 0  ;;  %v12293_v37 = vmul.f32 %v22270_v12, %v22270_v12  ;;  %v16236_v16 = vpop.f32.mrb[88].mxu0 }
 0x8aa   :  { %v18423_v52 = vpop.eup %18422  ;;  %18442 = vrcp.f32 %v10288_v58  ;;  %16947 = vmatpush3.bf16.msra.mxu1 %v24647_v57  ;;  %v22292_v4 = vsub.f32 %v10377_v30, %v22282_v48  ;;  %v22294_v36 = vand.u32 4294901760, %v10380_v9  ;;  %v17280_v53 = vadd.f32 %v22198_v32, %v16236_v16  ;;  %v10132_v56 = vpop.f32.mrb[89].mxu0 }
 0x8ab   :  { %v18425_v25 = vpop.eup %18424  ;;  %v10291_v41 = vadd.f32 1.0, %v18423_v52  ;;  %18444 = vpow2.f32 %v13266_v45  ;;  %v12343_v59 = vsel %vm2101_vm2, %v12293_v37, 0.0  ;;  %v17281_v63 = vadd.f32 %v22198_v32, %v10132_v56  ;;  %16949 = vmatprep.subr.bf16.mxu1 %v24648_v24 }
 0x8ac   :  { %v22300_v3 = vpop.eup %18426  ;;  %v10290_v13 = vadd.f32 1.0, %v18425_v25  ;;  %18446 = vpow2.f32 %v13265_v2  ;;  %v23975_v47 = vand.u32 4294901760, %v22292_v4  ;;  %v22304_v61 = vsub.f32 %v10380_v9, %v22294_v36  ;;  %12344 = vadd.xlane.f32.xlu1 %v12343_v59 }
 0x8ad   :  { %v22306_v14 = vpop.eup %18428  ;;  %18448 = vrcp.f32 %v10291_v41  ;;  %v13268_v26 = vmul.f32 -1.442695, %v17280_v53  ;;  %v13267_v33 = vmul.f32 -1.442695, %v17281_v63  ;;  %v12292_v23 = vmul.f32 %v22280_v44, %v22280_v44  ;;  %v16239_v60 = vpop.f32.mrb[90].mxu0 }
 0x8ae   :  { %v18431_v49 = vpop.eup %18430  ;;  %18450 = vrcp.f32 %v10290_v13  ;;  %v10558_v35 = vsub.f32 %v22292_v4, %v23975_v47  ;;  %v23973_v5 = vand.u32 4294901760, %v22304_v61  ;;  %v10383_v21 = vsel %vm2101_vm2, %v22241_v43, 0  ;;  %v10144_v1 = vpop.f32.mrb[91].mxu0  ;;  %16951 = vmatpush3.bf16.msra.mxu1 %v24648_v24 }
 0x8af   :  { %v22317_v42 = vpop.eup %18432  ;;  %v10293_v10 = vadd.f32 1.0, %v18431_v49  ;;  %18452 = vpow2.f32 %v13268_v26  ;;  %v12340_v27 = vsel %vm2101_vm2, %v12292_v23, 0.0  ;;  %v22320_v39 = vand.u32 4294901760, %v10383_v21  ;;  %16953 = vmatprep.subr.bf16.mxu1 %v24649_v28 }
 0x8b0   :  { %v18435_v46 = vpop.eup %18434  ;;  %v10559_v31 = vand.u32 4294901760, %v10558_v35  ;;  %v10568_v54 = vsub.f32 %v22304_v61, %v23973_v5  ;;  %18454 = vpow2.f32 %v13267_v33  ;;  %12341 = vadd.xlane.f32.xlu0 %v12340_v27  ;;  %v10386_v43 = vsel %vm2101_vm2, %v22238_v20, 0 }
 0x8b1   :  { %v18437_v19 = vpop.eup %18436  ;;  %18456 = vrcp.f32 %v10293_v10  ;;  %v10292_v15 = vadd.f32 1.0, %v18435_v46  ;;  %v22329_v8 = vsub.f32 %v10383_v21, %v22320_v39  ;;  %v22331_v7 = vand.u32 4294901760, %v10386_v43  ;;  %v16242_v30 = vpop.f32.mrb[92].mxu0 }
 0x8b2   :  { %v18439_v40 = vpop.eup %18438  ;;  %v10295_v51 = vadd.f32 1.0, %v18437_v19  ;;  %16257 = vmatprep.mubr.f32.mxu1 %v10559_v31  ;;  %v10569_v29 = vand.u32 4294901760, %v10568_v54  ;;  %v12295_v50 = vmul.f32 %v22284_v34, %v22284_v34  ;;  %v17282_v58 = vadd.f32 %v22198_v32, %v16239_v60  ;;  %v10156_v45 = vpop.f32.mrb[93].mxu0 }
 0x8b3   :  { %v22336_v20 = vpop.eup %18440  ;;  %18458 = vrcp.f32 %v10292_v15  ;;  %v10294_v2 = vadd.f32 1.0, %v18439_v40  ;;  %v23972_v9 = vand.u32 4294901760, %v22329_v8  ;;  %v22340_v37 = vsub.f32 %v10386_v43, %v22331_v7 }
 0x8b4   :  { %v22342_v16 = vpop.eup %18442  ;;  %18460 = vrcp.f32 %v10295_v51  ;;  %16258 = vmatmul.mubr.f32.gmra.mrb[98].mxu1 %v10569_v29  ;;  %v12349_v52 = vsel %vm2101_vm2, %v12295_v50, 0.0  ;;  %v13270_v57 = vmul.f32 -1.442695, %v17282_v58  ;;  %v17283_v53 = vadd.f32 %v22198_v32, %v10144_v1 }
 0x8b5   :  { %v18445_v56 = vpop.eup %18444  ;;  %18462 = vrcp.f32 %v10294_v2  ;;  %v10578_v25 = vsub.f32 %v22329_v8, %v23972_v9  ;;  %v23971_v41 = vand.u32 4294901760, %v22340_v37  ;;  %12350 = vadd.xlane.f32.xlu1 %v12349_v52  ;;  %v12294_v59 = vmul.f32 %v22300_v3, %v22300_v3  ;;  %v16245_v63 = vpop.f32.mrb[94].mxu0 }
 0x8b6   :  { %v18447_v24 = vpop.eup %18446  ;;  %v10297_v13 = vadd.f32 1.0, %v18445_v56  ;;  %18464 = vpow2.f32 %v13270_v57  ;;  %v13269_v26 = vmul.f32 -1.442695, %v17283_v53  ;;  %v10389_v33 = vsel %vm2101_vm2, %v22265_v22, 0  ;;  %v10168_v23 = vpop.f32.mrb[95].mxu0 }
 0x8b7   :  { %v22354_v60 = vpop.eup %18448  ;;  %v10296_v49 = vadd.f32 1.0, %v18447_v24  ;;  %v10579_v35 = vand.u32 4294901760, %v10578_v25  ;;  %v10588_v21 = vsub.f32 %v22340_v37, %v23971_v41  ;;  %v12346_v1 = vsel %vm2101_vm2, %v12294_v59, 0.0 }
 0x8b8   :  { %v22360_v10 = vpop.eup %18450  ;;  %18466 = vrcp.f32 %v10297_v13  ;;  %12347 = vadd.xlane.f32.xlu0 %v12346_v1  ;;  %v22362_v27 = vand.u32 4294901760, %v10389_v33  ;;  %v10392_v22 = vsel %vm2101_vm2, %v22254_v6, 0  ;;  %v12297_v46 = vmul.f32 %v22306_v14, %v22306_v14 }
 0x8b9   :  { %v18453_v31 = vpop.eup %18452  ;;  %18468 = vrcp.f32 %v10296_v49  ;;  %16260 = vmatprep.mubr.f32.mxu1 %v10579_v35  ;;  %v10589_v54 = vand.u32 4294901760, %v10588_v21  ;;  %v22368_v43 = vand.u32 4294901760, %v10392_v22  ;;  %v17284_v19 = vadd.f32 %v22198_v32, %v16242_v30 }
 0x8ba   :  { %v18455_v15 = vpop.eup %18454  ;;  %v10299_v40 = vadd.f32 1.0, %v18453_v31  ;;  %18470 = vpow2.f32 %v13269_v26  ;;  %v22372_v51 = vsub.f32 %v10389_v33, %v22362_v27  ;;  %v12355_v29 = vsel %vm2101_vm2, %v12297_v46, 0.0 }
 0x8bb   :  { %v22375_v6 = vpop.eup %18456  ;;  %v10298_v50 = vadd.f32 1.0, %v18455_v15  ;;  %16261 = vmatmul.mubr.f32.gmra.mrb[100].mxu1 %v10589_v54  ;;  %v22378_v58 = vsub.f32 %v10392_v22, %v22368_v43  ;;  %12356 = vadd.xlane.f32.xlu1 %v12355_v29  ;;  %v13272_v2 = vmul.f32 -1.442695, %v17284_v19  ;;  %v17285_v52 = vadd.f32 %v22198_v32, %v10156_v45 }
 0x8bc   :  { %18472 = vrcp.f32 %v10299_v40  ;;  %v23970_v30 = vand.u32 4294901760, %v22372_v51  ;;  %v12296_v57 = vmul.f32 %v22317_v42, %v22317_v42  ;;  %v10395_v53 = vsel %vm2101_vm2, %v22280_v44, 0 }
 0x8bd   :  { %v22386_v56 = vpop.eup %18458  ;;  %18474 = vrcp.f32 %v10298_v50  ;;  %v23968_v25 = vand.u32 4294901760, %v22378_v58  ;;  %v13271_v59 = vmul.f32 -1.442695, %v17285_v52  ;;  %v22389_v24 = vand.u32 4294901760, %v10395_v53 }
 0x8be   :  { %v22391_v13 = vpop.eup %18460  ;;  %v10598_v45 = vsub.f32 %v22372_v51, %v23970_v30  ;;  %18476 = vpow2.f32 %v13272_v2  ;;  %v12352_v26 = vsel %vm2101_vm2, %v12296_v57, 0.0  ;;  %v10398_v44 = vsel %vm2101_vm2, %v22270_v12, 0 }
 0x8bf   :  { %v22399_v33 = vpop.eup %18462  ;;  %v10608_v49 = vsub.f32 %v22378_v58, %v23968_v25  ;;  %18478 = vpow2.f32 %v13271_v59  ;;  %12353 = vadd.xlane.f32.xlu0 %v12352_v26  ;;  %v22405_v35 = vsub.f32 %v10395_v53, %v22389_v24  ;;  %v22407_v21 = vand.u32 4294901760, %v10398_v44 }
 0x8c0   :  { %v18465_v1 = vpop.eup %18464  ;;  %v10599_v22 = vand.u32 4294901760, %v10598_v45  ;;  %v17286_v46 = vadd.f32 %v22198_v32, %v16245_v63  ;;  %v17287_v31 = vadd.f32 %v22198_v32, %v10168_v23  ;;  %v10401_v12 = vsel %vm2101_vm2, %v22300_v3, 0 }
 0x8c1   :  { %v10301_v54 = vadd.f32 1.0, %v18465_v1  ;;  %v10609_v19 = vand.u32 4294901760, %v10608_v49  ;;  %v23967_v15 = vand.u32 4294901760, %v22405_v35  ;;  %v22415_v40 = vsub.f32 %v10398_v44, %v22407_v21 }
 0x8c2   :  { %v22417_v29 = vpop.eup %18466  ;;  %16263 = vmatprep.mubr.f32.mxu1 %v10599_v22  ;;  %v13274_v50 = vmul.f32 -1.442695, %v17286_v46  ;;  %v13273_v2 = vmul.f32 -1.442695, %v17287_v31  ;;  %v22419_v52 = vand.u32 4294901760, %v10401_v12  ;;  %v10404_v32 = vsel %vm2101_vm2, %v22284_v34, 0 }
 0x8c3   :  { %v22423_v63 = vpop.eup %18468  ;;  %18480 = vrcp.f32 %v10301_v54  ;;  %16264 = vmatmul.mubr.f32.gmra.mrb[102].mxu1 %v10609_v19  ;;  %v10618_v3 = vsub.f32 %v22405_v35, %v23967_v15  ;;  %v23966_v23 = vand.u32 4294901760, %v22415_v40  ;;  %v22429_v57 = vand.u32 4294901760, %v10404_v32 }
 0x8c4   :  { %v18471_v53 = vpop.eup %18470  ;;  %18482 = vpow2.f32 %v13274_v50  ;;  %v22432_v59 = vsub.f32 %v10401_v12, %v22419_v52  ;;  %v12301_v34 = vmul.f32 %v22354_v60, %v22354_v60  ;;  %v12300_v45 = vmul.f32 %v22360_v10, %v22360_v10 }
 0x8c5   :  { %v10300_v26 = vadd.f32 1.0, %v18471_v53  ;;  %v10619_v44 = vand.u32 4294901760, %v10618_v3  ;;  %v10628_v49 = vsub.f32 %v22415_v40, %v23966_v23  ;;  %18484 = vpow2.f32 %v13273_v2 }
 0x8c6   :  { %v22441_v1 = vpop.eup %18472  ;;  %v23965_v22 = vand.u32 4294901760, %v22432_v59  ;;  %v22445_v46 = vsub.f32 %v10404_v32, %v22429_v57  ;;  %v12367_v31 = vsel %vm2101_vm2, %v12301_v34, 0.0  ;;  %v12364_v12 = vsel %vm2101_vm2, %v12300_v45, 0.0 }
 0x8c7   :  { %v22449_v54 = vpop.eup %18474  ;;  %18486 = vrcp.f32 %v10300_v26  ;;  %16266 = vmatprep.mubr.f32.mxu1 %v10619_v44  ;;  %v10629_v19 = vand.u32 4294901760, %v10628_v49  ;;  %12368 = vadd.xlane.f32.xlu1 %v12367_v31  ;;  %v10407_v50 = vsel %vm2101_vm2, %v22317_v42, 0  ;;  %v10410_v2 = vsel %vm2101_vm2, %v22306_v14, 0 }
 0x8c8   :  { %v18477_v3 = vpop.eup %18476  ;;  %v10638_v32 = vsub.f32 %v22432_v59, %v23965_v22  ;;  %v23969_v53 = vand.u32 4294901760, %v22445_v46  ;;  %12365 = vadd.xlane.f32.xlu0 %v12364_v12  ;;  %v22459_v34 = vand.u32 4294901760, %v10407_v50  ;;  %v22461_v45 = vand.u32 4294901760, %v10410_v2 }
 0x8c9   :  { %v18479_v26 = vpop.eup %18478  ;;  %v10303_v44 = vadd.f32 1.0, %v18477_v3  ;;  %16267 = vmatmul.mubr.f32.gmra.mrb[104].mxu1 %v10629_v19  ;;  %v12303_v42 = vmul.f32 %v22375_v6, %v22375_v6  ;;  %v12302_v14 = vmul.f32 %v22386_v56, %v22386_v56  ;;  %v10413_v49 = vsel %vm2101_vm2, %v22342_v16, 0 }
 0x8ca   :  { %v10302_v31 = vadd.f32 1.0, %v18479_v26  ;;  %v10639_v22 = vand.u32 4294901760, %v10638_v32  ;;  %v10648_v12 = vsub.f32 %v22445_v46, %v23969_v53  ;;  %v22473_v23 = vsub.f32 %v10407_v50, %v22459_v34 }
 0x8cb   :  { %18488 = vrcp.f32 %v10303_v44  ;;  %v22476_v19 = vsub.f32 %v10410_v2, %v22461_v45  ;;  %v12373_v3 = vsel %vm2101_vm2, %v12303_v42, 0.0  ;;  %v12370_v15 = vsel %vm2101_vm2, %v12302_v14, 0.0 }
 0x8cc   :  { %24650 = vst [vmem:[#allocation105_spill] sm:$0xff] %v22473_v23  ;;  %18490 = vrcp.f32 %v10302_v31  ;;  %16269 = vmatprep.mubr.f32.mxu1 %v10639_v22  ;;  %v10649_v25 = vand.u32 4294901760, %v10648_v12  ;;  %v23974_v32 = vand.u32 4294901760, %v22473_v23  ;;  %12374 = vadd.xlane.f32.xlu1 %v12373_v3  ;;  %v22481_v26 = vand.u32 4294901760, %v10413_v49 }
 0x8cd   :  { %24651 = vst [vmem:[#allocation106_spill] sm:$0xff] %v22476_v19  ;;  %v22483_v53 = vpop.eup %18480  ;;  %v23978_v50 = vand.u32 4294901760, %v22476_v19  ;;  %12371 = vadd.xlane.f32.xlu0 %v12370_v15  ;;  %v10416_v2 = vsel %vm2101_vm2, %v22336_v20, 0  ;;  %v12305_v44 = vmul.f32 %v22391_v13, %v22391_v13  ;;  %v12304_v22 = vmul.f32 %v22399_v33, %v22399_v33 }
 0x8ce   :  { %v18483_v42 = vpop.eup %18482  ;;  %16270 = vmatmul.mubr.f32.gmra.mrb[106].mxu1 %v10649_v25  ;;  %v10658_v14 = vsub.f32 %v22473_v23, %v23974_v32  ;;  %v22496_v31 = vsub.f32 %v10413_v49, %v22481_v26  ;;  %v22498_v12 = vand.u32 4294901760, %v10416_v2  ;;  %v10419_v15 = vsel %vm2101_vm2, %v22360_v10, 0 }
 0x8cf   :  { %v18485_v3 = vpop.eup %18484  ;;  %v10305_v30 = vadd.f32 1.0, %v18483_v42  ;;  %v10668_v41 = vsub.f32 %v22476_v19, %v23978_v50  ;;  %v12379_v25 = vsel %vm2101_vm2, %v12305_v44, 0.0  ;;  %v12376_v9 = vsel %vm2101_vm2, %v12304_v22, 0.0 }
 0x8d0   :  { %24652 = vst [vmem:[#allocation107_spill] sm:$0xff] %v22496_v31  ;;  %v10304_v5 = vadd.f32 1.0, %v18485_v3  ;;  %v10659_v32 = vand.u32 4294901760, %v10658_v14  ;;  %v23977_v49 = vand.u32 4294901760, %v22496_v31  ;;  %v22509_v47 = vsub.f32 %v10416_v2, %v22498_v12  ;;  %12380 = vadd.xlane.f32.xlu1 %v12379_v25 }
 0x8d1   :  { %v22511_v55 = vpop.eup %18486  ;;  %18492 = vrcp.f32 %v10305_v30  ;;  %v10669_v10 = vand.u32 4294901760, %v10668_v41  ;;  %12377 = vadd.xlane.f32.xlu0 %v12376_v9  ;;  %v22513_v42 = vand.u32 4294901760, %v10419_v15  ;;  %v10422_v44 = vsel %vm2101_vm2, %v22354_v60, 0 }
 0x8d2   :  { %24653 = vst [vmem:[#allocation108_spill] sm:$0xff] %v22509_v47  ;;  %18494 = vrcp.f32 %v10304_v5  ;;  %16272 = vmatprep.mubr.f32.mxu1 %v10659_v32  ;;  %v10678_v22 = vsub.f32 %v22496_v31, %v23977_v49  ;;  %v23979_v2 = vand.u32 4294901760, %v22509_v47  ;;  %v22521_v14 = vand.u32 4294901760, %v10422_v44 }
 0x8d3   :  { %16273 = vmatmul.mubr.f32.gmra.mrb[108].mxu1 %v10669_v10  ;;  %v22524_v30 = vsub.f32 %v10419_v15, %v22513_v42  ;;  %v12307_v9 = vmul.f32 %v22417_v29, %v22417_v29  ;;  %v12306_v41 = vmul.f32 %v22423_v63, %v22423_v63  ;;  %v10425_v5 = vsel %vm2101_vm2, %v22386_v56, 0 }
 0x8d4   :  { %v10679_v60 = vand.u32 4294901760, %v10678_v22  ;;  %v10688_v32 = vsub.f32 %v22509_v47, %v23979_v2  ;;  %v22536_v3 = vsub.f32 %v10422_v44, %v22521_v14  ;;  %v22538_v25 = vand.u32 4294901760, %v10425_v5 }
 0x8d5   :  { %24654 = vst [vmem:[#allocation109_spill] sm:$0xff] %v22524_v30  ;;  %v22540_v15 = vpop.eup %18488  ;;  %v23982_v10 = vand.u32 4294901760, %v22524_v30  ;;  %v12385_v49 = vsel %vm2101_vm2, %v12307_v9, 0.0  ;;  %v12382_v50 = vsel %vm2101_vm2, %v12306_v41, 0.0  ;;  %v10428_v56 = vsel %vm2101_vm2, %v22375_v6, 0 }
 0x8d6   :  { %24655 = vst [vmem:[#allocation34_spill] sm:$0xff] %v22536_v3  ;;  %v22547_v22 = vpop.eup %18490  ;;  %16275 = vmatprep.mubr.f32.mxu1 %v10679_v60  ;;  %v10689_v2 = vand.u32 4294901760, %v10688_v32  ;;  %v23987_v44 = vand.u32 4294901760, %v22536_v3  ;;  %12386 = vadd.xlane.f32.xlu1 %v12385_v49  ;;  %v22551_v18 = vsub.f32 %v10425_v5, %v22538_v25  ;;  %v22553_v62 = vand.u32 4294901760, %v10428_v56 }
 0x8d7   :  { %v10698_v9 = vsub.f32 %v22524_v30, %v23982_v10  ;;  %12383 = vadd.xlane.f32.xlu0 %v12382_v50  ;;  %v12309_v6 = vmul.f32 %v22441_v1, %v22441_v1  ;;  %v12308_v41 = vmul.f32 %v22449_v54, %v22449_v54  ;;  %v10431_v60 = vsel %vm2101_vm2, %v22399_v33, 0 }
 0x8d8   :  { %24656 = vst [vmem:[#allocation33_spill] sm:$0xff] %v22551_v18  ;;  %16276 = vmatmul.mubr.f32.gmra.mrb[110].mxu1 %v10689_v2  ;;  %v10708_v49 = vsub.f32 %v22536_v3, %v23987_v44  ;;  %v23992_v5 = vand.u32 4294901760, %v22551_v18  ;;  %v22569_v32 = vsub.f32 %v10428_v56, %v22553_v62  ;;  %v22571_v50 = vand.u32 4294901760, %v10431_v60 }
 0x8d9   :  { %v10699_v10 = vand.u32 4294901760, %v10698_v9  ;;  %v12391_v30 = vsel %vm2101_vm2, %v12309_v6, 0.0  ;;  %v12388_v47 = vsel %vm2101_vm2, %v12308_v41, 0.0  ;;  %v10434_v33 = vsel %vm2101_vm2, %v22391_v13, 0 }
 0x8da   :  { %24657 = vst [vmem:[#allocation36_spill] sm:$0xff] %v22569_v32  ;;  %v10709_v2 = vand.u32 4294901760, %v10708_v49  ;;  %v10718_v44 = vsub.f32 %v22551_v18, %v23992_v5  ;;  %v23997_v3 = vand.u32 4294901760, %v22569_v32  ;;  %12392 = vadd.xlane.f32.xlu1 %v12391_v30  ;;  %v22582_v56 = vsub.f32 %v10431_v60, %v22571_v50 }
 0x8db   :  { %v22584_v31 = vpop.eup %18492  ;;  %16278 = vmatprep.mubr.f32.mxu1 %v10699_v10  ;;  %12389 = vadd.xlane.f32.xlu0 %v12388_v47  ;;  %v22586_v9 = vand.u32 4294901760, %v10434_v33  ;;  %v12311_v13 = vmul.f32 %v22483_v53, %v22483_v53  ;;  %v12310_v6 = vmul.f32 %v22511_v55, %v22511_v55  ;;  %v10437_v41 = vsel %vm2101_vm2, %v22423_v63, 0 }
 0x8dc   :  { %24658 = vst [vmem:[#allocation51_spill] sm:$0xff] %v22582_v56  ;;  %v22594_v49 = vpop.eup %18494  ;;  %16279 = vmatmul.mubr.f32.gmra.mrb[112].mxu1 %v10709_v2  ;;  %v10719_v30 = vand.u32 4294901760, %v10718_v44  ;;  %v10728_v10 = vsub.f32 %v22569_v32, %v23997_v3  ;;  %v24000_v47 = vand.u32 4294901760, %v22582_v56  ;;  %v22600_v60 = vand.u32 4294901760, %v10437_v41 }
 0x8dd   :  { %v22603_v5 = vsub.f32 %v10434_v33, %v22586_v9  ;;  %v12397_v18 = vsel %vm2101_vm2, %v12311_v13, 0.0  ;;  %v12394_v19 = vsel %vm2101_vm2, %v12310_v6, 0.0  ;;  %v10440_v63 = vsel %vm2101_vm2, %v22417_v29, 0 }
 0x8de   :  { %16281 = vmatprep.mubr.f32.mxu1 %v10719_v30  ;;  %v10729_v44 = vand.u32 4294901760, %v10728_v10  ;;  %v10738_v2 = vsub.f32 %v22582_v56, %v24000_v47  ;;  %12398 = vadd.xlane.f32.xlu1 %v12397_v18  ;;  %v22613_v3 = vsub.f32 %v10437_v41, %v22600_v60  ;;  %v22615_v32 = vand.u32 4294901760, %v10440_v63 }
 0x8df   :  { %v24005_v33 = vand.u32 4294901760, %v22603_v5  ;;  %12395 = vadd.xlane.f32.xlu0 %v12394_v19  ;;  %v12313_v13 = vmul.f32 %v22540_v15, %v22540_v15  ;;  %v12312_v29 = vmul.f32 %v22547_v22, %v22547_v22  ;;  %v10443_v6 = vsel %vm2101_vm2, %v22449_v54, 0 }
 0x8e0   :  { %24659 = vst [vmem:[#allocation62_spill] sm:$0xff] %v22613_v3  ;;  %24660 = vst [vmem:[#allocation67_spill] sm:$0xff] %v22615_v32  ;;  %16282 = vmatmul.mubr.f32.gmra.mrb[114].mxu1 %v10729_v44  ;;  %v10739_v30 = vand.u32 4294901760, %v10738_v2  ;;  %v24006_v18 = vand.u32 4294901760, %v22613_v3  ;;  %v22626_v41 = vsub.f32 %v10440_v63, %v22615_v32  ;;  %v22628_v10 = vand.u32 4294901760, %v10443_v6 }
 0x8e1   :  { %v10748_v19 = vsub.f32 %v22603_v5, %v24005_v33  ;;  %v12403_v47 = vsel %vm2101_vm2, %v12313_v13, 0.0  ;;  %v12400_v56 = vsel %vm2101_vm2, %v12312_v29, 0.0  ;;  %v10446_v54 = vsel %vm2101_vm2, %v22441_v1, 0 }
 0x8e2   :  { %24661 = vst [vmem:[#allocation37_spill] sm:$0xff] %v22626_v41  ;;  %24662 = vst [vmem:[#allocation70_spill] sm:$0xff] %v22628_v10  ;;  %16284 = vmatprep.mubr.f32.mxu1 %v10739_v30  ;;  %v10758_v44 = vsub.f32 %v22613_v3, %v24006_v18  ;;  %v24009_v63 = vand.u32 4294901760, %v22626_v41  ;;  %12404 = vadd.xlane.f32.xlu1 %v12403_v47  ;;  %v22642_v2 = vsub.f32 %v10443_v6, %v22628_v10 }
 0x8e3   :  { %v22644_v23 = vand.u32 4294901760, %v10446_v54  ;;  %v10749_v33 = vand.u32 4294901760, %v10748_v19  ;;  %12401 = vadd.xlane.f32.xlu0 %v12400_v56  ;;  %v12315_v13 = vmul.f32 %v22584_v31, %v22584_v31  ;;  %v12314_v1 = vmul.f32 %v22594_v49, %v22594_v49 }
 0x8e4   :  { %v10449_v29 = vsel %vm2101_vm2, %v22511_v55, 0  ;;  %v10759_v30 = vand.u32 4294901760, %v10758_v44  ;;  %v10768_v47 = vsub.f32 %v22626_v41, %v24009_v63  ;;  %v24013_v6 = vand.u32 4294901760, %v22642_v2 }
 0x8e5   :  { %24663 = vst [vmem:[#allocation71_spill] sm:$0xff] %v22644_v23  ;;  %v22657_v18 = vsub.f32 %v10446_v54, %v22644_v23  ;;  %16285 = vmatmul.mubr.f32.gmra.mrb[116].mxu1 %v10749_v33  ;;  %v12409_v56 = vsel %vm2101_vm2, %v12315_v13, 0.0  ;;  %v12406_v19 = vsel %vm2101_vm2, %v12314_v1, 0.0  ;;  %v22661_v3 = vand.u32 4294901760, %v10449_v29 }
 0x8e6   :  { %v10452_v55 = vsel %vm2101_vm2, %v22483_v53, 0  ;;  %16287 = vmatprep.mubr.f32.mxu1 %v10759_v30  ;;  %v10769_v44 = vand.u32 4294901760, %v10768_v47  ;;  %v10778_v63 = vsub.f32 %v22642_v2, %v24013_v6  ;;  %12410 = vadd.xlane.f32.xlu1 %v12409_v56  ;;  %v12299_v13 = vmul.f32 %v22336_v20, %v22336_v20 }
 0x8e7   :  { %24664 = vst [vmem:[#allocation72_spill] sm:$0xff] %v22661_v3  ;;  %v24012_v41 = vand.u32 4294901760, %v22657_v18  ;;  %v22669_v54 = vand.u32 4294901760, %v10452_v55  ;;  %12407 = vadd.xlane.f32.xlu0 %v12406_v19  ;;  %v22672_v33 = vsub.f32 %v10449_v29, %v22661_v3  ;;  %v12298_v53 = vmul.f32 %v22342_v16, %v22342_v16 }
 0x8e8   :  { %v10455_v1 = vsel %vm2101_vm2, %v22547_v22, 0  ;;  %v10779_v30 = vand.u32 4294901760, %v10778_v63  ;;  %v12361_v20 = vsel %vm2101_vm2, %v12299_v13, 0.0  ;;  %v10458_v16 = vsel %vm2101_vm2, %v22540_v15, 0 }
 0x8e9   :  { %24665 = vst [vmem:[#allocation76_spill] sm:$0xff] %v22669_v54  ;;  %v10788_v47 = vsub.f32 %v22657_v18, %v24012_v41  ;;  %v22684_v56 = vsub.f32 %v10452_v55, %v22669_v54  ;;  %v22686_v19 = vand.u32 4294901760, %v10455_v1  ;;  %16288 = vmatmul.mubr.f32.gmra.mrb[118].mxu1 %v10769_v44  ;;  %v24014_v29 = vand.u32 4294901760, %v22672_v33 }
 0x8ea   :  { %16290 = vmatprep.mubr.f32.mxu1 %v10779_v30  ;;  %12362 = vadd.xlane.f32.xlu1 %v12361_v20  ;;  %v12358_v63 = vsel %vm2101_vm2, %v12298_v53, 0.0  ;;  %v22697_v55 = vand.u32 4294901760, %v10458_v16  ;;  %v10461_v15 = vsel %vm2101_vm2, %v22594_v49, 0  ;;  %v10464_v13 = vsel %vm2101_vm2, %v22584_v31, 0 }
 0x8eb   :  { %24666 = vst [vmem:[#allocation81_spill] sm:$0xff] %v22684_v56  ;;  %24667 = vst [vmem:[#allocation89_spill] sm:$0xff] %v22686_v19  ;;  %v24015_v22 = vand.u32 4294901760, %v22684_v56  ;;  %v22695_v41 = vsub.f32 %v10455_v1, %v22686_v19  ;;  %v10789_v6 = vand.u32 4294901760, %v10788_v47  ;;  %v10798_v44 = vsub.f32 %v22672_v33, %v24014_v29  ;;  %12359 = vadd.xlane.f32.xlu0 %v12358_v63 }
 0x8ec   :  { %24668 = vst [vmem:[#allocation90_spill] sm:$0xff] %v22697_v55  ;;  %v22711_v30 = vsub.f32 %v10458_v16, %v22697_v55  ;;  %v22713_v47 = vand.u32 4294901760, %v10461_v15  ;;  %v22715_v63 = vand.u32 4294901760, %v10464_v13 }
 0x8ed   :  { %v10808_v53 = vsub.f32 %v22684_v56, %v24015_v22  ;;  %v24018_v1 = vand.u32 4294901760, %v22695_v41  ;;  %16291 = vmatmul.mubr.f32.gmra.mrb[120].mxu1 %v10789_v6  ;;  %v10799_v20 = vand.u32 4294901760, %v10798_v44 }
 0x8ee   :  { %24669 = vst [vmem:[#allocation91_spill] sm:$0xff] %v22713_v47  ;;  %24670 = vst [vmem:[#allocation92_spill] sm:$0xff] %v22715_v63  ;;  %v24021_v31 = vand.u32 4294901760, %v22711_v30  ;;  %v22722_v29 = vsub.f32 %v10461_v15, %v22713_v47  ;;  %v22725_v16 = vsub.f32 %v10464_v13, %v22715_v63 }
 0x8ef   :  { %v10818_v49 = vsub.f32 %v22695_v41, %v24018_v1  ;;  %16293 = vmatprep.mubr.f32.mxu1 %v10799_v20  ;;  %v10809_v22 = vand.u32 4294901760, %v10808_v53 }
 0x8f0   :  { %v10828_v6 = vsub.f32 %v22711_v30, %v24021_v31  ;;  %v24020_v44 = vand.u32 4294901760, %v22722_v29  ;;  %v24019_v1 = vand.u32 4294901760, %v22725_v16  ;;  %v24683_v31 = vld [vmem:[#allocation51_spill] sm:$0xff] }
 0x8f1   :  { %v10819_v56 = vand.u32 4294901760, %v10818_v49  ;;  %16294 = vmatmul.mubr.f32.gmra.mrb[122].mxu1 %v10809_v22  ;;  %v24672_v22 = vld [vmem:[#allocation54_spill] sm:$0xff] }
 0x8f2   :  { %v10838_v15 = vsub.f32 %v22722_v29, %v24020_v44  ;;  %v10829_v20 = vand.u32 4294901760, %v10828_v6  ;;  %v10848_v13 = vsub.f32 %v22725_v16, %v24019_v1  ;;  %v24674_v6 = vld [vmem:[#allocation40_spill] sm:$0xff]  ;;  %v24681_v1 = vld [vmem:[#allocation33_spill] sm:$0xff] }
 0x8f3   :  { %16296 = vmatprep.mubr.f32.mxu1 %v10819_v56  ;;  %v24671_v56 = vld [vmem:[#allocation35_spill] sm:$0xff]  ;;  %v24682_v44 = vld [vmem:[#allocation36_spill] sm:$0xff] }
 0x8f4   :  { %v10839_v53 = vand.u32 4294901760, %v10838_v15  ;;  %v10849_v49 = vand.u32 4294901760, %v10848_v13  ;;  %v24675_v15 = vld [vmem:[#allocation105_spill] sm:$0xff]  ;;  %v24677_v13 = vld [vmem:[#allocation107_spill] sm:$0xff] }
 0x8f5   :  { %16297 = vmatmul.mubr.f32.gmra.mrb[124].mxu1 %v10829_v20  ;;  %v24676_v20 = vld [vmem:[#allocation106_spill] sm:$0xff] }
 0x8f6   :  { %16299 = vmatprep.mubr.f32.mxu1 %v10839_v53  ;;  %v24678_v53 = vld [vmem:[#allocation108_spill] sm:$0xff] }
 0x8f9   :  { %16300 = vmatmul.mubr.f32.gmra.mrb[126].mxu1 %v10849_v49  ;;  %v24679_v49 = vld [vmem:[#allocation109_spill] sm:$0xff] }
 0x8fa   :  { %16310 = vmatprep.mubr.f32.mxu1 %v22235_v11 }
 0x8fd   :  { %16311 = vmatmul.mubr.f32.vlgmr.msra.gmra.mrb[96].mxu1 %v22216_v17 }
 0x8fe   :  { %16313 = vmatprep.mubr.f32.mxu1 %v22282_v48  ;;  %16955 = vmatpush3.bf16.msra.mxu1 %v24649_v28  ;;  %v24673_v28 = vld [vmem:[#allocation85_spill] sm:$0xff] }
 0x8ff   :  { %16957 = vmatprep.subr.bf16.mxu1 %v24671_v56 }
 0x901   :  { %16314 = vmatmul.mubr.f32.gmra.mrb[98].mxu1 %v22294_v36 }
 0x902   :  { %16316 = vmatprep.mubr.f32.mxu1 %v22320_v39  ;;  %16959 = vmatpush3.bf16.msra.mxu1 %v24671_v56  ;;  %v24680_v56 = vld [vmem:[#allocation34_spill] sm:$0xff] }
 0x903   :  { %16961 = vmatprep.subr.bf16.mxu1 %v24672_v22 }
 0x905   :  { %16317 = vmatmul.mubr.f32.gmra.mrb[100].mxu1 %v22331_v7 }
 0x906   :  { %16319 = vmatprep.mubr.f32.mxu1 %v22362_v27 }
 0x909   :  { %16320 = vmatmul.mubr.f32.gmra.mrb[102].mxu1 %v22368_v43 }
 0x90a   :  { %16322 = vmatprep.mubr.f32.mxu1 %v22389_v24 }
 0x90d   :  { %16323 = vmatmul.mubr.f32.gmra.mrb[104].mxu1 %v22407_v21 }
 0x90e   :  { %16325 = vmatprep.mubr.f32.mxu1 %v22419_v52 }
 0x911   :  { %16326 = vmatmul.mubr.f32.gmra.mrb[106].mxu1 %v22429_v57 }
 0x912   :  { %16328 = vmatprep.mubr.f32.mxu1 %v22459_v34 }
 0x915   :  { %16329 = vmatmul.mubr.f32.gmra.mrb[108].mxu1 %v22461_v45 }
 0x916   :  { %16331 = vmatprep.mubr.f32.mxu1 %v22481_v26 }
 0x919   :  { %16332 = vmatmul.mubr.f32.gmra.mrb[110].mxu1 %v22498_v12 }
 0x91a   :  { %16334 = vmatprep.mubr.f32.mxu1 %v22513_v42 }
 0x91d   :  { %16335 = vmatmul.mubr.f32.gmra.mrb[112].mxu1 %v22521_v14 }
 0x91e   :  { %16337 = vmatprep.mubr.f32.mxu1 %v22538_v25 }
 0x921   :  { %16338 = vmatmul.mubr.f32.gmra.mrb[114].mxu1 %v22553_v62 }
 0x922   :  { %16340 = vmatprep.mubr.f32.mxu1 %v22571_v50 }
 0x925   :  { %16341 = vmatmul.mubr.f32.gmra.mrb[116].mxu1 %v22586_v9 }
 0x926   :  { %16343 = vmatprep.mubr.f32.mxu1 %v22600_v60 }
 0x929   :  { %16344 = vmatmul.mubr.f32.gmra.mrb[118].mxu1 %v22615_v32  ;;  %v24692_v32 = vand.u32 4294901760, %v22329_v8 }
 0x92a   :  { %16346 = vmatprep.mubr.f32.mxu1 %v22628_v10  ;;  %v24691_v10 = vand.u32 4294901760, %v22304_v61 }
 0x92d   :  { %16347 = vmatmul.mubr.f32.gmra.mrb[120].mxu1 %v22644_v23  ;;  %v24690_v23 = vld [vmem:[#allocation39_spill] sm:$0xff] }
 0x92e   :  { %16349 = vmatprep.mubr.f32.mxu1 %v22661_v3  ;;  %v24689_v3 = vand.u32 4294901760, %v22292_v4 }
 0x931   :  { %16350 = vmatmul.mubr.f32.gmra.mrb[122].mxu1 %v22669_v54  ;;  %v24688_v54 = vand.u32 4294901760, %v22223_v0 }
 0x932   :  { %16352 = vmatprep.mubr.f32.mxu1 %v22686_v19  ;;  %v24687_v19 = vand.u32 4294901760, %v22247_v38 }
 0x935   :  { %16353 = vmatmul.mubr.f32.gmra.mrb[124].mxu1 %v22697_v55  ;;  %v24686_v55 = vld [vmem:[#allocation81_spill] sm:$0xff] }
 0x936   :  { %16355 = vmatprep.mubr.f32.mxu1 %v22713_v47  ;;  %v24685_v47 = vld [vmem:[#allocation37_spill] sm:$0xff] }
 0x939   :  { %16356 = vmatmul.mubr.f32.gmra.mrb[126].mxu1 %v22715_v63  ;;  %v24684_v63 = vld [vmem:[#allocation62_spill] sm:$0xff] }
 0x93a   :  { %16366 = vmatprep.mubr.f32.mxu1 %v22247_v38  ;;  %v24694_v38 = vand.u32 4294901760, %v22372_v51 }
 0x93d   :  { %16367 = vmatmul.mubr.f32.vlgmr.msra.gmra.mrb[96].mxu1 %v22223_v0  ;;  %v24693_v0 = vand.u32 4294901760, %v22340_v37 }
 0x93e   :  { %16369 = vmatprep.mubr.f32.mxu1 %v22292_v4  ;;  %16963 = vmatpush3.bf16.msra.mxu1 %v24672_v22  ;;  %v24695_v4 = vand.u32 4294901760, %v22378_v58 }
 0x93f   :  { %16965 = vmatprep.subr.bf16.mxu1 %v24673_v28 }
 0x941   :  { %16370 = vmatmul.mubr.f32.gmra.mrb[98].mxu1 %v22304_v61  ;;  %v24697_v61 = vand.u32 4294901760, %v22415_v40 }
 0x942   :  { %16372 = vmatprep.mubr.f32.mxu1 %v22329_v8  ;;  %16967 = vmatpush3.bf16.msra.mxu1 %v24673_v28  ;;  %v24698_v8 = vand.u32 4294901760, %v22432_v59 }
 0x943   :  { %16969 = vmatprep.subr.bf16.mxu1 %v24674_v6 }
 0x945   :  { %16373 = vmatmul.mubr.f32.gmra.mrb[100].mxu1 %v22340_v37  ;;  %v24700_v37 = vand.u32 4294901760, %v24675_v15 }
 0x946   :  { %16375 = vmatprep.mubr.f32.mxu1 %v22372_v51  ;;  %v24701_v51 = vand.u32 4294901760, %v24676_v20 }
 0x949   :  { %16376 = vmatmul.mubr.f32.gmra.mrb[102].mxu1 %v22378_v58  ;;  %v24702_v58 = vand.u32 4294901760, %v24677_v13 }
 0x94a   :  { %16378 = vmatprep.mubr.f32.mxu1 %v22405_v35 }
 0x94d   :  { %16379 = vmatmul.mubr.f32.gmra.mrb[104].mxu1 %v22415_v40  ;;  %v24704_v40 = vand.u32 4294901760, %v24679_v49 }
 0x94e   :  { %16381 = vmatprep.mubr.f32.mxu1 %v22432_v59  ;;  %v24705_v59 = vand.u32 4294901760, %v24680_v56 }
 0x951   :  { %16382 = vmatmul.mubr.f32.gmra.mrb[106].mxu1 %v22445_v46 }
 0x952   :  { %16384 = vmatprep.mubr.f32.mxu1 %v24675_v15  ;;  %v24712_v15 = vand.u32 4294901760, %v22642_v2 }
 0x955   :  { %16385 = vmatmul.mubr.f32.gmra.mrb[108].mxu1 %v24676_v20 }
 0x956   :  { %16387 = vmatprep.mubr.f32.mxu1 %v24677_v13 }
 0x959   :  { %16388 = vmatmul.mubr.f32.gmra.mrb[110].mxu1 %v24678_v53 }
 0x95a   :  { %16390 = vmatprep.mubr.f32.mxu1 %v24679_v49  ;;  %v22984_v49 = vld [vmem:[#allocation14 + $0x10] sm:$0xff] }
 0x95d   :  { %16391 = vmatmul.mubr.f32.gmra.mrb[112].mxu1 %v24680_v56  ;;  %v22986_v56 = vld [vmem:[#allocation14 + $0x18] sm:$0xff] }
 0x95e   :  { %16393 = vmatprep.mubr.f32.mxu1 %v24681_v1 }
 0x961   :  { %16394 = vmatmul.mubr.f32.gmra.mrb[114].mxu1 %v24682_v44 }
 0x962   :  { %16396 = vmatprep.mubr.f32.mxu1 %v24683_v31 }
 0x965   :  { %16397 = vmatmul.mubr.f32.gmra.mrb[116].mxu1 %v22603_v5 }
 0x966   :  { %16399 = vmatprep.mubr.f32.mxu1 %v24684_v63 }
 0x969   :  { %16400 = vmatmul.mubr.f32.gmra.mrb[118].mxu1 %v24685_v47 }
 0x96a   :  { %16402 = vmatprep.mubr.f32.mxu1 %v22642_v2  ;;  %v24719_v2 = vand.u32 4294901760, %v22725_v16 }
 0x96d   :  { %16403 = vmatmul.mubr.f32.gmra.mrb[120].mxu1 %v22657_v18 }
 0x96e   :  { %16405 = vmatprep.mubr.f32.mxu1 %v22672_v33 }
 0x971   :  { %16406 = vmatmul.mubr.f32.gmra.mrb[122].mxu1 %v24686_v55 }
 0x972   :  { %16408 = vmatprep.mubr.f32.mxu1 %v22695_v41 }
 0x975   :  { %16409 = vmatmul.mubr.f32.gmra.mrb[124].mxu1 %v22711_v30 }
 0x976   :  { %16411 = vmatprep.mubr.f32.mxu1 %v22722_v29 }
 0x979   :  { %16412 = vmatmul.mubr.f32.gmra.mrb[126].mxu1 %v22725_v16  ;;  %v24726_v16 = vld [vmem:[#allocation90_spill] sm:$0xff] }
 0x97a   :  { %16422 = vmatprep.mubr.f32.mxu1 %v24687_v19  ;;  %v24710_v19 = vand.u32 4294901760, %v24684_v63  ;;  %v24717_v63 = vand.u32 4294901760, %v22711_v30  ;;  %v24725_v30 = vld [vmem:[#allocation89_spill] sm:$0xff] }
 0x97d   :  { %16423 = vmatmul.mubr.f32.vlgmr.msra.gmra.mrb[96].mxu1 %v24688_v54  ;;  %v24709_v54 = vand.u32 4294901760, %v22603_v5  ;;  %v24716_v5 = vand.u32 4294901760, %v22695_v41  ;;  %v24721_v41 = vld [vmem:[#allocation70_spill] sm:$0xff] }
 0x97e   :  { %16425 = vmatprep.mubr.f32.mxu1 %v24689_v3  ;;  %16971 = vmatpush3.bf16.msra.mxu1 %v24674_v6  ;;  %v24696_v3 = vand.u32 4294901760, %v22405_v35  ;;  %v24703_v35 = vand.u32 4294901760, %v24678_v53  ;;  %v24711_v6 = vand.u32 4294901760, %v24685_v47  ;;  %v24718_v47 = vand.u32 4294901760, %v22722_v29  ;;  %v24723_v29 = vld [vmem:[#allocation72_spill] sm:$0xff] }
 0x97f   :  { %16973 = vmatprep.subr.bf16.mxu1 %v24690_v23 }
 0x981   :  { %16426 = vmatmul.mubr.f32.gmra.mrb[98].mxu1 %v24691_v10  ;;  %v24708_v10 = vand.u32 4294901760, %v24683_v31  ;;  %v24715_v31 = vand.u32 4294901760, %v24686_v55  ;;  %v24724_v55 = vld [vmem:[#allocation76_spill] sm:$0xff] }
 0x982   :  { %16428 = vmatprep.mubr.f32.mxu1 %v24692_v32  ;;  %16975 = vmatpush3.bf16.msra.mxu1 %v24690_v23  ;;  %v24699_v23 = vand.u32 4294901760, %v22445_v46  ;;  %v24706_v46 = vand.u32 4294901760, %v24681_v1  ;;  %v24707_v32 = vand.u32 4294901760, %v24682_v44  ;;  %v24713_v1 = vand.u32 4294901760, %v22657_v18  ;;  %v24720_v18 = vld [vmem:[#allocation67_spill] sm:$0xff] }
 0x983   :  { %16977 = vmatprep.subr.bf16.mxu1 %v24672_v22  ;;  %v24714_v44 = vand.u32 4294901760, %v22672_v33  ;;  %v24722_v33 = vld [vmem:[#allocation71_spill] sm:$0xff] }
 0x985   :  { %16429 = vmatmul.mubr.f32.gmra.mrb[100].mxu1 %v24693_v0  ;;  %v22988_v0 = vld [vmem:[#allocation14 + $0x20] sm:$0xff] }
 0x986   :  { %16431 = vmatprep.mubr.f32.mxu1 %v24694_v38 }
 0x989   :  { %16432 = vmatmul.mubr.f32.gmra.mrb[102].mxu1 %v24695_v4  ;;  %v12541_v4 = vand.u32 4294901760, %v22984_v49 }
 0x98a   :  { %16434 = vmatprep.mubr.f32.mxu1 %v24696_v3  ;;  %v12544_v3 = vand.u32 4294901760, %v22986_v56 }
 0x98d   :  { %16435 = vmatmul.mubr.f32.gmra.mrb[104].mxu1 %v24697_v61  ;;  %v22994_v61 = vld [vmem:[#allocation14 + $0x28] sm:$0xff] }
 0x98e   :  { %16437 = vmatprep.mubr.f32.mxu1 %v24698_v8  ;;  %v12547_v8 = vand.u32 4294901760, %v22988_v0 }
 0x991   :  { %16438 = vmatmul.mubr.f32.gmra.mrb[106].mxu1 %v24699_v23  ;;  %v22997_v23 = vld [vmem:[#allocation14 + $0x30] sm:$0xff] }
 0x992   :  { %16440 = vmatprep.mubr.f32.mxu1 %v24700_v37  ;;  %v22999_v37 = vld [vmem:[#allocation14 + $0x38] sm:$0xff] }
 0x995   :  { %16441 = vmatmul.mubr.f32.gmra.mrb[108].mxu1 %v24701_v51  ;;  %v24048_v51 = vmov 0.0  }
 0x996   :  { %16443 = vmatprep.mubr.f32.mxu1 %v24702_v58  ;;  %16649 = vmatprep.mubr.msk.f32.mxu0 %vm18751_vm3, %v24048_v51  ;;  %v12550_v58 = vand.u32 4294901760, %v22994_v61 }
 0x999   :  { %16444 = vmatmul.mubr.f32.gmra.mrb[110].mxu1 %v24703_v35  ;;  %v12553_v35 = vand.u32 4294901760, %v22997_v23 }
 0x99a   :  { %16446 = vmatprep.mubr.f32.mxu1 %v24704_v40  ;;  %v12556_v40 = vand.u32 4294901760, %v22999_v37 }
 0x99d   :  { %16447 = vmatmul.mubr.f32.gmra.mrb[112].mxu1 %v24705_v59  ;;  %v23008_v59 = vld [vmem:[#allocation14 + $0x40] sm:$0xff] }
 0x99e   :  { %16449 = vmatprep.mubr.f32.mxu1 %v24706_v46  ;;  %v23010_v46 = vld [vmem:[#allocation14 + $0x48] sm:$0xff] }
 0x9a1   :  { %16450 = vmatmul.mubr.f32.gmra.mrb[114].mxu1 %v24707_v32 }
 0x9a2   :  { %16452 = vmatprep.mubr.f32.mxu1 %v24708_v10  ;;  %v23016_v10 = vsub.f32 %v22984_v49, %v12541_v4 }
 0x9a5   :  { %16453 = vmatmul.mubr.f32.gmra.mrb[116].mxu1 %v24709_v54  ;;  %v23019_v54 = vsub.f32 %v22986_v56, %v12544_v3 }
 0x9a6   :  { %16455 = vmatprep.mubr.f32.mxu1 %v24710_v19  ;;  %v23024_v19 = vsub.f32 %v22988_v0, %v12547_v8 }
 0x9a9   :  { %16456 = vmatmul.mubr.f32.gmra.mrb[118].mxu1 %v24711_v6  ;;  %v24059_v6 = vand.u32 4294901760, %v23008_v59 }
 0x9aa   :  { %16458 = vmatprep.mubr.f32.mxu1 %v24712_v15 }
 0x9ad   :  { %16459 = vmatmul.mubr.f32.gmra.mrb[120].mxu1 %v24713_v1  ;;  %v23033_v1 = vsub.f32 %v22994_v61, %v12550_v58 }
 0x9ae   :  { %16461 = vmatprep.mubr.f32.mxu1 %v24714_v44  ;;  %v23038_v44 = vsub.f32 %v22997_v23, %v12553_v35 }
 0x9b1   :  { %16462 = vmatmul.mubr.f32.gmra.mrb[122].mxu1 %v24715_v31  ;;  %v23043_v31 = vsub.f32 %v22999_v37, %v12556_v40 }
 0x9b2   :  { %16464 = vmatprep.mubr.f32.mxu1 %v24716_v5  ;;  %v24054_v5 = vand.u32 4294901760, %v23010_v46 }
 0x9b5   :  { %16465 = vmatmul.mubr.f32.gmra.mrb[124].mxu1 %v24717_v63  ;;  %v24044_v63 = vand.u32 4294901760, %v23016_v10 }
 0x9b6   :  { %16467 = vmatprep.mubr.f32.mxu1 %v24718_v47  ;;  %v24042_v47 = vand.u32 4294901760, %v23019_v54 }
 0x9b9   :  { %16468 = vmatmul.mubr.f32.gmra.mrb[126].mxu1 %v24719_v2  ;;  %v24040_v2 = vand.u32 4294901760, %v23024_v19 }
 0x9ba   :  { %16478 = vmatprep.mubr.f32.mxu1 %v22235_v11 }
 0x9bd   :  { %16479 = vmatmul.mubr.f32.vlgmr.msra.gmra.mrb[96].mxu1 %v22216_v17 }
 0x9be   :  { %16481 = vmatprep.mubr.f32.mxu1 %v22282_v48  ;;  %16979 = vmatpush3.bf16.msra.mxu1 %v24672_v22  ;;  %v24727_v22 = vld [vmem:[#allocation91_spill] sm:$0xff] }
 0x9bf   :  { %16981 = vmatprep.subr.bf16.mxu1 %v24673_v28 }
 0x9c1   :  { %16482 = vmatmul.mubr.f32.gmra.mrb[98].mxu1 %v22294_v36 }
 0x9c2   :  { %16484 = vmatprep.mubr.f32.mxu1 %v22320_v39  ;;  %16983 = vmatpush3.bf16.msra.mxu1 %v24673_v28  ;;  %v24728_v28 = vld [vmem:[#allocation92_spill] sm:$0xff] }
 0x9c5   :  { %16485 = vmatmul.mubr.f32.gmra.mrb[100].mxu1 %v22331_v7 }
 0x9c6   :  { %16487 = vmatprep.mubr.f32.mxu1 %v22362_v27 }
 0x9c9   :  { %16488 = vmatmul.mubr.f32.gmra.mrb[102].mxu1 %v22368_v43 }
 0x9ca   :  { %16490 = vmatprep.mubr.f32.mxu1 %v22389_v24 }
 0x9cd   :  { %16491 = vmatmul.mubr.f32.gmra.mrb[104].mxu1 %v22407_v21 }
 0x9ce   :  { %16493 = vmatprep.mubr.f32.mxu1 %v22419_v52 }
 0x9d1   :  { %16494 = vmatmul.mubr.f32.gmra.mrb[106].mxu1 %v22429_v57 }
 0x9d2   :  { %16496 = vmatprep.mubr.f32.mxu1 %v22459_v34 }
 0x9d5   :  { %16497 = vmatmul.mubr.f32.gmra.mrb[108].mxu1 %v22461_v45 }
 0x9d6   :  { %16499 = vmatprep.mubr.f32.mxu1 %v22481_v26 }
 0x9d9   :  { %16500 = vmatmul.mubr.f32.gmra.mrb[110].mxu1 %v22498_v12 }
 0x9da   :  { %16502 = vmatprep.mubr.f32.mxu1 %v22513_v42 }
 0x9dd   :  { %16503 = vmatmul.mubr.f32.gmra.mrb[112].mxu1 %v22521_v14 }
 0x9de   :  { %16505 = vmatprep.mubr.f32.mxu1 %v22538_v25 }
 0x9e1   :  { %16506 = vmatmul.mubr.f32.gmra.mrb[114].mxu1 %v22553_v62 }
 0x9e2   :  { %16508 = vmatprep.mubr.f32.mxu1 %v22571_v50 }
 0x9e5   :  { %16509 = vmatmul.mubr.f32.gmra.mrb[116].mxu1 %v22586_v9 }
 0x9e6   :  { %16511 = vmatprep.mubr.f32.mxu1 %v22600_v60 }
 0x9e9   :  { %16512 = vmatmul.mubr.f32.gmra.mrb[118].mxu1 %v24720_v18 }
 0x9ea   :  { %16514 = vmatprep.mubr.f32.mxu1 %v24721_v41 }
 0x9ed   :  { %16515 = vmatmul.mubr.f32.gmra.mrb[120].mxu1 %v24722_v33 }
 0x9ee   :  { %16517 = vmatprep.mubr.f32.mxu1 %v24723_v29 }
 0x9f1   :  { %16518 = vmatmul.mubr.f32.gmra.mrb[122].mxu1 %v24724_v55 }
 0x9f2   :  { %16520 = vmatprep.mubr.f32.mxu1 %v24725_v30 }
 0x9f5   :  { %16521 = vmatmul.mubr.f32.gmra.mrb[124].mxu1 %v24726_v16 }
 0x9f6   :  { %16523 = vmatprep.mubr.f32.mxu1 %v24727_v22 }
 0x9f9   :  { %16524 = vmatmul.mubr.f32.gmra.mrb[126].mxu1 %v24728_v28 }
 0x9fa   :  { %16534 = vmatprep.mubr.f32.mxu1 %v22235_v11  ;;  %v12518_v11 = vld [vmem:[#allocation14] sm:$0xff] }
 0x9fd   :  { %16535 = vmatmul.mubr.f32.vlgmr.msra.gmra.mrb[96].mxu1 %v22216_v17  ;;  %v22947_v17 = vpop.xlane.xlu0 %12317 }
 0x9fe   :  { %16537 = vmatprep.mubr.f32.mxu1 %v22282_v48  ;;  %v12519_v48 = vld [vmem:[#allocation14 + $0x8] sm:$0xff] }
 0xa01   :  { %16538 = vmatmul.mubr.f32.gmra.mrb[98].mxu1 %v22294_v36  ;;  %v24067_v36 = vmov 0.0|0.0  }
 0xa02   :  { %16540 = vmatprep.mubr.f32.mxu1 %v22320_v39  ;;  %17008 = vmatprep.subr.bf16.mxu0 %v24067_v36  ;;  %v12535_v39 = vand.u32 4294901760, %v12518_v11 }
 0xa03   :  { %16984 = vmatprep.subr.bf16.mxu1 %v24067_v36 }
 0xa05   :  { %16541 = vmatmul.mubr.f32.gmra.mrb[100].mxu1 %v22331_v7  ;;  %v12538_v7 = vand.u32 4294901760, %v12519_v48 }
 0xa06   :  { %16543 = vmatprep.mubr.f32.mxu1 %v22362_v27  ;;  %v22951_v27 = vsub.f32 %v12518_v11, %v12535_v39 }
 0xa07   :  { %v22990_v38 = vpack.c.bf16 %v12538_v7, %v12535_v39 }
 0xa09   :  { %16544 = vmatmul.mubr.f32.gmra.mrb[102].mxu1 %v22368_v43  ;;  %v22953_v43 = vsub.f32 %v12519_v48, %v12538_v7 }
 0xa0a   :  { %16546 = vmatprep.mubr.f32.mxu1 %v22389_v24  ;;  %16986 = vmatpush3.bf16.msra.mxu1 %v22990_v38 }
 0xa0b   :  { %16987 = vmatprep.subr.bf16.mxu1 %v24067_v36 }
 0xa0d   :  { %16547 = vmatmul.mubr.f32.gmra.mrb[104].mxu1 %v22407_v21  ;;  %v24047_v21 = vand.u32 4294901760, %v22951_v27 }
 0xa0e   :  { %16549 = vmatprep.mubr.f32.mxu1 %v22419_v52  ;;  %v24046_v52 = vand.u32 4294901760, %v22953_v43 }
 0xa11   :  { %16550 = vmatmul.mubr.f32.gmra.mrb[106].mxu1 %v22429_v57  ;;  %v22959_v57 = vpop.xlane.xlu0 %12323 }
 0xa12   :  { %16552 = vmatprep.mubr.f32.mxu1 %v22459_v34  ;;  %v12629_v34 = vsub.f32 %v22951_v27, %v24047_v21 }
 0xa15   :  { %16553 = vmatmul.mubr.f32.gmra.mrb[108].mxu1 %v22461_v45  ;;  %v12636_v45 = vsub.f32 %v22953_v43, %v24046_v52  ;;  %v23097_v52 = vld [vmem:[#allocation14 + $0x68] sm:$0xff] }
 0xa16   :  { %16555 = vmatprep.mubr.f32.mxu1 %v22481_v26  ;;  %v12630_v26 = vand.u32 4294901760, %v12629_v34 }
 0xa19   :  { %16556 = vmatmul.mubr.f32.gmra.mrb[110].mxu1 %v22498_v12  ;;  %v12637_v12 = vand.u32 4294901760, %v12636_v45 }
 0xa1a   :  { %16558 = vmatprep.mubr.f32.mxu1 %v22513_v42 }
 0xa1d   :  { %16559 = vmatmul.mubr.f32.gmra.mrb[112].mxu1 %v22521_v14  ;;  %v17009_v14 = vpack.c.bf16 %v12637_v12, %v12630_v26  ;;  %v23086_v26 = vld [vmem:[#allocation14 + $0x50] sm:$0xff]  ;;  %v23088_v12 = vld [vmem:[#allocation14 + $0x58] sm:$0xff] }
 0xa1e   :  { %16561 = vmatprep.mubr.f32.mxu1 %v22538_v25  ;;  %v22969_v25 = vpop.xlane.xlu0 %12329 }
 0xa1f   :  { %17010 = vmatpush3.bf16.msra.mxu0 %v17009_v14 }
 0xa20   :  { %17011 = vmatprep.subr.bf16.mxu0 %v24067_v36 }
 0xa21   :  { %16562 = vmatmul.mubr.f32.gmra.mrb[114].mxu1 %v22553_v62  ;;  %v22945_v62 = vpop.xlane.xlu1 %12320 }
 0xa22   :  { %16564 = vmatprep.mubr.f32.mxu1 %v22571_v50 }
 0xa25   :  { %16565 = vmatmul.mubr.f32.gmra.mrb[116].mxu1 %v22586_v9  ;;  %v22955_v24 = vpop.xlane.xlu1 %12326  ;;  %v22974_v9 = vpop.xlane.xlu0 %12335 }
 0xa26   :  { %16567 = vmatprep.mubr.f32.mxu1 %v22600_v60 }
 0xa29   :  { %16568 = vmatmul.mubr.f32.gmra.mrb[118].mxu1 %v24720_v18  ;;  %v22967_v42 = vpop.xlane.xlu1 %12332  ;;  %v22978_v20 = vpop.xlane.xlu0 %12341  ;;  %v23052_v18 = vsub.f32 %v23008_v59, %v24059_v6 }
 0xa2a   :  { %16570 = vmatprep.mubr.f32.mxu1 %v24721_v41  ;;  %v24041_v41 = vand.u32 4294901760, %v23033_v1 }
 0xa2b   :  { %v24051_v11 = vand.u32 4294901760, %v23052_v18 }
 0xa2c   :  { %v12664_v39 = vsub.f32 %v23033_v1, %v24041_v41 }
 0xa2d   :  { %16571 = vmatmul.mubr.f32.gmra.mrb[120].mxu1 %v24722_v33  ;;  %v22972_v50 = vpop.xlane.xlu1 %12338  ;;  %v22982_v53 = vpop.xlane.xlu0 %12347  ;;  %v24043_v33 = vand.u32 4294901760, %v23038_v44  ;;  %v12685_v41 = vsub.f32 %v23052_v18, %v24051_v11 }
 0xa2e   :  { %16573 = vmatprep.mubr.f32.mxu1 %v24723_v29  ;;  %v24045_v29 = vand.u32 4294901760, %v23043_v31 }
 0xa2f   :  { %v12671_v7 = vsub.f32 %v23038_v44, %v24043_v33 }
 0xa30   :  { %v12678_v34 = vsub.f32 %v23043_v31, %v24045_v29  ;;  %v24052_v29 = vand.u32 4294901760, %v23088_v12 }
 0xa31   :  { %16574 = vmatmul.mubr.f32.gmra.mrb[122].mxu1 %v24724_v55  ;;  %v22976_v60 = vpop.xlane.xlu1 %12344  ;;  %v23028_v15 = vpop.xlane.xlu0 %12353  ;;  %v23060_v55 = vsub.f32 %v23010_v46, %v24054_v5  ;;  %v12672_v21 = vand.u32 4294901760, %v12671_v7 }
 0xa32   :  { %16576 = vmatprep.mubr.f32.mxu1 %v24725_v30  ;;  %v23116_v7 = vsub.f32 %v23088_v12, %v24052_v29 }
 0xa33   :  { %v24050_v45 = vand.u32 4294901760, %v23060_v55 }
 0xa34   :  { %v24056_v11 = vand.u32 4294901760, %v23116_v7 }
 0xa35   :  { %16577 = vmatmul.mubr.f32.gmra.mrb[124].mxu1 %v24726_v16  ;;  %v22980_v13 = vpop.xlane.xlu1 %12350  ;;  %v12643_v16 = vsub.f32 %v23016_v10, %v24044_v63  ;;  %v23074_v48 = vpop.xlane.xlu0 %12365  ;;  %v24053_v63 = vand.u32 4294901760, %v23086_v26 }
 0xa36   :  { %16579 = vmatprep.mubr.f32.mxu1 %v24727_v22  ;;  %v12650_v22 = vsub.f32 %v23019_v54, %v24042_v47  ;;  %v23093_v47 = vld [vmem:[#allocation14 + $0x60] sm:$0xff]  ;;  %v12706_v5 = vsub.f32 %v23116_v7, %v24056_v11 }
 0xa37   :  { %v12644_v14 = vand.u32 4294901760, %v12643_v16  ;;  %v12692_v16 = vsub.f32 %v23060_v55, %v24050_v45 }
 0xa38   :  { %v12651_v49 = vand.u32 4294901760, %v12650_v22  ;;  %v23102_v22 = vpack.c.bf16 %v12544_v3, %v12541_v4  ;;  %v23119_v4 = vld [vmem:[#allocation14 + $0x78] sm:$0xff]  ;;  %v12707_v6 = vand.u32 4294901760, %v12706_v5  ;;  %v24730_v5 = vand.u32 4294901760, %v23008_v59 }
 0xa39   :  { %16580 = vmatmul.mubr.f32.gmra.mrb[126].mxu1 %v24728_v28  ;;  %v23013_v32 = vpop.xlane.xlu1 %12356  ;;  %v12657_v28 = vsub.f32 %v23024_v19, %v24040_v2  ;;  %v12665_v2 = vand.u32 4294901760, %v12664_v39  ;;  %v23121_v3 = vpop.xlane.xlu0 %12371 }
 0xa3a   :  { %16614 = vmatprep.mubr.msk.f32.mxu1 %vm18751_vm3, %v24048_v51  ;;  %v17012_v33 = vpack.c.bf16 %v12651_v49, %v12644_v14  ;;  %v12679_v51 = vand.u32 4294901760, %v12678_v34  ;;  %v23111_v49 = vsub.f32 %v23086_v26, %v24053_v63  ;;  %v24055_v34 = vand.u32 4294901760, %v23093_v47  ;;  %16989 = vmatpush3.bf16.msra.mxu1 %v23102_v22 }
 0xa3b   :  { %v12658_v56 = vand.u32 4294901760, %v12657_v28  ;;  %v23104_v28 = vld [vmem:[#allocation14 + $0x70] sm:$0xff]  ;;  %16990 = vmatprep.subr.bf16.mxu1 %v24067_v36  ;;  %v12693_v63 = vand.u32 4294901760, %v12692_v16 }
 0xa3c   :  { %17013 = vmatpush3.bf16.msra.mxu0 %v17012_v33  ;;  %v12686_v33 = vand.u32 4294901760, %v12685_v41  ;;  %v24057_v45 = vand.u32 4294901760, %v23111_v49  ;;  %v23138_v41 = vsub.f32 %v23093_v47, %v24055_v34  ;;  %v24058_v29 = vand.u32 4294901760, %v23104_v28 }
 0xa3d   :  { %v23062_v30 = vpop.xlane.xlu1 %12368  ;;  %v17015_v14 = vpack.c.bf16 %v12665_v2, %v12658_v56  ;;  %17014 = vmatprep.subr.bf16.mxu0 %v24067_v36  ;;  %v23129_v2 = vpack.c.bf16 %v12550_v58, %v12547_v8  ;;  %v12574_v56 = vand.u32 4294901760, %v23097_v52  ;;  %v17018_v0 = vpack.c.bf16 %v12679_v51, %v12672_v21 }
 0xa3e   :  { %v24060_v8 = vand.u32 4294901760, %v23119_v4  ;;  %v12699_v58 = vsub.f32 %v23111_v49, %v24057_v45  ;;  %v24062_v34 = vand.u32 4294901760, %v23138_v41  ;;  %v23155_v21 = vsub.f32 %v23104_v28, %v24058_v29  ;;  %v23176_v45 = vpop.xlane.xlu0 %12377 }
 0xa3f   :  { %v23142_v61 = vsub.f32 %v23097_v52, %v12574_v56  ;;  %16992 = vmatpush3.bf16.msra.mxu1 %v23129_v2  ;;  %v23164_v51 = vpack.c.bf16 %v12556_v40, %v12553_v35  ;;  %v17021_v29 = vpack.c.bf16 %v12693_v63, %v12686_v33  ;;  %v24731_v63 = vand.u32 4294901760, %v23010_v46 }
 0xa40   :  { %17016 = vmatpush3.bf16.msra.mxu0 %v17015_v14  ;;  %v23169_v16 = vsub.f32 %v23119_v4, %v24060_v8  ;;  %16993 = vmatprep.subr.bf16.mxu1 %v24067_v36  ;;  %v12700_v23 = vand.u32 4294901760, %v12699_v58  ;;  %v12713_v35 = vsub.f32 %v23138_v41, %v24062_v34  ;;  %v24066_v14 = vand.u32 4294901760, %v23155_v21 }
 0xa41   :  { %v23106_v39 = vpop.xlane.xlu1 %12374  ;;  %17017 = vmatprep.subr.bf16.mxu0 %v24067_v36  ;;  %v24061_v52 = vand.u32 4294901760, %v23142_v61  ;;  %24729 = vst [vmem:[#allocation95_spill] sm:$0xff] %v23164_v51  ;;  %v23194_v33 = vpack.c.bf16 %v24731_v63, %v24730_v5  ;;  %v24732_v46 = vand.u32 4294901760, %v23086_v26  ;;  %v24734_v26 = vand.u32 4294901760, %v23093_v47 }
 0xa42   :  { %v24065_v8 = vand.u32 4294901760, %v23169_v16  ;;  %v12727_v37 = vsub.f32 %v23155_v21, %v24066_v14  ;;  %v24735_v5 = vand.u32 4294901760, %v23104_v28 }
 0xa43   :  { %v12720_v40 = vsub.f32 %v23142_v61, %v24061_v52  ;;  %16995 = vmatpush3.bf16.msra.mxu1 %v23164_v51  ;;  %v12714_v52 = vand.u32 4294901760, %v12713_v35  ;;  %v23205_v51 = vpop.xlane.xlu0 %12383 }
 0xa44   :  { %17019 = vmatpush3.bf16.msra.mxu0 %v17018_v0  ;;  %16996 = vmatprep.subr.bf16.mxu1 %v24067_v36  ;;  %v17024_v0 = vpack.c.bf16 %v12707_v6, %v12700_v23  ;;  %v12734_v59 = vsub.f32 %v23169_v16, %v24065_v8  ;;  %v24733_v6 = vand.u32 4294901760, %v23088_v12  ;;  %v12728_v8 = vand.u32 4294901760, %v12727_v37 }
 0xa45   :  { %v23173_v11 = vpop.xlane.xlu1 %12380  ;;  %17020 = vmatprep.subr.bf16.mxu0 %v24067_v36  ;;  %v12721_v34 = vand.u32 4294901760, %v12720_v40  ;;  %v23224_v12 = vpack.c.bf16 %v12574_v56, %v24734_v26 }
 0xa46   :  { %v12735_v14 = vand.u32 4294901760, %v12734_v59 }
 0xa47   :  { %16998 = vmatpush3.bf16.msra.mxu1 %v23194_v33  ;;  %v17027_v63 = vpack.c.bf16 %v12721_v34, %v12714_v52  ;;  %v23229_v23 = vpop.xlane.xlu0 %12389 }
 0xa48   :  { %17022 = vmatpush3.bf16.msra.mxu0 %v17021_v29  ;;  %v23213_v29 = vpack.c.bf16 %v24733_v6, %v24732_v46  ;;  %16999 = vmatprep.subr.bf16.mxu1 %v24067_v36  ;;  %v17030_v56 = vpack.c.bf16 %v12735_v14, %v12728_v8 }
 0xa49   :  { %v23197_v58 = vpop.xlane.xlu1 %12386  ;;  %17023 = vmatprep.subr.bf16.mxu0 %v24067_v36 }
 0xa4b   :  { %17001 = vmatpush3.bf16.msra.mxu1 %v23213_v29  ;;  %v23252_v28 = vpop.xlane.xlu0 %12395 }
 0xa4c   :  { %17025 = vmatpush3.bf16.msra.mxu0 %v17024_v0  ;;  %17002 = vmatprep.subr.bf16.mxu1 %v24067_v36 }
 0xa4d   :  { %17026 = vmatprep.subr.bf16.mxu0 %v24067_v36  ;;  %v23226_v46 = vpop.xlane.xlu1 %12392 }
 0xa4f   :  { %17004 = vmatpush3.bf16.msra.mxu1 %v23224_v12 }
 0xa50   :  { %17028 = vmatpush3.bf16.msra.mxu0 %v17027_v63  ;;  %17005 = vmatprep.subr.bf16.mxu1 %v24067_v36 }
 0xa51   :  { %17029 = vmatprep.subr.bf16.mxu0 %v24067_v36  ;;  %v23249_v14 = vpop.xlane.xlu1 %12398 }
 0xa54   :  { %17031 = vmatpush3.bf16.msra.mxu0 %v17030_v56 }
 0xa55   :  { %17032 = vmatprep.subr.bf16.mxu0 %v24067_v36 }
 0xad0   :  { %v16536_v35 = vpop.f32.mrb[96].mxu1 }
 0xad1   :  { %v12094_v40 = vpop.f32.mrb[97].mxu1  ;;  %v12413_v0 = vadd.f32 %v16536_v35, %v22945_v62  ;;  %v24736_v62 = vand.u32 4294901760, %v23119_v4 }
 0xad2   :  { %v12412_v59 = vadd.f32 %v22947_v17, %v12094_v40 }
 0xad4   :  { %v16539_v6 = vpop.f32.mrb[98].mxu1 }
 0xad5   :  { %v12415_v34 = vadd.f32 %v16539_v6, %v22955_v24  ;;  %v12106_v52 = vpop.f32.mrb[99].mxu1  ;;  %v23243_v24 = vpack.c.bf16 %v24736_v62, %v24735_v5 }
 0xad6   :  { %v12414_v47 = vadd.f32 %v22959_v57, %v12106_v52 }
 0xad7   :  { %v12445_v26 = vmin.f32 %v12413_v0, %v12415_v34  ;;  %17007 = vmatpush3.bf16.msra.mxu1 %v23243_v24  ;;  %v24737_v34 = vld [vmem:[#allocation103_spill] sm:$0xff] }
 0xad8   :  { %v12444_v35 = vmin.f32 %v12412_v59, %v12414_v47  ;;  %v16542_v6 = vpop.f32.mrb[100].mxu1 }
 0xad9   :  { %v12417_v17 = vadd.f32 %v16542_v6, %v22967_v42  ;;  %v12118_v57 = vpop.f32.mrb[101].mxu1 }
 0xada   :  { %v12416_v40 = vadd.f32 %v22969_v25, %v12118_v57  ;;  %v23260_v25 = vpop.xlane.xlu1 %12404 }
 0xadb   :  { %v12447_v4 = vmin.f32 %v12445_v26, %v12417_v17  ;;  %v23262_v26 = vpop.xlane.xlu0 %12401 }
 0xadc   :  { %v12446_v5 = vmin.f32 %v12444_v35, %v12416_v40  ;;  %v16545_v63 = vpop.f32.mrb[102].mxu1 }
 0xadd   :  { %v12419_v42 = vadd.f32 %v16545_v63, %v22972_v50  ;;  %v12130_v0 = vpop.f32.mrb[103].mxu1 }
 0xade   :  { %v12418_v52 = vadd.f32 %v22974_v9, %v12130_v0  ;;  %v23269_v63 = vpop.xlane.xlu1 %12410 }
 0xadf   :  { %v12449_v59 = vmin.f32 %v12447_v4, %v12419_v42  ;;  %v23272_v42 = vpop.xlane.xlu0 %12407 }
 0xae0   :  { %v12448_v47 = vmin.f32 %v12446_v5, %v12418_v52  ;;  %v16548_v56 = vpop.f32.mrb[104].mxu1 }
 0xae1   :  { %v12421_v62 = vadd.f32 %v16548_v56, %v22976_v60  ;;  %v12142_v6 = vpop.f32.mrb[105].mxu1 }
 0xae2   :  { %v12420_v50 = vadd.f32 %v22978_v20, %v12142_v6  ;;  %v6297_v20 = vrot.slane %v24737_v34, 4 }
 0xae3   :  { %v12451_v17 = vmin.f32 %v12449_v59, %v12421_v62  ;;  %v12363_v62 = vpop.xlane.xlu1 %12362 }
 0xae4   :  { %v12450_v57 = vmin.f32 %v12448_v47, %v12420_v50  ;;  %v16551_v40 = vpop.f32.mrb[106].mxu1  ;;  %v12360_v50 = vpop.xlane.xlu0 %12359 }
 0xae5   :  { %v12423_v9 = vadd.f32 %v16551_v40, %v22980_v13  ;;  %v12154_v4 = vpop.f32.mrb[107].mxu1 }
 0xae6   :  { %v12422_v5 = vadd.f32 %v22982_v53, %v12154_v4  ;;  %v6298_v53 = vmin.f32 %v24737_v34, %v6297_v20 }
 0xae7   :  { %v12453_v0 = vmin.f32 %v12451_v17, %v12423_v9 }
 0xae8   :  { %v12452_v60 = vmin.f32 %v12450_v57, %v12422_v5  ;;  %v16554_v52 = vpop.f32.mrb[108].mxu1 }
 0xae9   :  { %v12425_v56 = vadd.f32 %v16554_v52, %v23013_v32  ;;  %v12166_v35 = vpop.f32.mrb[109].mxu1  ;;  %v6299_v32 = vrot.slane %v6298_v53, 2 }
 0xaea   :  { %v12424_v59 = vadd.f32 %v23028_v15, %v12166_v35 }
 0xaeb   :  { %v12455_v47 = vmin.f32 %v12453_v0, %v12425_v56 }
 0xaec   :  { %v12454_v13 = vmin.f32 %v12452_v60, %v12424_v59  ;;  %v16557_v6 = vpop.f32.mrb[110].mxu1  ;;  %v6300_v60 = vmin.f32 %v6298_v53, %v6299_v32 }
 0xaed   :  { %v12427_v40 = vadd.f32 %v16557_v6, %v12363_v62  ;;  %v12178_v8 = vpop.f32.mrb[111].mxu1 }
 0xaee   :  { %v12426_v4 = vadd.f32 %v12360_v50, %v12178_v8  ;;  %v6301_v50 = vrot.slane %v6300_v60, 1 }
 0xaef   :  { %v12457_v17 = vmin.f32 %v12455_v47, %v12427_v40 }
 0xaf0   :  { %v12456_v57 = vmin.f32 %v12454_v13, %v12426_v4  ;;  %v16560_v9 = vpop.f32.mrb[112].mxu1 }
 0xaf1   :  { %v12190_v5 = vpop.f32.mrb[113].mxu1  ;;  %v12429_v15 = vadd.f32 %v16560_v9, %v23062_v30 }
 0xaf2   :  { %v12458_v52 = vmin.f32 %v12456_v57, %v12457_v17  ;;  %v12428_v59 = vadd.f32 %v23074_v48, %v12190_v5  ;;  %v6302_v17 = vmin.f32 %v6300_v60, %v6301_v50 }
 0xaf4   :  { %v12459_v37 = vrot.slane %v12458_v52, 4  ;;  %v16563_v36 = vpop.f32.mrb[114].mxu1 }
 0xaf5   :  { %v12431_v35 = vadd.f32 %v16563_v36, %v23106_v39  ;;  %v12202_v0 = vpop.f32.mrb[115].mxu1 }
 0xaf6   :  { %v12460_v56 = vmin.f32 %v12458_v52, %v12459_v37  ;;  %v12430_v34 = vadd.f32 %v23121_v3, %v12202_v0 }
 0xaf7   :  { %v12466_v8 = vmin.f32 %v12429_v15, %v12431_v35 }
 0xaf8   :  { %v12461_v20 = vrot.slane %v12460_v56, 2  ;;  %v12465_v47 = vmin.f32 %v12428_v59, %v12430_v34  ;;  %v16566_v62 = vpop.f32.mrb[116].mxu1 }
 0xaf9   :  { %v12433_v13 = vadd.f32 %v16566_v62, %v23173_v11  ;;  %v12214_v6 = vpop.f32.mrb[117].mxu1  ;;  %v24738_v62 = vld [vmem:[#allocation104_spill] sm:$0xff] }
 0xafa   :  { %v12462_v40 = vmin.f32 %v12460_v56, %v12461_v20  ;;  %v12432_v30 = vadd.f32 %v23176_v45, %v12214_v6 }
 0xafb   :  { %v12468_v4 = vmin.f32 %v12466_v8, %v12433_v13  ;;  %v6318_v13 = vrot.slane %v24738_v62, 4 }
 0xafc   :  { %v12463_v36 = vrot.slane %v12462_v40, 1  ;;  %v12467_v39 = vmin.f32 %v12465_v47, %v12432_v30  ;;  %v16569_v53 = vpop.f32.mrb[118].mxu1 }
 0xafd   :  { %v12435_v37 = vadd.f32 %v16569_v53, %v23197_v58  ;;  %v12226_v48 = vpop.f32.mrb[119].mxu1 }
 0xafe   :  { %v12464_v3 = vmin.f32 %v12462_v40, %v12463_v36  ;;  %v12434_v57 = vadd.f32 %v23205_v51, %v12226_v48 }
 0xaff   :  { %v12470_v9 = vmin.f32 %v12468_v4, %v12435_v37 }
 0xb00   :  { %v12486_v5 = vmin.f32 %v6302_v17, %v12464_v3  ;;  %v12469_v32 = vmin.f32 %v12467_v39, %v12434_v57  ;;  %v16572_v11 = vpop.f32.mrb[120].mxu1 }
 0xb01   :  { %v12437_v52 = vadd.f32 %v16572_v11, %v23226_v46  ;;  %v12238_v15 = vpop.f32.mrb[121].mxu1 }
 0xb02   :  { %v12436_v45 = vadd.f32 %v23229_v23, %v12238_v15 }
 0xb03   :  { %v12472_v35 = vmin.f32 %v12470_v9, %v12437_v52 }
 0xb04   :  { %v12471_v0 = vmin.f32 %v12469_v32, %v12436_v45  ;;  %v16575_v56 = vpop.f32.mrb[122].mxu1 }
 0xb05   :  { %v12439_v59 = vadd.f32 %v16575_v56, %v23249_v14  ;;  %v12250_v58 = vpop.f32.mrb[123].mxu1  ;;  %v6319_v14 = vmin.f32 %v24738_v62, %v6318_v13 }
 0xb06   :  { %v12438_v60 = vadd.f32 %v23252_v28, %v12250_v58 }
 0xb07   :  { %v12474_v34 = vmin.f32 %v12472_v35, %v12439_v59  ;;  %v6320_v39 = vrot.slane %v6319_v14, 2 }
 0xb08   :  { %v12473_v8 = vmin.f32 %v12471_v0, %v12438_v60  ;;  %v16578_v51 = vpop.f32.mrb[124].mxu1 }
 0xb09   :  { %v12441_v20 = vadd.f32 %v16578_v51, %v23260_v25  ;;  %v12262_v47 = vpop.f32.mrb[125].mxu1  ;;  %v13275_v25 = vld [vmem:[#allocation13] ss:$0 sm:$0xff]  ;;  %v6321_v48 = vmin.f32 %v6319_v14, %v6320_v39  ;;  %v24744_v39 = vpack.c.bf16 %v23043_v31, %v23038_v44 }
 0xb0a   :  { %v12440_v46 = vadd.f32 %v23262_v26, %v12262_v47  ;;  %v12495_v3 = vadd.f32 %v13275_v25, %v12486_v5 }
 0xb0b   :  { %v12476_v6 = vmin.f32 %v12474_v34, %v12441_v20  ;;  %v6322_v57 = vrot.slane %v6321_v48, 1 }
 0xb0c   :  { %v12475_v23 = vmin.f32 %v12473_v8, %v12440_v46  ;;  %v16581_v50 = vpop.f32.mrb[126].mxu1  ;;  %v12497_v32 = vmax.f32 %v12495_v3, 0.0  ;;  %v24750_v3 = vand.u32 4294901760, %v22951_v27 }
 0xb0d   :  { %v12443_v40 = vadd.f32 %v16581_v50, %v23269_v63  ;;  %v12274_v30 = vpop.f32.mrb[127].mxu1  ;;  %v6323_v63 = vmin.f32 %v6321_v48, %v6322_v57  ;;  %v24740_v50 = vmov 0.0   ;;  %v24748_v48 = vpack.c.bf16 %v23169_v16, %v23155_v21 }
 0xb0e   :  { %v12442_v28 = vadd.f32 %v23272_v42, %v12274_v30  ;;  %v12501_v15 = vadd.f32 0.0001, %v12497_v32  ;;  %v12499_v59 = vadd.f32 1.0, %v12497_v32  ;;  %v24753_v32 = vand.u32 4294901760, %v23019_v54 }
 0xb0f   :  { %v12478_v4 = vmin.f32 %v12476_v6, %v12443_v40  ;;  %v24741_v40 = vmov 0.0|0.0  }
 0xb10   :  { %v12477_v36 = vmin.f32 %v12475_v23, %v12442_v28  ;;  %18496 = vrcp.f32 %v12501_v15  ;;  %v24739_v23 = vpack.c.bf16 %v22953_v43, %v22951_v27  ;;  %v24742_v28 = vpack.c.bf16 %v23019_v54, %v23016_v10 }
 0xb11   :  { %v24754_v27 = vand.u32 4294901760, %v23024_v19  ;;  %v24758_v15 = vand.u32 4294901760, %v23052_v18 }
 0xb12   :  { %v12479_v53 = vmin.f32 %v12477_v36, %v12478_v4  ;;  %v24743_v36 = vpack.c.bf16 %v23033_v1, %v23024_v19  ;;  %v24760_v19 = vand.u32 4294901760, %v23111_v49 }
 0xb14   :  { %v12480_v37 = vrot.slane %v12479_v53, 4 }
 0xb16   :  { %v12481_v17 = vmin.f32 %v12479_v53, %v12480_v37  ;;  %v24745_v53 = vpack.c.bf16 %v23060_v55, %v23052_v18  ;;  %v24747_v37 = vpack.c.bf16 %v23142_v61, %v23138_v41  ;;  %v24764_v18 = vand.u32 4294901760, %v23155_v21 }
 0xb18   :  { %v12482_v26 = vrot.slane %v12481_v17, 2 }
 0xb1a   :  { %v12483_v9 = vmin.f32 %v12481_v17, %v12482_v26  ;;  %v18497_v56 = vpop.eup %18496  ;;  %v24749_v17 = vld [vmem:[#allocation95_spill] sm:$0xff]  ;;  %v24751_v26 = vand.u32 4294901760, %v22953_v43  ;;  %v24755_v43 = vand.u32 4294901760, %v23033_v1  ;;  %v24761_v1 = vand.u32 4294901760, %v23116_v7 }
 0xb1b   :  { %v12504_v58 = vmul.f32 %v18497_v56, %v12499_v59 }
 0xb1c   :  { %v12484_v11 = vrot.slane %v12483_v9, 1  ;;  %v17081_v57 = vpack.c.bf16 %v24751_v26, %v24750_v3 }
 0xb1e   :  { %v12485_v52 = vmin.f32 %v12483_v9, %v12484_v11  ;;  %v24752_v9 = vand.u32 4294901760, %v23016_v10  ;;  %v24757_v10 = vand.u32 4294901760, %v23043_v31  ;;  %v24763_v31 = vand.u32 4294901760, %v23142_v61 }
 0xb20   :  { %v12487_v45 = vmin.f32 %v6323_v63, %v12485_v52  ;;  %v17084_v11 = vpack.c.bf16 %v24753_v32, %v24752_v9  ;;  %v17087_v63 = vpack.c.bf16 %v24755_v43, %v24754_v27  ;;  %v24756_v52 = vand.u32 4294901760, %v23038_v44 }
 0xb21   :  { %v24762_v44 = vand.u32 4294901760, %v23138_v41 }
 0xb22   :  { %v12496_v35 = vadd.f32 %v13275_v25, %v12487_v45  ;;  %v24746_v25 = vpack.c.bf16 %v23116_v7, %v23111_v49  ;;  %v17090_v54 = vpack.c.bf16 %v24757_v10, %v24756_v52  ;;  %v24759_v45 = vand.u32 4294901760, %v23060_v55 }
 0xb23   :  { %v24765_v55 = vand.u32 4294901760, %v23169_v16 }
 0xb24   :  { %v12498_v42 = vmax.f32 %v12496_v35, 0.0  ;;  %v17093_v35 = vpack.c.bf16 %v24759_v45, %v24758_v15 }
 0xb25   :  { %v17102_v56 = vpack.c.bf16 %v24765_v55, %v24764_v18 }
 0xb26   :  { %v12502_v0 = vadd.f32 0.0001, %v12498_v42  ;;  %v12500_v60 = vadd.f32 1.0, %v12498_v42  ;;  %v17096_v42 = vpack.c.bf16 %v24761_v1, %v24760_v19 }
 0xb28   :  { %18498 = vrcp.f32 %v12502_v0  ;;  %v17099_v0 = vpack.c.bf16 %v24763_v31, %v24762_v44 }
 0xb29   :  { %18500 = vlog2.f32 %v12504_v58 }
 0xb32   :  { %v18499_v34 = vpop.eup %18498 }
 0xb33   :  { %v12506_v5 = vmul.f32 %v18499_v34, %v12500_v60  ;;  %v18501_v8 = vpop.eup %18500 }
 0xb34   :  { %v12508_v47 = vmul.f32 0.6931472, %v18501_v8 }
 0xb35   :  { %18502 = vlog2.f32 %v12506_v5 }
 0xb3f   :  { %v18503_v51 = vpop.eup %18502 }
 0xb40   :  { %v12510_v20 = vmul.f32 0.6931472, %v18503_v51 }
 0xb42   :  { %v12513_v62 = vrot.slane %v12510_v20, 7 }
 0xb44   :  { %v12515_v13 = vsel %vm12514_vm4, %v12513_v62, %v12508_v47 }
 0xb45   :  { %v23296_v46 = vand.u32 4294901760, %v12515_v13  ;;  %12517 = vst [vmem:[#allocation17] sm:$0x3] %v12515_v13 }
 0xb47   :  { %v12616_v6 = vsub.f32 %v12515_v13, %v23296_v46  ;;  %16650 = vmatmul.mubr.f32.vlgmr.msra.gmra.mrb[96].mxu0 %v23296_v46 }
 0xb48   :  { %17034 = vmatpush3.bf16.msra.mxu0 %v24739_v23  ;;  %16684 = vmatprep.mubr.msk.f32.mxu0 %vm18751_vm3, %v24740_v50 }
 0xb49   :  { %17035 = vmatprep.subr.bf16.mxu0 %v24741_v40  ;;  %v12617_v30 = vand.u32 4294901760, %v12616_v6 }
 0xb4b   :  { %v12618_v14 = vsub.f32 %v12616_v6, %v12617_v30 }
 0xb4c   :  { %17037 = vmatpush3.bf16.msra.mxu0 %v24742_v28 }
 0xb4d   :  { %17038 = vmatprep.subr.bf16.mxu0 %v24741_v40  ;;  %v12619_v4 = vand.u32 4294901760, %v12618_v14 }
 0xb4f   :  { %16615 = vmatmul.mubr.f32.vlgmr.msra.gmra.mrb[128].mxu1 %v12619_v4 }
 0xb50   :  { %17040 = vmatpush3.bf16.msra.mxu0 %v24743_v36 }
 0xb51   :  { %17041 = vmatprep.subr.bf16.mxu0 %v24741_v40 }
 0xb54   :  { %17043 = vmatpush3.bf16.msra.mxu0 %v24744_v39 }
 0xb55   :  { %17044 = vmatprep.subr.bf16.mxu0 %v24741_v40 }
 0xb58   :  { %17046 = vmatpush3.bf16.msra.mxu0 %v24745_v53 }
 0xb59   :  { %17047 = vmatprep.subr.bf16.mxu0 %v24741_v40 }
 0xb5c   :  { %17049 = vmatpush3.bf16.msra.mxu0 %v24746_v25 }
 0xb5d   :  { %17050 = vmatprep.subr.bf16.mxu0 %v24741_v40 }
 0xb60   :  { %17052 = vmatpush3.bf16.msra.mxu0 %v24747_v37 }
 0xb61   :  { %17053 = vmatprep.subr.bf16.mxu0 %v24741_v40 }
 0xb64   :  { %17055 = vmatpush3.bf16.msra.mxu0 %v24748_v48 }
 0xb65   :  { %17056 = vmatprep.subr.bf16.mxu0 %v24741_v40 }
 0xb67   :  { %16685 = vmatmul.mubr.f32.vlgmr.msra.gmra.mrb[96].mxu0 %v12616_v6 }
 0xb68   :  { %17058 = vmatpush3.bf16.msra.mxu0 %v22990_v38  ;;  %16719 = vmatprep.mubr.msk.f32.mxu0 %vm18751_vm3, %v24740_v50 }
 0xb69   :  { %17059 = vmatprep.subr.bf16.mxu0 %v24741_v40 }
 0xb6c   :  { %17061 = vmatpush3.bf16.msra.mxu0 %v23102_v22 }
 0xb6d   :  { %17062 = vmatprep.subr.bf16.mxu0 %v24741_v40 }
 0xb70   :  { %17064 = vmatpush3.bf16.msra.mxu0 %v23129_v2 }
 0xb71   :  { %17065 = vmatprep.subr.bf16.mxu0 %v24741_v40 }
 0xb74   :  { %17067 = vmatpush3.bf16.msra.mxu0 %v24749_v17 }
 0xb75   :  { %17068 = vmatprep.subr.bf16.mxu0 %v24741_v40 }
 0xb78   :  { %17070 = vmatpush3.bf16.msra.mxu0 %v23194_v33 }
 0xb79   :  { %17071 = vmatprep.subr.bf16.mxu0 %v24741_v40 }
 0xb7c   :  { %17073 = vmatpush3.bf16.msra.mxu0 %v23213_v29 }
 0xb7d   :  { %17074 = vmatprep.subr.bf16.mxu0 %v24741_v40 }
 0xb80   :  { %17076 = vmatpush3.bf16.msra.mxu0 %v23224_v12 }
 0xb81   :  { %17077 = vmatprep.subr.bf16.mxu0 %v24741_v40 }
 0xb84   :  { %17079 = vmatpush3.bf16.msra.mxu0 %v23243_v24 }
 0xb85   :  { %17080 = vmatprep.subr.bf16.mxu0 %v24741_v40 }
 0xb87   :  { %16720 = vmatmul.mubr.f32.vlgmr.msra.gmra.mrb[96].mxu0 %v12617_v30 }
 0xb88   :  { %17082 = vmatpush3.bf16.msra.mxu0 %v17081_v57  ;;  %16754 = vmatprep.mubr.msk.f32.mxu0 %vm18751_vm3, %v24740_v50 }
 0xb89   :  { %17083 = vmatprep.subr.bf16.mxu0 %v24741_v40 }
 0xb8c   :  { %17085 = vmatpush3.bf16.msra.mxu0 %v17084_v11 }
 0xb8d   :  { %17086 = vmatprep.subr.bf16.mxu0 %v24741_v40 }
 0xb90   :  { %17088 = vmatpush3.bf16.msra.mxu0 %v17087_v63 }
 0xb91   :  { %17089 = vmatprep.subr.bf16.mxu0 %v24741_v40 }
 0xb94   :  { %17091 = vmatpush3.bf16.msra.mxu0 %v17090_v54 }
 0xb95   :  { %17092 = vmatprep.subr.bf16.mxu0 %v24741_v40 }
 0xb98   :  { %17094 = vmatpush3.bf16.msra.mxu0 %v17093_v35 }
 0xb99   :  { %17095 = vmatprep.subr.bf16.mxu0 %v24741_v40 }
 0xb9c   :  { %17097 = vmatpush3.bf16.msra.mxu0 %v17096_v42 }
 0xb9d   :  { %17098 = vmatprep.subr.bf16.mxu0 %v24741_v40 }
 0xba0   :  { %17100 = vmatpush3.bf16.msra.mxu0 %v17099_v0 }
 0xba1   :  { %17101 = vmatprep.subr.bf16.mxu0 %v24741_v40 }
 0xba4   :  { %17103 = vmatpush3.bf16.msra.mxu0 %v17102_v56 }
 0xba5   :  { %17104 = vmatprep.subr.bf16.mxu0 %v24741_v40 }
 0xba7   :  { %16755 = vmatmul.mubr.f32.vlgmr.msra.gmra.mrb[96].mxu0 %v23296_v46 }
 0xba8   :  { %17106 = vmatpush3.bf16.msra.mxu0 %v22990_v38  ;;  %16789 = vmatprep.mubr.msk.f32.mxu0 %vm18751_vm3, %v24740_v50 }
 0xba9   :  { %17107 = vmatprep.subr.bf16.mxu0 %v24741_v40 }
 0xbac   :  { %17109 = vmatpush3.bf16.msra.mxu0 %v23102_v22 }
 0xbad   :  { %17110 = vmatprep.subr.bf16.mxu0 %v24741_v40 }
 0xbb0   :  { %17112 = vmatpush3.bf16.msra.mxu0 %v23129_v2 }
 0xbb1   :  { %17113 = vmatprep.subr.bf16.mxu0 %v24741_v40 }
 0xbb4   :  { %17115 = vmatpush3.bf16.msra.mxu0 %v24749_v17 }
 0xbb5   :  { %17116 = vmatprep.subr.bf16.mxu0 %v24741_v40 }
 0xbb8   :  { %17118 = vmatpush3.bf16.msra.mxu0 %v23194_v33 }
 0xbb9   :  { %17119 = vmatprep.subr.bf16.mxu0 %v24741_v40 }
 0xbbc   :  { %17121 = vmatpush3.bf16.msra.mxu0 %v23213_v29 }
 0xbbd   :  { %17122 = vmatprep.subr.bf16.mxu0 %v24741_v40 }
 0xbc0   :  { %17124 = vmatpush3.bf16.msra.mxu0 %v23224_v12 }
 0xbc1   :  { %17125 = vmatprep.subr.bf16.mxu0 %v24741_v40 }
 0xbc4   :  { %17127 = vmatpush3.bf16.msra.mxu0 %v23243_v24 }
 0xbc7   :  { %16790 = vmatmul.mubr.f32.vlgmr.msra.gmra.mrb[96].mxu0 %v23296_v46 }
 0xbc8   :  { %18693 = shalt.err (!%p18690_p12)
}
 0xbc9   :  { %s18694_s18 = scalar_lea.hbm %s23446_s9, 32 }
 0xbca   :  { %p18695_p13 = scmp.ne.s32.totalorder %s23446_s9, %s18694_s18  ;;  %p18698_p0 = scmp.lt.u32.totalorder %s18694_s18, %s23446_s9 }
 0xbcc   :  { %p18700_p1 = pnand %p18698_p0, %p18695_p13 }
 0xbce   :  { %18703 = shalt.err (!%p18700_p1)
}
 0xbcf   :  { %13195 = dma.vmem_to_hbm [thread:$0]  %s13193_s10, 32, %s23446_s9, [#allocation18]  }
 0xbd0   :  { %s18754_s25 = smov [#allocation16]  }
 0xbd1   :  { %s13182_s0 = sshll.u32 %s18754_s25, 4  ;;  %s13183_s0 = int_to_ptr.vmem [resolvable:$true] %s13182_s0 }
 0xbd2   :  { %s18704_s26 = scalar_lea.vmem %s13183_s0, 32  ;;  %p18709_p3 = scmp.lt.s32.totalorder %s13183_s0, %s13183_s0 }
 0xbd3   :  { %p18705_p2 = scmp.ne.s32.totalorder %s13183_s0, %s18704_s26  ;;  %p18710_p4 = scmp.lt.s32.totalorder %s18704_s26, %s18704_s26 }
 0xbd5   :  { %p18711_p5 = por %p18710_p4, %p18709_p3 }
 0xbd7   :  { %p18712_p6 = pnand %p18711_p5, %p18705_p2 }
 0xc22   :  { %v12621_v38 = vpop.f32.mrb[128].mxu1 }
 0xc23   :  { %v16616_v22 = vpop.f32.mrb[129].mxu1 }
 0xc9a   :  { %v13171_v49 = vpop.f32.mrb[96].mxu0 }
 0xc9b   :  { %v17288_v7 = vadd.f32 %v13171_v49, %v12621_v38  ;;  %v16791_v2 = vpop.f32.mrb[97].mxu0 }
 0xc9d   :  { %13175 = vst [vmem:[#allocation16] sm:$0x3] %v17288_v7 }
 0xc9e   :  { %18715 = shalt.err (!%p18712_p6)
}
 0xc9f   :  { %s18716_s9 = scalar_lea.hbm %s23445_s8, 32 }
 0xca0   :  { %p18717_p7 = scmp.ne.s32.totalorder %s23445_s8, %s18716_s9  ;;  %p18720_p8 = scmp.lt.u32.totalorder %s18716_s9, %s23445_s8 }
 0xca2   :  { %p18722_p9 = pnand %p18720_p8, %p18717_p7 }
 0xca4   :  { %18725 = shalt.err (!%p18722_p9)
}
 0xca5   :  { %13185 = dma.vmem_to_hbm [thread:$0]  %s13183_s0, 32, %s23445_s8, [#allocation4]  }
 0xca6   :  { %18736 = dma.done.wait [#allocation4], 32  }
 0xca7   :  { %18737 = vsyncadd [#allocation4], 4294967264 }
 0xca8   :  { %18738 = dma.done.wait [#allocation18], 32  }
 0xca9   :  { %18739 = vsyncadd [#allocation18], 4294967264 }
 0xcaa   :  { %13202 = vsyncpa [#allocation3], 1 }
 0xcab   :  { %13203 = vsyncpa [#allocation6], 1 }
 0xcac   :  { %13204 = vsyncpa [#allocation9], 1 }
 0xcad   :  { %13205 = vsyncpa [#allocation12], 1 }
 0xcae   :  { %13206 = vsyncpa [#allocation15], 1 }
 0xcaf   :  { %13207 = vsyncpa [#allocation4], 1 }
 0xcb0   :  { %13208 = vsyncpa [#allocation18], 1 }

</bundles_post_ra>
